<compile_context>
chip_gen: v6e
topology: v6e:2x2x1
jax: 0.10.0
libtpu: 0.0.40
codegen_flags: <defaults>
</compile_context>

<pallas_src>
import functools

import jax
import jax.numpy as jnp
import numpy as np
from jax import lax
from jax.experimental import pallas as pl
from jax.experimental.pallas import tpu as pltpu

LEAKY_ALPHA = 0.01
NUM_LAYERS = 3
KH = 3          # (3, 1) kernel: 3 taps along H, pointwise along W


def resblock_kernel(x_ref, m_ref, b_ref, o_ref, *, w_shift):
    """One batch-block of the fused ResBlock.

    x_ref: (R, HW)        lane-dense activations, R = nb*C rows, HW = H*W lanes
    m_ref: (L, KH*R, R)   per-layer block-diagonal channel-mix matrices (3 taps stacked)
    b_ref: (L, R, 1)      per-layer per-row bias columns
    o_ref: (R, HW)        output block
    w_shift:              static lane stride of one image row (= W)
    """
    R, HW = x_ref.shape
    L = m_ref.shape[0]
    hp = jax.lax.Precision.HIGHEST

    x = x_ref[...]                                   # (R, HW), f32

    # 0/1 shift matrices for the +/-1 row taps of the (3,1) conv, built once
    # per grid step from iota (no HBM traffic).  Right-multiplying by s_prev
    # reads the previous image row (zero at the top boundary); s_next reads the
    # next image row (zero at the bottom boundary).
    row = lax.broadcasted_iota(jnp.int32, (HW, HW), 0)
    col = lax.broadcasted_iota(jnp.int32, (HW, HW), 1)
    s_prev = (col == row + w_shift).astype(jnp.float32)   # eye(HW, k=+W)
    s_next = (col + w_shift == row).astype(jnp.float32)   # eye(HW, k=-W)

    h = x
    for l in range(L):
        # Channel mix for all 3 taps in one matmul: (3R, R) @ (R, HW) -> (3R, HW).
        y3 = jnp.dot(m_ref[l], h, preferred_element_type=jnp.float32, precision=hp)
        # Tap 0 reads row h-1, tap 1 row h, tap 2 row h+1 (zero-padded along H).
        y = (jnp.dot(y3[0:R], s_prev, preferred_element_type=jnp.float32, precision=hp)
             + y3[R:2 * R]
             + jnp.dot(y3[2 * R:3 * R], s_next,
                       preferred_element_type=jnp.float32, precision=hp))
        y = y + b_ref[l]                             # (R, 1) bias column broadcast
        h = jnp.where(y > 0, y, LEAKY_ALPHA * y)     # LeakyReLU(0.01)

    o_ref[...] = (h + x).astype(o_ref.dtype)         # residual add


def _pick_batch_block(n, c, hw, itemsize=4, max_block_bytes=4 << 20):
    """Largest divisor of n whose block is (8,128)-legal and VMEM-friendly."""
    for nb in range(n, 0, -1):
        if n % nb:
            continue
        r = nb * c
        if r % 8 == 0 and r * hw * itemsize <= max_block_bytes:
            return nb
    return n   # whole batch: block == full array is always legal


def resblock_forward(x_nchw, weights, biases, *, batch_block=None):
    """
    x_nchw:  (N, C, H, W) float32 (PyTorch layout).
    weights: (L, KH, C_in, C_out); weights[l, t, ci, co] == torch Conv2d
             weight[l][co, ci, t, 0].
    biases:  (L, C)
    Returns: (N, C, H, W)
    """
    N, C, H, W = x_nchw.shape
    HW = H * W
    L = weights.shape[0]

    nb = batch_block if batch_block is not None else _pick_batch_block(N, C, HW)
    assert N % nb == 0
    R = nb * C

    # Pure reshape (no transpose): each (n, c) image becomes one lane-dense row.
    x_flat = x_nchw.reshape(N * C, HW)

    # Fused block-diagonal channel-mix matrices (3 taps stacked along rows):
    #   Mcat[l, t*R + n*C + co, n*C + ci] = weights[l, t, ci, co]
    w_t = jnp.transpose(weights, (0, 1, 3, 2)).astype(jnp.float32)   # (L, KH, Co, Ci)
    eye_nb = jnp.eye(nb, dtype=jnp.float32)                          # (nb, nb)
    Mcat = jnp.einsum('ltoc,ab->ltaobc', w_t, eye_nb).reshape(L, KH * R, R)

    # Per-row bias columns: bcol[l, n*C + co, 0] = biases[l, co]
    bcol = jnp.tile(biases.astype(jnp.float32), (1, nb)).reshape(L, R, 1)

    kernel = functools.partial(resblock_kernel, w_shift=W)

    grid = (N // nb,)
    out_flat = pl.pallas_call(
        kernel,
        out_shape=jax.ShapeDtypeStruct((N * C, HW), x_flat.dtype),
        grid_spec=pltpu.PrefetchScalarGridSpec(
            num_scalar_prefetch=0,
            grid=grid,
            in_specs=[
                pl.BlockSpec((R, HW), lambda i: (i, 0)),
                pl.BlockSpec((L, KH * R, R), lambda i: (0, 0, 0)),
                pl.BlockSpec((L, R, 1), lambda i: (0, 0, 0)),
            ],
            out_specs=pl.BlockSpec((R, HW), lambda i: (i, 0)),
        ),
        compiler_params=pltpu.CompilerParams(
            dimension_semantics=("parallel",)),
    )(x_flat, Mcat, bcol)

    return out_flat.reshape(N, C, H, W)


def resblock_reference(x_nchw, weights, biases):
    """Pure-JAX f32 reference matching PyTorch ResBlock.forward."""
    N, C, H, W = x_nchw.shape
    h = x_nchw
    for l in range(NUM_LAYERS):
        hp = jnp.pad(h, ((0, 0), (0, 0), (1, 1), (0, 0)))
        acc = jnp.zeros_like(h)
        for t in range(KH):
            tap = hp[:, :, t:t + H, :]     # input row (h + t - 1), zero-padded
            acc = acc + jnp.einsum('io,nihw->nohw', weights[l, t], tap,
                                   precision=jax.lax.Precision.HIGHEST)
        y = acc + biases[l][None, :, None, None]
        h = jnp.where(y > 0, y, LEAKY_ALPHA * y)
    return h + x_nchw


if __name__ == "__main__":
    N, C, H, W = 2, 4, 16, 16

    key = jax.random.PRNGKey(0)
    kx, kw, kb = jax.random.split(key, 3)

    x = jax.random.normal(kx, (N, C, H, W), dtype=jnp.float32)
    # Conv2d weight per layer is (C, C, 3, 1); stored pre-transposed as
    # (L, KH, C_in, C_out) so that weights[l, t, ci, co] == torch weight[co, ci, t, 0].
    weights = jax.random.normal(kw, (NUM_LAYERS, KH, C, C), dtype=jnp.float32) * 0.1
    biases = jax.random.normal(kb, (NUM_LAYERS, C), dtype=jnp.float32) * 0.1

    out = jax.block_until_ready(resblock_forward(x, weights, biases))
    ref = jax.block_until_ready(resblock_reference(x, weights, biases))

    assert out.shape == (N, C, H, W)
    np.testing.assert_allclose(np.asarray(out), np.asarray(ref), rtol=1e-5, atol=2e-5)
    print("KERNEL_OK")
</pallas_src>

<mosaic_0001>
module attributes {stable_mosaic.version = 11 : i64} {
  func.func @resblock_kernel(%arg0: i32, %arg1: memref<8x256xf32, #tpu.memory_space<vmem>>, %arg2: memref<3x24x8xf32, #tpu.memory_space<vmem>>, %arg3: memref<3x8x1xf32, #tpu.memory_space<vmem>>, %arg4: memref<8x256xf32, #tpu.memory_space<vmem>>) attributes {dimension_semantics = [#tpu.dimension_semantics<parallel>], iteration_bounds = array<i64: 1>, scalar_prefetch = 0 : i64, scratch_operands = 0 : i64, tpu.core_type = #tpu.core_type<tc>, window_params = [{transform_indices = @transform_0, window_bounds = array<i64: 8, 256>}, {pipeline_mode = #tpu.pipeline_mode<synchronous>, transform_indices = @transform_1, window_bounds = array<i64: 3, 24, 8>}, {pipeline_mode = #tpu.pipeline_mode<synchronous>, transform_indices = @transform_2, window_bounds = array<i64: 3, 8, 1>}, {transform_indices = @transform_3, window_bounds = array<i64: 8, 256>}]} {
    %c0 = arith.constant 0 : index
    %c0_0 = arith.constant 0 : index
    %0 = vector.load %arg1[%c0, %c0_0] : memref<8x256xf32, #tpu.memory_space<vmem>>, vector<8x256xf32>
    %1 = tpu.iota {dimensions = array<i32: 0>} : vector<256x256xi32>
    %2 = tpu.iota {dimensions = array<i32: 1>} : vector<256x256xi32>
    %c16_i32 = arith.constant 16 : i32
    %3 = vector.broadcast %c16_i32 : i32 to vector<256x256xi32>
    %4 = arith.addi %1, %3 : vector<256x256xi32>
    %5 = arith.cmpi eq, %2, %4 : vector<256x256xi32>
    %6 = arith.extui %5 : vector<256x256xi1> to vector<256x256xi32>
    %7 = arith.sitofp %6 : vector<256x256xi32> to vector<256x256xf32>
    %c16_i32_1 = arith.constant 16 : i32
    %8 = vector.broadcast %c16_i32_1 : i32 to vector<256x256xi32>
    %9 = arith.addi %2, %8 : vector<256x256xi32>
    %10 = arith.cmpi eq, %9, %1 : vector<256x256xi32>
    %11 = arith.extui %10 : vector<256x256xi1> to vector<256x256xi32>
    %12 = arith.sitofp %11 : vector<256x256xi32> to vector<256x256xf32>
    %c0_2 = arith.constant 0 : index
    %c0_3 = arith.constant 0 : index
    %c0_4 = arith.constant 0 : index
    %13 = vector.load %arg2[%c0_2, %c0_3, %c0_4] : memref<3x24x8xf32, #tpu.memory_space<vmem>>, vector<1x24x8xf32>
    %14 = vector.shape_cast %13 : vector<1x24x8xf32> to vector<24x8xf32>
    %cst = arith.constant dense<0.000000e+00> : vector<24x256xf32>
    %15 = tpu.matmul %14, %0, %cst {dimension_numbers = #tpu.dot_dimension_numbers<[1], [0], [0], [1], [0, 0, 1, 1], [], []>, precision = #tpu.contract_precision<fp32>} : vector<24x8xf32>, vector<8x256xf32>, vector<24x256xf32> -> vector<24x256xf32>
    %16 = vector.extract_strided_slice %15 {offsets = [0, 0], sizes = [8, 256], strides = [1, 1]} : vector<24x256xf32> to vector<8x256xf32>
    %cst_5 = arith.constant dense<0.000000e+00> : vector<8x256xf32>
    %17 = tpu.matmul %16, %7, %cst_5 {dimension_numbers = #tpu.dot_dimension_numbers<[1], [0], [0], [1], [0, 0, 1, 1], [], []>, precision = #tpu.contract_precision<fp32>} : vector<8x256xf32>, vector<256x256xf32>, vector<8x256xf32> -> vector<8x256xf32>
    %18 = vector.extract_strided_slice %15 {offsets = [8, 0], sizes = [8, 256], strides = [1, 1]} : vector<24x256xf32> to vector<8x256xf32>
    %19 = arith.addf %17, %18 : vector<8x256xf32>
    %20 = vector.extract_strided_slice %15 {offsets = [16, 0], sizes = [8, 256], strides = [1, 1]} : vector<24x256xf32> to vector<8x256xf32>
    %cst_6 = arith.constant dense<0.000000e+00> : vector<8x256xf32>
    %21 = tpu.matmul %20, %12, %cst_6 {dimension_numbers = #tpu.dot_dimension_numbers<[1], [0], [0], [1], [0, 0, 1, 1], [], []>, precision = #tpu.contract_precision<fp32>} : vector<8x256xf32>, vector<256x256xf32>, vector<8x256xf32> -> vector<8x256xf32>
    %22 = arith.addf %19, %21 : vector<8x256xf32>
    %c0_7 = arith.constant 0 : index
    %c0_8 = arith.constant 0 : index
    %c0_9 = arith.constant 0 : index
    %23 = vector.load %arg3[%c0_7, %c0_8, %c0_9] : memref<3x8x1xf32, #tpu.memory_space<vmem>>, vector<1x8x1xf32>
    %24 = vector.shape_cast %23 : vector<1x8x1xf32> to vector<8x1xf32>
    %25 = vector.broadcast %24 : vector<8x1xf32> to vector<8x256xf32>
    %26 = arith.addf %22, %25 : vector<8x256xf32>
    %cst_10 = arith.constant 0.000000e+00 : f32
    %27 = vector.broadcast %cst_10 : f32 to vector<8x256xf32>
    %28 = arith.cmpf ogt, %26, %27 : vector<8x256xf32>
    %cst_11 = arith.constant 0.00999999977 : f32
    %29 = vector.broadcast %cst_11 : f32 to vector<8x256xf32>
    %30 = arith.mulf %29, %26 : vector<8x256xf32>
    %31 = arith.select %28, %26, %30 : vector<8x256xi1>, vector<8x256xf32>
    %c1 = arith.constant 1 : index
    %c0_12 = arith.constant 0 : index
    %c0_13 = arith.constant 0 : index
    %32 = vector.load %arg2[%c1, %c0_12, %c0_13] : memref<3x24x8xf32, #tpu.memory_space<vmem>>, vector<1x24x8xf32>
    %33 = vector.shape_cast %32 : vector<1x24x8xf32> to vector<24x8xf32>
    %cst_14 = arith.constant dense<0.000000e+00> : vector<24x256xf32>
    %34 = tpu.matmul %33, %31, %cst_14 {dimension_numbers = #tpu.dot_dimension_numbers<[1], [0], [0], [1], [0, 0, 1, 1], [], []>, precision = #tpu.contract_precision<fp32>} : vector<24x8xf32>, vector<8x256xf32>, vector<24x256xf32> -> vector<24x256xf32>
    %35 = vector.extract_strided_slice %34 {offsets = [0, 0], sizes = [8, 256], strides = [1, 1]} : vector<24x256xf32> to vector<8x256xf32>
    %cst_15 = arith.constant dense<0.000000e+00> : vector<8x256xf32>
    %36 = tpu.matmul %35, %7, %cst_15 {dimension_numbers = #tpu.dot_dimension_numbers<[1], [0], [0], [1], [0, 0, 1, 1], [], []>, precision = #tpu.contract_precision<fp32>} : vector<8x256xf32>, vector<256x256xf32>, vector<8x256xf32> -> vector<8x256xf32>
    %37 = vector.extract_strided_slice %34 {offsets = [8, 0], sizes = [8, 256], strides = [1, 1]} : vector<24x256xf32> to vector<8x256xf32>
    %38 = arith.addf %36, %37 : vector<8x256xf32>
    %39 = vector.extract_strided_slice %34 {offsets = [16, 0], sizes = [8, 256], strides = [1, 1]} : vector<24x256xf32> to vector<8x256xf32>
    %cst_16 = arith.constant dense<0.000000e+00> : vector<8x256xf32>
    %40 = tpu.matmul %39, %12, %cst_16 {dimension_numbers = #tpu.dot_dimension_numbers<[1], [0], [0], [1], [0, 0, 1, 1], [], []>, precision = #tpu.contract_precision<fp32>} : vector<8x256xf32>, vector<256x256xf32>, vector<8x256xf32> -> vector<8x256xf32>
    %41 = arith.addf %38, %40 : vector<8x256xf32>
    %c1_17 = arith.constant 1 : index
    %c0_18 = arith.constant 0 : index
    %c0_19 = arith.constant 0 : index
    %42 = vector.load %arg3[%c1_17, %c0_18, %c0_19] : memref<3x8x1xf32, #tpu.memory_space<vmem>>, vector<1x8x1xf32>
    %43 = vector.shape_cast %42 : vector<1x8x1xf32> to vector<8x1xf32>
    %44 = vector.broadcast %43 : vector<8x1xf32> to vector<8x256xf32>
    %45 = arith.addf %41, %44 : vector<8x256xf32>
    %cst_20 = arith.constant 0.000000e+00 : f32
    %46 = vector.broadcast %cst_20 : f32 to vector<8x256xf32>
    %47 = arith.cmpf ogt, %45, %46 : vector<8x256xf32>
    %cst_21 = arith.constant 0.00999999977 : f32
    %48 = vector.broadcast %cst_21 : f32 to vector<8x256xf32>
    %49 = arith.mulf %48, %45 : vector<8x256xf32>
    %50 = arith.select %47, %45, %49 : vector<8x256xi1>, vector<8x256xf32>
    %c2 = arith.constant 2 : index
    %c0_22 = arith.constant 0 : index
    %c0_23 = arith.constant 0 : index
    %51 = vector.load %arg2[%c2, %c0_22, %c0_23] : memref<3x24x8xf32, #tpu.memory_space<vmem>>, vector<1x24x8xf32>
    %52 = vector.shape_cast %51 : vector<1x24x8xf32> to vector<24x8xf32>
    %cst_24 = arith.constant dense<0.000000e+00> : vector<24x256xf32>
    %53 = tpu.matmul %52, %50, %cst_24 {dimension_numbers = #tpu.dot_dimension_numbers<[1], [0], [0], [1], [0, 0, 1, 1], [], []>, precision = #tpu.contract_precision<fp32>} : vector<24x8xf32>, vector<8x256xf32>, vector<24x256xf32> -> vector<24x256xf32>
    %54 = vector.extract_strided_slice %53 {offsets = [0, 0], sizes = [8, 256], strides = [1, 1]} : vector<24x256xf32> to vector<8x256xf32>
    %cst_25 = arith.constant dense<0.000000e+00> : vector<8x256xf32>
    %55 = tpu.matmul %54, %7, %cst_25 {dimension_numbers = #tpu.dot_dimension_numbers<[1], [0], [0], [1], [0, 0, 1, 1], [], []>, precision = #tpu.contract_precision<fp32>} : vector<8x256xf32>, vector<256x256xf32>, vector<8x256xf32> -> vector<8x256xf32>
    %56 = vector.extract_strided_slice %53 {offsets = [8, 0], sizes = [8, 256], strides = [1, 1]} : vector<24x256xf32> to vector<8x256xf32>
    %57 = arith.addf %55, %56 : vector<8x256xf32>
    %58 = vector.extract_strided_slice %53 {offsets = [16, 0], sizes = [8, 256], strides = [1, 1]} : vector<24x256xf32> to vector<8x256xf32>
    %cst_26 = arith.constant dense<0.000000e+00> : vector<8x256xf32>
    %59 = tpu.matmul %58, %12, %cst_26 {dimension_numbers = #tpu.dot_dimension_numbers<[1], [0], [0], [1], [0, 0, 1, 1], [], []>, precision = #tpu.contract_precision<fp32>} : vector<8x256xf32>, vector<256x256xf32>, vector<8x256xf32> -> vector<8x256xf32>
    %60 = arith.addf %57, %59 : vector<8x256xf32>
    %c2_27 = arith.constant 2 : index
    %c0_28 = arith.constant 0 : index
    %c0_29 = arith.constant 0 : index
    %61 = vector.load %arg3[%c2_27, %c0_28, %c0_29] : memref<3x8x1xf32, #tpu.memory_space<vmem>>, vector<1x8x1xf32>
    %62 = vector.shape_cast %61 : vector<1x8x1xf32> to vector<8x1xf32>
    %63 = vector.broadcast %62 : vector<8x1xf32> to vector<8x256xf32>
    %64 = arith.addf %60, %63 : vector<8x256xf32>
    %cst_30 = arith.constant 0.000000e+00 : f32
    %65 = vector.broadcast %cst_30 : f32 to vector<8x256xf32>
    %66 = arith.cmpf ogt, %64, %65 : vector<8x256xf32>
    %cst_31 = arith.constant 0.00999999977 : f32
    %67 = vector.broadcast %cst_31 : f32 to vector<8x256xf32>
    %68 = arith.mulf %67, %64 : vector<8x256xf32>
    %69 = arith.select %66, %64, %68 : vector<8x256xi1>, vector<8x256xf32>
    %70 = arith.addf %69, %0 : vector<8x256xf32>
    %c0_32 = arith.constant 0 : index
    %c0_33 = arith.constant 0 : index
    %71 = vector.load %arg4[%c0_32, %c0_33] : memref<8x256xf32, #tpu.memory_space<vmem>>, vector<8x256xf32>
    tpu.vector_store %arg4[%c0_32, %c0_33], %70 {strides = array<i32>} : memref<8x256xf32, #tpu.memory_space<vmem>>, vector<8x256xf32>,
    return
  }
  func.func @transform_0(%arg0: i32) -> (i32, i32) {
    %c0_i32 = arith.constant 0 : i32
    %c0_i32_0 = arith.constant 0 : i32
    return %arg0, %c0_i32 : i32, i32
  }
  func.func @transform_1(%arg0: i32) -> (i32, i32, i32) {
    %c0_i32 = arith.constant 0 : i32
    %c0_i32_0 = arith.constant 0 : i32
    %c0_i32_1 = arith.constant 0 : i32
    %c0_i32_2 = arith.constant 0 : i32
    return %c0_i32, %c0_i32_0, %c0_i32_1 : i32, i32, i32
  }
  func.func @transform_2(%arg0: i32) -> (i32, i32, i32) {
    %c0_i32 = arith.constant 0 : i32
    %c0_i32_0 = arith.constant 0 : i32
    %c0_i32_1 = arith.constant 0 : i32
    %c0_i32_2 = arith.constant 0 : i32
    return %c0_i32, %c0_i32_0, %c0_i32_1 : i32, i32, i32
  }
  func.func @transform_3(%arg0: i32) -> (i32, i32) {
    %c0_i32 = arith.constant 0 : i32
    %c0_i32_0 = arith.constant 0 : i32
    return %arg0, %c0_i32 : i32, i32
  }
}

</mosaic_0001>

<bundles_post_ra>
// kernel: tpu_custom_call.1
= control target key start
LH: loop header
LB: loop body
LE: loop exit
PB: predicated region body
PF: predicated region fallthrough
CT: control target
= control target key end

     0   :  { %vm15580_vm0 = vcmask 64512   ;;  %v17_v3 = vlaneseq  ;;  %v15589_v6 = vmov 0.0   ;;  %s15545_s0 = inlined_call_operand.vmem [shape: f32[8,256], index: 0, kind: input, shape index: {}]   ;;  %s15546_s1 = inlined_call_operand.vmem [shape: f32[3,24,8], index: 1, kind: input, shape index: {}]   ;;  %s15547_s2 = inlined_call_operand.vmem [shape: f32[3,8,1], index: 2, kind: input, shape index: {}]   ;;  %s15548_s3 = inlined_call_operand.hbm [shape: f32[8,256], index: 3, kind: output, shape index: {}]  }
   0x1   :  { %v16_v0 = vld [vmem:[%s15545_s0 + $0x8] sm:$0xff]  ;;  %v15_v1 = vld [vmem:[%s15545_s0] sm:$0xff]  ;;  %549 = vmatprep.mubr.f32.mxu0 %v15589_v6  ;;  %657 = vmatprep.mubr.f32.mxu1 %v15589_v6  ;;  %v472_v9 = vld [vmem:[%s15546_s1 + $0x10] sm:$0xff] }
   0x2   :  { %v470_v2 = vld [vmem:[%s15546_s1] sm:$0xff]  ;;  %v10641_v4 = vand.u32 4294901760, %v16_v0  ;;  %v10643_v5 = vand.u32 4294901760, %v15_v1  ;;  %v471_v8 = vld [vmem:[%s15546_s1 + $0x8] sm:$0xff]  ;;  %v481_v12 = vsel %vm15580_vm0, %v472_v9, 0  ;;  %v10658_v13 = vshrl.u32 %v17_v3, 7 }
   0x3   :  { %v475_v7 = vsel %vm15580_vm0, %v470_v2, 0  ;;  %v478_v11 = vsel %vm15580_vm0, %v471_v8, 0 }
   0x4   :  { %v10654_v10 = vand.u32 4294901760, %v475_v7  ;;  %16302 = vst [vmem:[#allocation5_spill] sm:$0xff] %v10658_v13 }
   0x5   :  { %8 = vsyncpa [#allocation3], 0  ;;  %514 = vmatprep.subr.mxu0 %v10641_v4  ;;  %v614_v14 = vsub.f32 %v16_v0, %v10641_v4  ;;  %v10663_v15 = vsub.f32 %v15_v1, %v10643_v5  ;;  %v10665_v16 = vand.u32 4294901760, %v478_v11  ;;  %v10667_v17 = vand.u32 4294901760, %v481_v12 }
   0x6   :  { %516 = vmatpush1.msra.mxu0 %v10643_v5  ;;  %v10671_v18 = vsub.f32 %v475_v7, %v10654_v10  ;;  %v10674_v19 = vadd.s32 120, %v10658_v13  ;;  %v10676_v20 = vand.u32 127, %v17_v3  ;;  %v16306_v33 = vmov 0 }
   0x7   :  { %v615_v21 = vand.u32 4294901760, %v614_v14  ;;  %v621_v22 = vand.u32 4294901760, %v10663_v15  ;;  %711 = vmatprep.subr.mxu0 %v614_v14  ;;  %v10680_v23 = vsub.f32 %v478_v11, %v10665_v16  ;;  %v10683_v24 = vsub.f32 %v481_v12, %v10667_v17 }
   0x8   :  { %16303 = vst [vmem:[#allocation6_spill] sm:$0xff] %v10674_v19  ;;  %16304 = vst [vmem:[#allocation7_spill] sm:$0xff] %v10676_v20  ;;  %v552_v25 = vand.u32 4294901760, %v10671_v18  ;;  %v10687_v26 = vadd.s32 128, %v10676_v20  ;;  %v67_v27 = vadd.s32 16, %v10674_v19  ;;  %v10705_v37 = vadd.s32 112, %v10658_v13 }
   0x9   :  { %v616_v28 = vsub.f32 %v614_v14, %v615_v21  ;;  %v622_v29 = vsub.f32 %v10663_v15, %v621_v22  ;;  %v563_v30 = vand.u32 4294901760, %v10680_v23  ;;  %v574_v32 = vand.u32 4294901760, %v10683_v24 }
   0xa   :  { %16305 = vst [vmem:[#allocation8_spill] sm:$0xff] %v10687_v26  ;;  %v553_v31 = vsub.f32 %v10671_v18, %v552_v25  ;;  %vm10697_vm1 = vcmp.eq.s32.totalorder %v10687_v26, %v67_v27  ;;  %16309 = vst [vmem:[#allocation10_spill] sm:$0xff] %v10705_v37  ;;  %v66_v43 = vadd.s32 16, %v10705_v37  ;;  %v10719_v44 = vadd.s32 104, %v10658_v13 }
   0xb   :  { %v16307_v33 = vsel %vm10697_vm1, 4294967295, %v16306_v33  ;;  %v617_v34 = vand.u32 4294901760, %v616_v28  ;;  %v623_v35 = vand.u32 4294901760, %v622_v29  ;;  %v564_v36 = vsub.f32 %v10680_v23, %v563_v30 }
   0xc   :  { %16308 = vst [vmem:[#allocation9_spill] sm:$0xff] %v16307_v33  ;;  %v554_v38 = vand.u32 4294901760, %v553_v31  ;;  %v9985_v39 = vsel %vm10697_vm1, 1.0, %v15589_v6  ;;  %v575_v41 = vsub.f32 %v10683_v24, %v574_v32  ;;  %16311 = vst [vmem:[#allocation12_spill] sm:$0xff] %v10719_v44  ;;  %v10725_v45 = vadd.s32 96, %v10658_v13 }
   0xd   :  { %618 = vmatprep.subr.mxu1 %v617_v34  ;;  %v565_v40 = vand.u32 4294901760, %v564_v36  ;;  %v10713_v42 = vsub.f32 %v9985_v39, %v9985_v39  ;;  %vm10734_vm2 = vcmp.eq.s32.totalorder %v10687_v26, %v66_v43  ;;  %v16314_v48 = vmov 0 }
   0xe   :  { %555 = vmatmul.mubr.f32.vlgmr.msra.gmra.mxu0 %v554_v38  ;;  %624 = vmatpush1.msra.mxu1 %v623_v35  ;;  %16312 = vst [vmem:[#allocation13_spill] sm:$0xff] %v10725_v45  ;;  %v576_v46 = vand.u32 4294901760, %v575_v41  ;;  %v16315_v48 = vsel %vm10734_vm2, 4294967295, %v16314_v48  ;;  %v65_v49 = vadd.s32 16, %v10719_v44  ;;  %v10742_v50 = vadd.s32 88, %v10658_v13 }
   0xf   :  { %16310 = vst [vmem:[#allocation11_spill] sm:$0xff] %v10713_v42  ;;  %659 = vmatmul.mubr.f32.vlgmr.msra.gmra.mxu1 %v10654_v10  ;;  %560 = vmatprep.mubr.f32.mxu0 %v15589_v6  ;;  %v10729_v47 = vand.u32 4294901760, %v10713_v42  ;;  %16316 = vst [vmem:[#allocation15_spill] sm:$0xff] %v16315_v48  ;;  %v64_v51 = vadd.s32 16, %v10725_v45  ;;  %v10746_v52 = vadd.s32 80, %v10658_v13  ;;  %v9984_v54 = vsel %vm10734_vm2, 1.0, %v15589_v6 }
  0x10   :  { %714 = vmatpush1.msra.mxu0 %v10663_v15  ;;  %664 = vmatprep.mubr.f32.mxu1 %v15589_v6  ;;  %16317 = vst [vmem:[#allocation16_spill] sm:$0xff] %v10742_v50  ;;  %vm10756_vm3 = vcmp.eq.s32.totalorder %v10676_v20, %v65_v49  ;;  %v16319_v55 = vmov 0  ;;  %v63_v56 = vadd.s32 16, %v10742_v50  ;;  %v10763_v57 = vadd.s32 72, %v10658_v13 }
  0x11   :  { %803 = vmatprep.subr.mxu1 %v10641_v4  ;;  %899 = vmatprep.subr.mxu0 %v615_v21  ;;  %16313 = vst [vmem:[#allocation14_spill] sm:$0xff] %v10729_v47  ;;  %16318 = vst [vmem:[#allocation17_spill] sm:$0xff] %v10746_v52  ;;  %v1194_v53 = vsub.f32 %v10713_v42, %v10729_v47  ;;  %v16320_v55 = vsel %vm10756_vm3, 4294967295, %v16319_v55  ;;  %v10765_v58 = vsub.f32 %v9984_v54, %v9984_v54  ;;  %v16324_v59 = vmov 0 }
  0x12   :  { %566 = vmatmul.mubr.f32.gmra.mxu0 %v565_v40  ;;  %805 = vmatpush1.msra.mxu1 %v10643_v5  ;;  %16321 = vst [vmem:[#allocation18_spill] sm:$0xff] %v16320_v55  ;;  %16322 = vst [vmem:[#allocation19_spill] sm:$0xff] %v10763_v57  ;;  %vm10768_vm4 = vcmp.eq.s32.totalorder %v10676_v20, %v64_v51  ;;  %v62_v60 = vadd.s32 16, %v10746_v52  ;;  %v9983_v62 = vsel %vm10756_vm3, 1.0, %v15589_v6  ;;  %v10780_v63 = vadd.s32 64, %v10658_v13 }
  0x13   :  { %666 = vmatmul.mubr.f32.gmra.mxu1 %v10665_v16  ;;  %571 = vmatprep.mubr.f32.mxu0 %v15589_v6  ;;  %16323 = vst [vmem:[#allocation20_spill] sm:$0xff] %v10765_v58  ;;  %v16325_v59 = vsel %vm10768_vm4, 4294967295, %v16324_v59  ;;  %v10774_v61 = vand.u32 4294901760, %v1194_v53  ;;  %v9982_v0 = vsel %vm10768_vm4, 1.0, %v15589_v6  ;;  %vm10790_vm5 = vcmp.eq.s32.totalorder %v10676_v20, %v63_v56 }
  0x14   :  { %671 = vmatprep.mubr.f32.mxu1 %v15589_v6  ;;  %989 = vmatprep.subr.mxu1 %v10641_v4  ;;  %16326 = vst [vmem:[#allocation21_spill] sm:$0xff] %v16325_v59  ;;  %16328 = vst [vmem:[#allocation23_spill] sm:$0xff] %v10780_v63  ;;  %v16329_v1 = vmov 0  ;;  %v61_v2 = vadd.s32 16, %v10763_v57  ;;  %v10796_v3 = vadd.s32 56, %v10658_v13  ;;  %v10800_v4 = vand.u32 4294901760, %v10765_v58 }
  0x15   :  { %16327 = vst [vmem:[#allocation22_spill] sm:$0xff] %v10774_v61  ;;  %v16330_v1 = vsel %vm10790_vm5, 4294967295, %v16329_v1  ;;  %v10802_v7 = vsub.f32 %v9983_v62, %v9983_v62  ;;  %v15549_v8 = vmov 1.0   ;;  %vm10808_vm6 = vcmp.eq.s32.totalorder %v10676_v20, %v62_v60 }
  0x16   :  { %577 = vmatmul.mubr.f32.gmra.mxu0 %v576_v46  ;;  %16331 = vst [vmem:[#allocation24_spill] sm:$0xff] %v16330_v1  ;;  %16332 = vst [vmem:[#allocation25_spill] sm:$0xff] %v10796_v3  ;;  %v16335_v9 = vmov 0  ;;  %v10816_v11 = vadd.s32 48, %v10658_v13  ;;  %v10821_v12 = vsub.f32 %v9982_v0, %v9982_v0  ;;  %v9981_v14 = vsel %vm10790_vm5, 1.0, %v15589_v6 }
  0x17   :  { %673 = vmatmul.mubr.f32.gmra.mxu1 %v10667_v17  ;;  %747 = vmatprep.mubr.f32.mxu0 %v15589_v6  ;;  %16333 = vst [vmem:[#allocation26_spill] sm:$0xff] %v10800_v4  ;;  %16334 = vst [vmem:[#allocation27_spill] sm:$0xff] %v10802_v7  ;;  %v16336_v9 = vsel %vm10808_vm6, 4294967295, %v16335_v9  ;;  %v9980_v15 = vsel %vm10808_vm6, 1.0, %v15589_v6  ;;  %vm10831_vm7 = vcmp.eq.s32.totalorder %v10676_v20, %v61_v2  ;;  %v59_v21 = vadd.s32 16, %v10796_v3 }
  0x18   :  { %838 = vmatprep.mubr.f32.mxu1 %v15589_v6  ;;  %16337 = vst [vmem:[#allocation28_spill] sm:$0xff] %v16336_v9  ;;  %16338 = vst [vmem:[#allocation29_spill] sm:$0xff] %v10816_v11  ;;  %v10845_v27 = vsub.f32 %v9981_v14, %v9981_v14  ;;  %v16346_v28 = vmov 0  ;;  %v58_v29 = vadd.s32 16, %v10816_v11  ;;  %v10859_v31 = vsub.f32 %v9980_v15, %v9980_v15 }
  0x19   :  { %16339 = vst [vmem:[#allocation30_spill] sm:$0xff] %v10821_v12  ;;  %v9979_v34 = vsel %vm10831_vm7, 1.0, %v15589_v6  ;;  %v10866_v35 = vand.u32 4294901760, %v10821_v12  ;;  %vm10869_vm9 = vcmp.eq.s32.totalorder %v10676_v20, %v59_v21  ;;  %v16352_v36 = vmov 0 }
  0x1a   :  { %750 = vmatmul.mubr.f32.vlgmr.msra.gmra.mxu0 %v10671_v18  ;;  %v16340_v18 = vmov 0  ;;  %16345 = vst [vmem:[#allocation34_spill] sm:$0xff] %v10845_v27  ;;  %16350 = vst [vmem:[#allocation37_spill] sm:$0xff] %v10859_v31  ;;  %v16353_v36 = vsel %vm10869_vm9, 4294967295, %v16352_v36  ;;  %v10886_v41 = vand.u32 4294901760, %v10845_v27  ;;  %v10888_v43 = vsub.f32 %v9979_v34, %v9979_v34 }
  0x1b   :  { %842 = vmatmul.mubr.f32.vlgmr.msra.gmra.mxu1 %v552_v25  ;;  %755 = vmatprep.mubr.f32.mxu0 %v15589_v6  ;;  %v16341_v18 = vsel %vm10831_vm7, 4294967295, %v16340_v18  ;;  %v10842_v25 = vand.u32 4294901760, %v10802_v7  ;;  %16351 = vst [vmem:[#allocation38_spill] sm:$0xff] %v10866_v35  ;;  %16354 = vst [vmem:[#allocation39_spill] sm:$0xff] %v16353_v36  ;;  %vm10891_vm10 = vcmp.eq.s32.totalorder %v10676_v20, %v58_v29  ;;  %v16359_v46 = vmov 0  ;;  %v16691_v36 = vld [vmem:[#allocation8_spill] sm:$0xff] }
  0x1c   :  { %903 = vmatpush1.msra.mxu0 %v621_v22  ;;  %847 = vmatprep.mubr.f32.mxu1 %v15589_v6  ;;  %16342 = vst [vmem:[#allocation31_spill] sm:$0xff] %v16341_v18  ;;  %v10837_v22 = vadd.s32 40, %v10658_v13  ;;  %16357 = vst [vmem:[#allocation42_spill] sm:$0xff] %v10886_v41  ;;  %v16360_v46 = vsel %vm10891_vm10, 4294967295, %v16359_v46  ;;  %v10899_v51 = vand.u32 4294901760, %v10859_v31  ;;  %v9977_v53 = vsel %vm10869_vm9, 1.0, %v15589_v6 }
  0x1d   :  { %991 = vmatpush1.msra.mxu1 %v10643_v5  ;;  %10030 = vmatprep.subr.msk.mxu0 %vm10697_vm1, %v15549_v8  ;;  %v60_v5 = vadd.s32 16, %v10780_v63  ;;  %16344 = vst [vmem:[#allocation33_spill] sm:$0xff] %v10842_v25  ;;  %v1224_v39 = vsub.f32 %v10802_v7, %v10842_v25  ;;  %16358 = vst [vmem:[#allocation43_spill] sm:$0xff] %v10888_v43  ;;  %v1236_v54 = vsub.f32 %v10821_v12, %v10866_v35  ;;  %v16370_v15 = vmov 0 }
  0x1e   :  { %758 = vmatmul.mubr.f32.gmra.mxu0 %v10680_v23  ;;  %1196 = vmatprep.subr.mxu1 %v10774_v61  ;;  %16343 = vst [vmem:[#allocation32_spill] sm:$0xff] %v10837_v22  ;;  %v1206_v23 = vsub.f32 %v10765_v58, %v10800_v4  ;;  %16361 = vst [vmem:[#allocation44_spill] sm:$0xff] %v16360_v46  ;;  %v9976_v0 = vsel %vm10891_vm10, 1.0, %v15589_v6  ;;  %v1248_v2 = vsub.f32 %v10845_v27, %v10886_v41  ;;  %v16409_v11 = vmov 0 }
  0x1f   :  { %851 = vmatmul.mubr.f32.gmra.mxu1 %v563_v30  ;;  %763 = vmatprep.mubr.f32.mxu0 %v15589_v6  ;;  %vm10848_vm8 = vcmp.eq.s32.totalorder %v10676_v20, %v60_v5  ;;  %v10854_v30 = vadd.s32 32, %v10658_v13  ;;  %16362 = vst [vmem:[#allocation45_spill] sm:$0xff] %v10899_v51  ;;  %v10917_v62 = vand.u32 4294901760, %v1224_v39  ;;  %v10928_v5 = vand.u32 4294901760, %v10888_v43 }
  0x20   :  { %856 = vmatprep.mubr.f32.mxu1 %v15589_v6  ;;  %v16347_v28 = vsel %vm10848_vm8, 4294967295, %v16346_v28  ;;  %v10877_v38 = vand.u32 4294901760, %v1206_v23  ;;  %v9978_v40 = vsel %vm10848_vm8, 1.0, %v15589_v6  ;;  %v10930_v14 = vsub.f32 %v9977_v53, %v9977_v53 }
  0x21   :  { %16348 = vst [vmem:[#allocation35_spill] sm:$0xff] %v16347_v28  ;;  %16349 = vst [vmem:[#allocation36_spill] sm:$0xff] %v10854_v30  ;;  %v56_v49 = vadd.s32 16, %v10854_v30  ;;  %v10908_v56 = vsub.f32 %v9978_v40, %v9978_v40  ;;  %v1260_v21 = vsub.f32 %v10859_v31, %v10899_v51  ;;  %v10946_v29 = vand.u32 4294901760, %v1236_v54 }
  0x22   :  { %766 = vmatmul.mubr.f32.gmra.mxu0 %v10683_v24  ;;  %v57_v24 = vadd.s32 16, %v10837_v22  ;;  %16356 = vst [vmem:[#allocation41_spill] sm:$0xff] %v10877_v38  ;;  %16367 = vst [vmem:[#allocation48_spill] sm:$0xff] %v10917_v62  ;;  %v10967_v40 = vand.u32 4294901760, %v1248_v2  ;;  %v10972_v53 = vand.u32 4294901760, %v10930_v14  ;;  %v11118_v22 = vadd.s32 224, %v10658_v13 }
  0x23   :  { %860 = vmatmul.mubr.f32.gmra.mxu1 %v574_v32  ;;  %936 = vmatprep.mubr.f32.mxu0 %v15589_v6  ;;  %v10875_v32 = vadd.s32 24, %v10658_v13  ;;  %16363 = vst [vmem:[#allocation46_spill] sm:$0xff] %v10908_v56  ;;  %16368 = vst [vmem:[#allocation49_spill] sm:$0xff] %v10928_v5  ;;  %vm10933_vm12 = vcmp.eq.s32.totalorder %v10676_v20, %v56_v49  ;;  %v10949_v34 = vand.u32 4294901760, %v10908_v56  ;;  %v16412_v3 = vmov 0 }
  0x24   :  { %1024 = vmatprep.mubr.f32.mxu1 %v15589_v6  ;;  %vm10911_vm11 = vcmp.eq.s32.totalorder %v10676_v20, %v57_v24  ;;  %16369 = vst [vmem:[#allocation50_spill] sm:$0xff] %v10930_v14  ;;  %v16371_v15 = vsel %vm10933_vm12, 4294967295, %v16370_v15  ;;  %16373 = vst [vmem:[#allocation52_spill] sm:$0xff] %v10946_v29  ;;  %v10951_v24 = vsub.f32 %v9976_v0, %v9976_v0  ;;  %v9974_v39 = vsel %vm10933_vm12, 1.0, %v15589_v6 }
  0x25   :  { %16355 = vst [vmem:[#allocation40_spill] sm:$0xff] %v10875_v32  ;;  %v55_v60 = vadd.s32 16, %v10875_v32  ;;  %16372 = vst [vmem:[#allocation51_spill] sm:$0xff] %v16371_v15  ;;  %v9975_v23 = vsel %vm10911_vm11, 1.0, %v15589_v6  ;;  %v1272_v49 = vsub.f32 %v10888_v43, %v10928_v5  ;;  %v10982_v0 = vand.u32 4294901760, %v1260_v21 }
  0x26   :  { %938 = vmatmul.mubr.f32.vlgmr.msra.gmra.mxu0 %v10654_v10  ;;  %16374 = vst [vmem:[#allocation53_spill] sm:$0xff] %v10949_v34  ;;  %16375 = vst [vmem:[#allocation54_spill] sm:$0xff] %v10951_v24  ;;  %v10974_v54 = vsub.f32 %v9975_v23, %v9975_v23  ;;  %v1284_v2 = vsub.f32 %v10908_v56, %v10949_v34  ;;  %v10988_v23 = vand.u32 4294901760, %v10951_v24  ;;  %v11145_v63 = vadd.s32 216, %v10658_v13 }
  0x27   :  { %1026 = vmatmul.mubr.f32.vlgmr.msra.gmra.mxu1 %v10654_v10  ;;  %943 = vmatprep.mubr.f32.mxu0 %v15589_v6  ;;  %v16364_v10 = vmov 0  ;;  %vm10954_vm13 = vcmp.eq.s32.totalorder %v10676_v20, %v55_v60  ;;  %16379 = vst [vmem:[#allocation56_spill] sm:$0xff] %v10967_v40  ;;  %16380 = vst [vmem:[#allocation57_spill] sm:$0xff] %v10972_v53  ;;  %v10997_v21 = vand.u32 4294901760, %v1272_v49  ;;  %v16420_v50 = vmov 0 }
  0x28   :  { %1031 = vmatprep.mubr.f32.mxu1 %v15589_v6  ;;  %1202 = vmatpush1.msra.mxu1 %v15589_v6  ;;  %v16365_v10 = vsel %vm10911_vm11, 4294967295, %v16364_v10  ;;  %16381 = vst [vmem:[#allocation58_spill] sm:$0xff] %v10974_v54  ;;  %v9973_v60 = vsel %vm10954_vm13, 1.0, %v15589_v6  ;;  %16382 = vst [vmem:[#allocation59_spill] sm:$0xff] %v10982_v0  ;;  %v11012_v49 = vand.u32 4294901760, %v1284_v2  ;;  %v79_v45 = vadd.s32 16, %v11145_v63 }
  0x29   :  { %16366 = vst [vmem:[#allocation47_spill] sm:$0xff] %v16365_v10  ;;  %1208 = vmatprep.subr.mxu1 %v10877_v38  ;;  %1049 = vmatpush1.msra.mxu0 %v15589_v6  ;;  %16383 = vst [vmem:[#allocation60_spill] sm:$0xff] %v10988_v23  ;;  %v11170_v44 = vadd.s32 208, %v10658_v13  ;;  %v16465_v41 = vmov 0  ;;  %v11383_v4 = vadd.s32 144, %v10658_v13  ;;  %v12152_v28 = vadd.s32 16, %v16691_v36 }
  0x2a   :  { %945 = vmatmul.mubr.f32.gmra.mxu0 %v10665_v16  ;;  %1214 = vmatpush1.msra.mxu1 %v15589_v6  ;;  %16386 = vst [vmem:[#allocation62_spill] sm:$0xff] %v10997_v21  ;;  %16389 = vst [vmem:[#allocation65_spill] sm:$0xff] %v11012_v49 }
  0x2b   :  { %1033 = vmatmul.mubr.f32.gmra.mxu1 %v10665_v16  ;;  %950 = vmatprep.mubr.f32.mxu0 %v15589_v6  ;;  %v16376_v16 = vmov 0  ;;  %16406 = vst [vmem:[#allocation78_spill] sm:$0xff] %v11118_v22  ;;  %16415 = vst [vmem:[#allocation83_spill] sm:$0xff] %v11145_v63 }
  0x2c   :  { %1038 = vmatprep.mubr.f32.mxu1 %v15589_v6  ;;  %1220 = vmatprep.subr.mxu1 %v15589_v6  ;;  %v16377_v16 = vsel %vm10954_vm13, 4294967295, %v16376_v16  ;;  %16423 = vst [vmem:[#allocation88_spill] sm:$0xff] %v11170_v44  ;;  %16478 = vst [vmem:[#allocation127_spill] sm:$0xff] %v11383_v4 }
  0x2d   :  { %16378 = vst [vmem:[#allocation55_spill] sm:$0xff] %v16377_v16  ;;  %1226 = vmatpush1.msra.mxu1 %v10917_v62  ;;  %10031 = vmatprep.subr.msk.mxu0 %vm10734_vm2, %v15549_v8  ;;  %v10990_v8 = vsub.f32 %v9974_v39, %v9974_v39  ;;  %v11003_v62 = vand.u32 4294901760, %v10974_v54  ;;  %v11005_v39 = vsub.f32 %v9973_v60, %v9973_v60 }
  0x2e   :  { %952 = vmatmul.mubr.f32.gmra.mxu0 %v10667_v17  ;;  %1232 = vmatprep.subr.mxu1 %v15589_v6 }
  0x2f   :  { %1040 = vmatmul.mubr.f32.gmra.mxu1 %v10667_v17  ;;  %1053 = vmatpush1.msra.mxu0 %v15589_v6  ;;  %16384 = vst [vmem:[#allocation61_spill] sm:$0xff] %v10990_v8  ;;  %v16385_v17 = vmov 1.0   ;;  %16387 = vst [vmem:[#allocation63_spill] sm:$0xff] %v11003_v62  ;;  %v11018_v38 = vand.u32 4294901760, %v10990_v8  ;;  %v1320_v2 = vsub.f32 %v10974_v54, %v11003_v62 }
  0x30   :  { %1238 = vmatpush1.msra.mxu1 %v10946_v29  ;;  %1055 = vmatprep.subr.mxu0 %v15589_v6  ;;  %v1296_v29 = vsub.f32 %v10930_v14, %v10972_v53  ;;  %16388 = vst [vmem:[#allocation64_spill] sm:$0xff] %v11005_v39 }
  0x31   :  { %1244 = vmatprep.subr.mxu1 %v15589_v6  ;;  %10032 = vmatpush1.msk.msra.mxu0 %vm10756_vm3, %v16385_v17  ;;  %16390 = vst [vmem:[#allocation66_spill] sm:$0xff] %v11018_v38 }
  0x32   :  { %1250 = vmatpush1.msra.mxu1 %v10967_v40  ;;  %1059 = vmatprep.subr.mxu0 %v15589_v6  ;;  %v1308_v40 = vsub.f32 %v10951_v24, %v10988_v23  ;;  %v11025_v60 = vand.u32 4294901760, %v1296_v29  ;;  %v1332_v29 = vsub.f32 %v10990_v8, %v11018_v38  ;;  %v11260_v23 = vadd.s32 184, %v10658_v13 }
  0x33   :  { %1256 = vmatprep.subr.mxu1 %v15589_v6  ;;  %10033 = vmatpush1.msk.msra.mxu0 %vm10768_vm4, %v16385_v17 }
  0x34   :  { %1262 = vmatpush1.msra.mxu1 %v10982_v0  ;;  %1063 = vmatprep.subr.mxu0 %v15589_v6  ;;  %16391 = vst [vmem:[#allocation67_spill] sm:$0xff] %v11025_v60  ;;  %v11031_v0 = vand.u32 4294901760, %v11005_v39  ;;  %v11038_v61 = vand.u32 4294901760, %v1308_v40  ;;  %16446 = vst [vmem:[#allocation105_spill] sm:$0xff] %v11260_v23 }
  0x35   :  { %1268 = vmatprep.subr.mxu1 %v15589_v6  ;;  %10034 = vmatpush1.msk.msra.mxu0 %vm10790_vm5, %v16385_v17 }
  0x36   :  { %1274 = vmatpush1.msra.mxu1 %v10997_v21  ;;  %1067 = vmatprep.subr.mxu0 %v15589_v6  ;;  %16392 = vst [vmem:[#allocation68_spill] sm:$0xff] %v11031_v0  ;;  %16393 = vst [vmem:[#allocation69_spill] sm:$0xff] %v11038_v61  ;;  %v11048_v21 = vand.u32 4294901760, %v1320_v2  ;;  %v1344_v40 = vsub.f32 %v11005_v39, %v11031_v0 }
  0x37   :  { %1280 = vmatprep.subr.mxu1 %v15589_v6  ;;  %10035 = vmatpush1.msk.msra.mxu0 %vm10808_vm6, %v16385_v17 }
  0x38   :  { %1286 = vmatpush1.msra.mxu1 %v11012_v49  ;;  %1071 = vmatprep.subr.mxu0 %v15589_v6  ;;  %16394 = vst [vmem:[#allocation70_spill] sm:$0xff] %v11048_v21  ;;  %v11058_v49 = vand.u32 4294901760, %v1332_v29  ;;  %v11066_v2 = vand.u32 4294901760, %v1344_v40  ;;  %v11075_v29 = vadd.s32 16, %v10658_v13 }
  0x39   :  { %1292 = vmatprep.subr.mxu1 %v15589_v6  ;;  %10036 = vmatpush1.msk.msra.mxu0 %vm10831_vm7, %v16385_v17 }
  0x3a   :  { %1298 = vmatpush1.msra.mxu1 %v11025_v60  ;;  %1075 = vmatprep.subr.mxu0 %v15589_v6  ;;  %16395 = vst [vmem:[#allocation71_spill] sm:$0xff] %v11058_v49  ;;  %16396 = vst [vmem:[#allocation72_spill] sm:$0xff] %v11066_v2  ;;  %v54_v40 = vadd.s32 16, %v11075_v29  ;;  %v11100_v60 = vadd.s32 232, %v10658_v13  ;;  %vm11130_vm0 = vcmp.eq.s32.totalorder %v10676_v20, %v11075_v29 }
  0x3b   :  { %1304 = vmatprep.subr.mxu1 %v15589_v6  ;;  %10037 = vmatpush1.msk.msra.mxu0 %vm10848_vm8, %v16385_v17  ;;  %16397 = vst [vmem:[#allocation73_spill] sm:$0xff] %v11075_v29  ;;  %v16410_v11 = vsel %vm11130_vm0, 4294967295, %v16409_v11 }
  0x3c   :  { %1310 = vmatpush1.msra.mxu1 %v11038_v61  ;;  %1079 = vmatprep.subr.mxu0 %v15589_v6  ;;  %vm11091_vm14 = vcmp.eq.s32.totalorder %v10676_v20, %v54_v40  ;;  %16401 = vst [vmem:[#allocation75_spill] sm:$0xff] %v11100_v60  ;;  %v16403_v40 = vmov 0  ;;  %v81_v30 = vadd.s32 16, %v11100_v60  ;;  %16411 = vst [vmem:[#allocation81_spill] sm:$0xff] %v16410_v11  ;;  %v9970_v60 = vsel %vm11130_vm0, 1.0, %v15589_v6 }
  0x3d   :  { %1316 = vmatprep.subr.mxu1 %v15589_v6  ;;  %10038 = vmatpush1.msk.msra.mxu0 %vm10869_vm9, %v16385_v17 }
  0x3e   :  { %1322 = vmatpush1.msra.mxu1 %v11048_v21  ;;  %1083 = vmatprep.subr.mxu0 %v15589_v6  ;;  %v19_v21 = vadd.s32 8, %v10658_v13 }
  0x3f   :  { %1328 = vmatprep.subr.mxu1 %v15589_v6  ;;  %10039 = vmatpush1.msk.msra.mxu0 %vm10891_vm10, %v16385_v17 }
  0x40   :  { %1334 = vmatpush1.msra.mxu1 %v11058_v49  ;;  %1087 = vmatprep.subr.mxu0 %v15589_v6  ;;  %v16398_v49 = vmov 0  ;;  %v53_v61 = vadd.s32 16, %v19_v21 }
  0x41   :  { %1340 = vmatprep.subr.mxu1 %v15589_v6  ;;  %10040 = vmatpush1.msk.msra.mxu0 %vm10911_vm11, %v16385_v17  ;;  %v16399_v49 = vsel %vm11091_vm14, 4294967295, %v16398_v49 }
  0x42   :  { %1346 = vmatpush1.msra.mxu1 %v11066_v2  ;;  %1091 = vmatprep.subr.mxu0 %v15589_v6  ;;  %16400 = vst [vmem:[#allocation74_spill] sm:$0xff] %v16399_v49  ;;  %v9972_v2 = vsel %vm11091_vm14, 1.0, %v15589_v6  ;;  %vm11108_vm15 = vcmp.eq.s32.totalorder %v10676_v20, %v53_v61 }
  0x43   :  { %1352 = vmatprep.subr.mxu1 %v15589_v6  ;;  %10041 = vmatpush1.msk.msra.mxu0 %vm10933_vm12, %v16385_v17  ;;  %v11105_v32 = vsub.f32 %v9972_v2, %v9972_v2  ;;  %v16404_v40 = vsel %vm11108_vm15, 4294967295, %v16403_v40  ;;  %v9971_v21 = vsel %vm11108_vm15, 1.0, %v15589_v6  ;;  %v16709_v1 = vld [vmem:[#allocation75_spill] sm:$0xff] }
  0x44   :  { %1095 = vmatprep.subr.mxu0 %v15589_v6  ;;  %16405 = vst [vmem:[#allocation77_spill] sm:$0xff] %v16404_v40  ;;  %v11126_v2 = vsub.f32 %v9971_v21, %v9971_v21  ;;  %v80_v21 = vadd.s32 16, %v11118_v22 }
  0x45   :  { %10042 = vmatpush1.msk.msra.mxu0 %vm10954_vm13, %v16385_v17  ;;  %16402 = vst [vmem:[#allocation76_spill] sm:$0xff] %v11105_v32  ;;  %v11124_v61 = vand.u32 4294901760, %v11105_v32  ;;  %vm11139_vm13 = vcmp.eq.s32.totalorder %v10687_v26, %v81_v30  ;;  %v16418_v30 = vmov 0.0  }
  0x46   :  { %1099 = vmatprep.subr.mxu0 %v15589_v6  ;;  %16408 = vst [vmem:[#allocation80_spill] sm:$0xff] %v11126_v2  ;;  %v16413_v3 = vsel %vm11139_vm13, 4294967295, %v16412_v3  ;;  %v11153_v57 = vand.u32 4294901760, %v11126_v2  ;;  %v9999_v52 = vsel %vm11139_vm13, 1.0, %v16418_v30 }
  0x47   :  { %10043 = vmatpush1.msk.msra.mxu0 %vm11091_vm14, %v16385_v17  ;;  %16407 = vst [vmem:[#allocation79_spill] sm:$0xff] %v11124_v61  ;;  %16414 = vst [vmem:[#allocation82_spill] sm:$0xff] %v16413_v3  ;;  %v1356_v29 = vsub.f32 %v11105_v32, %v11124_v61  ;;  %v11161_v22 = vsub.f32 %v9999_v52, %v9999_v52  ;;  %vm11164_vm14 = vcmp.eq.s32.totalorder %v10687_v26, %v80_v21 }
  0x48   :  { %1103 = vmatprep.subr.mxu0 %v15589_v6  ;;  %16416 = vst [vmem:[#allocation84_spill] sm:$0xff] %v11153_v57  ;;  %v11155_v6 = vsub.f32 %v9970_v60, %v9970_v60  ;;  %v16421_v50 = vsel %vm11164_vm14, 4294967295, %v16420_v50  ;;  %v1368_v52 = vsub.f32 %v11126_v2, %v11153_v57  ;;  %v9998_v21 = vsel %vm11164_vm14, 1.0, %v16418_v30 }
  0x49   :  { %10044 = vmatpush1.msk.msra.mxu0 %vm11108_vm15, %v16385_v17  ;;  %16419 = vst [vmem:[#allocation86_spill] sm:$0xff] %v11161_v22  ;;  %16422 = vst [vmem:[#allocation87_spill] sm:$0xff] %v16421_v50  ;;  %v11175_v60 = vand.u32 4294901760, %v1356_v29  ;;  %v11189_v63 = vand.u32 4294901760, %v11161_v22  ;;  %v11191_v19 = vsub.f32 %v9998_v21, %v9998_v21  ;;  %v16428_v29 = vmov 0 }
  0x4a   :  { %16417 = vst [vmem:[#allocation85_spill] sm:$0xff] %v11155_v6  ;;  %1107 = vmatprep.subr.mxu0 %v16418_v30  ;;  %v11180_v37 = vand.u32 4294901760, %v11155_v6  ;;  %v78_v57 = vadd.s32 16, %v11170_v44  ;;  %v11201_v20 = vand.u32 4294901760, %v1368_v52 }
  0x4b   :  { %10045 = vmatpush1.msk.msra.mxu0 %vm11130_vm0, %v16385_v17  ;;  %16424 = vst [vmem:[#allocation89_spill] sm:$0xff] %v11175_v60  ;;  %16426 = vst [vmem:[#allocation91_spill] sm:$0xff] %v11189_v63  ;;  %vm11194_vm0 = vcmp.eq.s32.totalorder %v10687_v26, %v79_v45  ;;  %1358 = vmatpush1.msra.mxu1 %v11175_v60  ;;  %v11209_v45 = vadd.s32 200, %v10658_v13  ;;  %v1410_v52 = vsub.f32 %v11161_v22, %v11189_v63 }
  0x4c   :  { %16425 = vst [vmem:[#allocation90_spill] sm:$0xff] %v11180_v37  ;;  %10046 = vmatprep.subr.msk.mxu0 %vm11139_vm13, %v16385_v17  ;;  %16427 = vst [vmem:[#allocation92_spill] sm:$0xff] %v11191_v19  ;;  %v16429_v29 = vsel %vm11194_vm0, 4294967295, %v16428_v29  ;;  %v1380_v61 = vsub.f32 %v11155_v6, %v11180_v37  ;;  %v9997_v21 = vsel %vm11194_vm0, 1.0, %v16418_v30  ;;  %1364 = vmatprep.subr.mxu1 %v16418_v30  ;;  %v11218_v60 = vand.u32 4294901760, %v11191_v19 }
  0x4d   :  { %16430 = vst [vmem:[#allocation93_spill] sm:$0xff] %v16429_v29  ;;  %1121 = vmatpush2.msra.mxu0 %v16418_v30  ;;  %16431 = vst [vmem:[#allocation94_spill] sm:$0xff] %v11201_v20  ;;  %v11220_v44 = vsub.f32 %v9997_v21, %v9997_v21  ;;  %vm11223_vm13 = vcmp.eq.s32.totalorder %v10687_v26, %v78_v57  ;;  %v16435_v37 = vmov 0  ;;  %1370 = vmatpush1.msra.mxu1 %v11201_v20  ;;  %v77_v38 = vadd.s32 16, %v11209_v45 }
  0x4e   :  { %16432 = vst [vmem:[#allocation95_spill] sm:$0xff] %v11209_v45  ;;  %10047 = vmatprep.subr.msk.mxu0 %vm11164_vm14, %v16385_v17  ;;  %16433 = vst [vmem:[#allocation96_spill] sm:$0xff] %v11218_v60  ;;  %v16436_v37 = vsel %vm11223_vm13, 4294967295, %v16435_v37  ;;  %v11229_v0 = vand.u32 4294901760, %v1380_v61  ;;  %v9996_v63 = vsel %vm11223_vm13, 1.0, %v16418_v30  ;;  %v11236_v21 = vadd.s32 192, %v10658_v13  ;;  %1376 = vmatprep.subr.mxu1 %v16418_v30 }
  0x4f   :  { %16434 = vst [vmem:[#allocation97_spill] sm:$0xff] %v11220_v44  ;;  %16437 = vst [vmem:[#allocation98_spill] sm:$0xff] %v16436_v37  ;;  %1125 = vmatpush2.msra.mxu0 %v16418_v30  ;;  %v11242_v57 = vand.u32 4294901760, %v1410_v52  ;;  %v1422_v61 = vsub.f32 %v11191_v19, %v11218_v60  ;;  %v11247_v20 = vand.u32 4294901760, %v11220_v44  ;;  %v11249_v62 = vsub.f32 %v9996_v63, %v9996_v63 }
  0x50   :  { %16438 = vst [vmem:[#allocation99_spill] sm:$0xff] %v11229_v0  ;;  %16439 = vst [vmem:[#allocation100_spill] sm:$0xff] %v11236_v21  ;;  %10048 = vmatprep.subr.msk.mxu0 %vm11194_vm0, %v16385_v17  ;;  %1382 = vmatpush1.msra.mxu1 %v11229_v0  ;;  %vm11254_vm14 = vcmp.eq.s32.totalorder %v10687_v26, %v77_v38  ;;  %v16443_v45 = vmov 0  ;;  %v76_v52 = vadd.s32 16, %v11236_v21 }
  0x51   :  { %16440 = vst [vmem:[#allocation101_spill] sm:$0xff] %v11242_v57  ;;  %16441 = vst [vmem:[#allocation102_spill] sm:$0xff] %v11247_v20  ;;  %1129 = vmatpush2.msra.mxu0 %v16418_v30  ;;  %v16444_v45 = vsel %vm11254_vm14, 4294967295, %v16443_v45  ;;  %1412 = vmatprep.subr.mxu1 %v11242_v57  ;;  %v11266_v63 = vand.u32 4294901760, %v1422_v61  ;;  %v1434_v0 = vsub.f32 %v11220_v44, %v11247_v20  ;;  %v11271_v38 = vand.u32 4294901760, %v11249_v62 }
  0x52   :  { %16442 = vst [vmem:[#allocation103_spill] sm:$0xff] %v11249_v62  ;;  %16445 = vst [vmem:[#allocation104_spill] sm:$0xff] %v16444_v45  ;;  %10049 = vmatprep.subr.msk.mxu0 %vm11223_vm13, %v16385_v17  ;;  %v9995_v21 = vsel %vm11254_vm14, 1.0, %v16418_v30  ;;  %1418 = vmatpush2.msra.mxu1 %v16418_v30  ;;  %vm11281_vm13 = vcmp.eq.s32.totalorder %v10687_v26, %v76_v52  ;;  %v16450_v61 = vmov 0  ;;  %v75_v57 = vadd.s32 16, %v11260_v23 }
  0x53   :  { %16447 = vst [vmem:[#allocation106_spill] sm:$0xff] %v11266_v63  ;;  %16448 = vst [vmem:[#allocation107_spill] sm:$0xff] %v11271_v38  ;;  %1133 = vmatpush2.msra.mxu0 %v16418_v30  ;;  %v11278_v60 = vsub.f32 %v9995_v21, %v9995_v21  ;;  %v16451_v61 = vsel %vm11281_vm13, 4294967295, %v16450_v61  ;;  %v11287_v20 = vadd.s32 176, %v10658_v13  ;;  %1424 = vmatprep.subr.mxu1 %v11266_v63  ;;  %v11293_v53 = vand.u32 4294901760, %v1434_v0 }
  0x54   :  { %16452 = vst [vmem:[#allocation109_spill] sm:$0xff] %v16451_v61  ;;  %10050 = vmatprep.subr.msk.mxu0 %vm11254_vm14, %v16385_v17  ;;  %v1446_v21 = vsub.f32 %v11249_v62, %v11271_v38  ;;  %v9994_v52 = vsel %vm11281_vm13, 1.0, %v16418_v30  ;;  %v11301_v23 = vadd.s32 168, %v10658_v13  ;;  %1430 = vmatpush2.msra.mxu1 %v16418_v30  ;;  %vm11311_vm14 = vcmp.eq.s32.totalorder %v10687_v26, %v75_v57 }
  0x55   :  { %16449 = vst [vmem:[#allocation108_spill] sm:$0xff] %v11278_v60  ;;  %16453 = vst [vmem:[#allocation110_spill] sm:$0xff] %v11287_v20  ;;  %1137 = vmatpush2.msra.mxu0 %v16418_v30  ;;  %v11306_v34 = vand.u32 4294901760, %v11278_v60  ;;  %v11308_v63 = vsub.f32 %v9994_v52, %v9994_v52  ;;  %v16458_v0 = vmov 0  ;;  %v74_v38 = vadd.s32 16, %v11287_v20  ;;  %1436 = vmatprep.subr.mxu1 %v11293_v53 }
  0x56   :  { %16454 = vst [vmem:[#allocation111_spill] sm:$0xff] %v11293_v53  ;;  %16455 = vst [vmem:[#allocation112_spill] sm:$0xff] %v11301_v23  ;;  %v16459_v0 = vsel %vm11311_vm14, 4294967295, %v16458_v0  ;;  %10051 = vmatprep.subr.msk.mxu0 %vm11281_vm13, %v16385_v17  ;;  %v11320_v5 = vand.u32 4294901760, %v1446_v21  ;;  %v9993_v52 = vsel %vm11311_vm14, 1.0, %v16418_v30  ;;  %v73_v51 = vadd.s32 16, %v11301_v23  ;;  %1442 = vmatpush2.msra.mxu1 %v16418_v30 }
  0x57   :  { %16456 = vst [vmem:[#allocation113_spill] sm:$0xff] %v11306_v34  ;;  %16457 = vst [vmem:[#allocation114_spill] sm:$0xff] %v11308_v63  ;;  %v11327_v57 = vadd.s32 160, %v10658_v13  ;;  %1141 = vmatpush2.msra.mxu0 %v16418_v30  ;;  %v1458_v20 = vsub.f32 %v11278_v60, %v11306_v34  ;;  %v11334_v53 = vand.u32 4294901760, %v11308_v63  ;;  %v11336_v21 = vsub.f32 %v9993_v52, %v9993_v52 }
  0x58   :  { %16460 = vst [vmem:[#allocation115_spill] sm:$0xff] %v16459_v0  ;;  %16461 = vst [vmem:[#allocation116_spill] sm:$0xff] %v11320_v5  ;;  %vm11339_vm13 = vcmp.eq.s32.totalorder %v10687_v26, %v74_v38  ;;  %10052 = vmatprep.subr.msk.mxu0 %vm11311_vm14, %v16385_v17  ;;  %1448 = vmatprep.subr.mxu1 %v11320_v5  ;;  %vm11351_vm0 = vcmp.eq.s32.totalorder %v10687_v26, %v73_v51  ;;  %v16468_v34 = vmov 0  ;;  %v11357_v52 = vadd.s32 152, %v10658_v13 }
  0x59   :  { %16462 = vst [vmem:[#allocation117_spill] sm:$0xff] %v11327_v57  ;;  %16463 = vst [vmem:[#allocation118_spill] sm:$0xff] %v11334_v53  ;;  %v16466_v41 = vsel %vm11339_vm13, 4294967295, %v16465_v41  ;;  %v9992_v23 = vsel %vm11339_vm13, 1.0, %v16418_v30  ;;  %v16469_v34 = vsel %vm11351_vm0, 4294967295, %v16468_v34  ;;  %v72_v38 = vadd.s32 16, %v11327_v57  ;;  %1145 = vmatpush2.msra.mxu0 %v16418_v30  ;;  %1454 = vmatpush2.msra.mxu1 %v16418_v30 }
  0x5a   :  { %16464 = vst [vmem:[#allocation119_spill] sm:$0xff] %v11336_v21  ;;  %16467 = vst [vmem:[#allocation120_spill] sm:$0xff] %v16466_v41  ;;  %v11361_v35 = vand.u32 4294901760, %v1458_v20  ;;  %v1470_v5 = vsub.f32 %v11308_v63, %v11334_v53  ;;  %v11366_v25 = vand.u32 4294901760, %v11336_v21  ;;  %v11368_v51 = vsub.f32 %v9992_v23, %v9992_v23  ;;  %10053 = vmatprep.subr.msk.mxu0 %vm11339_vm13, %v16385_v17 }
  0x5b   :  { %16470 = vst [vmem:[#allocation121_spill] sm:$0xff] %v16469_v34  ;;  %16471 = vst [vmem:[#allocation122_spill] sm:$0xff] %v11357_v52  ;;  %v9991_v57 = vsel %vm11351_vm0, 1.0, %v16418_v30  ;;  %vm11377_vm14 = vcmp.eq.s32.totalorder %v10687_v26, %v72_v38  ;;  %v16475_v20 = vmov 0  ;;  %v71_v53 = vadd.s32 16, %v11357_v52  ;;  %1149 = vmatpush2.msra.mxu0 %v16418_v30 }
  0x5c   :  { %16472 = vst [vmem:[#allocation123_spill] sm:$0xff] %v11361_v35  ;;  %16473 = vst [vmem:[#allocation124_spill] sm:$0xff] %v11366_v25  ;;  %v16476_v20 = vsel %vm11377_vm14, 4294967295, %v16475_v20  ;;  %1460 = vmatprep.subr.mxu1 %v11361_v35  ;;  %v11387_v23 = vand.u32 4294901760, %v1470_v5  ;;  %v1482_v47 = vsub.f32 %v11336_v21, %v11366_v25  ;;  %v11392_v63 = vand.u32 4294901760, %v11368_v51  ;;  %10054 = vmatprep.subr.msk.mxu0 %vm11351_vm0, %v16385_v17 }
  0x5d   :  { %16474 = vst [vmem:[#allocation125_spill] sm:$0xff] %v11368_v51  ;;  %16477 = vst [vmem:[#allocation126_spill] sm:$0xff] %v16476_v20  ;;  %v11394_v38 = vsub.f32 %v9991_v57, %v9991_v57  ;;  %1466 = vmatpush2.msra.mxu1 %v16418_v30  ;;  %v9990_v35 = vsel %vm11377_vm14, 1.0, %v16418_v30  ;;  %vm11404_vm13 = vcmp.eq.s32.totalorder %v10687_v26, %v71_v53  ;;  %v16482_v5 = vmov 0  ;;  %1153 = vmatpush2.msra.mxu0 %v16418_v30 }
  0x5e   :  { %16479 = vst [vmem:[#allocation128_spill] sm:$0xff] %v11387_v23  ;;  %16480 = vst [vmem:[#allocation129_spill] sm:$0xff] %v11392_v63  ;;  %v16483_v5 = vsel %vm11404_vm13, 4294967295, %v16482_v5  ;;  %v70_v52 = vadd.s32 16, %v11383_v4  ;;  %v11410_v57 = vadd.s32 136, %v10658_v13  ;;  %1472 = vmatprep.subr.mxu1 %v11387_v23  ;;  %v11414_v25 = vand.u32 4294901760, %v1482_v47  ;;  %10055 = vmatprep.subr.msk.mxu0 %vm11377_vm14, %v16385_v17 }
  0x5f   :  { %16481 = vst [vmem:[#allocation130_spill] sm:$0xff] %v11394_v38  ;;  %16484 = vst [vmem:[#allocation131_spill] sm:$0xff] %v16483_v5  ;;  %v1494_v21 = vsub.f32 %v11368_v51, %v11392_v63  ;;  %v11419_v34 = vand.u32 4294901760, %v11394_v38  ;;  %v11421_v53 = vsub.f32 %v9990_v35, %v9990_v35  ;;  %1478 = vmatpush2.msra.mxu1 %v16418_v30  ;;  %v9989_v23 = vsel %vm11404_vm13, 1.0, %v16418_v30 }
  0x60   :  { %16485 = vst [vmem:[#allocation132_spill] sm:$0xff] %v11410_v57  ;;  %16486 = vst [vmem:[#allocation133_spill] sm:$0xff] %v11414_v25  ;;  %vm11431_vm0 = vcmp.eq.s32.totalorder %v10687_v26, %v70_v52  ;;  %v16489_v47 = vmov 0  ;;  %v69_v4 = vadd.s32 16, %v11410_v57  ;;  %v11437_v35 = vadd.s32 128, %v10658_v13  ;;  %1157 = vmatpush2.msra.mxu0 %v16418_v30  ;;  %1484 = vmatprep.subr.mxu1 %v11414_v25 }
  0x61   :  { %16487 = vst [vmem:[#allocation134_spill] sm:$0xff] %v11419_v34  ;;  %16488 = vst [vmem:[#allocation135_spill] sm:$0xff] %v11421_v53  ;;  %v16490_v47 = vsel %vm11431_vm0, 4294967295, %v16489_v47  ;;  %v11441_v63 = vand.u32 4294901760, %v1494_v21  ;;  %v1506_v51 = vsub.f32 %v11394_v38, %v11419_v34  ;;  %v11446_v20 = vand.u32 4294901760, %v11421_v53  ;;  %10056 = vmatprep.subr.msk.mxu0 %vm11404_vm13, %v16385_v17  ;;  %1490 = vmatpush2.msra.mxu1 %v16418_v30 }
  0x62   :  { %16491 = vst [vmem:[#allocation136_spill] sm:$0xff] %v16490_v47  ;;  %16492 = vst [vmem:[#allocation137_spill] sm:$0xff] %v11437_v35  ;;  %v11448_v52 = vsub.f32 %v9989_v23, %v9989_v23  ;;  %v9988_v25 = vsel %vm11431_vm0, 1.0, %v16418_v30  ;;  %vm11458_vm14 = vcmp.eq.s32.totalorder %v10687_v26, %v69_v4  ;;  %v16496_v21 = vmov 0  ;;  %1161 = vmatpush2.msra.mxu0 %v16418_v30 }
  0x63   :  { %16493 = vst [vmem:[#allocation138_spill] sm:$0xff] %v11441_v63  ;;  %16494 = vst [vmem:[#allocation139_spill] sm:$0xff] %v11446_v20  ;;  %v16497_v21 = vsel %vm11458_vm14, 4294967295, %v16496_v21  ;;  %v68_v57 = vadd.s32 16, %v11437_v35  ;;  %1496 = vmatprep.subr.mxu1 %v11441_v63  ;;  %v11465_v23 = vand.u32 4294901760, %v1506_v51  ;;  %v1518_v13 = vsub.f32 %v11421_v53, %v11446_v20  ;;  %10057 = vmatprep.subr.msk.mxu0 %vm11431_vm0, %v16385_v17 }
  0x64   :  { %16495 = vst [vmem:[#allocation140_spill] sm:$0xff] %v11448_v52  ;;  %16498 = vst [vmem:[#allocation141_spill] sm:$0xff] %v16497_v21  ;;  %v11470_v34 = vand.u32 4294901760, %v11448_v52  ;;  %v11472_v38 = vsub.f32 %v9988_v25, %v9988_v25  ;;  %1502 = vmatpush2.msra.mxu1 %v16418_v30  ;;  %v9987_v4 = vsel %vm11458_vm14, 1.0, %v16418_v30  ;;  %v16502_v51 = vmov 0  ;;  %1165 = vmatpush2.msra.mxu0 %v16418_v30 }
  0x65   :  { %16499 = vst [vmem:[#allocation142_spill] sm:$0xff] %v11465_v23  ;;  %vm11482_vm13 = vcmp.eq.s32.totalorder %v10687_v26, %v68_v57  ;;  %1508 = vmatprep.subr.mxu1 %v11465_v23  ;;  %v11488_v25 = vand.u32 4294901760, %v1518_v13  ;;  %v11495_v20 = vsub.f32 %v9987_v4, %v9987_v4  ;;  %10058 = vmatprep.subr.msk.mxu0 %vm11458_vm14, %v16385_v17 }
  0x66   :  { %16500 = vst [vmem:[#allocation143_spill] sm:$0xff] %v11470_v34  ;;  %16501 = vst [vmem:[#allocation144_spill] sm:$0xff] %v11472_v38  ;;  %v16503_v51 = vsel %vm11482_vm13, 4294967295, %v16502_v51  ;;  %v1530_v63 = vsub.f32 %v11448_v52, %v11470_v34  ;;  %v11493_v35 = vand.u32 4294901760, %v11472_v38  ;;  %1514 = vmatpush2.msra.mxu1 %v16418_v30  ;;  %v9986_v57 = vsel %vm11482_vm13, 1.0, %v16418_v30  ;;  %1169 = vmatpush2.msra.mxu0 %v16418_v30 }
  0x67   :  { %16504 = vst [vmem:[#allocation145_spill] sm:$0xff] %v16503_v51  ;;  %16505 = vst [vmem:[#allocation146_spill] sm:$0xff] %v11488_v25  ;;  %1520 = vmatprep.subr.mxu1 %v11488_v25  ;;  %v11511_v23 = vand.u32 4294901760, %v11495_v20  ;;  %v11513_v26 = vsub.f32 %v9986_v57, %v9986_v57  ;;  %10059 = vmatprep.subr.msk.mxu0 %vm11482_vm13, %v16385_v17 }
  0x68   :  { %16506 = vst [vmem:[#allocation147_spill] sm:$0xff] %v11493_v35  ;;  %16507 = vst [vmem:[#allocation148_spill] sm:$0xff] %v11495_v20  ;;  %v11506_v13 = vand.u32 4294901760, %v1530_v63  ;;  %v1542_v4 = vsub.f32 %v11472_v38, %v11493_v35  ;;  %1526 = vmatpush2.msra.mxu1 %v16418_v30  ;;  %1173 = vmatpush2.msra.mxu0 %v16418_v30 }
  0x69   :  { %16509 = vst [vmem:[#allocation150_spill] sm:$0xff] %v11511_v23  ;;  %16510 = vst [vmem:[#allocation151_spill] sm:$0xff] %v11513_v26  ;;  %v1554_v25 = vsub.f32 %v11495_v20, %v11511_v23  ;;  %v11526_v35 = vand.u32 4294901760, %v11513_v26  ;;  %1586 = vmatprep.subr.mxu0 %v10713_v42 }
  0x6a   :  { %16508 = vst [vmem:[#allocation149_spill] sm:$0xff] %v11506_v13  ;;  %1532 = vmatprep.subr.mxu1 %v11506_v13  ;;  %v11521_v63 = vand.u32 4294901760, %v1542_v4 }
  0x6b   :  { %16512 = vst [vmem:[#allocation153_spill] sm:$0xff] %v11526_v35  ;;  %1538 = vmatpush2.msra.mxu1 %v16418_v30  ;;  %v11531_v57 = vand.u32 4294901760, %v1554_v25  ;;  %v1566_v34 = vsub.f32 %v11513_v26, %v11526_v35 }
  0x6c   :  { %16511 = vst [vmem:[#allocation152_spill] sm:$0xff] %v11521_v63  ;;  %1544 = vmatprep.subr.mxu1 %v11521_v63 }
  0x6d   :  { %16513 = vst [vmem:[#allocation154_spill] sm:$0xff] %v11531_v57  ;;  %1550 = vmatpush2.msra.mxu1 %v16418_v30  ;;  %v11537_v4 = vand.u32 4294901760, %v1566_v34 }
  0x6e   :  { %1556 = vmatprep.subr.mxu1 %v11531_v57 }
  0x6f   :  { %16514 = vst [vmem:[#allocation155_spill] sm:$0xff] %v11537_v4  ;;  %1562 = vmatpush2.msra.mxu1 %v16418_v30 }
  0x70   :  { %1568 = vmatprep.subr.mxu1 %v11537_v4 }
  0x71   :  { %1574 = vmatpush2.msra.mxu1 %v16418_v30 }
  0x72   :  { %10060 = vmatprep.subr.msk.mxu1 %vm10697_vm1, %v16385_v17 }
  0xce   :  { %v556_v25 = vpop.f32.mrf.mxu0 }
  0xcf   :  { %v660_v42 = vpop.f32.mrf.mxu1 }
  0xd0   :  { %v558_v63 = vpop.f32.mrf.mxu0  ;;  %v661_v62 = vadd.f32 %v660_v42, %v556_v25 }
  0xd1   :  { %v662_v13 = vpop.f32.mrf.mxu1 }
  0xd2   :  { %v567_v35 = vpop.f32.mrf.mxu0  ;;  %v663_v19 = vadd.f32 %v662_v13, %v558_v63 }
  0xd3   :  { %v667_v23 = vpop.f32.mrf.mxu1 }
  0xd4   :  { %v668_v26 = vadd.f32 %v667_v23, %v567_v35  ;;  %v569_v57 = vpop.f32.mrf.mxu0 }
  0xd5   :  { %v669_v34 = vpop.f32.mrf.mxu1 }
  0xd6   :  { %v670_v20 = vadd.f32 %v669_v34, %v569_v57  ;;  %v578_v38 = vpop.f32.mrf.mxu0 }
  0xd7   :  { %v674_v52 = vpop.f32.mrf.mxu1 }
  0xd8   :  { %v675_v51 = vadd.f32 %v674_v52, %v578_v38  ;;  %v580_v4 = vpop.f32.mrf.mxu0 }
  0xd9   :  { %v676_v53 = vpop.f32.mrf.mxu1 }
  0xda   :  { %v677_v21 = vadd.f32 %v676_v53, %v580_v4  ;;  %v751_v47 = vpop.f32.mrf.mxu0 }
  0xdb   :  { %v843_v5 = vpop.f32.mrf.mxu1  ;;  %v752_v35 = vadd.f32 %v751_v47, %v661_v62 }
  0xdc   :  { %v753_v33 = vpop.f32.mrf.mxu0 }
  0xdd   :  { %v845_v60 = vpop.f32.mrf.mxu1  ;;  %v754_v22 = vadd.f32 %v753_v33, %v663_v19  ;;  %v844_v4 = vadd.f32 %v843_v5, %v752_v35 }
  0xde   :  { %v759_v41 = vpop.f32.mrf.mxu0 }
  0xdf   :  { %v760_v0 = vadd.f32 %v759_v41, %v668_v26  ;;  %v852_v44 = vpop.f32.mrf.mxu1  ;;  %v846_v42 = vadd.f32 %v845_v60, %v754_v22 }
  0xe0   :  { %v761_v61 = vpop.f32.mrf.mxu0 }
  0xe1   :  { %v853_v23 = vadd.f32 %v852_v44, %v760_v0  ;;  %v762_v45 = vadd.f32 %v761_v61, %v670_v20  ;;  %v854_v57 = vpop.f32.mrf.mxu1 }
  0xe2   :  { %v767_v34 = vpop.f32.mrf.mxu0 }
  0xe3   :  { %v855_v38 = vadd.f32 %v854_v57, %v762_v45  ;;  %v768_v52 = vadd.f32 %v767_v34, %v675_v51  ;;  %v861_v6 = vpop.f32.mrf.mxu1 }
  0xe4   :  { %v769_v53 = vpop.f32.mrf.mxu0 }
  0xe5   :  { %v862_v37 = vadd.f32 %v861_v6, %v768_v52  ;;  %v770_v2 = vadd.f32 %v769_v53, %v677_v21  ;;  %v863_v29 = vpop.f32.mrf.mxu1  ;;  %v16522_v53 = vld [vmem:[#allocation76_spill] sm:$0xff] }
  0xe6   :  { %v939_v32 = vpop.f32.mrf.mxu0 }
  0xe7   :  { %v11545_v26 = vadd.f32 %v863_v29, %v770_v2  ;;  %v940_v41 = vadd.f32 %v939_v32, %v844_v4  ;;  %v1027_v13 = vpop.f32.mrf.mxu1  ;;  %v16523_v4 = vld [vmem:[#allocation93_spill] sm:$0xff] }
  0xe8   :  { %v941_v62 = vpop.f32.mrf.mxu0 }
  0xe9   :  { %v1028_v44 = vadd.f32 %v1027_v13, %v940_v41  ;;  %v942_v61 = vadd.f32 %v941_v62, %v846_v42  ;;  %v1029_v0 = vpop.f32.mrf.mxu1  ;;  %v16525_v42 = vld [vmem:[#allocation80_spill] sm:$0xff]  ;;  %v16526_v41 = vld [vmem:[#allocation98_spill] sm:$0xff]  ;;  %v16528_v13 = vld [vmem:[#allocation85_spill] sm:$0xff] }
  0xea   :  { %v946_v20 = vpop.f32.mrf.mxu0  ;;  %v16529_v62 = vld [vmem:[#allocation86_spill] sm:$0xff] }
  0xeb   :  { %v11547_v19 = vand.u32 4294901760, %v1028_v44  ;;  %v1030_v33 = vadd.f32 %v1029_v0, %v942_v61  ;;  %v947_v45 = vadd.f32 %v946_v20, %v853_v23  ;;  %v1034_v47 = vpop.f32.mrf.mxu1  ;;  %v16532_v61 = vld [vmem:[#allocation92_spill] sm:$0xff]  ;;  %v16533_v0 = vld [vmem:[#allocation109_spill] sm:$0xff] }
  0xec   :  { %v948_v5 = vpop.f32.mrf.mxu0  ;;  %v16535_v20 = vld [vmem:[#allocation97_spill] sm:$0xff] }
  0xed   :  { %v11550_v6 = vsub.f32 %v1028_v44, %v11547_v19  ;;  %v11552_v21 = vand.u32 4294901760, %v1030_v33  ;;  %v949_v22 = vadd.f32 %v948_v5, %v855_v38  ;;  %v11554_v2 = vadd.f32 %v1034_v47, %v947_v45  ;;  %v1036_v32 = vpop.f32.mrf.mxu1  ;;  %v16530_v44 = vld [vmem:[#allocation104_spill] sm:$0xff]  ;;  %v16538_v45 = vld [vmem:[#allocation103_spill] sm:$0xff] }
  0xee   :  { %v953_v60 = vpop.f32.mrf.mxu0  ;;  %v16539_v47 = vld [vmem:[#allocation120_spill] sm:$0xff] }
  0xef   :  { %16515 = vst [vmem:[#allocation156_spill] sm:$0xff] %v11554_v2  ;;  %v15802_v29 = vand.u32 4294901760, %v11550_v6  ;;  %v1175_v51 = vsub.f32 %v1030_v33, %v11552_v21  ;;  %v954_v63 = vadd.f32 %v953_v60, %v862_v37  ;;  %v11558_v25 = vadd.f32 %v1036_v32, %v949_v22  ;;  %1576 = vmatprep.mubr.f32.mxu1 %v11552_v21  ;;  %v1041_v35 = vpop.f32.mrf.mxu1  ;;  %v16536_v33 = vld [vmem:[#allocation115_spill] sm:$0xff]  ;;  %v16541_v5 = vld [vmem:[#allocation108_spill] sm:$0xff]  ;;  %v16542_v22 = vld [vmem:[#allocation121_spill] sm:$0xff] }
  0xf0   :  { %1578 = vmatmul.mubr.f32.vlgmr.msra.gmra.mxu1 %v11547_v19  ;;  %v16544_v32 = vld [vmem:[#allocation114_spill] sm:$0xff] }
  0xf1   :  { %16516 = vst [vmem:[#allocation157_spill] sm:$0xff] %v11558_v25  ;;  %v11562_v23 = vadd.f32 %v1041_v35, %v954_v63  ;;  %1790 = vmatpush1.msra.mxu1 %v16418_v30  ;;  %v1176_v57 = vand.u32 4294901760, %v1175_v51  ;;  %v1183_v34 = vsub.f32 %v11550_v6, %v15802_v29  ;;  %v16545_v60 = vld [vmem:[#allocation126_spill] sm:$0xff]  ;;  %v16548_v63 = vld [vmem:[#allocation131_spill] sm:$0xff]  ;;  %v16550_v35 = vld [vmem:[#allocation125_spill] sm:$0xff] }
  0xf2   :  { %10061 = vmatprep.subr.msk.mxu1 %vm10734_vm2, %v16385_v17  ;;  %v16556_v29 = vld [vmem:[#allocation140_spill] sm:$0xff] }
  0xf3   :  { %1794 = vmatpush1.msra.mxu1 %v16418_v30  ;;  %1918 = vmatprep.mubr.f32.mxu1 %v1176_v57  ;;  %v1177_v37 = vsub.f32 %v1175_v51, %v1176_v57  ;;  %v1184_v52 = vand.u32 4294901760, %v1183_v34  ;;  %v16552_v34 = vld [vmem:[#allocation130_spill] sm:$0xff]  ;;  %v16647_v57 = vld [vmem:[#allocation25_spill] sm:$0xff] }
  0xf4   :  { %1796 = vmatprep.subr.mxu1 %v16418_v30 }
  0xf5   :  { %10062 = vmatpush1.msk.msra.mxu1 %vm10756_vm3, %v16385_v17  ;;  %v1178_v38 = vand.u32 4294901760, %v1177_v37  ;;  %v16648_v37 = vmov 0 }
  0xf6   :  { %1800 = vmatprep.subr.mxu1 %v16418_v30 }
  0xf7   :  { %10063 = vmatpush1.msk.msra.mxu1 %vm10768_vm4, %v16385_v17  ;;  %1179 = vmatprep.mubr.f32.mxu0 %v1178_v38  ;;  %v16554_v38 = vld [vmem:[#allocation135_spill] sm:$0xff] }
  0xf8   :  { %1804 = vmatprep.subr.mxu1 %v16418_v30  ;;  %1185 = vmatmul.mubr.f32.vlgmr.msra.gmra.mxu0 %v1184_v52  ;;  %v16656_v52 = vld [vmem:[#allocation29_spill] sm:$0xff] }
  0xf9   :  { %1589 = vmatpush1.msra.mxu0 %v16418_v30  ;;  %10064 = vmatpush1.msk.msra.mxu1 %vm10790_vm5, %v16385_v17 }
  0xfa   :  { %1592 = vmatprep.subr.mxu0 %v10765_v58  ;;  %1778 = vmatprep.mubr.f32.mxu0 %v1175_v51  ;;  %v16547_v51 = vld [vmem:[#allocation119_spill] sm:$0xff] }
  0xfb   :  { %1808 = vmatprep.subr.mxu1 %v16418_v30  ;;  %1595 = vmatpush1.msra.mxu0 %v16418_v30 }
  0xfc   :  { %10065 = vmatpush1.msk.msra.mxu1 %vm10808_vm6, %v16385_v17  ;;  %1598 = vmatprep.subr.mxu0 %v16418_v30 }
  0xfd   :  { %1812 = vmatprep.subr.mxu1 %v16418_v30  ;;  %1601 = vmatpush1.msra.mxu0 %v10802_v7  ;;  %v16644_v7 = vld [vmem:[#allocation139_spill] sm:$0xff] }
  0xfe   :  { %10066 = vmatpush1.msk.msra.mxu1 %vm10831_vm7, %v16385_v17  ;;  %1604 = vmatprep.subr.mxu0 %v16418_v30 }
  0xff   :  { %1816 = vmatprep.subr.mxu1 %v16418_v30  ;;  %1607 = vmatpush1.msra.mxu0 %v10821_v12 }
 0x100   :  { %10067 = vmatpush1.msk.msra.mxu1 %vm10848_vm8, %v16385_v17  ;;  %1610 = vmatprep.subr.mxu0 %v16418_v30 }
 0x101   :  { %1820 = vmatprep.subr.mxu1 %v16418_v30  ;;  %1613 = vmatpush1.msra.mxu0 %v10845_v27 }
 0x102   :  { %10068 = vmatpush1.msk.msra.mxu1 %vm10869_vm9, %v16385_v17  ;;  %1616 = vmatprep.subr.mxu0 %v16418_v30 }
 0x103   :  { %1824 = vmatprep.subr.mxu1 %v16418_v30  ;;  %1619 = vmatpush1.msra.mxu0 %v10859_v31 }
 0x104   :  { %10069 = vmatpush1.msk.msra.mxu1 %vm10891_vm10, %v16385_v17  ;;  %1622 = vmatprep.subr.mxu0 %v16418_v30  ;;  %vm16517_vm10 = vnez %v16377_v16 }
 0x105   :  { %1828 = vmatprep.subr.mxu1 %v16418_v30  ;;  %1625 = vmatpush1.msra.mxu0 %v10888_v43  ;;  %v16637_v43 = vmov 0 }
 0x106   :  { %10070 = vmatpush1.msk.msra.mxu1 %vm10911_vm11, %v16385_v17  ;;  %1628 = vmatprep.subr.mxu0 %v16418_v30  ;;  %vm16518_vm11 = vnez %v16399_v49 }
 0x107   :  { %1832 = vmatprep.subr.mxu1 %v16418_v30  ;;  %1631 = vmatpush1.msra.mxu0 %v10908_v56  ;;  %v16636_v56 = vld [vmem:[#allocation23_spill] sm:$0xff] }
 0x108   :  { %10071 = vmatpush1.msk.msra.mxu1 %vm10933_vm12, %v16385_v17  ;;  %1634 = vmatprep.subr.mxu0 %v16418_v30 }
 0x109   :  { %1836 = vmatprep.subr.mxu1 %v16418_v30  ;;  %1637 = vmatpush1.msra.mxu0 %v10930_v14 }
 0x10a   :  { %10072 = vmatpush1.msk.msra.mxu1 %vm16517_vm10, %v16385_v17  ;;  %1640 = vmatprep.subr.mxu0 %v16418_v30  ;;  %vm16519_vm10 = vnez %v16410_v11 }
 0x10b   :  { %1840 = vmatprep.subr.mxu1 %v16418_v30  ;;  %1643 = vmatpush1.msra.mxu0 %v10951_v24  ;;  %v16632_v24 = vmov 0 }
 0x10c   :  { %10073 = vmatpush1.msk.msra.mxu1 %vm16518_vm11, %v16385_v17  ;;  %1646 = vmatprep.subr.mxu0 %v16418_v30  ;;  %vm16520_vm11 = vnez %v16413_v3 }
 0x10d   :  { %1844 = vmatprep.subr.mxu1 %v16418_v30  ;;  %1649 = vmatpush1.msra.mxu0 %v10974_v54 }
 0x10e   :  { %10074 = vmatpush1.msk.msra.mxu1 %vm11108_vm15, %v16385_v17  ;;  %1652 = vmatprep.subr.mxu0 %v16418_v30  ;;  %vm16521_vm15 = vnez %v16421_v50 }
 0x10f   :  { %1848 = vmatprep.subr.mxu1 %v16418_v30  ;;  %1655 = vmatpush1.msra.mxu0 %v10990_v8  ;;  %v16626_v8 = vmov 0 }
 0x110   :  { %10075 = vmatpush1.msk.msra.mxu1 %vm16519_vm10, %v16385_v17  ;;  %1658 = vmatprep.subr.mxu0 %v16418_v30  ;;  %vm16524_vm10 = vnez %v16523_v4 }
 0x111   :  { %10076 = vmatprep.subr.msk.mxu1 %vm16520_vm11, %v16385_v17  ;;  %1661 = vmatpush1.msra.mxu0 %v11005_v39  ;;  %vm16527_vm11 = vnez %v16526_v41  ;;  %v16625_v39 = vld [vmem:[#allocation17_spill] sm:$0xff] }
 0x112   :  { %1862 = vmatpush2.msra.mxu1 %v16418_v30  ;;  %1664 = vmatprep.subr.mxu0 %v16418_v30 }
 0x113   :  { %10077 = vmatprep.subr.msk.mxu1 %vm16521_vm15, %v16385_v17  ;;  %1667 = vmatpush1.msra.mxu0 %v16522_v53  ;;  %vm16531_vm15 = vnez %v16530_v44 }
 0x114   :  { %1866 = vmatpush2.msra.mxu1 %v16418_v30  ;;  %1670 = vmatprep.subr.mxu0 %v16418_v30 }
 0x115   :  { %10078 = vmatprep.subr.msk.mxu1 %vm16524_vm10, %v16385_v17  ;;  %1673 = vmatpush1.msra.mxu0 %v16525_v42  ;;  %vm16534_vm10 = vnez %v16533_v0  ;;  %v16617_v42 = vmov 0 }
 0x116   :  { %1870 = vmatpush2.msra.mxu1 %v16418_v30  ;;  %1676 = vmatprep.subr.mxu0 %v16418_v30 }
 0x117   :  { %10079 = vmatprep.subr.msk.mxu1 %vm16527_vm11, %v16385_v17  ;;  %1679 = vmatpush1.msra.mxu0 %v16528_v13  ;;  %vm16537_vm11 = vnez %v16536_v33 }
 0x118   :  { %1874 = vmatpush2.msra.mxu1 %v16418_v30  ;;  %1694 = vmatprep.subr.mxu0 %v16529_v62  ;;  %v16614_v62 = vld [vmem:[#allocation113_spill] sm:$0xff] }
 0x119   :  { %10080 = vmatprep.subr.msk.mxu1 %vm16531_vm15, %v16385_v17  ;;  %1697 = vmatpush2.msra.mxu0 %v16418_v30  ;;  %vm16540_vm15 = vnez %v16539_v47 }
 0x11a   :  { %1878 = vmatpush2.msra.mxu1 %v16418_v30  ;;  %1700 = vmatprep.subr.mxu0 %v16532_v61  ;;  %v1043_v61 = vpop.f32.mrf.mxu1 }
 0x11b   :  { %10081 = vmatprep.subr.msk.mxu1 %vm16534_vm10, %v16385_v17  ;;  %1703 = vmatpush2.msra.mxu0 %v16418_v30  ;;  %vm16543_vm10 = vnez %v16542_v22  ;;  %v16657_v22 = vmov 0 }
 0x11c   :  { %1882 = vmatpush2.msra.mxu1 %v16418_v30  ;;  %1706 = vmatprep.subr.mxu0 %v16535_v20  ;;  %v16604_v20 = vmov 0 }
 0x11d   :  { %10082 = vmatprep.subr.msk.mxu1 %vm16537_vm11, %v16385_v17  ;;  %1709 = vmatpush2.msra.mxu0 %v16418_v30  ;;  %vm16546_vm11 = vnez %v16545_v60 }
 0x11e   :  { %1886 = vmatpush2.msra.mxu1 %v16418_v30  ;;  %1712 = vmatprep.subr.mxu0 %v16538_v45  ;;  %v16603_v45 = vld [vmem:[#allocation12_spill] sm:$0xff] }
 0x11f   :  { %10083 = vmatprep.subr.msk.mxu1 %vm16540_vm15, %v16385_v17  ;;  %1715 = vmatpush2.msra.mxu0 %v16418_v30  ;;  %vm16549_vm15 = vnez %v16548_v63 }
 0x120   :  { %1890 = vmatpush2.msra.mxu1 %v16418_v30  ;;  %1718 = vmatprep.subr.mxu0 %v16541_v5  ;;  %v16601_v5 = vld [vmem:[#allocation102_spill] sm:$0xff] }
 0x121   :  { %10084 = vmatprep.subr.msk.mxu1 %vm16543_vm10, %v16385_v17  ;;  %1721 = vmatpush2.msra.mxu0 %v16418_v30 }
 0x122   :  { %1894 = vmatpush2.msra.mxu1 %v16418_v30  ;;  %1724 = vmatprep.subr.mxu0 %v16544_v32  ;;  %v16596_v32 = vld [vmem:[#allocation10_spill] sm:$0xff] }
 0x123   :  { %10085 = vmatprep.subr.msk.mxu1 %vm16546_vm11, %v16385_v17  ;;  %1727 = vmatpush2.msra.mxu0 %v16418_v30 }
 0x124   :  { %1898 = vmatpush2.msra.mxu1 %v16418_v30  ;;  %1730 = vmatprep.subr.mxu0 %v16547_v51  ;;  %v16591_v51 = vmov 0 }
 0x125   :  { %10086 = vmatprep.subr.msk.mxu1 %vm16549_vm15, %v16385_v17  ;;  %1733 = vmatpush2.msra.mxu0 %v16418_v30 }
 0x126   :  { %1902 = vmatpush2.msra.mxu1 %v16418_v30  ;;  %1736 = vmatprep.subr.mxu0 %v16550_v35 }
 0x127   :  { %10087 = vmatprep.subr.msk.mxu1 %vm11431_vm0, %v16385_v17  ;;  %1739 = vmatpush2.msra.mxu0 %v16418_v30 }
 0x128   :  { %1906 = vmatpush2.msra.mxu1 %v16418_v30  ;;  %1742 = vmatprep.subr.mxu0 %v16552_v34  ;;  %v16557_v34 = vand.u32 4294901760, %v11550_v6 }
 0x129   :  { %10088 = vmatprep.subr.msk.mxu1 %vm11458_vm14, %v16385_v17  ;;  %1745 = vmatpush2.msra.mxu0 %v16418_v30 }
 0x12a   :  { %1910 = vmatpush2.msra.mxu1 %v16418_v30  ;;  %1748 = vmatprep.subr.mxu0 %v16554_v38  ;;  %v16559_v38 = vld [vmem:[#allocation144_spill] sm:$0xff] }
 0x12b   :  { %10089 = vmatprep.subr.msk.mxu1 %vm11482_vm13, %v16385_v17  ;;  %1751 = vmatpush2.msra.mxu0 %v16418_v30 }
 0x12c   :  { %1914 = vmatpush2.msra.mxu1 %v16418_v30  ;;  %1754 = vmatprep.subr.mxu0 %v16556_v29  ;;  %v16561_v29 = vld [vmem:[#allocation151_spill] sm:$0xff] }
 0x12d   :  { %1922 = vmatmul.mubr.f32.vlgmr.msra.gmra.mxu1 %v16557_v34  ;;  %10090 = vmatprep.subr.msk.mxu1 %vm10697_vm1, %v16385_v17  ;;  %v16560_v34 = vld [vmem:[#allocation148_spill] sm:$0xff] }
 0x12e   :  { %1757 = vmatpush2.msra.mxu0 %v16418_v30  ;;  %2196 = vmatpush1.msra.mxu1 %v16418_v30 }
 0x12f   :  { %2322 = vmatprep.mubr.f32.mxu1 %v11552_v21  ;;  %1760 = vmatprep.subr.mxu0 %v16559_v38  ;;  %v16590_v38 = vld [vmem:[#allocation6_spill] sm:$0xff] }
 0x130   :  { %10091 = vmatprep.subr.msk.mxu1 %vm10734_vm2, %v16385_v17  ;;  %1763 = vmatpush2.msra.mxu0 %v16418_v30 }
 0x131   :  { %2200 = vmatpush1.msra.mxu1 %v16418_v30  ;;  %1766 = vmatprep.subr.mxu0 %v16560_v34  ;;  %v16562_v34 = vld [vmem:[#allocation14_spill] sm:$0xff] }
 0x132   :  { %2202 = vmatprep.subr.mxu1 %v16418_v30  ;;  %1769 = vmatpush2.msra.mxu0 %v16418_v30 }
 0x133   :  { %10092 = vmatpush1.msk.msra.mxu1 %vm10756_vm3, %v16385_v17  ;;  %1772 = vmatprep.subr.mxu0 %v16561_v29  ;;  %v16563_v29 = vld [vmem:[#allocation26_spill] sm:$0xff] }
 0x134   :  { %2206 = vmatprep.subr.mxu1 %v16418_v30  ;;  %1775 = vmatpush2.msra.mxu0 %v16418_v30 }
 0x135   :  { %10093 = vmatpush1.msk.msra.mxu1 %vm10768_vm4, %v16385_v17  ;;  %1781 = vmatmul.mubr.f32.vlgmr.msra.gmra.mxu0 %v11550_v6  ;;  %v16564_v6 = vld [vmem:[#allocation33_spill] sm:$0xff] }
 0x136   :  { %1931 = vmatprep.subr.mxu0 %v16562_v34  ;;  %2210 = vmatprep.subr.mxu1 %v16418_v30 }
 0x137   :  { %1935 = vmatpush1.msra.mxu0 %v16418_v30  ;;  %2185 = vmatprep.mubr.f32.mxu0 %v11552_v21  ;;  %v16565_v21 = vld [vmem:[#allocation38_spill] sm:$0xff] }
 0x138   :  { %10094 = vmatpush1.msk.msra.mxu1 %vm10790_vm5, %v16385_v17  ;;  %1939 = vmatprep.subr.mxu0 %v16563_v29  ;;  %v16566_v29 = vld [vmem:[#allocation42_spill] sm:$0xff] }
 0x139   :  { %2214 = vmatprep.subr.mxu1 %v16418_v30  ;;  %1943 = vmatpush1.msra.mxu0 %v16418_v30 }
 0x13a   :  { %10095 = vmatpush1.msk.msra.mxu1 %vm10808_vm6, %v16385_v17  ;;  %1947 = vmatprep.subr.mxu0 %v16418_v30 }
 0x13b   :  { %2218 = vmatprep.subr.mxu1 %v16418_v30  ;;  %1951 = vmatpush1.msra.mxu0 %v16564_v6  ;;  %v16567_v6 = vld [vmem:[#allocation45_spill] sm:$0xff] }
 0x13c   :  { %10096 = vmatpush1.msk.msra.mxu1 %vm10831_vm7, %v16385_v17  ;;  %1955 = vmatprep.subr.mxu0 %v16418_v30  ;;  %vm16568_vm7 = vnez %v16360_v46 }
 0x13d   :  { %2222 = vmatprep.subr.mxu1 %v16418_v30  ;;  %1959 = vmatpush1.msra.mxu0 %v16565_v21  ;;  %v16569_v21 = vld [vmem:[#allocation49_spill] sm:$0xff] }
 0x13e   :  { %10097 = vmatpush1.msk.msra.mxu1 %vm10848_vm8, %v16385_v17  ;;  %1963 = vmatprep.subr.mxu0 %v16418_v30  ;;  %vm16570_vm8 = vnez %v16365_v10  ;;  %v16690_v10 = vld [vmem:[#allocation5_spill] sm:$0xff] }
 0x13f   :  { %2226 = vmatprep.subr.mxu1 %v16418_v30  ;;  %1967 = vmatpush1.msra.mxu0 %v16566_v29  ;;  %v16571_v29 = vld [vmem:[#allocation53_spill] sm:$0xff]  ;;  %v49_v46 = vadd.s32 248, %v16690_v10 }
 0x140   :  { %10098 = vmatpush1.msk.msra.mxu1 %vm10869_vm9, %v16385_v17  ;;  %1971 = vmatprep.subr.mxu0 %v16418_v30  ;;  %vm16600_vm9 = vnez %v16533_v0 }
 0x141   :  { %2230 = vmatprep.subr.mxu1 %v16418_v30  ;;  %1975 = vmatpush1.msra.mxu0 %v16567_v6  ;;  %v16572_v6 = vld [vmem:[#allocation57_spill] sm:$0xff]  ;;  %vm12188_vm2 = vcmp.eq.s32.totalorder %v12152_v28, %v49_v46 }
 0x142   :  { %10099 = vmatpush1.msk.msra.mxu1 %vm16568_vm7, %v16385_v17  ;;  %1979 = vmatprep.subr.mxu0 %v16418_v30  ;;  %vm16573_vm7 = vnez %v16377_v16 }
 0x143   :  { %2234 = vmatprep.subr.mxu1 %v16418_v30  ;;  %1983 = vmatpush1.msra.mxu0 %v16569_v21  ;;  %v16574_v21 = vld [vmem:[#allocation60_spill] sm:$0xff] }
 0x144   :  { %10100 = vmatpush1.msk.msra.mxu1 %vm16570_vm8, %v16385_v17  ;;  %1987 = vmatprep.subr.mxu0 %v16418_v30  ;;  %vm16575_vm8 = vnez %v16399_v49  ;;  %v16678_v49 = vld [vmem:[#allocation40_spill] sm:$0xff] }
 0x145   :  { %2238 = vmatprep.subr.mxu1 %v16418_v30  ;;  %1991 = vmatpush1.msra.mxu0 %v16571_v29  ;;  %v16576_v29 = vld [vmem:[#allocation63_spill] sm:$0xff] }
 0x146   :  { %10101 = vmatpush1.msk.msra.mxu1 %vm10933_vm12, %v16385_v17  ;;  %1995 = vmatprep.subr.mxu0 %v16418_v30  ;;  %vm16577_vm12 = vnez %v16404_v40 }
 0x147   :  { %2242 = vmatprep.subr.mxu1 %v16418_v30  ;;  %1999 = vmatpush1.msra.mxu0 %v16572_v6  ;;  %v16578_v6 = vld [vmem:[#allocation66_spill] sm:$0xff] }
 0x148   :  { %10102 = vmatpush1.msk.msra.mxu1 %vm16573_vm7, %v16385_v17  ;;  %2003 = vmatprep.subr.mxu0 %v16418_v30  ;;  %vm16579_vm7 = vnez %v16410_v11 }
 0x149   :  { %2246 = vmatprep.subr.mxu1 %v16418_v30  ;;  %2007 = vmatpush1.msra.mxu0 %v16574_v21  ;;  %v16584_v21 = vld [vmem:[#allocation7_spill] sm:$0xff] }
 0x14a   :  { %10103 = vmatpush1.msk.msra.mxu1 %vm16575_vm8, %v16385_v17  ;;  %2011 = vmatprep.subr.mxu0 %v16418_v30  ;;  %vm16580_vm8 = vnez %v16413_v3  ;;  %v11850_v34 = vadd.s32 16, %v16584_v21  ;;  %v16589_v21 = vld [vmem:[#allocation91_spill] sm:$0xff] }
 0x14b   :  { %2250 = vmatprep.subr.mxu1 %v16418_v30  ;;  %2015 = vmatpush1.msra.mxu0 %v16576_v29  ;;  %v16581_v29 = vld [vmem:[#allocation68_spill] sm:$0xff] }
 0x14c   :  { %10104 = vmatpush1.msk.msra.mxu1 %vm16577_vm12, %v16385_v17  ;;  %2019 = vmatprep.subr.mxu0 %v16418_v30  ;;  %vm16582_vm12 = vnez %v16421_v50  ;;  %v16674_v50 = vld [vmem:[#allocation150_spill] sm:$0xff]  ;;  %vm12117_vm4 = vcmp.eq.s32.totalorder %v11850_v34, %v16678_v49 }
 0x14d   :  { %2254 = vmatprep.subr.mxu1 %v16418_v30  ;;  %2023 = vmatpush1.msra.mxu0 %v16578_v6  ;;  %v16583_v6 = vld [vmem:[#allocation79_spill] sm:$0xff]  ;;  %v10001_v15 = vsel %vm12117_vm4, 1.0, %v16418_v30 }
 0x14e   :  { %10105 = vmatpush1.msk.msra.mxu1 %vm16579_vm7, %v16385_v17  ;;  %2027 = vmatprep.subr.mxu0 %v16418_v30  ;;  %vm11866_vm7 = vcmp.eq.s32.totalorder %v11850_v34, %v16590_v38  ;;  %v12179_v18 = vsub.f32 %v10001_v15, %v10001_v15 }
 0x14f   :  { %10106 = vmatprep.subr.msk.mxu1 %vm16580_vm8, %v16385_v17  ;;  %2031 = vmatpush1.msra.mxu0 %v16581_v29  ;;  %vm16585_vm8 = vnez %v16523_v4  ;;  %v16586_v29 = vld [vmem:[#allocation84_spill] sm:$0xff]  ;;  %v16592_v51 = vsel %vm11866_vm7, 4294967295, %v16591_v51  ;;  %v10013_v38 = vsel %vm11866_vm7, 1.0, %v16418_v30  ;;  %v16671_v4 = vmov 0 }
 0x150   :  { %2268 = vmatpush2.msra.mxu1 %v16418_v30  ;;  %2035 = vmatprep.subr.mxu0 %v16418_v30  ;;  %16593 = vst [vmem:[#allocation7_spill] sm:$0xff] %v16592_v51  ;;  %16697 = vst [vmem:[#allocation186_spill] sm:$0xff] %v12179_v18 }
 0x151   :  { %10107 = vmatprep.subr.msk.mxu1 %vm16582_vm12, %v16385_v17  ;;  %2039 = vmatpush1.msra.mxu0 %v16583_v6  ;;  %vm16587_vm12 = vnez %v16526_v41  ;;  %v16588_v6 = vld [vmem:[#allocation90_spill] sm:$0xff]  ;;  %v16670_v41 = vld [vmem:[#allocation36_spill] sm:$0xff] }
 0x152   :  { %2272 = vmatpush2.msra.mxu1 %v16418_v30  ;;  %2043 = vmatprep.subr.mxu0 %v16418_v30  ;;  %vm12098_vm5 = vcmp.eq.s32.totalorder %v11850_v34, %v16670_v41 }
 0x153   :  { %10108 = vmatprep.subr.msk.mxu1 %vm16585_vm8, %v16385_v17  ;;  %2047 = vmatpush1.msra.mxu0 %v16586_v29  ;;  %vm16594_vm8 = vnez %v16530_v44  ;;  %v955_v29 = vpop.f32.mrf.mxu0  ;;  %v16672_v4 = vsel %vm12098_vm5, 4294967295, %v16671_v4  ;;  %v10002_v16 = vsel %vm12098_vm5, 1.0, %v16418_v30 }
 0x154   :  { %2276 = vmatpush2.msra.mxu1 %v16418_v30  ;;  %2051 = vmatprep.subr.mxu0 %v16418_v30  ;;  %16673 = vst [vmem:[#allocation36_spill] sm:$0xff] %v16672_v4 }
 0x155   :  { %10109 = vmatprep.subr.msk.mxu1 %vm16587_vm12, %v16385_v17  ;;  %2055 = vmatpush1.msra.mxu0 %v16588_v6  ;;  %v16595_v6 = vld [vmem:[#allocation96_spill] sm:$0xff]  ;;  %vm11878_vm12 = vcmp.eq.s32.totalorder %v11850_v34, %v16596_v32 }
 0x156   :  { %2280 = vmatpush2.msra.mxu1 %v16418_v30  ;;  %2075 = vmatprep.subr.mxu0 %v16589_v21  ;;  %v16597_v21 = vmov 0  ;;  %v10012_v32 = vsel %vm11878_vm12, 1.0, %v16418_v30 }
 0x157   :  { %10110 = vmatprep.subr.msk.mxu1 %vm16594_vm8, %v16385_v17  ;;  %2079 = vmatpush2.msra.mxu0 %v16418_v30  ;;  %v16598_v21 = vsel %vm11878_vm12, 4294967295, %v16597_v21  ;;  %vm16602_vm8 = vnez %v16536_v33  ;;  %v11921_v13 = vsub.f32 %v10012_v32, %v10012_v32  ;;  %v16620_v32 = vld [vmem:[#allocation118_spill] sm:$0xff] }
 0x158   :  { %2284 = vmatpush2.msra.mxu1 %v16418_v30  ;;  %2083 = vmatprep.subr.mxu0 %v16595_v6  ;;  %16599 = vst [vmem:[#allocation6_spill] sm:$0xff] %v16598_v21  ;;  %v956_v6 = vadd.f32 %v955_v29, %v11545_v26  ;;  %v16607_v26 = vld [vmem:[#allocation107_spill] sm:$0xff]  ;;  %v11907_v29 = vsub.f32 %v10013_v38, %v10013_v38 }
 0x159   :  { %10111 = vmatprep.subr.msk.mxu1 %vm16600_vm9, %v16385_v17  ;;  %2087 = vmatpush2.msra.mxu0 %v16418_v30  ;;  %vm11901_vm9 = vcmp.eq.s32.totalorder %v11850_v34, %v16603_v45  ;;  %v16611_v45 = vmov 0  ;;  %16615 = vst [vmem:[#allocation158_spill] sm:$0xff] %v11921_v13 }
 0x15a   :  { %2288 = vmatpush2.msra.mxu1 %v16418_v30  ;;  %2091 = vmatprep.subr.mxu0 %v16601_v5  ;;  %v16605_v20 = vsel %vm11901_vm9, 4294967295, %v16604_v20  ;;  %16608 = vst [vmem:[#allocation12_spill] sm:$0xff] %v11907_v29  ;;  %v16610_v5 = vld [vmem:[#allocation13_spill] sm:$0xff]  ;;  %v10011_v38 = vsel %vm11901_vm9, 1.0, %v16418_v30 }
 0x15b   :  { %10112 = vmatprep.subr.msk.mxu1 %vm16602_vm8, %v16385_v17  ;;  %2095 = vmatpush2.msra.mxu0 %v16418_v30  ;;  %16606 = vst [vmem:[#allocation10_spill] sm:$0xff] %v16605_v20  ;;  %vm16609_vm8 = vnez %v16539_v47  ;;  %vm11915_vm6 = vcmp.eq.s32.totalorder %v11850_v34, %v16610_v5  ;;  %v16616_v5 = vld [vmem:[#allocation16_spill] sm:$0xff]  ;;  %v16665_v47 = vld [vmem:[#allocation147_spill] sm:$0xff] }
 0x15c   :  { %2292 = vmatpush2.msra.mxu1 %v16418_v30  ;;  %2099 = vmatprep.subr.mxu0 %v16607_v26  ;;  %v16612_v45 = vsel %vm11915_vm6, 4294967295, %v16611_v45  ;;  %v1044_v26 = vadd.f32 %v1043_v61, %v956_v6  ;;  %v10010_v61 = vsel %vm11915_vm6, 1.0, %v16418_v30  ;;  %v11948_v6 = vsub.f32 %v10011_v38, %v10011_v38 }
 0x15d   :  { %10113 = vmatprep.subr.msk.mxu1 %vm16609_vm8, %v16385_v17  ;;  %2103 = vmatpush2.msra.mxu0 %v16418_v30  ;;  %16613 = vst [vmem:[#allocation13_spill] sm:$0xff] %v16612_v45  ;;  %vm11932_vm8 = vcmp.eq.s32.totalorder %v11850_v34, %v16616_v5  ;;  %v16623_v5 = vld [vmem:[#allocation124_spill] sm:$0xff]  ;;  %v11970_v38 = vsub.f32 %v10010_v61, %v10010_v61 }
 0x15e   :  { %2296 = vmatpush2.msra.mxu1 %v16418_v30  ;;  %2107 = vmatprep.subr.mxu0 %v16614_v62  ;;  %v16618_v42 = vsel %vm11932_vm8, 4294967295, %v16617_v42  ;;  %v11939_v62 = vand.u32 4294901760, %v11907_v29  ;;  %16622 = vst [vmem:[#allocation160_spill] sm:$0xff] %v11948_v6  ;;  %v10009_v53 = vsel %vm11932_vm8, 1.0, %v16418_v30  ;;  %v11964_v54 = vand.u32 4294901760, %v1044_v26 }
 0x15f   :  { %10114 = vmatprep.subr.msk.mxu1 %vm16543_vm10, %v16385_v17  ;;  %2111 = vmatpush2.msra.mxu0 %v16418_v30  ;;  %16619 = vst [vmem:[#allocation16_spill] sm:$0xff] %v16618_v42  ;;  %vm11960_vm10 = vcmp.eq.s32.totalorder %v11850_v34, %v16625_v39  ;;  %16630 = vst [vmem:[#allocation163_spill] sm:$0xff] %v11970_v38  ;;  %v16635_v39 = vld [vmem:[#allocation129_spill] sm:$0xff]  ;;  %v11993_v61 = vand.u32 4294901760, %v11948_v6 }
 0x160   :  { %2300 = vmatpush2.msra.mxu1 %v16418_v30  ;;  %2115 = vmatprep.subr.mxu0 %v16620_v32  ;;  %16621 = vst [vmem:[#allocation159_spill] sm:$0xff] %v11939_v62  ;;  %v11953_v32 = vand.u32 4294901760, %v11921_v13  ;;  %v16627_v8 = vsel %vm11960_vm10, 4294967295, %v16626_v8  ;;  %16629 = vst [vmem:[#allocation162_spill] sm:$0xff] %v11964_v54  ;;  %v2484_v14 = vsub.f32 %v11907_v29, %v11939_v62  ;;  %v16764_v62 = vmov 0 }
 0x161   :  { %10115 = vmatprep.subr.msk.mxu1 %vm16546_vm11, %v16385_v17  ;;  %2119 = vmatpush2.msra.mxu0 %v16418_v30  ;;  %16628 = vst [vmem:[#allocation17_spill] sm:$0xff] %v16627_v8  ;;  %16640 = vst [vmem:[#allocation164_spill] sm:$0xff] %v11993_v61  ;;  %v12008_v12 = vsub.f32 %v1044_v26, %v11964_v54  ;;  %v2508_v63 = vsub.f32 %v11948_v6, %v11993_v61  ;;  %v16756_v61 = vld [vmem:[#allocation110_spill] sm:$0xff] }
 0x162   :  { %2304 = vmatpush2.msra.mxu1 %v16418_v30  ;;  %2123 = vmatprep.subr.mxu0 %v16623_v5  ;;  %16624 = vst [vmem:[#allocation161_spill] sm:$0xff] %v11953_v32  ;;  %v16631_v5 = vld [vmem:[#allocation19_spill] sm:$0xff]  ;;  %v2496_v31 = vsub.f32 %v11921_v13, %v11953_v32  ;;  %v12022_v58 = vand.u32 4294901760, %v2484_v14 }
 0x163   :  { %10116 = vmatprep.subr.msk.mxu1 %vm16549_vm15, %v16385_v17  ;;  %2127 = vmatpush2.msra.mxu0 %v16418_v30  ;;  %vm11974_vm11 = vcmp.eq.s32.totalorder %v11850_v34, %v16631_v5  ;;  %vm11984_vm15 = vcmp.eq.s32.totalorder %v11850_v34, %v16636_v56  ;;  %v11995_v5 = vsub.f32 %v10009_v53, %v10009_v53  ;;  %v16642_v56 = vld [vmem:[#allocation134_spill] sm:$0xff]  ;;  %v12015_v53 = vand.u32 4294901760, %v11970_v38 }
 0x164   :  { %v16633_v24 = vsel %vm11974_vm11, 4294967295, %v16632_v24  ;;  %2308 = vmatpush2.msra.mxu1 %v16418_v30  ;;  %2131 = vmatprep.subr.mxu0 %v16635_v39  ;;  %v16638_v43 = vsel %vm11984_vm15, 4294967295, %v16637_v43  ;;  %v10008_v39 = vsel %vm11960_vm10, 1.0, %v16418_v30  ;;  %v10007_v27 = vsel %vm11974_vm11, 1.0, %v16418_v30  ;;  %16645 = vst [vmem:[#allocation167_spill] sm:$0xff] %v12022_v58 }
 0x165   :  { %16634 = vst [vmem:[#allocation19_spill] sm:$0xff] %v16633_v24  ;;  %16639 = vst [vmem:[#allocation23_spill] sm:$0xff] %v16638_v43  ;;  %10117 = vmatprep.subr.msk.mxu1 %vm11431_vm0, %v16385_v17  ;;  %2135 = vmatpush2.msra.mxu0 %v16418_v30  ;;  %v12024_v26 = vsub.f32 %v10008_v39, %v10008_v39  ;;  %v12039_v14 = vand.u32 4294901760, %v11995_v5  ;;  %v12041_v39 = vsub.f32 %v10007_v27, %v10007_v27 }
 0x166   :  { %16641 = vst [vmem:[#allocation165_spill] sm:$0xff] %v11995_v5  ;;  %2312 = vmatpush2.msra.mxu1 %v16418_v30  ;;  %2139 = vmatprep.subr.mxu0 %v16642_v56  ;;  %16643 = vst [vmem:[#allocation166_spill] sm:$0xff] %v12015_v53  ;;  %v10006_v56 = vsel %vm11984_vm15, 1.0, %v16418_v30  ;;  %v2520_v27 = vsub.f32 %v11970_v38, %v12015_v53  ;;  %v12076_v33 = vand.u32 4294901760, %v2508_v63  ;;  %v16676_v11 = vand.u32 4294901760, %v12008_v12 }
 0x167   :  { %10118 = vmatprep.subr.msk.mxu1 %vm11458_vm14, %v16385_v17  ;;  %2143 = vmatpush2.msra.mxu0 %v16418_v30  ;;  %16646 = vst [vmem:[#allocation168_spill] sm:$0xff] %v12024_v26  ;;  %vm12028_vm14 = vcmp.eq.s32.totalorder %v11850_v34, %v16647_v57  ;;  %16651 = vst [vmem:[#allocation169_spill] sm:$0xff] %v12039_v14  ;;  %v16653_v57 = vld [vmem:[#allocation143_spill] sm:$0xff]  ;;  %v12047_v60 = vsub.f32 %v10006_v56, %v10006_v56  ;;  %v16660_v56 = vld [vmem:[#allocation32_spill] sm:$0xff] }
 0x168   :  { %2316 = vmatpush2.msra.mxu1 %v16418_v30  ;;  %2147 = vmatprep.subr.mxu0 %v16644_v7  ;;  %v16649_v37 = vsel %vm12028_vm14, 4294967295, %v16648_v37  ;;  %16652 = vst [vmem:[#allocation170_spill] sm:$0xff] %v12041_v39  ;;  %v12045_v7 = vand.u32 4294901760, %v2496_v31  ;;  %v10005_v31 = vsel %vm12028_vm14, 1.0, %v16418_v30  ;;  %vm12065_vm0 = vcmp.eq.s32.totalorder %v11850_v34, %v16660_v56  ;;  %16666 = vst [vmem:[#allocation174_spill] sm:$0xff] %v12076_v33 }
 0x169   :  { %16650 = vst [vmem:[#allocation25_spill] sm:$0xff] %v16649_v37  ;;  %10119 = vmatprep.subr.msk.mxu1 %vm11482_vm13, %v16385_v17  ;;  %2151 = vmatpush2.msra.mxu0 %v16418_v30  ;;  %16655 = vst [vmem:[#allocation172_spill] sm:$0xff] %v12047_v60  ;;  %vm12051_vm13 = vcmp.eq.s32.totalorder %v11850_v34, %v16656_v52  ;;  %v16661_v52 = vmov 0  ;;  %v2532_v0 = vsub.f32 %v11995_v5, %v12039_v14  ;;  %v12081_v56 = vand.u32 4294901760, %v12041_v39 }
 0x16a   :  { %2320 = vmatpush2.msra.mxu1 %v16418_v30  ;;  %2155 = vmatprep.subr.mxu0 %v16653_v57  ;;  %16654 = vst [vmem:[#allocation171_spill] sm:$0xff] %v12045_v7  ;;  %v16658_v22 = vsel %vm12051_vm13, 4294967295, %v16657_v22  ;;  %v16662_v52 = vsel %vm12065_vm0, 4294967295, %v16661_v52  ;;  %v12072_v57 = vand.u32 4294901760, %v12024_v26  ;;  %v10004_v44 = vsel %vm12051_vm13, 1.0, %v16418_v30 }
 0x16b   :  { %16659 = vst [vmem:[#allocation29_spill] sm:$0xff] %v16658_v22  ;;  %2324 = vmatmul.mubr.f32.vlgmr.msra.gmra.mxu1 %v11547_v19  ;;  %2480 = vmatprep.subr.mxu1 %v16418_v30  ;;  %16663 = vst [vmem:[#allocation32_spill] sm:$0xff] %v16662_v52  ;;  %v10003_v63 = vsel %vm12065_vm0, 1.0, %v16418_v30  ;;  %v12104_v3 = vand.u32 4294901760, %v2520_v27  ;;  %v12113_v40 = vsub.f32 %v10004_v44, %v10004_v44  ;;  %v16682_v27 = vld [vmem:[#allocation153_spill] sm:$0xff] }
 0x16c   :  { %2159 = vmatpush2.msra.mxu0 %v16418_v30  ;;  %2486 = vmatpush1.msra.mxu1 %v12022_v58  ;;  %16664 = vst [vmem:[#allocation173_spill] sm:$0xff] %v12072_v57  ;;  %16667 = vst [vmem:[#allocation175_spill] sm:$0xff] %v12081_v56  ;;  %v12089_v58 = vand.u32 4294901760, %v12047_v60  ;;  %v2544_v41 = vsub.f32 %v12024_v26, %v12072_v57  ;;  %v2556_v49 = vsub.f32 %v12041_v39, %v12081_v56  ;;  %v16743_v56 = vmov 0 }
 0x16d   :  { %2860 = vmatprep.mubr.f32.mxu1 %v11964_v54  ;;  %2163 = vmatprep.subr.mxu0 %v16665_v47  ;;  %v12091_v47 = vsub.f32 %v10005_v31, %v10005_v31  ;;  %16675 = vst [vmem:[#allocation178_spill] sm:$0xff] %v12104_v3  ;;  %v2461_v31 = vsub.f32 %v12008_v12, %v16676_v11  ;;  %16677 = vst [vmem:[#allocation179_spill] sm:$0xff] %v12113_v40  ;;  %v12123_v11 = vand.u32 4294901760, %v2532_v0  ;;  %v16686_v0 = vld [vmem:[#allocation73_spill] sm:$0xff]  ;;  %v16750_v57 = vmov 0 }
 0x16e   :  { %2492 = vmatprep.subr.mxu1 %v16418_v30  ;;  %2167 = vmatpush2.msra.mxu0 %v16418_v30  ;;  %16668 = vst [vmem:[#allocation176_spill] sm:$0xff] %v12089_v58  ;;  %v2568_v44 = vsub.f32 %v12047_v60, %v12089_v58  ;;  %vm12141_vm3 = vcmp.eq.s32.totalorder %v11850_v34, %v16686_v0  ;;  %v12156_v0 = vand.u32 4294901760, %v2544_v41 }
 0x16f   :  { %16669 = vst [vmem:[#allocation177_spill] sm:$0xff] %v12091_v47  ;;  %2498 = vmatpush1.msra.mxu1 %v12045_v7  ;;  %2171 = vmatprep.subr.mxu0 %v16674_v50  ;;  %v16679_v7 = vmov 0  ;;  %16683 = vst [vmem:[#allocation180_spill] sm:$0xff] %v12123_v11  ;;  %v12125_v50 = vsub.f32 %v10003_v63, %v10003_v63  ;;  %v16687_v63 = vmov 0  ;;  %v10000_v41 = vsel %vm12141_vm3, 1.0, %v16418_v30 }
 0x170   :  { %2504 = vmatprep.subr.mxu1 %v16418_v30  ;;  %2175 = vmatpush2.msra.mxu0 %v16418_v30  ;;  %v16680_v7 = vsel %vm12117_vm4, 4294967295, %v16679_v7  ;;  %v16688_v63 = vsel %vm12141_vm3, 4294967295, %v16687_v63  ;;  %16692 = vst [vmem:[#allocation5_spill] sm:$0xff] %v12156_v0  ;;  %v12199_v9 = vsub.f32 %v10000_v41, %v10000_v41 }
 0x171   :  { %16681 = vst [vmem:[#allocation40_spill] sm:$0xff] %v16680_v7  ;;  %2510 = vmatpush1.msra.mxu1 %v12076_v33  ;;  %2179 = vmatprep.subr.mxu0 %v16682_v27  ;;  %16684 = vst [vmem:[#allocation181_spill] sm:$0xff] %v12125_v50  ;;  %v12137_v27 = vand.u32 4294901760, %v12091_v47  ;;  %v2462_v33 = vand.u32 4294901760, %v2461_v31  ;;  %v48_v31 = vadd.s32 240, %v16690_v10  ;;  %v12168_v36 = vand.u32 4294901760, %v12125_v50 }
 0x172   :  { %2516 = vmatprep.subr.mxu1 %v16418_v30  ;;  %2183 = vmatpush2.msra.mxu0 %v16418_v30  ;;  %16689 = vst [vmem:[#allocation73_spill] sm:$0xff] %v16688_v63  ;;  %16703 = vst [vmem:[#allocation190_spill] sm:$0xff] %v12199_v9  ;;  %v12242_v48 = vand.u32 4294901760, %v12199_v9 }
 0x173   :  { %16685 = vst [vmem:[#allocation182_spill] sm:$0xff] %v12137_v27  ;;  %2522 = vmatpush1.msra.mxu1 %v12104_v3  ;;  %2187 = vmatmul.mubr.f32.vlgmr.msra.gmra.mxu0 %v11547_v19  ;;  %v12159_v3 = vand.u32 4294901760, %v12113_v40  ;;  %v12161_v19 = vsub.f32 %v10002_v16, %v10002_v16  ;;  %16695 = vst [vmem:[#allocation184_spill] sm:$0xff] %v12168_v36  ;;  %v12175_v16 = vand.u32 4294901760, %v2556_v49 }
 0x174   :  { %2331 = vmatprep.subr.mxu0 %v16418_v30  ;;  %2528 = vmatprep.subr.mxu1 %v16418_v30  ;;  %v2580_v10 = vsub.f32 %v12091_v47, %v12137_v27  ;;  %vm12202_vm1 = vcmp.eq.s32.totalorder %v12152_v28, %v48_v31  ;;  %v2604_v46 = vsub.f32 %v12125_v50, %v12168_v36  ;;  %v12217_v31 = vand.u32 4294901760, %v12179_v18 }
 0x175   :  { %16693 = vst [vmem:[#allocation8_spill] sm:$0xff] %v12159_v3  ;;  %16694 = vst [vmem:[#allocation183_spill] sm:$0xff] %v12161_v19  ;;  %10120 = vmatpush1.msk.msra.mxu0 %vm11866_vm7, %v16385_v17  ;;  %2463 = vmatprep.mubr.f32.mxu0 %v2462_v33  ;;  %v12185_v33 = vand.u32 4294901760, %v2568_v44  ;;  %v2592_v15 = vsub.f32 %v12113_v40, %v12159_v3  ;;  %v12197_v49 = vand.u32 4294901760, %v12161_v19  ;;  %v16704_v44 = vmov 0 }
 0x176   :  { %2534 = vmatpush1.msra.mxu1 %v12123_v11  ;;  %2335 = vmatprep.subr.mxu0 %v16418_v30  ;;  %16696 = vst [vmem:[#allocation185_spill] sm:$0xff] %v12175_v16  ;;  %v16699_v11 = vmov 0  ;;  %v16705_v44 = vsel %vm12202_vm1, 4294967295, %v16704_v44  ;;  %v12214_v41 = vand.u32 4294901760, %v2580_v10  ;;  %16708 = vst [vmem:[#allocation193_spill] sm:$0xff] %v12217_v31  ;;  %v16710_v10 = vmov 0 }
 0x177   :  { %2540 = vmatprep.subr.mxu1 %v16418_v30  ;;  %10121 = vmatpush1.msk.msra.mxu0 %vm11878_vm12, %v16385_v17  ;;  %16698 = vst [vmem:[#allocation187_spill] sm:$0xff] %v12185_v33  ;;  %v16700_v11 = vsel %vm12188_vm2, 4294967295, %v16699_v11  ;;  %16702 = vst [vmem:[#allocation189_spill] sm:$0xff] %v12197_v49  ;;  %v12237_v59 = vand.u32 4294901760, %v2592_v15  ;;  %v2616_v55 = vsub.f32 %v12161_v19, %v12197_v49  ;;  %v16718_v15 = vmov 0 }
 0x178   :  { %16701 = vst [vmem:[#allocation188_spill] sm:$0xff] %v16700_v11  ;;  %2546 = vmatpush1.msra.mxu1 %v12156_v0  ;;  %2339 = vmatprep.subr.mxu0 %v16418_v30  ;;  %16706 = vst [vmem:[#allocation191_spill] sm:$0xff] %v16705_v44  ;;  %v10029_v0 = vsel %vm12188_vm2, 1.0, %v16418_v30  ;;  %v2628_v25 = vsub.f32 %v12179_v18, %v12217_v31  ;;  %v16730_v49 = vmov 0  ;;  %v16737_v27 = vmov 0 }
 0x179   :  { %2552 = vmatprep.subr.mxu1 %v16418_v30  ;;  %10122 = vmatpush1.msk.msra.mxu0 %vm11901_vm9, %v16385_v17  ;;  %16707 = vst [vmem:[#allocation192_spill] sm:$0xff] %v12214_v41  ;;  %vm12231_vm9 = vcmp.eq.s32.totalorder %v12152_v28, %v16709_v1  ;;  %16713 = vst [vmem:[#allocation194_spill] sm:$0xff] %v12237_v59  ;;  %v12248_v1 = vand.u32 4294901760, %v2604_v46  ;;  %v12250_v35 = vsub.f32 %v10029_v0, %v10029_v0  ;;  %v16722_v46 = vld [vmem:[#allocation83_spill] sm:$0xff] }
 0x17a   :  { %2558 = vmatpush1.msra.mxu1 %v12175_v16  ;;  %2343 = vmatprep.subr.mxu0 %v16418_v30  ;;  %v10028_v16 = vsel %vm12202_vm1, 1.0, %v16418_v30  ;;  %v16711_v10 = vsel %vm12231_vm9, 4294967295, %v16710_v10  ;;  %16714 = vst [vmem:[#allocation195_spill] sm:$0xff] %v12242_v48  ;;  %v10027_v0 = vsel %vm12231_vm9, 1.0, %v16418_v30  ;;  %v12306_v36 = vand.u32 4294901760, %v2628_v25 }
 0x17b   :  { %2564 = vmatprep.subr.mxu1 %v16418_v30  ;;  %10123 = vmatpush1.msk.msra.mxu0 %vm11915_vm6, %v16385_v17  ;;  %16712 = vst [vmem:[#allocation75_spill] sm:$0xff] %v16711_v10  ;;  %16715 = vst [vmem:[#allocation196_spill] sm:$0xff] %v12248_v1  ;;  %v12262_v2 = vsub.f32 %v10028_v16, %v10028_v16  ;;  %v12279_v16 = vand.u32 4294901760, %v2616_v55  ;;  %v12291_v31 = vand.u32 4294901760, %v12250_v35 }
 0x17c   :  { %2570 = vmatpush1.msra.mxu1 %v12185_v33  ;;  %2347 = vmatprep.subr.mxu0 %v16418_v30  ;;  %16716 = vst [vmem:[#allocation197_spill] sm:$0xff] %v12250_v35  ;;  %v16717_v33 = vld [vmem:[#allocation78_spill] sm:$0xff]  ;;  %16733 = vst [vmem:[#allocation202_spill] sm:$0xff] %v12306_v36 }
 0x17d   :  { %2576 = vmatprep.subr.mxu1 %v16418_v30  ;;  %10124 = vmatpush1.msk.msra.mxu0 %vm11932_vm8, %v16385_v17  ;;  %vm12254_vm6 = vcmp.eq.s32.totalorder %v12152_v28, %v16717_v33  ;;  %16721 = vst [vmem:[#allocation198_spill] sm:$0xff] %v12262_v2  ;;  %vm12269_vm8 = vcmp.eq.s32.totalorder %v12152_v28, %v16722_v46  ;;  %v16723_v33 = vmov 0  ;;  %16726 = vst [vmem:[#allocation199_spill] sm:$0xff] %v12279_v16  ;;  %v12309_v3 = vand.u32 4294901760, %v12262_v2 }
 0x17e   :  { %v16719_v15 = vsel %vm12254_vm6, 4294967295, %v16718_v15  ;;  %2582 = vmatpush1.msra.mxu1 %v12214_v41  ;;  %2351 = vmatprep.subr.mxu0 %v16418_v30  ;;  %v16724_v33 = vsel %vm12269_vm8, 4294967295, %v16723_v33  ;;  %v2640_v41 = vsub.f32 %v12199_v9, %v12242_v48  ;;  %v10026_v46 = vsel %vm12254_vm6, 1.0, %v16418_v30  ;;  %16727 = vst [vmem:[#allocation200_spill] sm:$0xff] %v12291_v31  ;;  %v16729_v48 = vld [vmem:[#allocation88_spill] sm:$0xff] }
 0x17f   :  { %16720 = vst [vmem:[#allocation78_spill] sm:$0xff] %v16719_v15  ;;  %16725 = vst [vmem:[#allocation83_spill] sm:$0xff] %v16724_v33  ;;  %2588 = vmatprep.subr.mxu1 %v16418_v30  ;;  %10125 = vmatpush1.msk.msra.mxu0 %vm11960_vm10, %v16385_v17  ;;  %v10025_v55 = vsel %vm12269_vm8, 1.0, %v16418_v30  ;;  %vm12300_vm10 = vcmp.eq.s32.totalorder %v12152_v28, %v16729_v48  ;;  %v16736_v48 = vld [vmem:[#allocation95_spill] sm:$0xff] }
 0x180   :  { %2594 = vmatpush1.msra.mxu1 %v12237_v59  ;;  %2355 = vmatprep.subr.mxu0 %v16418_v30  ;;  %v12293_v59 = vsub.f32 %v10027_v0, %v10027_v0  ;;  %v16731_v49 = vsel %vm12300_vm10, 4294967295, %v16730_v49  ;;  %16734 = vst [vmem:[#allocation203_spill] sm:$0xff] %v12309_v3  ;;  %v12315_v0 = vsub.f32 %v10026_v46, %v10026_v46  ;;  %v12325_v25 = vand.u32 4294901760, %v2640_v41  ;;  %v16742_v46 = vld [vmem:[#allocation100_spill] sm:$0xff] }
 0x181   :  { %2600 = vmatprep.subr.mxu1 %v16418_v30  ;;  %10126 = vmatpush1.msk.msra.mxu0 %vm11974_vm11, %v16385_v17  ;;  %16732 = vst [vmem:[#allocation88_spill] sm:$0xff] %v16731_v49  ;;  %vm12319_vm11 = vcmp.eq.s32.totalorder %v12152_v28, %v16736_v48  ;;  %v10024_v58 = vsel %vm12300_vm10, 1.0, %v16418_v30  ;;  %v2670_v41 = vsub.f32 %v12250_v35, %v12291_v31  ;;  %v16778_v35 = vmov 0 }
 0x182   :  { %16728 = vst [vmem:[#allocation201_spill] sm:$0xff] %v12293_v59  ;;  %2606 = vmatpush1.msra.mxu1 %v12248_v1  ;;  %2359 = vmatprep.subr.mxu0 %v16418_v30  ;;  %16735 = vst [vmem:[#allocation204_spill] sm:$0xff] %v12315_v0  ;;  %v16738_v27 = vsel %vm12319_vm11, 4294967295, %v16737_v27  ;;  %v12327_v1 = vsub.f32 %v10025_v55, %v10025_v55  ;;  %v12345_v55 = vand.u32 4294901760, %v12293_v59 }
 0x183   :  { %2612 = vmatprep.subr.mxu1 %v16418_v30  ;;  %10127 = vmatpush1.msk.msra.mxu0 %vm11984_vm15, %v16385_v17  ;;  %16739 = vst [vmem:[#allocation95_spill] sm:$0xff] %v16738_v27  ;;  %16740 = vst [vmem:[#allocation205_spill] sm:$0xff] %v12325_v25  ;;  %vm12334_vm15 = vcmp.eq.s32.totalorder %v12152_v28, %v16742_v46  ;;  %v2682_v48 = vsub.f32 %v12262_v2, %v12309_v3  ;;  %v10023_v46 = vsel %vm12319_vm11, 1.0, %v16418_v30  ;;  %v16749_v3 = vld [vmem:[#allocation105_spill] sm:$0xff]  ;;  %v16777_v2 = vld [vmem:[#allocation122_spill] sm:$0xff] }
 0x184   :  { %2618 = vmatpush1.msra.mxu1 %v12279_v16  ;;  %2363 = vmatprep.subr.mxu0 %v16418_v30  ;;  %16741 = vst [vmem:[#allocation206_spill] sm:$0xff] %v12327_v1  ;;  %v16744_v56 = vsel %vm12334_vm15, 4294967295, %v16743_v56  ;;  %16746 = vst [vmem:[#allocation207_spill] sm:$0xff] %v12345_v55  ;;  %v12359_v16 = vand.u32 4294901760, %v12315_v0  ;;  %v12361_v31 = vsub.f32 %v10024_v58, %v10024_v58  ;;  %v12375_v14 = vand.u32 4294901760, %v12327_v1 }
 0x185   :  { %16745 = vst [vmem:[#allocation100_spill] sm:$0xff] %v16744_v56  ;;  %2624 = vmatprep.subr.mxu1 %v16418_v30  ;;  %10128 = vmatpush1.msk.msra.mxu0 %vm12028_vm14, %v16385_v17  ;;  %vm12368_vm14 = vcmp.eq.s32.totalorder %v12152_v28, %v16749_v3  ;;  %v12381_v58 = vand.u32 4294901760, %v2670_v41  ;;  %v2694_v3 = vsub.f32 %v12293_v59, %v12345_v55  ;;  %v16770_v59 = vld [vmem:[#allocation117_spill] sm:$0xff] }
 0x186   :  { %2630 = vmatpush1.msra.mxu1 %v12306_v36  ;;  %2367 = vmatprep.subr.mxu0 %v16418_v30  ;;  %16747 = vst [vmem:[#allocation208_spill] sm:$0xff] %v12359_v16  ;;  %16748 = vst [vmem:[#allocation209_spill] sm:$0xff] %v12361_v31  ;;  %v10022_v36 = vsel %vm12334_vm15, 1.0, %v16418_v30  ;;  %v16751_v57 = vsel %vm12368_vm14, 4294967295, %v16750_v57  ;;  %v12385_v53 = vsub.f32 %v10023_v46, %v10023_v46  ;;  %v10021_v41 = vsel %vm12368_vm14, 1.0, %v16418_v30 }
 0x187   :  { %2636 = vmatprep.subr.mxu1 %v16418_v30  ;;  %10129 = vmatpush1.msk.msra.mxu0 %vm12051_vm13, %v16385_v17  ;;  %16752 = vst [vmem:[#allocation105_spill] sm:$0xff] %v16751_v57  ;;  %16753 = vst [vmem:[#allocation210_spill] sm:$0xff] %v12375_v14  ;;  %vm12389_vm13 = vcmp.eq.s32.totalorder %v12152_v28, %v16756_v61  ;;  %v12395_v32 = vsub.f32 %v10022_v36, %v10022_v36  ;;  %v12404_v61 = vand.u32 4294901760, %v2682_v48  ;;  %v16763_v36 = vld [vmem:[#allocation112_spill] sm:$0xff] }
 0x188   :  { %2642 = vmatpush1.msra.mxu1 %v12325_v25  ;;  %2371 = vmatprep.subr.mxu0 %v16418_v30  ;;  %16754 = vst [vmem:[#allocation211_spill] sm:$0xff] %v12381_v58  ;;  %16755 = vst [vmem:[#allocation212_spill] sm:$0xff] %v12385_v53  ;;  %v16757_v25 = vmov 0  ;;  %v2706_v46 = vsub.f32 %v12315_v0, %v12359_v16  ;;  %v12409_v55 = vand.u32 4294901760, %v12361_v31  ;;  %v2718_v48 = vsub.f32 %v12327_v1, %v12375_v14 }
 0x189   :  { %2648 = vmatprep.subr.mxu1 %v16418_v30  ;;  %10130 = vmatpush1.msk.msra.mxu0 %vm12065_vm0, %v16385_v17  ;;  %v16758_v25 = vsel %vm12389_vm13, 4294967295, %v16757_v25  ;;  %16760 = vst [vmem:[#allocation213_spill] sm:$0xff] %v12395_v32  ;;  %16761 = vst [vmem:[#allocation214_spill] sm:$0xff] %v12404_v61  ;;  %vm12413_vm0 = vcmp.eq.s32.totalorder %v12152_v28, %v16763_v36  ;;  %v10020_v16 = vsel %vm12389_vm13, 1.0, %v16418_v30  ;;  %v12428_v36 = vand.u32 4294901760, %v2694_v3 }
 0x18a   :  { %16759 = vst [vmem:[#allocation110_spill] sm:$0xff] %v16758_v25  ;;  %2654 = vmatpush1.msra.mxu1 %v16418_v30  ;;  %2375 = vmatprep.subr.mxu0 %v16418_v30  ;;  %16762 = vst [vmem:[#allocation215_spill] sm:$0xff] %v12409_v55  ;;  %v16765_v62 = vsel %vm12413_vm0, 4294967295, %v16764_v62  ;;  %v12431_v54 = vand.u32 4294901760, %v12385_v53  ;;  %v12433_v0 = vsub.f32 %v10021_v41, %v10021_v41  ;;  %v16771_v14 = vmov 0 }
 0x18b   :  { %2660 = vmatprep.subr.mxu1 %v16418_v30  ;;  %10131 = vmatpush1.msk.msra.mxu0 %vm12098_vm5, %v16385_v17  ;;  %16766 = vst [vmem:[#allocation112_spill] sm:$0xff] %v16765_v62  ;;  %16767 = vst [vmem:[#allocation216_spill] sm:$0xff] %v12428_v36  ;;  %vm12437_vm5 = vcmp.eq.s32.totalorder %v12152_v28, %v16770_v59  ;;  %v10019_v3 = vsel %vm12413_vm0, 1.0, %v16418_v30  ;;  %v12453_v59 = vand.u32 4294901760, %v2706_v46 }
 0x18c   :  { %2666 = vmatpush1.msra.mxu1 %v16418_v30  ;;  %2379 = vmatprep.subr.mxu0 %v16418_v30  ;;  %16768 = vst [vmem:[#allocation217_spill] sm:$0xff] %v12431_v54  ;;  %16769 = vst [vmem:[#allocation218_spill] sm:$0xff] %v12433_v0  ;;  %v16772_v14 = vsel %vm12437_vm5, 4294967295, %v16771_v14  ;;  %v2730_v41 = vsub.f32 %v12361_v31, %v12409_v55  ;;  %v12457_v1 = vsub.f32 %v10020_v16, %v10020_v16  ;;  %v16784_v31 = vld [vmem:[#allocation127_spill] sm:$0xff] }
 0x18d   :  { %2672 = vmatprep.subr.mxu1 %v12381_v58  ;;  %10132 = vmatpush1.msk.msra.mxu0 %vm12117_vm4, %v16385_v17  ;;  %16773 = vst [vmem:[#allocation117_spill] sm:$0xff] %v16772_v14  ;;  %v12444_v58 = vand.u32 4294901760, %v12395_v32  ;;  %16775 = vst [vmem:[#allocation220_spill] sm:$0xff] %v12453_v59  ;;  %vm12461_vm4 = vcmp.eq.s32.totalorder %v12152_v28, %v16777_v2  ;;  %v10018_v46 = vsel %vm12437_vm5, 1.0, %v16418_v30  ;;  %v12477_v16 = vand.u32 4294901760, %v12433_v0 }
 0x18e   :  { %2678 = vmatpush2.msra.mxu1 %v16418_v30  ;;  %2383 = vmatprep.subr.mxu0 %v16418_v30  ;;  %16776 = vst [vmem:[#allocation221_spill] sm:$0xff] %v12457_v1  ;;  %v16779_v35 = vsel %vm12461_vm4, 4294967295, %v16778_v35  ;;  %v2742_v2 = vsub.f32 %v12385_v53, %v12431_v54  ;;  %v12479_v55 = vsub.f32 %v10019_v3, %v10019_v3  ;;  %v10017_v54 = vsel %vm12461_vm4, 1.0, %v16418_v30 }
 0x18f   :  { %16774 = vst [vmem:[#allocation219_spill] sm:$0xff] %v12444_v58  ;;  %2684 = vmatprep.subr.mxu1 %v12404_v61  ;;  %10133 = vmatpush1.msk.msra.mxu0 %vm12141_vm3, %v16385_v17  ;;  %16780 = vst [vmem:[#allocation122_spill] sm:$0xff] %v16779_v35  ;;  %v12467_v61 = vand.u32 4294901760, %v2718_v48  ;;  %vm12483_vm3 = vcmp.eq.s32.totalorder %v12152_v28, %v16784_v31  ;;  %v16785_v48 = vmov 0  ;;  %v12496_v3 = vand.u32 4294901760, %v2730_v41 }
 0x190   :  { %2690 = vmatpush2.msra.mxu1 %v16418_v30  ;;  %2387 = vmatprep.subr.mxu0 %v16418_v30  ;;  %16782 = vst [vmem:[#allocation223_spill] sm:$0xff] %v12477_v16  ;;  %16783 = vst [vmem:[#allocation224_spill] sm:$0xff] %v12479_v55  ;;  %v16786_v48 = vsel %vm12483_vm3, 4294967295, %v16785_v48  ;;  %v12499_v28 = vand.u32 4294901760, %v12457_v1  ;;  %v12501_v31 = vsub.f32 %v10018_v46, %v10018_v46  ;;  %v16792_v41 = vmov 0 }
 0x191   :  { %16781 = vst [vmem:[#allocation222_spill] sm:$0xff] %v12467_v61  ;;  %2696 = vmatprep.subr.mxu1 %v12428_v36  ;;  %2389 = vmatpush1.msra.mxu0 %v16418_v30  ;;  %16787 = vst [vmem:[#allocation127_spill] sm:$0xff] %v16786_v48  ;;  %v2754_v36 = vsub.f32 %v12395_v32, %v12444_v58  ;;  %v10016_v58 = vsel %vm12483_vm3, 1.0, %v16418_v30  ;;  %v12518_v46 = vand.u32 4294901760, %v2742_v2  ;;  %v12523_v53 = vand.u32 4294901760, %v12479_v55 }
 0x192   :  { %2702 = vmatpush2.msra.mxu1 %v16418_v30  ;;  %2391 = vmatprep.subr.mxu0 %v16418_v30  ;;  %16788 = vst [vmem:[#allocation225_spill] sm:$0xff] %v12496_v3  ;;  %16789 = vst [vmem:[#allocation226_spill] sm:$0xff] %v12499_v28  ;;  %v2766_v32 = vsub.f32 %v12433_v0, %v12477_v16  ;;  %v12525_v9 = vsub.f32 %v10017_v54, %v10017_v54  ;;  %v16800_v2 = vmov 0  ;;  %v12544_v16 = vand.u32 4294901760, %v12501_v31 }
 0x193   :  { %2708 = vmatprep.subr.mxu1 %v12453_v59  ;;  %2393 = vmatpush1.msra.mxu0 %v16418_v30  ;;  %16790 = vst [vmem:[#allocation227_spill] sm:$0xff] %v12501_v31  ;;  %v16791_v59 = vld [vmem:[#allocation132_spill] sm:$0xff]  ;;  %16795 = vst [vmem:[#allocation228_spill] sm:$0xff] %v12518_v46  ;;  %v2778_v54 = vsub.f32 %v12457_v1, %v12499_v28  ;;  %v12546_v0 = vsub.f32 %v10016_v58, %v10016_v58 }
 0x194   :  { %2714 = vmatpush2.msra.mxu1 %v16418_v30  ;;  %10134 = vmatprep.subr.msk.mxu0 %vm12188_vm2, %v16385_v17  ;;  %vm12512_vm12 = vcmp.eq.s32.totalorder %v11850_v34, %v16791_v59  ;;  %16796 = vst [vmem:[#allocation229_spill] sm:$0xff] %v12523_v53  ;;  %16797 = vst [vmem:[#allocation230_spill] sm:$0xff] %v12525_v9  ;;  %v12531_v59 = vand.u32 4294901760, %v2754_v36  ;;  %v2790_v58 = vsub.f32 %v12479_v55, %v12523_v53 }
 0x195   :  { %v16793_v41 = vsel %vm12512_vm12, 4294967295, %v16792_v41  ;;  %2720 = vmatprep.subr.mxu1 %v12467_v61  ;;  %2397 = vmatpush2.msra.mxu0 %v16418_v30  ;;  %v16799_v61 = vld [vmem:[#allocation137_spill] sm:$0xff]  ;;  %16803 = vst [vmem:[#allocation232_spill] sm:$0xff] %v12544_v16  ;;  %16804 = vst [vmem:[#allocation233_spill] sm:$0xff] %v12546_v0  ;;  %v10015_v36 = vsel %vm12512_vm12, 1.0, %v16418_v30  ;;  %v2802_v53 = vsub.f32 %v12501_v31, %v12544_v16  ;;  %v12580_v28 = vand.u32 4294901760, %v12546_v0 }
 0x196   :  { %16794 = vst [vmem:[#allocation132_spill] sm:$0xff] %v16793_v41  ;;  %2726 = vmatpush2.msra.mxu1 %v16418_v30  ;;  %10135 = vmatprep.subr.msk.mxu0 %vm12202_vm1, %v16385_v17  ;;  %16798 = vst [vmem:[#allocation231_spill] sm:$0xff] %v12531_v59  ;;  %vm12535_vm2 = vcmp.eq.s32.totalorder %v11850_v34, %v16799_v61  ;;  %v12557_v34 = vand.u32 4294901760, %v2766_v32  ;;  %v12562_v61 = vand.u32 4294901760, %v12525_v9  ;;  %v12575_v32 = vand.u32 4294901760, %v2778_v54 }
 0x197   :  { %v16801_v2 = vsel %vm12535_vm2, 4294967295, %v16800_v2  ;;  %2732 = vmatprep.subr.mxu1 %v12496_v3  ;;  %2401 = vmatpush2.msra.mxu0 %v16418_v30  ;;  %v10014_v3 = vsel %vm12535_vm2, 1.0, %v16418_v30  ;;  %16809 = vst [vmem:[#allocation238_spill] sm:$0xff] %v12580_v28  ;;  %v12590_v54 = vand.u32 4294901760, %v2790_v58  ;;  %v2826_v58 = vsub.f32 %v12546_v0, %v12580_v28 }
 0x198   :  { %16802 = vst [vmem:[#allocation137_spill] sm:$0xff] %v16801_v2  ;;  %2738 = vmatpush2.msra.mxu1 %v16418_v30  ;;  %10136 = vmatprep.subr.msk.mxu0 %vm12231_vm9, %v16385_v17  ;;  %16805 = vst [vmem:[#allocation234_spill] sm:$0xff] %v12557_v34  ;;  %v12625_v28 = vand.u32 4294901760, %v11562_v23 }
 0x199   :  { %2744 = vmatprep.subr.mxu1 %v12518_v46  ;;  %2405 = vmatpush2.msra.mxu0 %v16418_v30  ;;  %16806 = vst [vmem:[#allocation235_spill] sm:$0xff] %v12562_v61  ;;  %v12571_v46 = vsub.f32 %v10015_v36, %v10015_v36  ;;  %16808 = vst [vmem:[#allocation237_spill] sm:$0xff] %v12575_v32  ;;  %v12586_v36 = vsub.f32 %v10014_v3, %v10014_v3  ;;  %v12603_v3 = vand.u32 4294901760, %v2802_v53 }
 0x19a   :  { %2750 = vmatpush2.msra.mxu1 %v16418_v30  ;;  %10137 = vmatprep.subr.msk.mxu0 %vm12254_vm6, %v16385_v17  ;;  %16811 = vst [vmem:[#allocation240_spill] sm:$0xff] %v12590_v54 }
 0x19b   :  { %16807 = vst [vmem:[#allocation236_spill] sm:$0xff] %v12571_v46  ;;  %2756 = vmatprep.subr.mxu1 %v12531_v59  ;;  %2409 = vmatpush2.msra.mxu0 %v16418_v30  ;;  %16810 = vst [vmem:[#allocation239_spill] sm:$0xff] %v12586_v36  ;;  %v2814_v59 = vsub.f32 %v12525_v9, %v12562_v61  ;;  %v12599_v16 = vand.u32 4294901760, %v12571_v46 }
 0x19c   :  { %2762 = vmatpush2.msra.mxu1 %v16418_v30  ;;  %10138 = vmatprep.subr.msk.mxu0 %vm12269_vm8, %v16385_v17  ;;  %16813 = vst [vmem:[#allocation242_spill] sm:$0xff] %v12603_v3 }
 0x19d   :  { %2768 = vmatprep.subr.mxu1 %v12557_v34  ;;  %2413 = vmatpush2.msra.mxu0 %v16418_v30  ;;  %16812 = vst [vmem:[#allocation241_spill] sm:$0xff] %v12599_v16  ;;  %v12612_v34 = vand.u32 4294901760, %v12586_v36  ;;  %v2844_v53 = vsub.f32 %v12571_v46, %v12599_v16 }
 0x19e   :  { %2774 = vmatpush2.msra.mxu1 %v16418_v30  ;;  %10139 = vmatprep.subr.msk.mxu0 %vm12300_vm10, %v16385_v17 }
 0x19f   :  { %2780 = vmatprep.subr.mxu1 %v12575_v32  ;;  %2417 = vmatpush2.msra.mxu0 %v16418_v30  ;;  %16814 = vst [vmem:[#allocation243_spill] sm:$0xff] %v12612_v34  ;;  %v12616_v32 = vand.u32 4294901760, %v2814_v59  ;;  %v2856_v59 = vsub.f32 %v12586_v36, %v12612_v34 }
 0x1a0   :  { %2786 = vmatpush2.msra.mxu1 %v16418_v30  ;;  %10140 = vmatprep.subr.msk.mxu0 %vm12319_vm11, %v16385_v17 }
 0x1a1   :  { %2792 = vmatprep.subr.mxu1 %v12590_v54  ;;  %2421 = vmatpush2.msra.mxu0 %v16418_v30  ;;  %16815 = vst [vmem:[#allocation244_spill] sm:$0xff] %v12616_v32  ;;  %v12629_v54 = vand.u32 4294901760, %v2826_v58  ;;  %v12643_v58 = vand.u32 4294901760, %v2844_v53 }
 0x1a2   :  { %2798 = vmatpush2.msra.mxu1 %v16418_v30  ;;  %10141 = vmatprep.subr.msk.mxu0 %vm12334_vm15, %v16385_v17 }
 0x1a3   :  { %2804 = vmatprep.subr.mxu1 %v12603_v3  ;;  %2425 = vmatpush2.msra.mxu0 %v16418_v30  ;;  %16816 = vst [vmem:[#allocation245_spill] sm:$0xff] %v12629_v54  ;;  %16817 = vst [vmem:[#allocation246_spill] sm:$0xff] %v12643_v58  ;;  %v12647_v3 = vsub.f32 %v11562_v23, %v12625_v28 }
 0x1a4   :  { %2810 = vmatpush2.msra.mxu1 %v16418_v30  ;;  %10142 = vmatprep.subr.msk.mxu0 %vm12368_vm14, %v16385_v17 }
 0x1a5   :  { %2816 = vmatprep.subr.mxu1 %v12616_v32  ;;  %2429 = vmatpush2.msra.mxu0 %v16418_v30  ;;  %v12655_v32 = vand.u32 4294901760, %v2856_v59  ;;  %v16066_v23 = vand.u32 4294901760, %v12647_v3  ;;  %v16819_v59 = vand.u32 4294901760, %v12008_v12 }
 0x1a6   :  { %2822 = vmatpush2.msra.mxu1 %v16418_v30  ;;  %10143 = vmatprep.subr.msk.mxu0 %vm12389_vm13, %v16385_v17 }
 0x1a7   :  { %2828 = vmatprep.subr.mxu1 %v12629_v54  ;;  %2433 = vmatpush2.msra.mxu0 %v16418_v30  ;;  %16818 = vst [vmem:[#allocation247_spill] sm:$0xff] %v12655_v32  ;;  %v2467_v53 = vsub.f32 %v12647_v3, %v16066_v23  ;;  %v16837_v23 = vld [vmem:[#allocation201_spill] sm:$0xff] }
 0x1a8   :  { %2834 = vmatpush2.msra.mxu1 %v16418_v30  ;;  %10144 = vmatprep.subr.msk.mxu0 %vm12413_vm0, %v16385_v17 }
 0x1a9   :  { %2840 = vmatprep.subr.mxu1 %v16418_v30  ;;  %2437 = vmatpush2.msra.mxu0 %v16418_v30 }
 0x1aa   :  { %2846 = vmatpush2.msra.mxu1 %v12643_v58  ;;  %10145 = vmatprep.subr.msk.mxu0 %vm12437_vm5, %v16385_v17 }
 0x1ab   :  { %2852 = vmatprep.subr.mxu1 %v16418_v30  ;;  %2441 = vmatpush2.msra.mxu0 %v16418_v30 }
 0x1ac   :  { %2858 = vmatpush2.msra.mxu1 %v12655_v32  ;;  %10146 = vmatprep.subr.msk.mxu0 %vm12461_vm4, %v16385_v17  ;;  %vm16820_vm4 = vnez %v16598_v21 }
 0x1ad   :  { %2862 = vmatmul.mubr.f32.vlgmr.msra.gmra.mxu1 %v12625_v28  ;;  %3072 = vmatprep.subr.mxu1 %v16418_v30 }
 0x1ae   :  { %2445 = vmatpush2.msra.mxu0 %v16418_v30  ;;  %10150 = vmatpush1.msk.msra.mxu1 %vm11866_vm7, %v16385_v17  ;;  %vm16821_vm7 = vnez %v16605_v20 }
 0x1af   :  { %3202 = vmatprep.mubr.f32.mxu1 %v16819_v59  ;;  %10147 = vmatprep.subr.msk.mxu0 %vm12483_vm3, %v16385_v17  ;;  %v2468_v59 = vand.u32 4294901760, %v2467_v53  ;;  %v16835_v53 = vld [vmem:[#allocation197_spill] sm:$0xff] }
 0x1b0   :  { %3076 = vmatprep.subr.mxu1 %v16418_v30  ;;  %2449 = vmatpush2.msra.mxu0 %v16418_v30 }
 0x1b1   :  { %10151 = vmatpush1.msk.msra.mxu1 %vm16820_vm4, %v16385_v17  ;;  %2451 = vmatprep.subr.mxu0 %v16418_v30  ;;  %vm16822_vm4 = vnez %v16612_v45 }
 0x1b2   :  { %3080 = vmatprep.subr.mxu1 %v16418_v30  ;;  %10148 = vmatpush2.msk.msra.mxu0 %vm12512_vm12, %v16385_v17 }
 0x1b3   :  { %10152 = vmatpush1.msk.msra.mxu1 %vm16821_vm7, %v16385_v17  ;;  %2455 = vmatprep.subr.mxu0 %v16418_v30  ;;  %vm16823_vm7 = vnez %v16618_v42 }
 0x1b4   :  { %3084 = vmatprep.subr.mxu1 %v16418_v30  ;;  %10149 = vmatpush2.msk.msra.mxu0 %vm12535_vm2, %v16385_v17  ;;  %vm16825_vm2 = vnez %v16633_v24 }
 0x1b5   :  { %10153 = vmatpush1.msk.msra.mxu1 %vm16822_vm4, %v16385_v17  ;;  %2469 = vmatmul.mubr.f32.vlgmr.msra.gmra.mxu0 %v2468_v59  ;;  %vm16824_vm4 = vnez %v16627_v8  ;;  %v16836_v59 = vld [vmem:[#allocation198_spill] sm:$0xff] }
 0x1b6   :  { %2870 = vmatprep.subr.mxu0 %v16418_v30  ;;  %3088 = vmatprep.subr.mxu1 %v16418_v30 }
 0x1b7   :  { %2873 = vmatpush1.msra.mxu0 %v11907_v29  ;;  %3062 = vmatprep.mubr.f32.mxu0 %v12008_v12  ;;  %v16834_v12 = vld [vmem:[#allocation190_spill] sm:$0xff] }
 0x1b8   :  { %10154 = vmatpush1.msk.msra.mxu1 %vm16823_vm7, %v16385_v17  ;;  %2876 = vmatprep.subr.mxu0 %v16418_v30  ;;  %vm16826_vm7 = vnez %v16638_v43 }
 0x1b9   :  { %3092 = vmatprep.subr.mxu1 %v16418_v30  ;;  %2879 = vmatpush1.msra.mxu0 %v11921_v13 }
 0x1ba   :  { %10155 = vmatpush1.msk.msra.mxu1 %vm16824_vm4, %v16385_v17  ;;  %2882 = vmatprep.subr.mxu0 %v16418_v30  ;;  %vm16827_vm4 = vnez %v16649_v37 }
 0x1bb   :  { %3096 = vmatprep.subr.mxu1 %v16418_v30  ;;  %2885 = vmatpush1.msra.mxu0 %v11948_v6 }
 0x1bc   :  { %10156 = vmatpush1.msk.msra.mxu1 %vm16825_vm2, %v16385_v17  ;;  %2888 = vmatprep.subr.mxu0 %v16418_v30  ;;  %vm16828_vm2 = vnez %v16658_v22 }
 0x1bd   :  { %3100 = vmatprep.subr.mxu1 %v16418_v30  ;;  %2891 = vmatpush1.msra.mxu0 %v11970_v38 }
 0x1be   :  { %10157 = vmatpush1.msk.msra.mxu1 %vm16826_vm7, %v16385_v17  ;;  %2894 = vmatprep.subr.mxu0 %v16418_v30  ;;  %vm16829_vm7 = vnez %v16662_v52 }
 0x1bf   :  { %3104 = vmatprep.subr.mxu1 %v16418_v30  ;;  %2897 = vmatpush1.msra.mxu0 %v11995_v5 }
 0x1c0   :  { %10158 = vmatpush1.msk.msra.mxu1 %vm16827_vm4, %v16385_v17  ;;  %2900 = vmatprep.subr.mxu0 %v16418_v30  ;;  %vm16830_vm4 = vnez %v16672_v4 }
 0x1c1   :  { %3108 = vmatprep.subr.mxu1 %v16418_v30  ;;  %2903 = vmatpush1.msra.mxu0 %v12024_v26 }
 0x1c2   :  { %10159 = vmatpush1.msk.msra.mxu1 %vm16828_vm2, %v16385_v17  ;;  %2906 = vmatprep.subr.mxu0 %v16418_v30  ;;  %vm16831_vm2 = vnez %v16680_v7 }
 0x1c3   :  { %3112 = vmatprep.subr.mxu1 %v16418_v30  ;;  %2909 = vmatpush1.msra.mxu0 %v12041_v39 }
 0x1c4   :  { %10160 = vmatpush1.msk.msra.mxu1 %vm16829_vm7, %v16385_v17  ;;  %2912 = vmatprep.subr.mxu0 %v16418_v30  ;;  %vm16832_vm7 = vnez %v16688_v63 }
 0x1c5   :  { %3116 = vmatprep.subr.mxu1 %v16418_v30  ;;  %2915 = vmatpush1.msra.mxu0 %v12047_v60  ;;  %v10210_v60 = vld [vmem:[%s15546_s1 + $0x18] sm:$0xff] }
 0x1c6   :  { %10161 = vmatpush1.msk.msra.mxu1 %vm16830_vm4, %v16385_v17  ;;  %2918 = vmatprep.subr.mxu0 %v16418_v30 }
 0x1c7   :  { %3120 = vmatprep.subr.mxu1 %v16418_v30  ;;  %2921 = vmatpush1.msra.mxu0 %v12091_v47 }
 0x1c8   :  { %10162 = vmatpush1.msk.msra.mxu1 %vm16831_vm2, %v16385_v17  ;;  %2924 = vmatprep.subr.mxu0 %v16418_v30 }
 0x1c9   :  { %3124 = vmatprep.subr.mxu1 %v16418_v30  ;;  %2927 = vmatpush1.msra.mxu0 %v12113_v40 }
 0x1ca   :  { %10163 = vmatpush1.msk.msra.mxu1 %vm16832_vm7, %v16385_v17  ;;  %2930 = vmatprep.subr.mxu0 %v16418_v30  ;;  %vm16833_vm7 = vnez %v16700_v11 }
 0x1cb   :  { %3128 = vmatprep.subr.mxu1 %v16418_v30  ;;  %2933 = vmatpush1.msra.mxu0 %v12125_v50 }
 0x1cc   :  { %3130 = vmatpush1.msra.mxu1 %v16418_v30  ;;  %2936 = vmatprep.subr.mxu0 %v16418_v30 }
 0x1cd   :  { %3132 = vmatprep.subr.mxu1 %v16418_v30  ;;  %2939 = vmatpush1.msra.mxu0 %v12161_v19 }
 0x1ce   :  { %3134 = vmatpush1.msra.mxu1 %v16418_v30  ;;  %2942 = vmatprep.subr.mxu0 %v16418_v30 }
 0x1cf   :  { %10164 = vmatprep.subr.msk.mxu1 %vm16833_vm7, %v16385_v17  ;;  %2945 = vmatpush1.msra.mxu0 %v12179_v18  ;;  %v16892_v18 = vld [vmem:[#allocation156_spill] sm:$0xff] }
 0x1d0   :  { %3138 = vmatpush2.msra.mxu1 %v16418_v30  ;;  %2948 = vmatprep.subr.mxu0 %v16418_v30 }
 0x1d1   :  { %10165 = vmatprep.subr.msk.mxu1 %vm12202_vm1, %v16385_v17  ;;  %2951 = vmatpush1.msra.mxu0 %v16834_v12 }
 0x1d2   :  { %3142 = vmatpush2.msra.mxu1 %v16418_v30  ;;  %2954 = vmatprep.subr.mxu0 %v16418_v30 }
 0x1d3   :  { %10166 = vmatprep.subr.msk.mxu1 %vm12231_vm9, %v16385_v17  ;;  %2957 = vmatpush1.msra.mxu0 %v16418_v30 }
 0x1d4   :  { %3146 = vmatpush2.msra.mxu1 %v16418_v30  ;;  %2960 = vmatprep.subr.mxu0 %v16418_v30 }
 0x1d5   :  { %10167 = vmatprep.subr.msk.mxu1 %vm12254_vm6, %v16385_v17  ;;  %2963 = vmatpush1.msra.mxu0 %v16418_v30 }
 0x1d6   :  { %3150 = vmatpush2.msra.mxu1 %v16418_v30  ;;  %2966 = vmatprep.subr.mxu0 %v16835_v53  ;;  %v16838_v53 = vld [vmem:[#allocation204_spill] sm:$0xff] }
 0x1d7   :  { %10168 = vmatprep.subr.msk.mxu1 %vm12269_vm8, %v16385_v17  ;;  %2969 = vmatpush2.msra.mxu0 %v16418_v30 }
 0x1d8   :  { %3154 = vmatpush2.msra.mxu1 %v16418_v30  ;;  %2972 = vmatprep.subr.mxu0 %v16836_v59  ;;  %v16839_v59 = vld [vmem:[#allocation206_spill] sm:$0xff] }
 0x1d9   :  { %10169 = vmatprep.subr.msk.mxu1 %vm12300_vm10, %v16385_v17  ;;  %2975 = vmatpush2.msra.mxu0 %v16418_v30 }
 0x1da   :  { %3158 = vmatpush2.msra.mxu1 %v16418_v30  ;;  %2978 = vmatprep.subr.mxu0 %v16837_v23  ;;  %v16840_v23 = vld [vmem:[#allocation209_spill] sm:$0xff] }
 0x1db   :  { %10170 = vmatprep.subr.msk.mxu1 %vm12319_vm11, %v16385_v17  ;;  %2981 = vmatpush2.msra.mxu0 %v16418_v30 }
 0x1dc   :  { %3162 = vmatpush2.msra.mxu1 %v16418_v30  ;;  %2984 = vmatprep.subr.mxu0 %v16838_v53  ;;  %v16841_v53 = vld [vmem:[#allocation212_spill] sm:$0xff] }
 0x1dd   :  { %10171 = vmatprep.subr.msk.mxu1 %vm12334_vm15, %v16385_v17  ;;  %2987 = vmatpush2.msra.mxu0 %v16418_v30 }
 0x1de   :  { %3166 = vmatpush2.msra.mxu1 %v16418_v30  ;;  %2990 = vmatprep.subr.mxu0 %v16839_v59  ;;  %v16842_v59 = vld [vmem:[#allocation213_spill] sm:$0xff] }
 0x1df   :  { %10172 = vmatprep.subr.msk.mxu1 %vm12368_vm14, %v16385_v17  ;;  %2993 = vmatpush2.msra.mxu0 %v16418_v30 }
 0x1e0   :  { %3170 = vmatpush2.msra.mxu1 %v16418_v30  ;;  %2996 = vmatprep.subr.mxu0 %v16840_v23  ;;  %v16843_v23 = vld [vmem:[#allocation218_spill] sm:$0xff] }
 0x1e1   :  { %10173 = vmatprep.subr.msk.mxu1 %vm12389_vm13, %v16385_v17  ;;  %2999 = vmatpush2.msra.mxu0 %v16418_v30  ;;  %vm16844_vm13 = vnez %v16779_v35 }
 0x1e2   :  { %3174 = vmatpush2.msra.mxu1 %v16418_v30  ;;  %3002 = vmatprep.subr.mxu0 %v16841_v53 }
 0x1e3   :  { %10174 = vmatprep.subr.msk.mxu1 %vm12413_vm0, %v16385_v17  ;;  %3005 = vmatpush2.msra.mxu0 %v16418_v30 }
 0x1e4   :  { %3178 = vmatpush2.msra.mxu1 %v16418_v30  ;;  %3008 = vmatprep.subr.mxu0 %v16842_v59 }
 0x1e5   :  { %10175 = vmatprep.subr.msk.mxu1 %vm12437_vm5, %v16385_v17  ;;  %3011 = vmatpush2.msra.mxu0 %v16418_v30 }
 0x1e6   :  { %3182 = vmatpush2.msra.mxu1 %v16418_v30  ;;  %3014 = vmatprep.subr.mxu0 %v16843_v23 }
 0x1e7   :  { %10176 = vmatprep.subr.msk.mxu1 %vm16844_vm13, %v16385_v17  ;;  %3017 = vmatpush2.msra.mxu0 %v16418_v30  ;;  %vm16851_vm13 = vnez %v16612_v45 }
 0x1e8   :  { %3186 = vmatpush2.msra.mxu1 %v16418_v30  ;;  %3020 = vmatprep.subr.mxu0 %v12457_v1 }
 0x1e9   :  { %10177 = vmatprep.subr.msk.mxu1 %vm12483_vm3, %v16385_v17  ;;  %3023 = vmatpush2.msra.mxu0 %v16418_v30  ;;  %vm16845_vm3 = vnez %v16801_v2 }
 0x1ea   :  { %3190 = vmatpush2.msra.mxu1 %v16418_v30  ;;  %3026 = vmatprep.subr.mxu0 %v12479_v55  ;;  %v16846_v55 = vand.u32 4294901760, %v12647_v3 }
 0x1eb   :  { %3192 = vmatprep.subr.mxu1 %v16418_v30  ;;  %3029 = vmatpush2.msra.mxu0 %v16418_v30 }
 0x1ec   :  { %10178 = vmatpush2.msk.msra.mxu1 %vm12512_vm12, %v16385_v17  ;;  %3032 = vmatprep.subr.mxu0 %v12501_v31  ;;  %vm16847_vm12 = vnez %v16592_v51  ;;  %v16848_v31 = vld [vmem:[#allocation162_spill] sm:$0xff] }
 0x1ed   :  { %3196 = vmatprep.subr.mxu1 %v16418_v30  ;;  %3035 = vmatpush2.msra.mxu0 %v16418_v30 }
 0x1ee   :  { %10179 = vmatpush2.msk.msra.mxu1 %vm16845_vm3, %v16385_v17  ;;  %3038 = vmatprep.subr.mxu0 %v12525_v9  ;;  %vm16849_vm3 = vnez %v16598_v21 }
 0x1ef   :  { %3206 = vmatmul.mubr.f32.vlgmr.msra.gmra.mxu1 %v16846_v55  ;;  %3478 = vmatprep.subr.mxu1 %v16418_v30  ;;  %v16852_v55 = vld [vmem:[#allocation159_spill] sm:$0xff] }
 0x1f0   :  { %3041 = vmatpush2.msra.mxu0 %v16418_v30  ;;  %10180 = vmatpush1.msk.msra.mxu1 %vm16847_vm12, %v16385_v17  ;;  %vm16850_vm12 = vnez %v16605_v20 }
 0x1f1   :  { %3606 = vmatprep.mubr.f32.mxu1 %v16848_v31  ;;  %3044 = vmatprep.subr.mxu0 %v12546_v0 }
 0x1f2   :  { %3482 = vmatprep.subr.mxu1 %v16418_v30  ;;  %3047 = vmatpush2.msra.mxu0 %v16418_v30 }
 0x1f3   :  { %10181 = vmatpush1.msk.msra.mxu1 %vm16849_vm3, %v16385_v17  ;;  %3050 = vmatprep.subr.mxu0 %v16418_v30  ;;  %vm16857_vm3 = vnez %v16633_v24 }
 0x1f4   :  { %3486 = vmatprep.subr.mxu1 %v16418_v30  ;;  %3053 = vmatpush2.msra.mxu0 %v12571_v46 }
 0x1f5   :  { %10182 = vmatpush1.msk.msra.mxu1 %vm16850_vm12, %v16385_v17  ;;  %3056 = vmatprep.subr.mxu0 %v16418_v30  ;;  %vm16853_vm12 = vnez %v16618_v42 }
 0x1f6   :  { %3490 = vmatprep.subr.mxu1 %v16418_v30  ;;  %3059 = vmatpush2.msra.mxu0 %v12586_v36  ;;  %v16854_v36 = vld [vmem:[#allocation161_spill] sm:$0xff] }
 0x1f7   :  { %10183 = vmatpush1.msk.msra.mxu1 %vm16851_vm13, %v16385_v17  ;;  %3065 = vmatmul.mubr.f32.vlgmr.msra.gmra.mxu0 %v12647_v3  ;;  %vm16855_vm13 = vnez %v16627_v8  ;;  %v16856_v3 = vld [vmem:[#allocation164_spill] sm:$0xff] }
 0x1f8   :  { %3215 = vmatprep.subr.mxu0 %v16418_v30  ;;  %3494 = vmatprep.subr.mxu1 %v16418_v30 }
 0x1f9   :  { %3219 = vmatpush1.msra.mxu0 %v16852_v55  ;;  %3469 = vmatprep.mubr.f32.mxu0 %v16848_v31  ;;  %v16858_v31 = vld [vmem:[#allocation166_spill] sm:$0xff] }
 0x1fa   :  { %10184 = vmatpush1.msk.msra.mxu1 %vm16853_vm12, %v16385_v17  ;;  %3223 = vmatprep.subr.mxu0 %v16418_v30  ;;  %vm16859_vm12 = vnez %v16638_v43 }
 0x1fb   :  { %3498 = vmatprep.subr.mxu1 %v16418_v30  ;;  %3227 = vmatpush1.msra.mxu0 %v16854_v36  ;;  %v16860_v36 = vld [vmem:[#allocation169_spill] sm:$0xff] }
 0x1fc   :  { %10185 = vmatpush1.msk.msra.mxu1 %vm16855_vm13, %v16385_v17  ;;  %3231 = vmatprep.subr.mxu0 %v16418_v30  ;;  %vm16861_vm13 = vnez %v16649_v37 }
 0x1fd   :  { %3502 = vmatprep.subr.mxu1 %v16418_v30  ;;  %3235 = vmatpush1.msra.mxu0 %v16856_v3  ;;  %v16862_v3 = vld [vmem:[#allocation173_spill] sm:$0xff] }
 0x1fe   :  { %10186 = vmatpush1.msk.msra.mxu1 %vm16857_vm3, %v16385_v17  ;;  %3239 = vmatprep.subr.mxu0 %v16418_v30  ;;  %vm16863_vm3 = vnez %v16658_v22 }
 0x1ff   :  { %3506 = vmatprep.subr.mxu1 %v16418_v30  ;;  %3243 = vmatpush1.msra.mxu0 %v16858_v31  ;;  %v16864_v31 = vld [vmem:[#allocation175_spill] sm:$0xff] }
 0x200   :  { %10187 = vmatpush1.msk.msra.mxu1 %vm16859_vm12, %v16385_v17  ;;  %3247 = vmatprep.subr.mxu0 %v16418_v30  ;;  %vm16865_vm12 = vnez %v16662_v52 }
 0x201   :  { %3510 = vmatprep.subr.mxu1 %v16418_v30  ;;  %3251 = vmatpush1.msra.mxu0 %v16860_v36  ;;  %v16866_v36 = vld [vmem:[#allocation176_spill] sm:$0xff] }
 0x202   :  { %10188 = vmatpush1.msk.msra.mxu1 %vm16861_vm13, %v16385_v17  ;;  %3255 = vmatprep.subr.mxu0 %v16418_v30 }
 0x203   :  { %3514 = vmatprep.subr.mxu1 %v16418_v30  ;;  %3259 = vmatpush1.msra.mxu0 %v16862_v3  ;;  %v16867_v3 = vld [vmem:[#allocation182_spill] sm:$0xff] }
 0x204   :  { %10189 = vmatpush1.msk.msra.mxu1 %vm16863_vm3, %v16385_v17  ;;  %3263 = vmatprep.subr.mxu0 %v16418_v30 }
 0x205   :  { %3518 = vmatprep.subr.mxu1 %v16418_v30  ;;  %3267 = vmatpush1.msra.mxu0 %v16864_v31  ;;  %v16868_v31 = vld [vmem:[#allocation8_spill] sm:$0xff] }
 0x206   :  { %10190 = vmatpush1.msk.msra.mxu1 %vm16865_vm12, %v16385_v17  ;;  %3271 = vmatprep.subr.mxu0 %v16418_v30  ;;  %vm16869_vm12 = vnez %v16688_v63 }
 0x207   :  { %3522 = vmatprep.subr.mxu1 %v16418_v30  ;;  %3275 = vmatpush1.msra.mxu0 %v16866_v36  ;;  %v16870_v36 = vld [vmem:[#allocation184_spill] sm:$0xff] }
 0x208   :  { %10191 = vmatpush1.msk.msra.mxu1 %vm16830_vm4, %v16385_v17  ;;  %3279 = vmatprep.subr.mxu0 %v16418_v30 }
 0x209   :  { %3526 = vmatprep.subr.mxu1 %v16418_v30  ;;  %3283 = vmatpush1.msra.mxu0 %v16867_v3  ;;  %v16871_v3 = vld [vmem:[#allocation189_spill] sm:$0xff] }
 0x20a   :  { %10192 = vmatpush1.msk.msra.mxu1 %vm16831_vm2, %v16385_v17  ;;  %3287 = vmatprep.subr.mxu0 %v16418_v30 }
 0x20b   :  { %3530 = vmatprep.subr.mxu1 %v16418_v30  ;;  %3291 = vmatpush1.msra.mxu0 %v16868_v31  ;;  %v16872_v31 = vld [vmem:[#allocation193_spill] sm:$0xff] }
 0x20c   :  { %10193 = vmatpush1.msk.msra.mxu1 %vm16869_vm12, %v16385_v17  ;;  %3295 = vmatprep.subr.mxu0 %v16418_v30 }
 0x20d   :  { %3534 = vmatprep.subr.mxu1 %v16418_v30  ;;  %3299 = vmatpush1.msra.mxu0 %v16870_v36  ;;  %v16873_v36 = vld [vmem:[#allocation195_spill] sm:$0xff] }
 0x20e   :  { %3536 = vmatpush1.msra.mxu1 %v16418_v30  ;;  %3303 = vmatprep.subr.mxu0 %v16418_v30 }
 0x20f   :  { %3538 = vmatprep.subr.mxu1 %v16418_v30  ;;  %3307 = vmatpush1.msra.mxu0 %v16871_v3  ;;  %v16876_v3 = vld [vmem:[#allocation207_spill] sm:$0xff] }
 0x210   :  { %3540 = vmatpush1.msra.mxu1 %v16418_v30  ;;  %3311 = vmatprep.subr.mxu0 %v16418_v30 }
 0x211   :  { %10194 = vmatprep.subr.msk.mxu1 %vm16833_vm7, %v16385_v17  ;;  %3315 = vmatpush1.msra.mxu0 %v16872_v31  ;;  %v16875_v31 = vld [vmem:[#allocation203_spill] sm:$0xff] }
 0x212   :  { %3544 = vmatpush2.msra.mxu1 %v16418_v30  ;;  %3319 = vmatprep.subr.mxu0 %v16418_v30 }
 0x213   :  { %10195 = vmatprep.subr.msk.mxu1 %vm12202_vm1, %v16385_v17  ;;  %3323 = vmatpush1.msra.mxu0 %v16873_v36  ;;  %v16874_v36 = vld [vmem:[#allocation200_spill] sm:$0xff] }
 0x214   :  { %3548 = vmatpush2.msra.mxu1 %v16418_v30  ;;  %3327 = vmatprep.subr.mxu0 %v16418_v30 }
 0x215   :  { %10196 = vmatprep.subr.msk.mxu1 %vm12231_vm9, %v16385_v17  ;;  %3331 = vmatpush1.msra.mxu0 %v16418_v30 }
 0x216   :  { %3552 = vmatpush2.msra.mxu1 %v16418_v30  ;;  %3335 = vmatprep.subr.mxu0 %v16418_v30 }
 0x217   :  { %10197 = vmatprep.subr.msk.mxu1 %vm12254_vm6, %v16385_v17  ;;  %3339 = vmatpush1.msra.mxu0 %v16418_v30 }
 0x218   :  { %3556 = vmatpush2.msra.mxu1 %v16418_v30  ;;  %3343 = vmatprep.subr.mxu0 %v16874_v36  ;;  %v16877_v36 = vld [vmem:[#allocation208_spill] sm:$0xff] }
 0x219   :  { %10198 = vmatprep.subr.msk.mxu1 %vm12269_vm8, %v16385_v17  ;;  %3347 = vmatpush2.msra.mxu0 %v16418_v30 }
 0x21a   :  { %3560 = vmatpush2.msra.mxu1 %v16418_v30  ;;  %3351 = vmatprep.subr.mxu0 %v16875_v31  ;;  %v16878_v31 = vld [vmem:[#allocation210_spill] sm:$0xff] }
 0x21b   :  { %10199 = vmatprep.subr.msk.mxu1 %vm12300_vm10, %v16385_v17  ;;  %3355 = vmatpush2.msra.mxu0 %v16418_v30 }
 0x21c   :  { %3564 = vmatpush2.msra.mxu1 %v16418_v30  ;;  %3359 = vmatprep.subr.mxu0 %v16876_v3  ;;  %v16879_v3 = vld [vmem:[#allocation215_spill] sm:$0xff] }
 0x21d   :  { %10200 = vmatprep.subr.msk.mxu1 %vm12319_vm11, %v16385_v17  ;;  %3363 = vmatpush2.msra.mxu0 %v16418_v30  ;;  %vm16880_vm11 = vnez %v16758_v25 }
 0x21e   :  { %3568 = vmatpush2.msra.mxu1 %v16418_v30  ;;  %3367 = vmatprep.subr.mxu0 %v16877_v36  ;;  %v16881_v36 = vld [vmem:[#allocation217_spill] sm:$0xff] }
 0x21f   :  { %10201 = vmatprep.subr.msk.mxu1 %vm12334_vm15, %v16385_v17  ;;  %3371 = vmatpush2.msra.mxu0 %v16418_v30 }
 0x220   :  { %3572 = vmatpush2.msra.mxu1 %v16418_v30  ;;  %3375 = vmatprep.subr.mxu0 %v16878_v31  ;;  %v16882_v31 = vld [vmem:[#allocation219_spill] sm:$0xff] }
 0x221   :  { %10202 = vmatprep.subr.msk.mxu1 %vm12368_vm14, %v16385_v17  ;;  %3379 = vmatpush2.msra.mxu0 %v16418_v30 }
 0x222   :  { %3576 = vmatpush2.msra.mxu1 %v16418_v30  ;;  %3383 = vmatprep.subr.mxu0 %v16879_v3  ;;  %v16883_v3 = vld [vmem:[#allocation223_spill] sm:$0xff] }
 0x223   :  { %10203 = vmatprep.subr.msk.mxu1 %vm16880_vm11, %v16385_v17  ;;  %3387 = vmatpush2.msra.mxu0 %v16418_v30  ;;  %vm16884_vm11 = vnez %v16779_v35 }
 0x224   :  { %3580 = vmatpush2.msra.mxu1 %v16418_v30  ;;  %3391 = vmatprep.subr.mxu0 %v16881_v36  ;;  %v16885_v36 = vld [vmem:[#allocation226_spill] sm:$0xff] }
 0x225   :  { %10204 = vmatprep.subr.msk.mxu1 %vm12413_vm0, %v16385_v17  ;;  %3395 = vmatpush2.msra.mxu0 %v16418_v30  ;;  %vm16886_vm0 = vnez %v16786_v48 }
 0x226   :  { %3584 = vmatpush2.msra.mxu1 %v16418_v30  ;;  %3399 = vmatprep.subr.mxu0 %v16882_v31  ;;  %v16887_v31 = vld [vmem:[#allocation229_spill] sm:$0xff] }
 0x227   :  { %10205 = vmatprep.subr.msk.mxu1 %vm12437_vm5, %v16385_v17  ;;  %3403 = vmatpush2.msra.mxu0 %v16418_v30 }
 0x228   :  { %3588 = vmatpush2.msra.mxu1 %v16418_v30  ;;  %3407 = vmatprep.subr.mxu0 %v16883_v3  ;;  %v16889_v3 = vld [vmem:[#allocation232_spill] sm:$0xff] }
 0x229   :  { %10206 = vmatprep.subr.msk.mxu1 %vm16884_vm11, %v16385_v17  ;;  %3411 = vmatpush2.msra.mxu0 %v16418_v30  ;;  %vm16888_vm11 = vnez %v16793_v41 }
 0x22a   :  { %3592 = vmatpush2.msra.mxu1 %v16418_v30  ;;  %3415 = vmatprep.subr.mxu0 %v16885_v36  ;;  %v16891_v36 = vld [vmem:[#allocation238_spill] sm:$0xff] }
 0x22b   :  { %10207 = vmatprep.subr.msk.mxu1 %vm16886_vm0, %v16385_v17  ;;  %3419 = vmatpush2.msra.mxu0 %v16418_v30  ;;  %vm16890_vm0 = vnez %v16801_v2 }
 0x22c   :  { %3596 = vmatpush2.msra.mxu1 %v16418_v30  ;;  %3423 = vmatprep.subr.mxu0 %v16887_v31  ;;  %v3616_v31 = vld [vmem:[%s15547_s2] sm:$0xff] }
 0x22d   :  { %3598 = vmatprep.subr.mxu1 %v16418_v30  ;;  %3427 = vmatpush2.msra.mxu0 %v16418_v30 }
 0x22e   :  { %10208 = vmatpush2.msk.msra.mxu1 %vm16888_vm11, %v16385_v17  ;;  %3431 = vmatprep.subr.mxu0 %v16889_v3  ;;  %v10610_v3 = vmov 0  }
 0x22f   :  { %3602 = vmatprep.subr.mxu1 %v16418_v30  ;;  %3435 = vmatpush2.msra.mxu0 %v16418_v30 }
 0x230   :  { %10209 = vmatpush2.msk.msra.mxu1 %vm16890_vm0, %v16385_v17  ;;  %3439 = vmatprep.subr.mxu0 %v12562_v61  ;;  %v10393_v61 = vld [vmem:[%s15547_s2 + $0x8] sm:$0xff]  ;;  %vm16894_vm0 = vcmask 64512  }
 0x231   :  { %3608 = vmatmul.mubr.f32.vlgmr.msra.gmra.mxu1 %v12625_v28  ;;  %3443 = vmatpush2.msra.mxu0 %v16418_v30  ;;  %v3635_v29 = vsel %vm16894_vm0, %v10210_v60, 0  ;;  %vm16895_vm11 = vmmov %vm16894_vm0 }
 0x232   :  { %3447 = vmatprep.subr.mxu0 %v16891_v36  ;;  %10582 = vset.pattern.permute.xlu0 %v10610_v3  ;;  %v1579_v36 = vpop.f32.mrf.mxu1 }
 0x233   :  { %3451 = vmatpush2.msra.mxu0 %v16418_v30  ;;  %3619 = vperm.xlu0 %10582, %v3616_v31   ;;  %v1186_v31 = vpop.f32.mrf.mxu0 }
 0x234   :  { %3455 = vmatprep.subr.mxu0 %v16418_v30  ;;  %3817 = vmatprep.mubr.f32.mxu1 %v16418_v30  ;;  %v1581_v0 = vpop.f32.mrf.mxu1 }
 0x235   :  { %3459 = vmatpush2.msra.mxu0 %v12599_v16  ;;  %10583 = vset.pattern.permute.xlu1 %v10610_v3  ;;  %v1188_v55 = vpop.f32.mrf.mxu0 }
 0x236   :  { %3463 = vmatprep.subr.mxu0 %v16418_v30  ;;  %v1923_v9 = vpop.f32.mrf.mxu1 }
 0x237   :  { %3467 = vmatpush2.msra.mxu0 %v12612_v34  ;;  %6780 = vperm.xlu0 %10582, %v10393_v61   ;;  %v1782_v46 = vpop.f32.mrf.mxu0  ;;  %v1187_v34 = vadd.f32 %v1186_v31, %v16892_v18 }
 0x238   :  { %3471 = vmatmul.mubr.f32.vlgmr.msra.gmra.mxu0 %v12625_v28  ;;  %v1925_v59 = vpop.f32.mrf.mxu1  ;;  %v16893_v28 = vld [vmem:[#allocation157_spill] sm:$0xff] }
 0x239   :  { %3709 = vmatprep.mubr.f32.mxu0 %v16418_v30  ;;  %v1784_v1 = vpop.f32.mrf.mxu0  ;;  %v1189_v50 = vadd.f32 %v1188_v55, %v16893_v28  ;;  %v1580_v47 = vadd.f32 %v1579_v36, %v1187_v34  ;;  %v10211_v55 = vld [vmem:[%s15546_s1 + $0x20] sm:$0xff]  ;;  %v13090_v28 = vand.u32 4294901760, %v3635_v29 }
 0x23a   :  { %v2325_v16 = vpop.f32.mrf.mxu1 }
 0x23b   :  { %v2188_v23 = vpop.f32.mrf.mxu0  ;;  %v1783_v26 = vadd.f32 %v1782_v46, %v1580_v47  ;;  %v1582_v5 = vadd.f32 %v1581_v0, %v1189_v50  ;;  %v3638_v0 = vsel %vm16895_vm11, %v10211_v55, 0 }
 0x23c   :  { %v2327_v12 = vpop.f32.mrf.mxu1 }
 0x23d   :  { %v2190_v3 = vpop.f32.mrf.mxu0  ;;  %v1785_v2 = vadd.f32 %v1784_v1, %v1582_v5  ;;  %v1924_v34 = vadd.f32 %v1923_v9, %v1783_v26  ;;  %v13097_v9 = vsub.f32 %v3635_v29, %v13090_v28  ;;  %v13099_v26 = vand.u32 4294901760, %v3638_v0 }
 0x23f   :  { %v2189_v48 = vadd.f32 %v2188_v23, %v1924_v34  ;;  %v1926_v47 = vadd.f32 %v1925_v59, %v1785_v2 }
 0x241   :  { %v2191_v60 = vadd.f32 %v2190_v3, %v1926_v47 }
 0x243   :  { %v2328_v23 = vadd.f32 %v2327_v12, %v2191_v60 }
 0x26d   :  { %v2863_v61 = vpop.f32.mrf.mxu1 }
 0x26f   :  { %v2865_v39 = vpop.f32.mrf.mxu1 }
 0x275   :  { %v2470_v53 = vpop.f32.mrf.mxu0 }
 0x276   :  { %v2864_v38 = vadd.f32 %v2863_v61, %v2470_v53 }
 0x277   :  { %v2472_v19 = vpop.f32.mrf.mxu0 }
 0x278   :  { %v2866_v18 = vadd.f32 %v2865_v39, %v2472_v19  ;;  %v2326_v39 = vadd.f32 %v2325_v16, %v2189_v48 }
 0x2ae   :  { %v3620_v3 = vpop.permute.xlu0 %3619 }
 0x2af   :  { %v3207_v6 = vpop.f32.mrf.mxu1 }
 0x2b1   :  { %v3209_v41 = vpop.f32.mrf.mxu1 }
 0x2b7   :  { %v3066_v40 = vpop.f32.mrf.mxu0 }
 0x2b8   :  { %v3067_v31 = vadd.f32 %v3066_v40, %v2864_v38  ;;  %v10212_v40 = vld [vmem:[%s15546_s1 + $0x28] sm:$0xff] }
 0x2b9   :  { %v3068_v13 = vpop.f32.mrf.mxu0  ;;  %v3641_v1 = vsel %vm16894_vm0, %v10212_v40, 0 }
 0x2ba   :  { %v3069_v36 = vadd.f32 %v3068_v13, %v2866_v18  ;;  %v3208_v50 = vadd.f32 %v3207_v6, %v3067_v31  ;;  %v3712_v18 = vand.u32 4294901760, %v13097_v9  ;;  %v13106_v29 = vand.u32 4294901760, %v3641_v1 }
 0x2bc   :  { %v3210_v5 = vadd.f32 %v3209_v41, %v3069_v36  ;;  %v13104_v41 = vsub.f32 %v3638_v0, %v13099_v26  ;;  %v3713_v48 = vsub.f32 %v13097_v9, %v3712_v18  ;;  %v3733_v12 = vsub.f32 %v3641_v1, %v13106_v29 }
 0x2be   :  { %v3723_v36 = vand.u32 4294901760, %v13104_v41  ;;  %v3714_v0 = vand.u32 4294901760, %v3713_v48  ;;  %v16909_v48 = vld [vmem:[#allocation24_spill] sm:$0xff] }
 0x2bf   :  { %vm16910_vm15 = vnez %v16909_v48 }
 0x2f1   :  { %v3609_v46 = vpop.f32.mrf.mxu1 }
 0x2f3   :  { %v3611_v2 = vpop.f32.mrf.mxu1 }
 0x2f8   :  { %v3472_v53 = vpop.f32.mrf.mxu0 }
 0x2f9   :  { %v3473_v38 = vadd.f32 %v3472_v53, %v3208_v50 }
 0x2fa   :  { %v3474_v13 = vpop.f32.mrf.mxu0 }
 0x2fb   :  { %v3610_v19 = vadd.f32 %v3609_v46, %v3473_v38  ;;  %v3475_v6 = vadd.f32 %v3474_v13, %v3210_v5  ;;  %v3724_v38 = vsub.f32 %v13104_v41, %v3723_v36  ;;  %v3734_v5 = vand.u32 4294901760, %v3733_v12 }
 0x2fd   :  { %v3612_v59 = vadd.f32 %v3611_v2, %v3475_v6  ;;  %v3614_v61 = vadd.f32 %v3610_v19, %v2326_v39  ;;  %v3725_v6 = vand.u32 4294901760, %v3724_v38  ;;  %v3735_v1 = vsub.f32 %v3733_v12, %v3734_v5  ;;  %v16926_v38 = vld [vmem:[#allocation70_spill] sm:$0xff] }
 0x2ff   :  { %v3615_v31 = vadd.f32 %v3612_v59, %v2328_v23  ;;  %v3622_v55 = vadd.f32 %v3620_v3, %v3614_v61  ;;  %v3736_v61 = vand.u32 4294901760, %v3735_v1  ;;  %v16935_v1 = vld [vmem:[#allocation89_spill] sm:$0xff] }
 0x301   :  { %v3623_v34 = vadd.f32 %v3620_v3, %v3615_v31  ;;  %vm3624_vm11 = vcmp.gt.f32.partialorder %v3622_v55, 0.0  ;;  %v3626_v16 = vmul.f32 0.01, %v3622_v55  ;;  %v16896_v31 = vld [vmem:[#allocation9_spill] sm:$0xff] }
 0x303   :  { %vm3625_vm0 = vcmp.gt.f32.partialorder %v3623_v34, 0.0  ;;  %v3627_v47 = vmul.f32 0.01, %v3623_v34  ;;  %v3628_v50 = vsel %vm3624_vm11, %v3622_v55, %v3626_v16  ;;  %vm16897_vm11 = vnez %v16896_v31  ;;  %v16902_v55 = vld [vmem:[#allocation18_spill] sm:$0xff]  ;;  %v16907_v16 = vld [vmem:[#allocation52_spill] sm:$0xff] }
 0x304   :  { %v3675_v46 = vand.u32 4294901760, %v3628_v50  ;;  %vm16903_vm5 = vnez %v16902_v55 }
 0x305   :  { %v3629_v53 = vsel %vm3625_vm0, %v3623_v34, %v3627_v47  ;;  %v16905_v34 = vld [vmem:[#allocation21_spill] sm:$0xff]  ;;  %v16915_v47 = vld [vmem:[#allocation31_spill] sm:$0xff] }
 0x306   :  { %v3673_v40 = vand.u32 4294901760, %v3629_v53  ;;  %v3780_v60 = vsub.f32 %v3628_v50, %v3675_v46  ;;  %vm16906_vm14 = vnez %v16905_v34  ;;  %vm16916_vm8 = vnez %v16915_v47  ;;  %v16917_v50 = vld [vmem:[#allocation65_spill] sm:$0xff] }
 0x308   :  { %3674 = vmatprep.subr.mxu0 %v3673_v40  ;;  %v3774_v13 = vsub.f32 %v3629_v53, %v3673_v40  ;;  %v3781_v39 = vand.u32 4294901760, %v3780_v60  ;;  %v16920_v53 = vld [vmem:[#allocation67_spill] sm:$0xff] }
 0x309   :  { %3676 = vmatpush1.msra.mxu0 %v3675_v46 }
 0x30a   :  { %3715 = vmatmul.mubr.f32.vlgmr.msra.gmra.mxu0 %v3714_v0  ;;  %3871 = vmatprep.subr.mxu0 %v3774_v13  ;;  %v3775_v19 = vand.u32 4294901760, %v3774_v13  ;;  %v3782_v2 = vsub.f32 %v3780_v60, %v3781_v39  ;;  %v16921_v0 = vld [vmem:[#allocation39_spill] sm:$0xff] }
 0x30b   :  { %3874 = vmatpush1.msra.mxu0 %v3780_v60  ;;  %3720 = vmatprep.mubr.f32.mxu0 %v16418_v30  ;;  %vm16922_vm9 = vnez %v16921_v0  ;;  %v16924_v60 = vld [vmem:[#allocation44_spill] sm:$0xff] }
 0x30c   :  { %4059 = vmatprep.subr.mxu0 %v3775_v19  ;;  %v3776_v23 = vsub.f32 %v3774_v13, %v3775_v19  ;;  %v3783_v3 = vand.u32 4294901760, %v3782_v2  ;;  %vm16925_vm1 = vnez %v16924_v60  ;;  %v16929_v13 = vld [vmem:[#allocation71_spill] sm:$0xff]  ;;  %v16932_v19 = vld [vmem:[#allocation72_spill] sm:$0xff]  ;;  %v16936_v2 = vld [vmem:[#allocation74_spill] sm:$0xff] }
 0x30d   :  { %vm16937_vm4 = vnez %v16936_v2 }
 0x30e   :  { %3726 = vmatmul.mubr.f32.gmra.mxu0 %v3725_v6  ;;  %v3777_v59 = vand.u32 4294901760, %v3776_v23  ;;  %v16933_v6 = vld [vmem:[#allocation55_spill] sm:$0xff]  ;;  %v16938_v23 = vld [vmem:[#allocation94_spill] sm:$0xff] }
 0x30f   :  { %3731 = vmatprep.mubr.f32.mxu0 %v16418_v30  ;;  %vm16934_vm2 = vnez %v16933_v6 }
 0x310   :  { %3778 = vmatprep.subr.mxu1 %v3777_v59  ;;  %v16939_v59 = vld [vmem:[#allocation77_spill] sm:$0xff] }
 0x311   :  { %3784 = vmatpush1.msra.mxu1 %v3783_v3  ;;  %vm16940_vm3 = vnez %v16939_v59  ;;  %v16942_v3 = vld [vmem:[#allocation81_spill] sm:$0xff] }
 0x312   :  { %3737 = vmatmul.mubr.f32.gmra.mxu0 %v3736_v61  ;;  %3819 = vmatmul.mubr.f32.vlgmr.msra.gmra.mxu1 %v13090_v28  ;;  %v16941_v61 = vld [vmem:[#allocation99_spill] sm:$0xff]  ;;  %vm16943_vm13 = vnez %v16942_v3 }
 0x313   :  { %3963 = vmatprep.subr.mxu1 %v3673_v40  ;;  %3824 = vmatprep.mubr.f32.mxu1 %v16418_v30 }
 0x314   :  { %3965 = vmatpush1.msra.mxu1 %v3675_v46  ;;  %3907 = vmatprep.mubr.f32.mxu0 %v16418_v30 }
 0x315   :  { %4149 = vmatprep.subr.mxu1 %v3673_v40  ;;  %v16923_v40 = vld [vmem:[#allocation69_spill] sm:$0xff] }
 0x316   :  { %3826 = vmatmul.mubr.f32.gmra.mxu1 %v13099_v26  ;;  %3910 = vmatmul.mubr.f32.vlgmr.msra.gmra.mxu0 %v13097_v9  ;;  %v16898_v9 = vld [vmem:[#allocation22_spill] sm:$0xff] }
 0x317   :  { %4063 = vmatpush1.msra.mxu0 %v3781_v39  ;;  %3831 = vmatprep.mubr.f32.mxu1 %v16418_v30  ;;  %v16930_v39 = vld [vmem:[#allocation51_spill] sm:$0xff] }
 0x318   :  { %3915 = vmatprep.mubr.f32.mxu0 %v16418_v30  ;;  %10213 = vmatprep.subr.msk.mxu0 %vm16897_vm11, %v16385_v17  ;;  %vm16931_vm12 = vnez %v16930_v39 }
 0x31a   :  { %3833 = vmatmul.mubr.f32.gmra.mxu1 %v13106_v29  ;;  %3918 = vmatmul.mubr.f32.gmra.mxu0 %v13104_v41  ;;  %v16899_v41 = vld [vmem:[#allocation15_spill] sm:$0xff] }
 0x31b   :  { %3923 = vmatprep.mubr.f32.mxu0 %v16418_v30  ;;  %3998 = vmatprep.mubr.f32.mxu1 %v16418_v30  ;;  %vm16900_vm0 = vnez %v16899_v41 }
 0x31e   :  { %3926 = vmatmul.mubr.f32.gmra.mxu0 %v3733_v12  ;;  %4002 = vmatmul.mubr.f32.vlgmr.msra.gmra.mxu1 %v3712_v18  ;;  %v16901_v18 = vld [vmem:[#allocation41_spill] sm:$0xff]  ;;  %v16912_v12 = vld [vmem:[#allocation28_spill] sm:$0xff] }
 0x31f   :  { %4151 = vmatpush1.msra.mxu1 %v3675_v46  ;;  %4007 = vmatprep.mubr.f32.mxu1 %v16418_v30  ;;  %vm16913_vm10 = vnez %v16912_v12  ;;  %v16918_v46 = vld [vmem:[#allocation35_spill] sm:$0xff] }
 0x320   :  { %4096 = vmatprep.mubr.f32.mxu0 %v16418_v30  ;;  %4356 = vmatprep.subr.mxu1 %v16898_v9  ;;  %vm16919_vm6 = vnez %v16918_v46  ;;  %v16983_v9 = vld [vmem:[#allocation155_spill] sm:$0xff] }
 0x322   :  { %4011 = vmatmul.mubr.f32.gmra.mxu1 %v3723_v36  ;;  %4098 = vmatmul.mubr.f32.vlgmr.msra.gmra.mxu0 %v13090_v28  ;;  %v16911_v36 = vld [vmem:[#allocation59_spill] sm:$0xff] }
 0x323   :  { %4016 = vmatprep.mubr.f32.mxu1 %v16418_v30  ;;  %4103 = vmatprep.mubr.f32.mxu0 %v16418_v30 }
 0x324   :  { %4209 = vmatpush1.msra.mxu0 %v16418_v30 }
 0x325   :  { %10214 = vmatprep.subr.msk.mxu0 %vm16900_vm0, %v16385_v17 }
 0x326   :  { %4020 = vmatmul.mubr.f32.gmra.mxu1 %v3734_v5  ;;  %4105 = vmatmul.mubr.f32.gmra.mxu0 %v13099_v26  ;;  %v16927_v5 = vld [vmem:[#allocation47_spill] sm:$0xff] }
 0x327   :  { %4110 = vmatprep.mubr.f32.mxu0 %v16418_v30  ;;  %4184 = vmatprep.mubr.f32.mxu1 %v16418_v30  ;;  %vm16928_vm7 = vnez %v16927_v5 }
 0x328   :  { %4213 = vmatpush1.msra.mxu0 %v16418_v30 }
 0x329   :  { %4215 = vmatprep.subr.mxu0 %v16418_v30 }
 0x32a   :  { %4112 = vmatmul.mubr.f32.gmra.mxu0 %v13106_v29  ;;  %4186 = vmatmul.mubr.f32.vlgmr.msra.gmra.mxu1 %v13090_v28  ;;  %v16904_v28 = vld [vmem:[#allocation48_spill] sm:$0xff] }
 0x32b   :  { %4191 = vmatprep.mubr.f32.mxu1 %v16418_v30  ;;  %4362 = vmatpush1.msra.mxu1 %v16418_v30 }
 0x32c   :  { %4368 = vmatprep.subr.mxu1 %v16901_v18  ;;  %10215 = vmatpush1.msk.msra.mxu0 %vm16903_vm5, %v16385_v17  ;;  %v16980_v18 = vld [vmem:[#allocation154_spill] sm:$0xff] }
 0x32d   :  { %4374 = vmatpush1.msra.mxu1 %v16418_v30  ;;  %4219 = vmatprep.subr.mxu0 %v16418_v30 }
 0x32e   :  { %4193 = vmatmul.mubr.f32.gmra.mxu1 %v13099_v26  ;;  %4380 = vmatprep.subr.mxu1 %v16418_v30  ;;  %v16908_v26 = vld [vmem:[#allocation56_spill] sm:$0xff] }
 0x32f   :  { %4198 = vmatprep.mubr.f32.mxu1 %v16418_v30  ;;  %4386 = vmatpush1.msra.mxu1 %v16904_v28  ;;  %v16977_v28 = vld [vmem:[#allocation152_spill] sm:$0xff] }
 0x330   :  { %4392 = vmatprep.subr.mxu1 %v16418_v30  ;;  %10216 = vmatpush1.msk.msra.mxu0 %vm16906_vm14, %v16385_v17 }
 0x331   :  { %4398 = vmatpush1.msra.mxu1 %v16907_v16  ;;  %4223 = vmatprep.subr.mxu0 %v16418_v30  ;;  %v16974_v16 = vld [vmem:[#allocation149_spill] sm:$0xff] }
 0x332   :  { %4200 = vmatmul.mubr.f32.gmra.mxu1 %v13106_v29  ;;  %4404 = vmatprep.subr.mxu1 %v16418_v30  ;;  %v16914_v29 = vld [vmem:[#allocation62_spill] sm:$0xff] }
 0x333   :  { %4410 = vmatpush1.msra.mxu1 %v16908_v26  ;;  %10217 = vmatpush1.msk.msra.mxu0 %vm16910_vm15, %v16385_v17  ;;  %v16971_v26 = vld [vmem:[#allocation146_spill] sm:$0xff] }
 0x334   :  { %4416 = vmatprep.subr.mxu1 %v16418_v30  ;;  %4227 = vmatprep.subr.mxu0 %v16418_v30 }
 0x335   :  { %4422 = vmatpush1.msra.mxu1 %v16911_v36  ;;  %10218 = vmatpush1.msk.msra.mxu0 %vm16913_vm10, %v16385_v17  ;;  %v16968_v36 = vld [vmem:[#allocation142_spill] sm:$0xff] }
 0x336   :  { %4428 = vmatprep.subr.mxu1 %v16418_v30  ;;  %4231 = vmatprep.subr.mxu0 %v16418_v30 }
 0x337   :  { %4434 = vmatpush1.msra.mxu1 %v16914_v29  ;;  %10219 = vmatpush1.msk.msra.mxu0 %vm16916_vm8, %v16385_v17  ;;  %v16965_v29 = vld [vmem:[#allocation138_spill] sm:$0xff] }
 0x338   :  { %4440 = vmatprep.subr.mxu1 %v16418_v30  ;;  %4235 = vmatprep.subr.mxu0 %v16418_v30 }
 0x339   :  { %4446 = vmatpush1.msra.mxu1 %v16917_v50  ;;  %10220 = vmatpush1.msk.msra.mxu0 %vm16919_vm6, %v16385_v17  ;;  %v16962_v50 = vld [vmem:[#allocation133_spill] sm:$0xff] }
 0x33a   :  { %4452 = vmatprep.subr.mxu1 %v16418_v30  ;;  %4239 = vmatprep.subr.mxu0 %v16418_v30 }
 0x33b   :  { %4458 = vmatpush1.msra.mxu1 %v16920_v53  ;;  %10221 = vmatpush1.msk.msra.mxu0 %vm16922_vm9, %v16385_v17  ;;  %v16959_v53 = vld [vmem:[#allocation128_spill] sm:$0xff] }
 0x33c   :  { %4464 = vmatprep.subr.mxu1 %v16418_v30  ;;  %4243 = vmatprep.subr.mxu0 %v16418_v30 }
 0x33d   :  { %4470 = vmatpush1.msra.mxu1 %v16923_v40  ;;  %10222 = vmatpush1.msk.msra.mxu0 %vm16925_vm1, %v16385_v17  ;;  %v16956_v40 = vld [vmem:[#allocation123_spill] sm:$0xff] }
 0x33e   :  { %4476 = vmatprep.subr.mxu1 %v16418_v30  ;;  %4247 = vmatprep.subr.mxu0 %v16418_v30 }
 0x33f   :  { %4482 = vmatpush1.msra.mxu1 %v16926_v38  ;;  %10223 = vmatpush1.msk.msra.mxu0 %vm16928_vm7, %v16385_v17  ;;  %v16953_v38 = vld [vmem:[#allocation116_spill] sm:$0xff] }
 0x340   :  { %4488 = vmatprep.subr.mxu1 %v16418_v30  ;;  %4251 = vmatprep.subr.mxu0 %v16418_v30 }
 0x341   :  { %4494 = vmatpush1.msra.mxu1 %v16929_v13  ;;  %10224 = vmatpush1.msk.msra.mxu0 %vm16931_vm12, %v16385_v17  ;;  %v16948_v13 = vld [vmem:[#allocation87_spill] sm:$0xff] }
 0x342   :  { %4500 = vmatprep.subr.mxu1 %v16418_v30  ;;  %4255 = vmatprep.subr.mxu0 %v16418_v30 }
 0x343   :  { %4506 = vmatpush1.msra.mxu1 %v16932_v19  ;;  %10225 = vmatpush1.msk.msra.mxu0 %vm16934_vm2, %v16385_v17  ;;  %v16945_v19 = vld [vmem:[#allocation82_spill] sm:$0xff] }
 0x344   :  { %4512 = vmatprep.subr.mxu1 %v16418_v30  ;;  %4259 = vmatprep.subr.mxu0 %v16418_v30 }
 0x345   :  { %4518 = vmatpush1.msra.mxu1 %v16935_v1  ;;  %10226 = vmatpush1.msk.msra.mxu0 %vm16937_vm4, %v16385_v17  ;;  %v16944_v1 = vld [vmem:[#allocation101_spill] sm:$0xff]  ;;  %vm16946_vm4 = vnez %v16945_v19 }
 0x346   :  { %4524 = vmatprep.subr.mxu1 %v16418_v30  ;;  %4263 = vmatprep.subr.mxu0 %v16418_v30 }
 0x347   :  { %4530 = vmatpush1.msra.mxu1 %v16938_v23  ;;  %10227 = vmatpush1.msk.msra.mxu0 %vm16940_vm3, %v16385_v17  ;;  %v16947_v23 = vld [vmem:[#allocation106_spill] sm:$0xff]  ;;  %vm16949_vm3 = vnez %v16948_v13 }
 0x348   :  { %4536 = vmatprep.subr.mxu1 %v16418_v30  ;;  %4267 = vmatprep.subr.mxu0 %v16418_v30 }
 0x349   :  { %4542 = vmatpush1.msra.mxu1 %v16941_v61  ;;  %10228 = vmatpush1.msk.msra.mxu0 %vm16943_vm13, %v16385_v17  ;;  %v16950_v61 = vld [vmem:[#allocation111_spill] sm:$0xff] }
 0x34a   :  { %4572 = vmatprep.subr.mxu1 %v16944_v1  ;;  %10229 = vmatprep.subr.msk.mxu0 %vm16946_vm4, %v16385_v17  ;;  %v16951_v1 = vld [vmem:[#allocation93_spill] sm:$0xff] }
 0x34b   :  { %4578 = vmatpush2.msra.mxu1 %v16418_v30  ;;  %4281 = vmatpush2.msra.mxu0 %v16418_v30  ;;  %vm16952_vm13 = vnez %v16951_v1 }
 0x34c   :  { %4584 = vmatprep.subr.mxu1 %v16947_v23  ;;  %10230 = vmatprep.subr.msk.mxu0 %vm16949_vm3, %v16385_v17  ;;  %v16954_v23 = vld [vmem:[#allocation98_spill] sm:$0xff] }
 0x34d   :  { %4590 = vmatpush2.msra.mxu1 %v16418_v30  ;;  %4285 = vmatpush2.msra.mxu0 %v16418_v30  ;;  %vm16955_vm4 = vnez %v16954_v23 }
 0x34e   :  { %4596 = vmatprep.subr.mxu1 %v16950_v61  ;;  %10231 = vmatprep.subr.msk.mxu0 %vm16952_vm13, %v16385_v17  ;;  %v16957_v61 = vld [vmem:[#allocation104_spill] sm:$0xff] }
 0x34f   :  { %4602 = vmatpush2.msra.mxu1 %v16418_v30  ;;  %4289 = vmatpush2.msra.mxu0 %v16418_v30  ;;  %vm16958_vm3 = vnez %v16957_v61 }
 0x350   :  { %4608 = vmatprep.subr.mxu1 %v16953_v38  ;;  %10232 = vmatprep.subr.msk.mxu0 %vm16955_vm4, %v16385_v17  ;;  %v16960_v38 = vld [vmem:[#allocation109_spill] sm:$0xff] }
 0x351   :  { %4614 = vmatpush2.msra.mxu1 %v16418_v30  ;;  %4293 = vmatpush2.msra.mxu0 %v16418_v30  ;;  %vm16961_vm13 = vnez %v16960_v38 }
 0x352   :  { %4620 = vmatprep.subr.mxu1 %v16956_v40  ;;  %10233 = vmatprep.subr.msk.mxu0 %vm16958_vm3, %v16385_v17  ;;  %v16963_v40 = vld [vmem:[#allocation115_spill] sm:$0xff] }
 0x353   :  { %4626 = vmatpush2.msra.mxu1 %v16418_v30  ;;  %4297 = vmatpush2.msra.mxu0 %v16418_v30  ;;  %vm16964_vm4 = vnez %v16963_v40 }
 0x354   :  { %4632 = vmatprep.subr.mxu1 %v16959_v53  ;;  %10234 = vmatprep.subr.msk.mxu0 %vm16961_vm13, %v16385_v17  ;;  %v16966_v53 = vld [vmem:[#allocation120_spill] sm:$0xff] }
 0x355   :  { %4638 = vmatpush2.msra.mxu1 %v16418_v30  ;;  %4301 = vmatpush2.msra.mxu0 %v16418_v30  ;;  %vm16967_vm3 = vnez %v16966_v53 }
 0x356   :  { %4644 = vmatprep.subr.mxu1 %v16962_v50  ;;  %10235 = vmatprep.subr.msk.mxu0 %vm16964_vm4, %v16385_v17  ;;  %v16969_v50 = vld [vmem:[#allocation121_spill] sm:$0xff] }
 0x357   :  { %4650 = vmatpush2.msra.mxu1 %v16418_v30  ;;  %4305 = vmatpush2.msra.mxu0 %v16418_v30  ;;  %vm16970_vm13 = vnez %v16969_v50 }
 0x358   :  { %4656 = vmatprep.subr.mxu1 %v16965_v29  ;;  %10236 = vmatprep.subr.msk.mxu0 %vm16967_vm3, %v16385_v17  ;;  %v16972_v29 = vld [vmem:[#allocation126_spill] sm:$0xff] }
 0x359   :  { %4662 = vmatpush2.msra.mxu1 %v16418_v30  ;;  %4309 = vmatpush2.msra.mxu0 %v16418_v30  ;;  %vm16973_vm4 = vnez %v16972_v29 }
 0x35a   :  { %4668 = vmatprep.subr.mxu1 %v16968_v36  ;;  %10237 = vmatprep.subr.msk.mxu0 %vm16970_vm13, %v16385_v17  ;;  %v16975_v36 = vld [vmem:[#allocation131_spill] sm:$0xff] }
 0x35b   :  { %4674 = vmatpush2.msra.mxu1 %v16418_v30  ;;  %4313 = vmatpush2.msra.mxu0 %v16418_v30  ;;  %vm16976_vm3 = vnez %v16975_v36 }
 0x35c   :  { %4680 = vmatprep.subr.mxu1 %v16971_v26  ;;  %10238 = vmatprep.subr.msk.mxu0 %vm16973_vm4, %v16385_v17  ;;  %v16978_v26 = vld [vmem:[#allocation136_spill] sm:$0xff] }
 0x35d   :  { %4686 = vmatpush2.msra.mxu1 %v16418_v30  ;;  %4317 = vmatpush2.msra.mxu0 %v16418_v30  ;;  %vm16979_vm13 = vnez %v16978_v26  ;;  %v17155_v26 = vld [vmem:[#allocation117_spill] sm:$0xff] }
 0x35e   :  { %4692 = vmatprep.subr.mxu1 %v16974_v16  ;;  %10239 = vmatprep.subr.msk.mxu0 %vm16976_vm3, %v16385_v17  ;;  %v16981_v16 = vld [vmem:[#allocation141_spill] sm:$0xff] }
 0x35f   :  { %4698 = vmatpush2.msra.mxu1 %v16418_v30  ;;  %4321 = vmatpush2.msra.mxu0 %v16418_v30  ;;  %vm16982_vm4 = vnez %v16981_v16  ;;  %v17154_v16 = vld [vmem:[#allocation246_spill] sm:$0xff] }
 0x360   :  { %4704 = vmatprep.subr.mxu1 %v16977_v28  ;;  %10240 = vmatprep.subr.msk.mxu0 %vm16979_vm13, %v16385_v17  ;;  %v16984_v28 = vld [vmem:[#allocation145_spill] sm:$0xff] }
 0x361   :  { %4710 = vmatpush2.msra.mxu1 %v16418_v30  ;;  %4325 = vmatpush2.msra.mxu0 %v16418_v30  ;;  %vm16985_vm3 = vnez %v16984_v28  ;;  %v17151_v28 = vld [vmem:[#allocation245_spill] sm:$0xff] }
 0x362   :  { %4716 = vmatprep.subr.mxu1 %v16980_v18  ;;  %10241 = vmatprep.subr.msk.mxu0 %vm16982_vm4, %v16385_v17  ;;  %v16986_v18 = vld [vmem:[#allocation11_spill] sm:$0xff] }
 0x363   :  { %4722 = vmatpush2.msra.mxu1 %v16418_v30  ;;  %4329 = vmatpush2.msra.mxu0 %v16418_v30 }
 0x364   :  { %4728 = vmatprep.subr.mxu1 %v16983_v9  ;;  %10242 = vmatprep.subr.msk.mxu0 %vm16985_vm3, %v16385_v17 }
 0x365   :  { %4734 = vmatpush2.msra.mxu1 %v16418_v30  ;;  %4333 = vmatpush2.msra.mxu0 %v16418_v30 }
 0x366   :  { %10243 = vmatprep.subr.msk.mxu1 %vm16897_vm11, %v16385_v17  ;;  %4746 = vmatprep.subr.mxu0 %v16986_v18 }
 0x3ca   :  { %v3716_v35 = vpop.f32.mrf.mxu0 }
 0x3cc   :  { %v3718_v32 = vpop.f32.mrf.mxu0 }
 0x3ce   :  { %v3727_v14 = vpop.f32.mrf.mxu0 }
 0x3d0   :  { %v3729_v58 = vpop.f32.mrf.mxu0 }
 0x3d2   :  { %v3738_v62 = vpop.f32.mrf.mxu0  ;;  %v3820_v9 = vpop.f32.mrf.mxu1 }
 0x3d4   :  { %v3740_v54 = vpop.f32.mrf.mxu0  ;;  %v3822_v25 = vpop.f32.mrf.mxu1 }
 0x3d6   :  { %v3827_v57 = vpop.f32.mrf.mxu1  ;;  %v3911_v56 = vpop.f32.mrf.mxu0 }
 0x3d7   :  { %v3828_v27 = vadd.f32 %v3827_v57, %v3727_v14  ;;  %v3821_v14 = vadd.f32 %v3820_v9, %v3716_v35 }
 0x3d8   :  { %v3829_v49 = vpop.f32.mrf.mxu1  ;;  %v3913_v33 = vpop.f32.mrf.mxu0 }
 0x3d9   :  { %v3830_v15 = vadd.f32 %v3829_v49, %v3729_v58  ;;  %v3823_v58 = vadd.f32 %v3822_v25, %v3718_v32  ;;  %v3912_v51 = vadd.f32 %v3911_v56, %v3821_v14 }
 0x3da   :  { %v3834_v10 = vpop.f32.mrf.mxu1  ;;  %v3919_v44 = vpop.f32.mrf.mxu0 }
 0x3db   :  { %v3835_v11 = vadd.f32 %v3834_v10, %v3738_v62  ;;  %v3920_v63 = vadd.f32 %v3919_v44, %v3828_v27  ;;  %v3914_v10 = vadd.f32 %v3913_v33, %v3823_v58 }
 0x3dc   :  { %v3836_v7 = vpop.f32.mrf.mxu1  ;;  %v3921_v18 = vpop.f32.mrf.mxu0 }
 0x3dd   :  { %v3837_v4 = vadd.f32 %v3836_v7, %v3740_v54  ;;  %v3922_v52 = vadd.f32 %v3921_v18, %v3830_v15 }
 0x3de   :  { %v3927_v22 = vpop.f32.mrf.mxu0  ;;  %v4003_v37 = vpop.f32.mrf.mxu1 }
 0x3df   :  { %v3928_v43 = vadd.f32 %v3927_v22, %v3835_v11  ;;  %v4004_v7 = vadd.f32 %v4003_v37, %v3912_v51 }
 0x3e0   :  { %v3929_v24 = vpop.f32.mrf.mxu0  ;;  %v4005_v8 = vpop.f32.mrf.mxu1 }
 0x3e1   :  { %v3930_v42 = vadd.f32 %v3929_v24, %v3837_v4  ;;  %v4006_v11 = vadd.f32 %v4005_v8, %v3914_v10  ;;  %v16988_v10 = vld [vmem:[#allocation27_spill] sm:$0xff] }
 0x3e2   :  { %v4012_v45 = vpop.f32.mrf.mxu1  ;;  %v4099_v20 = vpop.f32.mrf.mxu0 }
 0x3e3   :  { %v4013_v57 = vadd.f32 %v4012_v45, %v3920_v63  ;;  %v4100_v31 = vadd.f32 %v4099_v20, %v4004_v7  ;;  %v16989_v7 = vld [vmem:[#allocation30_spill] sm:$0xff] }
 0x3e4   :  { %v4014_v21 = vpop.f32.mrf.mxu1  ;;  %v4101_v49 = vpop.f32.mrf.mxu0 }
 0x3e5   :  { %v4015_v62 = vadd.f32 %v4014_v21, %v3922_v52  ;;  %v4102_v63 = vadd.f32 %v4101_v49, %v4006_v11  ;;  %v16994_v11 = vld [vmem:[#allocation50_spill] sm:$0xff] }
 0x3e6   :  { %v4021_v27 = vpop.f32.mrf.mxu1  ;;  %v4106_v44 = vpop.f32.mrf.mxu0 }
 0x3e7   :  { %v4022_v15 = vadd.f32 %v4021_v27, %v3928_v43  ;;  %v4107_v54 = vadd.f32 %v4106_v44, %v4013_v57  ;;  %v16987_v44 = vld [vmem:[#allocation20_spill] sm:$0xff] }
 0x3e8   :  { %v4023_v18 = vpop.f32.mrf.mxu1  ;;  %v4108_v22 = vpop.f32.mrf.mxu0 }
 0x3e9   :  { %v13323_v24 = vadd.f32 %v4023_v18, %v3930_v42  ;;  %v4109_v4 = vadd.f32 %v4108_v22, %v4015_v62  ;;  %v16992_v18 = vld [vmem:[#allocation43_spill] sm:$0xff]  ;;  %v16993_v22 = vld [vmem:[#allocation46_spill] sm:$0xff] }
 0x3ea   :  { %v4113_v35 = vpop.f32.mrf.mxu0  ;;  %v4187_v45 = vpop.f32.mrf.mxu1 }
 0x3eb   :  { %v4114_v9 = vadd.f32 %v4113_v35, %v4022_v15  ;;  %v4188_v25 = vadd.f32 %v4187_v45, %v4100_v31  ;;  %v16990_v15 = vld [vmem:[#allocation34_spill] sm:$0xff]  ;;  %v16999_v45 = vld [vmem:[#allocation61_spill] sm:$0xff] }
 0x3ec   :  { %v4189_v56 = vpop.f32.mrf.mxu1  ;;  %v16997_v35 = vld [vmem:[#allocation58_spill] sm:$0xff] }
 0x3ed   :  { %v13325_v21 = vand.u32 4294901760, %v4188_v25  ;;  %v4190_v52 = vadd.f32 %v4189_v56, %v4102_v63  ;;  %v17002_v63 = vld [vmem:[#allocation64_spill] sm:$0xff]  ;;  %v17008_v56 = vld [vmem:[#allocation85_spill] sm:$0xff] }
 0x3ee   :  { %v4194_v33 = vpop.f32.mrf.mxu1 }
 0x3ef   :  { %v13328_v43 = vsub.f32 %v4188_v25, %v13325_v21  ;;  %v13330_v51 = vand.u32 4294901760, %v4190_v52  ;;  %v13332_v8 = vadd.f32 %v4194_v33, %v4107_v54  ;;  %v16991_v54 = vld [vmem:[#allocation37_spill] sm:$0xff]  ;;  %v17006_v25 = vld [vmem:[#allocation80_spill] sm:$0xff] }
 0x3f0   :  { %v4196_v42 = vpop.f32.mrf.mxu1  ;;  %v17011_v33 = vld [vmem:[#allocation92_spill] sm:$0xff] }
 0x3f1   :  { %v16212_v20 = vand.u32 4294901760, %v13328_v43  ;;  %v4335_v37 = vsub.f32 %v4190_v52, %v13330_v51  ;;  %v13336_v32 = vadd.f32 %v4196_v42, %v4109_v4  ;;  %4736 = vmatprep.mubr.f32.mxu1 %v13330_v51  ;;  %v16995_v4 = vld [vmem:[#allocation54_spill] sm:$0xff]  ;;  %v17013_v42 = vld [vmem:[#allocation97_spill] sm:$0xff] }
 0x3f2   :  { %v4201_v31 = vpop.f32.mrf.mxu1  ;;  %4738 = vmatmul.mubr.f32.vlgmr.msra.gmra.mxu1 %v13325_v21  ;;  %v17009_v52 = vld [vmem:[#allocation86_spill] sm:$0xff] }
 0x3f3   :  { %v13340_v14 = vadd.f32 %v4201_v31, %v4114_v9  ;;  %4950 = vmatpush1.msra.mxu1 %v16418_v30  ;;  %v4336_v57 = vand.u32 4294901760, %v4335_v37  ;;  %v4343_v49 = vsub.f32 %v13328_v43, %v16212_v20  ;;  %v17004_v9 = vld [vmem:[#allocation76_spill] sm:$0xff] }
 0x3f4   :  { %10244 = vmatprep.subr.msk.mxu1 %vm16900_vm0, %v16385_v17  ;;  %v17017_v31 = vld [vmem:[#allocation108_spill] sm:$0xff] }
 0x3f5   :  { %4954 = vmatpush1.msra.mxu1 %v16418_v30  ;;  %5078 = vmatprep.mubr.f32.mxu1 %v4336_v57  ;;  %v4337_v58 = vsub.f32 %v4335_v37, %v4336_v57  ;;  %v4344_v27 = vand.u32 4294901760, %v4343_v49  ;;  %v17019_v57 = vld [vmem:[#allocation114_spill] sm:$0xff]  ;;  %v17021_v49 = vld [vmem:[#allocation119_spill] sm:$0xff]  ;;  %v17026_v20 = vld [vmem:[#allocation140_spill] sm:$0xff] }
 0x3f6   :  { %4956 = vmatprep.subr.mxu1 %v16418_v30 }
 0x3f7   :  { %10245 = vmatpush1.msk.msra.mxu1 %vm16903_vm5, %v16385_v17  ;;  %v4338_v62 = vand.u32 4294901760, %v4337_v58  ;;  %v17023_v58 = vld [vmem:[#allocation125_spill] sm:$0xff] }
 0x3f8   :  { %4960 = vmatprep.subr.mxu1 %v16418_v30 }
 0x3f9   :  { %10246 = vmatpush1.msk.msra.mxu1 %vm16906_vm14, %v16385_v17  ;;  %4339 = vmatprep.mubr.f32.mxu0 %v4338_v62  ;;  %v17024_v62 = vld [vmem:[#allocation130_spill] sm:$0xff] }
 0x3fa   :  { %4964 = vmatprep.subr.mxu1 %v16418_v30  ;;  %4345 = vmatmul.mubr.f32.vlgmr.msra.gmra.mxu0 %v4344_v27  ;;  %v17025_v27 = vld [vmem:[#allocation135_spill] sm:$0xff] }
 0x3fb   :  { %4749 = vmatpush1.msra.mxu0 %v16418_v30  ;;  %10247 = vmatpush1.msk.msra.mxu1 %vm16910_vm15, %v16385_v17 }
 0x3fc   :  { %4752 = vmatprep.subr.mxu0 %v16987_v44  ;;  %4938 = vmatprep.mubr.f32.mxu0 %v4335_v37  ;;  %v17015_v37 = vld [vmem:[#allocation103_spill] sm:$0xff]  ;;  %v17149_v44 = vld [vmem:[#allocation110_spill] sm:$0xff] }
 0x3fd   :  { %4968 = vmatprep.subr.mxu1 %v16418_v30  ;;  %4755 = vmatpush1.msra.mxu0 %v16418_v30 }
 0x3fe   :  { %10248 = vmatpush1.msk.msra.mxu1 %vm16913_vm10, %v16385_v17  ;;  %4758 = vmatprep.subr.mxu0 %v16418_v30 }
 0x3ff   :  { %4972 = vmatprep.subr.mxu1 %v16418_v30  ;;  %4761 = vmatpush1.msra.mxu0 %v16988_v10  ;;  %v17146_v10 = vld [vmem:[#allocation105_spill] sm:$0xff] }
 0x400   :  { %10249 = vmatpush1.msk.msra.mxu1 %vm16916_vm8, %v16385_v17  ;;  %4764 = vmatprep.subr.mxu0 %v16418_v30 }
 0x401   :  { %4976 = vmatprep.subr.mxu1 %v16418_v30  ;;  %4767 = vmatpush1.msra.mxu0 %v16989_v7  ;;  %v17145_v7 = vld [vmem:[#allocation242_spill] sm:$0xff] }
 0x402   :  { %10250 = vmatpush1.msk.msra.mxu1 %vm16919_vm6, %v16385_v17  ;;  %4770 = vmatprep.subr.mxu0 %v16418_v30 }
 0x403   :  { %4980 = vmatprep.subr.mxu1 %v16418_v30  ;;  %4773 = vmatpush1.msra.mxu0 %v16990_v15  ;;  %v17142_v15 = vld [vmem:[#allocation240_spill] sm:$0xff] }
 0x404   :  { %10251 = vmatpush1.msk.msra.mxu1 %vm16922_vm9, %v16385_v17  ;;  %4776 = vmatprep.subr.mxu0 %v16418_v30 }
 0x405   :  { %4984 = vmatprep.subr.mxu1 %v16418_v30  ;;  %4779 = vmatpush1.msra.mxu0 %v16991_v54  ;;  %v17139_v54 = vld [vmem:[#allocation237_spill] sm:$0xff] }
 0x406   :  { %10252 = vmatpush1.msk.msra.mxu1 %vm16925_vm1, %v16385_v17  ;;  %4782 = vmatprep.subr.mxu0 %v16418_v30 }
 0x407   :  { %4988 = vmatprep.subr.mxu1 %v16418_v30  ;;  %4785 = vmatpush1.msra.mxu0 %v16992_v18  ;;  %v17136_v18 = vld [vmem:[#allocation234_spill] sm:$0xff] }
 0x408   :  { %10253 = vmatpush1.msk.msra.mxu1 %vm16928_vm7, %v16385_v17  ;;  %4788 = vmatprep.subr.mxu0 %v16418_v30  ;;  %vm16996_vm7 = vnez %v16936_v2 }
 0x409   :  { %4992 = vmatprep.subr.mxu1 %v16418_v30  ;;  %4791 = vmatpush1.msra.mxu0 %v16993_v22  ;;  %v17133_v22 = vld [vmem:[#allocation231_spill] sm:$0xff] }
 0x40a   :  { %10254 = vmatpush1.msk.msra.mxu1 %vm16931_vm12, %v16385_v17  ;;  %4794 = vmatprep.subr.mxu0 %v16418_v30  ;;  %vm16998_vm12 = vnez %v16939_v59 }
 0x40b   :  { %4996 = vmatprep.subr.mxu1 %v16418_v30  ;;  %4797 = vmatpush1.msra.mxu0 %v16994_v11  ;;  %v17130_v11 = vld [vmem:[#allocation228_spill] sm:$0xff] }
 0x40c   :  { %10255 = vmatpush1.msk.msra.mxu1 %vm16934_vm2, %v16385_v17  ;;  %4800 = vmatprep.subr.mxu0 %v16418_v30  ;;  %vm17000_vm2 = vnez %v16942_v3 }
 0x40d   :  { %5000 = vmatprep.subr.mxu1 %v16418_v30  ;;  %4803 = vmatpush1.msra.mxu0 %v16995_v4  ;;  %v17127_v4 = vld [vmem:[#allocation225_spill] sm:$0xff] }
 0x40e   :  { %10256 = vmatpush1.msk.msra.mxu1 %vm16996_vm7, %v16385_v17  ;;  %4806 = vmatprep.subr.mxu0 %v16418_v30  ;;  %vm17001_vm7 = vnez %v16945_v19 }
 0x40f   :  { %5004 = vmatprep.subr.mxu1 %v16418_v30  ;;  %4809 = vmatpush1.msra.mxu0 %v16997_v35  ;;  %v17124_v35 = vld [vmem:[#allocation222_spill] sm:$0xff] }
 0x410   :  { %10257 = vmatpush1.msk.msra.mxu1 %vm16998_vm12, %v16385_v17  ;;  %4812 = vmatprep.subr.mxu0 %v16418_v30  ;;  %vm17003_vm12 = vnez %v16948_v13 }
 0x411   :  { %5008 = vmatprep.subr.mxu1 %v16418_v30  ;;  %4815 = vmatpush1.msra.mxu0 %v16999_v45  ;;  %v17120_v45 = vld [vmem:[#allocation216_spill] sm:$0xff] }
 0x412   :  { %10258 = vmatpush1.msk.msra.mxu1 %vm17000_vm2, %v16385_v17  ;;  %4818 = vmatprep.subr.mxu0 %v16418_v30  ;;  %vm17005_vm2 = vnez %v16951_v1 }
 0x413   :  { %10259 = vmatprep.subr.msk.mxu1 %vm17001_vm7, %v16385_v17  ;;  %4821 = vmatpush1.msra.mxu0 %v17002_v63  ;;  %vm17007_vm7 = vnez %v16954_v23  ;;  %v17118_v63 = vld [vmem:[#allocation73_spill] sm:$0xff] }
 0x414   :  { %5022 = vmatpush2.msra.mxu1 %v16418_v30  ;;  %4824 = vmatprep.subr.mxu0 %v16418_v30 }
 0x415   :  { %10260 = vmatprep.subr.msk.mxu1 %vm17003_vm12, %v16385_v17  ;;  %4827 = vmatpush1.msra.mxu0 %v17004_v9  ;;  %vm17010_vm12 = vnez %v16957_v61  ;;  %v17117_v9 = vld [vmem:[#allocation214_spill] sm:$0xff] }
 0x416   :  { %5026 = vmatpush2.msra.mxu1 %v16418_v30  ;;  %4830 = vmatprep.subr.mxu0 %v16418_v30 }
 0x417   :  { %10261 = vmatprep.subr.msk.mxu1 %vm17005_vm2, %v16385_v17  ;;  %4833 = vmatpush1.msra.mxu0 %v17006_v25  ;;  %vm17012_vm2 = vnez %v16960_v38  ;;  %v17115_v25 = vld [vmem:[#allocation40_spill] sm:$0xff] }
 0x418   :  { %5030 = vmatpush2.msra.mxu1 %v16418_v30  ;;  %4836 = vmatprep.subr.mxu0 %v16418_v30 }
 0x419   :  { %10262 = vmatprep.subr.msk.mxu1 %vm17007_vm7, %v16385_v17  ;;  %4839 = vmatpush1.msra.mxu0 %v17008_v56  ;;  %vm17014_vm7 = vnez %v16963_v40  ;;  %v17109_v56 = vld [vmem:[#allocation205_spill] sm:$0xff] }
 0x41a   :  { %5034 = vmatpush2.msra.mxu1 %v16418_v30  ;;  %4854 = vmatprep.subr.mxu0 %v17009_v52  ;;  %v17106_v52 = vld [vmem:[#allocation202_spill] sm:$0xff] }
 0x41b   :  { %10263 = vmatprep.subr.msk.mxu1 %vm17010_vm12, %v16385_v17  ;;  %4857 = vmatpush2.msra.mxu0 %v16418_v30  ;;  %vm17016_vm12 = vnez %v16966_v53 }
 0x41c   :  { %5038 = vmatpush2.msra.mxu1 %v16418_v30  ;;  %4860 = vmatprep.subr.mxu0 %v17011_v33  ;;  %v17103_v33 = vld [vmem:[#allocation199_spill] sm:$0xff] }
 0x41d   :  { %10264 = vmatprep.subr.msk.mxu1 %vm17012_vm2, %v16385_v17  ;;  %4863 = vmatpush2.msra.mxu0 %v16418_v30  ;;  %vm17018_vm2 = vnez %v16969_v50  ;;  %v17165_v50 = vld [vmem:[#allocation137_spill] sm:$0xff] }
 0x41e   :  { %5042 = vmatpush2.msra.mxu1 %v16418_v30  ;;  %4866 = vmatprep.subr.mxu0 %v17013_v42  ;;  %v17100_v42 = vld [vmem:[#allocation196_spill] sm:$0xff] }
 0x41f   :  { %10265 = vmatprep.subr.msk.mxu1 %vm17014_vm7, %v16385_v17  ;;  %4869 = vmatpush2.msra.mxu0 %v16418_v30  ;;  %vm17020_vm7 = vnez %v16972_v29  ;;  %v17161_v29 = vld [vmem:[#allocation127_spill] sm:$0xff] }
 0x420   :  { %5046 = vmatpush2.msra.mxu1 %v16418_v30  ;;  %4872 = vmatprep.subr.mxu0 %v17015_v37  ;;  %v17097_v37 = vld [vmem:[#allocation194_spill] sm:$0xff] }
 0x421   :  { %10266 = vmatprep.subr.msk.mxu1 %vm17016_vm12, %v16385_v17  ;;  %4875 = vmatpush2.msra.mxu0 %v16418_v30  ;;  %vm17022_vm12 = vnez %v16975_v36  ;;  %v17158_v36 = vld [vmem:[#allocation122_spill] sm:$0xff] }
 0x422   :  { %5050 = vmatpush2.msra.mxu1 %v16418_v30  ;;  %4878 = vmatprep.subr.mxu0 %v17017_v31  ;;  %v17078_v31 = vld [vmem:[#allocation153_spill] sm:$0xff] }
 0x423   :  { %10267 = vmatprep.subr.msk.mxu1 %vm17018_vm2, %v16385_v17  ;;  %4881 = vmatpush2.msra.mxu0 %v16418_v30 }
 0x424   :  { %5054 = vmatpush2.msra.mxu1 %v16418_v30  ;;  %4884 = vmatprep.subr.mxu0 %v17019_v57 }
 0x425   :  { %10268 = vmatprep.subr.msk.mxu1 %vm17020_vm7, %v16385_v17  ;;  %4887 = vmatpush2.msra.mxu0 %v16418_v30 }
 0x426   :  { %5058 = vmatpush2.msra.mxu1 %v16418_v30  ;;  %4890 = vmatprep.subr.mxu0 %v17021_v49 }
 0x427   :  { %10269 = vmatprep.subr.msk.mxu1 %vm17022_vm12, %v16385_v17  ;;  %4893 = vmatpush2.msra.mxu0 %v16418_v30 }
 0x428   :  { %5062 = vmatpush2.msra.mxu1 %v16418_v30  ;;  %4896 = vmatprep.subr.mxu0 %v17023_v58  ;;  %v17028_v58 = vld [vmem:[#allocation9_spill] sm:$0xff] }
 0x429   :  { %10270 = vmatprep.subr.msk.mxu1 %vm16979_vm13, %v16385_v17  ;;  %4899 = vmatpush2.msra.mxu0 %v16418_v30 }
 0x42a   :  { %5066 = vmatpush2.msra.mxu1 %v16418_v30  ;;  %4902 = vmatprep.subr.mxu0 %v17024_v62  ;;  %v17027_v62 = vand.u32 4294901760, %v13328_v43 }
 0x42b   :  { %10271 = vmatprep.subr.msk.mxu1 %vm16982_vm4, %v16385_v17  ;;  %4905 = vmatpush2.msra.mxu0 %v16418_v30 }
 0x42c   :  { %5070 = vmatpush2.msra.mxu1 %v16418_v30  ;;  %4908 = vmatprep.subr.mxu0 %v17025_v27  ;;  %v17029_v27 = vld [vmem:[#allocation144_spill] sm:$0xff] }
 0x42d   :  { %10272 = vmatprep.subr.msk.mxu1 %vm16985_vm3, %v16385_v17  ;;  %4911 = vmatpush2.msra.mxu0 %v16418_v30 }
 0x42e   :  { %5074 = vmatpush2.msra.mxu1 %v16418_v30  ;;  %4914 = vmatprep.subr.mxu0 %v17026_v20  ;;  %v17031_v20 = vld [vmem:[#allocation151_spill] sm:$0xff] }
 0x42f   :  { %5082 = vmatmul.mubr.f32.vlgmr.msra.gmra.mxu1 %v17027_v62  ;;  %10273 = vmatprep.subr.msk.mxu1 %vm16897_vm11, %v16385_v17  ;;  %v17030_v62 = vld [vmem:[#allocation148_spill] sm:$0xff] }
 0x430   :  { %4917 = vmatpush2.msra.mxu0 %v16418_v30  ;;  %5356 = vmatpush1.msra.mxu1 %v16418_v30 }
 0x431   :  { %5482 = vmatprep.mubr.f32.mxu1 %v13330_v51  ;;  %4920 = vmatprep.subr.mxu0 %v17029_v27 }
 0x432   :  { %10274 = vmatprep.subr.msk.mxu1 %vm16900_vm0, %v16385_v17  ;;  %4923 = vmatpush2.msra.mxu0 %v16418_v30 }
 0x433   :  { %5360 = vmatpush1.msra.mxu1 %v16418_v30  ;;  %4926 = vmatprep.subr.mxu0 %v17030_v62  ;;  %v17032_v62 = vld [vmem:[#allocation14_spill] sm:$0xff] }
 0x434   :  { %5362 = vmatprep.subr.mxu1 %v16418_v30  ;;  %4929 = vmatpush2.msra.mxu0 %v16418_v30 }
 0x435   :  { %10275 = vmatpush1.msk.msra.mxu1 %vm16903_vm5, %v16385_v17  ;;  %4932 = vmatprep.subr.mxu0 %v17031_v20  ;;  %v17033_v20 = vld [vmem:[#allocation26_spill] sm:$0xff]  ;;  %vm17119_vm5 = vnez %v17118_v63 }
 0x436   :  { %5366 = vmatprep.subr.mxu1 %v16418_v30  ;;  %4935 = vmatpush2.msra.mxu0 %v16418_v30 }
 0x437   :  { %10276 = vmatpush1.msk.msra.mxu1 %vm16906_vm14, %v16385_v17  ;;  %4941 = vmatmul.mubr.f32.vlgmr.msra.gmra.mxu0 %v13328_v43  ;;  %v17034_v43 = vld [vmem:[#allocation33_spill] sm:$0xff]  ;;  %vm17116_vm14 = vnez %v17115_v25 }
 0x438   :  { %5091 = vmatprep.subr.mxu0 %v17032_v62  ;;  %5370 = vmatprep.subr.mxu1 %v16418_v30  ;;  %v4203_v62 = vpop.f32.mrf.mxu1 }
 0x439   :  { %5095 = vmatpush1.msra.mxu0 %v16418_v30  ;;  %5345 = vmatprep.mubr.f32.mxu0 %v13330_v51  ;;  %v17035_v51 = vld [vmem:[#allocation38_spill] sm:$0xff] }
 0x43a   :  { %10277 = vmatpush1.msk.msra.mxu1 %vm16910_vm15, %v16385_v17  ;;  %5099 = vmatprep.subr.mxu0 %v17033_v20  ;;  %v17036_v20 = vld [vmem:[#allocation42_spill] sm:$0xff] }
 0x43b   :  { %5374 = vmatprep.subr.mxu1 %v16418_v30  ;;  %5103 = vmatpush1.msra.mxu0 %v16418_v30 }
 0x43c   :  { %10278 = vmatpush1.msk.msra.mxu1 %vm16913_vm10, %v16385_v17  ;;  %5107 = vmatprep.subr.mxu0 %v16418_v30 }
 0x43d   :  { %5378 = vmatprep.subr.mxu1 %v16418_v30  ;;  %5111 = vmatpush1.msra.mxu0 %v17034_v43  ;;  %v17037_v43 = vld [vmem:[#allocation45_spill] sm:$0xff] }
 0x43e   :  { %10279 = vmatpush1.msk.msra.mxu1 %vm16916_vm8, %v16385_v17  ;;  %5115 = vmatprep.subr.mxu0 %v16418_v30 }
 0x43f   :  { %5382 = vmatprep.subr.mxu1 %v16418_v30  ;;  %5119 = vmatpush1.msra.mxu0 %v17035_v51  ;;  %v17038_v51 = vld [vmem:[#allocation49_spill] sm:$0xff] }
 0x440   :  { %10280 = vmatpush1.msk.msra.mxu1 %vm16919_vm6, %v16385_v17  ;;  %5123 = vmatprep.subr.mxu0 %v16418_v30  ;;  %vm17039_vm6 = vnez %v16927_v5 }
 0x441   :  { %5386 = vmatprep.subr.mxu1 %v16418_v30  ;;  %5127 = vmatpush1.msra.mxu0 %v17036_v20  ;;  %v17040_v20 = vld [vmem:[#allocation53_spill] sm:$0xff] }
 0x442   :  { %10281 = vmatpush1.msk.msra.mxu1 %vm16922_vm9, %v16385_v17  ;;  %5131 = vmatprep.subr.mxu0 %v16418_v30  ;;  %vm17041_vm9 = vnez %v16930_v39 }
 0x443   :  { %5390 = vmatprep.subr.mxu1 %v16418_v30  ;;  %5135 = vmatpush1.msra.mxu0 %v17037_v43  ;;  %v17042_v43 = vld [vmem:[#allocation57_spill] sm:$0xff] }
 0x444   :  { %10282 = vmatpush1.msk.msra.mxu1 %vm16925_vm1, %v16385_v17  ;;  %5139 = vmatprep.subr.mxu0 %v16418_v30  ;;  %vm17043_vm1 = vnez %v16933_v6 }
 0x445   :  { %5394 = vmatprep.subr.mxu1 %v16418_v30  ;;  %5143 = vmatpush1.msra.mxu0 %v17038_v51  ;;  %v17044_v51 = vld [vmem:[#allocation60_spill] sm:$0xff] }
 0x446   :  { %10283 = vmatpush1.msk.msra.mxu1 %vm17039_vm6, %v16385_v17  ;;  %5147 = vmatprep.subr.mxu0 %v16418_v30  ;;  %vm17045_vm6 = vnez %v16936_v2 }
 0x447   :  { %5398 = vmatprep.subr.mxu1 %v16418_v30  ;;  %5151 = vmatpush1.msra.mxu0 %v17040_v20  ;;  %v17046_v20 = vld [vmem:[#allocation63_spill] sm:$0xff] }
 0x448   :  { %10284 = vmatpush1.msk.msra.mxu1 %vm17041_vm9, %v16385_v17  ;;  %5155 = vmatprep.subr.mxu0 %v16418_v30  ;;  %vm17047_vm9 = vnez %v16939_v59 }
 0x449   :  { %5402 = vmatprep.subr.mxu1 %v16418_v30  ;;  %5159 = vmatpush1.msra.mxu0 %v17042_v43  ;;  %v17048_v43 = vld [vmem:[#allocation66_spill] sm:$0xff] }
 0x44a   :  { %10285 = vmatpush1.msk.msra.mxu1 %vm17043_vm1, %v16385_v17  ;;  %5163 = vmatprep.subr.mxu0 %v16418_v30  ;;  %vm17049_vm1 = vnez %v16942_v3 }
 0x44b   :  { %5406 = vmatprep.subr.mxu1 %v16418_v30  ;;  %5167 = vmatpush1.msra.mxu0 %v17044_v51  ;;  %v17055_v51 = vld [vmem:[#allocation84_spill] sm:$0xff] }
 0x44c   :  { %10286 = vmatpush1.msk.msra.mxu1 %vm17045_vm6, %v16385_v17  ;;  %5171 = vmatprep.subr.mxu0 %v16418_v30  ;;  %vm17050_vm6 = vnez %v16945_v19 }
 0x44d   :  { %5410 = vmatprep.subr.mxu1 %v16418_v30  ;;  %5175 = vmatpush1.msra.mxu0 %v17046_v20  ;;  %v17051_v20 = vld [vmem:[#allocation68_spill] sm:$0xff] }
 0x44e   :  { %10287 = vmatpush1.msk.msra.mxu1 %vm17047_vm9, %v16385_v17  ;;  %5179 = vmatprep.subr.mxu0 %v16418_v30  ;;  %vm17052_vm9 = vnez %v16948_v13 }
 0x44f   :  { %5414 = vmatprep.subr.mxu1 %v16418_v30  ;;  %5183 = vmatpush1.msra.mxu0 %v17048_v43  ;;  %v17053_v43 = vld [vmem:[#allocation79_spill] sm:$0xff] }
 0x450   :  { %10288 = vmatpush1.msk.msra.mxu1 %vm17049_vm1, %v16385_v17  ;;  %5187 = vmatprep.subr.mxu0 %v16418_v30  ;;  %vm17054_vm1 = vnez %v16951_v1 }
 0x451   :  { %10289 = vmatprep.subr.msk.mxu1 %vm17050_vm6, %v16385_v17  ;;  %5191 = vmatpush1.msra.mxu0 %v17051_v20  ;;  %vm17056_vm6 = vnez %v16954_v23  ;;  %v17057_v20 = vld [vmem:[#allocation90_spill] sm:$0xff] }
 0x452   :  { %5428 = vmatpush2.msra.mxu1 %v16418_v30  ;;  %5195 = vmatprep.subr.mxu0 %v16418_v30 }
 0x453   :  { %10290 = vmatprep.subr.msk.mxu1 %vm17052_vm9, %v16385_v17  ;;  %5199 = vmatpush1.msra.mxu0 %v17053_v43  ;;  %v17058_v43 = vld [vmem:[#allocation91_spill] sm:$0xff]  ;;  %vm17059_vm9 = vnez %v16957_v61 }
 0x454   :  { %5432 = vmatpush2.msra.mxu1 %v16418_v30  ;;  %5203 = vmatprep.subr.mxu0 %v16418_v30 }
 0x455   :  { %10291 = vmatprep.subr.msk.mxu1 %vm17054_vm1, %v16385_v17  ;;  %5207 = vmatpush1.msra.mxu0 %v17055_v51  ;;  %v17060_v51 = vld [vmem:[#allocation96_spill] sm:$0xff]  ;;  %vm17061_vm1 = vnez %v16960_v38 }
 0x456   :  { %5436 = vmatpush2.msra.mxu1 %v16418_v30  ;;  %5211 = vmatprep.subr.mxu0 %v16418_v30 }
 0x457   :  { %10292 = vmatprep.subr.msk.mxu1 %vm17056_vm6, %v16385_v17  ;;  %5215 = vmatpush1.msra.mxu0 %v17057_v20  ;;  %v4115_v20 = vpop.f32.mrf.mxu0 }
 0x458   :  { %5440 = vmatpush2.msra.mxu1 %v16418_v30  ;;  %5235 = vmatprep.subr.mxu0 %v17058_v43  ;;  %v17062_v43 = vld [vmem:[#allocation102_spill] sm:$0xff]  ;;  %v4116_v27 = vadd.f32 %v4115_v20, %v13323_v24  ;;  %v17068_v20 = vld [vmem:[#allocation124_spill] sm:$0xff] }
 0x459   :  { %10293 = vmatprep.subr.msk.mxu1 %vm17059_vm9, %v16385_v17  ;;  %5239 = vmatpush2.msra.mxu0 %v16418_v30  ;;  %vm17063_vm9 = vnez %v16963_v40  ;;  %v17067_v24 = vld [vmem:[#allocation118_spill] sm:$0xff] }
 0x45a   :  { %5444 = vmatpush2.msra.mxu1 %v16418_v30  ;;  %5243 = vmatprep.subr.mxu0 %v17060_v51  ;;  %v17064_v51 = vld [vmem:[#allocation107_spill] sm:$0xff]  ;;  %v4204_v49 = vadd.f32 %v4203_v62, %v4116_v27  ;;  %v17069_v62 = vld [vmem:[#allocation129_spill] sm:$0xff] }
 0x45b   :  { %10294 = vmatprep.subr.msk.mxu1 %vm17061_vm1, %v16385_v17  ;;  %5247 = vmatpush2.msra.mxu0 %v16418_v30  ;;  %vm17065_vm1 = vnez %v16966_v53  ;;  %v17167_v53 = vld [vmem:[#allocation12_spill] sm:$0xff] }
 0x45c   :  { %5448 = vmatpush2.msra.mxu1 %v16418_v30  ;;  %5251 = vmatprep.subr.mxu0 %v17062_v43  ;;  %v17066_v43 = vld [vmem:[#allocation113_spill] sm:$0xff]  ;;  %v13676_v27 = vand.u32 4294901760, %v4204_v49 }
 0x45d   :  { %10295 = vmatprep.subr.msk.mxu1 %vm17063_vm9, %v16385_v17  ;;  %5255 = vmatpush2.msra.mxu0 %v16418_v30 }
 0x45e   :  { %5452 = vmatpush2.msra.mxu1 %v16418_v30  ;;  %5259 = vmatprep.subr.mxu0 %v17064_v51  ;;  %v17075_v51 = vld [vmem:[#allocation171_spill] sm:$0xff] }
 0x45f   :  { %10296 = vmatprep.subr.msk.mxu1 %vm17065_vm1, %v16385_v17  ;;  %5263 = vmatpush2.msra.mxu0 %v16418_v30 }
 0x460   :  { %5456 = vmatpush2.msra.mxu1 %v16418_v30  ;;  %5267 = vmatprep.subr.mxu0 %v17066_v43  ;;  %v17073_v43 = vld [vmem:[#allocation167_spill] sm:$0xff] }
 0x461   :  { %10297 = vmatprep.subr.msk.mxu1 %vm17018_vm2, %v16385_v17  ;;  %5271 = vmatpush2.msra.mxu0 %v16418_v30 }
 0x462   :  { %5460 = vmatpush2.msra.mxu1 %v16418_v30  ;;  %5275 = vmatprep.subr.mxu0 %v17067_v24  ;;  %v13691_v24 = vsub.f32 %v4204_v49, %v13676_v27  ;;  %v17072_v49 = vld [vmem:[#allocation143_spill] sm:$0xff] }
 0x463   :  { %10298 = vmatprep.subr.msk.mxu1 %vm17020_vm7, %v16385_v17  ;;  %5279 = vmatpush2.msra.mxu0 %v16418_v30 }
 0x464   :  { %5464 = vmatpush2.msra.mxu1 %v16418_v30  ;;  %5283 = vmatprep.subr.mxu0 %v17068_v20  ;;  %v17070_v20 = vld [vmem:[#allocation134_spill] sm:$0xff] }
 0x465   :  { %10299 = vmatprep.subr.msk.mxu1 %vm17022_vm12, %v16385_v17  ;;  %5287 = vmatpush2.msra.mxu0 %v16418_v30 }
 0x466   :  { %5468 = vmatpush2.msra.mxu1 %v16418_v30  ;;  %5291 = vmatprep.subr.mxu0 %v17069_v62  ;;  %v17071_v62 = vld [vmem:[#allocation139_spill] sm:$0xff] }
 0x467   :  { %10300 = vmatprep.subr.msk.mxu1 %vm16979_vm13, %v16385_v17  ;;  %5295 = vmatpush2.msra.mxu0 %v16418_v30 }
 0x468   :  { %5472 = vmatpush2.msra.mxu1 %v16418_v30  ;;  %5299 = vmatprep.subr.mxu0 %v17070_v20  ;;  %v16216_v20 = vand.u32 4294901760, %v13691_v24 }
 0x469   :  { %10301 = vmatprep.subr.msk.mxu1 %vm16982_vm4, %v16385_v17  ;;  %5303 = vmatpush2.msra.mxu0 %v16418_v30 }
 0x46a   :  { %5476 = vmatpush2.msra.mxu1 %v16418_v30  ;;  %5307 = vmatprep.subr.mxu0 %v17071_v62  ;;  %v17074_v62 = vld [vmem:[#allocation147_spill] sm:$0xff]  ;;  %v5621_v57 = vsub.f32 %v13691_v24, %v16216_v20 }
 0x46b   :  { %10302 = vmatprep.subr.msk.mxu1 %vm16985_vm3, %v16385_v17  ;;  %5311 = vmatpush2.msra.mxu0 %v16418_v30  ;;  %v17080_v20 = vld [vmem:[#allocation7_spill] sm:$0xff] }
 0x46c   :  { %5480 = vmatpush2.msra.mxu1 %v16418_v30  ;;  %5315 = vmatprep.subr.mxu0 %v17072_v49  ;;  %v17076_v49 = vld [vmem:[#allocation150_spill] sm:$0xff]  ;;  %vm17081_vm3 = vnez %v17080_v20 }
 0x46d   :  { %5484 = vmatmul.mubr.f32.vlgmr.msra.gmra.mxu1 %v13325_v21  ;;  %5640 = vmatprep.subr.mxu1 %v16418_v30 }
 0x46e   :  { %5319 = vmatpush2.msra.mxu0 %v16418_v30  ;;  %5646 = vmatpush1.msra.mxu1 %v17073_v43  ;;  %v17077_v43 = vld [vmem:[#allocation174_spill] sm:$0xff] }
 0x46f   :  { %6020 = vmatprep.mubr.f32.mxu1 %v13676_v27  ;;  %5323 = vmatprep.subr.mxu0 %v17074_v62  ;;  %v17079_v62 = vld [vmem:[#allocation178_spill] sm:$0xff] }
 0x470   :  { %5652 = vmatprep.subr.mxu1 %v16418_v30  ;;  %5327 = vmatpush2.msra.mxu0 %v16418_v30 }
 0x471   :  { %5658 = vmatpush1.msra.mxu1 %v17075_v51  ;;  %5331 = vmatprep.subr.mxu0 %v17076_v49  ;;  %v5622_v49 = vand.u32 4294901760, %v5621_v57  ;;  %v17086_v57 = vld [vmem:[#allocation10_spill] sm:$0xff]  ;;  %v17094_v51 = vld [vmem:[#allocation192_spill] sm:$0xff] }
 0x472   :  { %5664 = vmatprep.subr.mxu1 %v16418_v30  ;;  %5335 = vmatpush2.msra.mxu0 %v16418_v30  ;;  %vm17087_vm13 = vnez %v17086_v57 }
 0x473   :  { %5670 = vmatpush1.msra.mxu1 %v17077_v43  ;;  %5339 = vmatprep.subr.mxu0 %v17078_v31  ;;  %v17082_v43 = vld [vmem:[#allocation180_spill] sm:$0xff]  ;;  %v17091_v31 = vld [vmem:[#allocation187_spill] sm:$0xff] }
 0x474   :  { %5676 = vmatprep.subr.mxu1 %v16418_v30  ;;  %5343 = vmatpush2.msra.mxu0 %v16418_v30 }
 0x475   :  { %5682 = vmatpush1.msra.mxu1 %v17079_v62  ;;  %5347 = vmatmul.mubr.f32.vlgmr.msra.gmra.mxu0 %v13325_v21  ;;  %v17083_v62 = vld [vmem:[#allocation6_spill] sm:$0xff]  ;;  %v17085_v21 = vld [vmem:[#allocation5_spill] sm:$0xff] }
 0x476   :  { %5491 = vmatprep.subr.mxu0 %v16418_v30  ;;  %5688 = vmatprep.subr.mxu1 %v16418_v30  ;;  %vm17084_vm4 = vnez %v17083_v62 }
 0x477   :  { %10303 = vmatpush1.msk.msra.mxu0 %vm17081_vm3, %v16385_v17  ;;  %5623 = vmatprep.mubr.f32.mxu0 %v5622_v49  ;;  %v17088_v49 = vld [vmem:[#allocation185_spill] sm:$0xff] }
 0x478   :  { %5694 = vmatpush1.msra.mxu1 %v17082_v43  ;;  %5495 = vmatprep.subr.mxu0 %v16418_v30  ;;  %v17089_v43 = vld [vmem:[#allocation13_spill] sm:$0xff] }
 0x479   :  { %5700 = vmatprep.subr.mxu1 %v16418_v30  ;;  %10304 = vmatpush1.msk.msra.mxu0 %vm17084_vm4, %v16385_v17  ;;  %vm17090_vm12 = vnez %v17089_v43 }
 0x47a   :  { %5706 = vmatpush1.msra.mxu1 %v17085_v21  ;;  %5499 = vmatprep.subr.mxu0 %v16418_v30  ;;  %v17092_v21 = vld [vmem:[#allocation16_spill] sm:$0xff] }
 0x47b   :  { %5712 = vmatprep.subr.mxu1 %v16418_v30  ;;  %10305 = vmatpush1.msk.msra.mxu0 %vm17087_vm13, %v16385_v17  ;;  %vm17093_vm7 = vnez %v17092_v21 }
 0x47c   :  { %5718 = vmatpush1.msra.mxu1 %v17088_v49  ;;  %5503 = vmatprep.subr.mxu0 %v16418_v30  ;;  %v17095_v49 = vld [vmem:[#allocation17_spill] sm:$0xff] }
 0x47d   :  { %5724 = vmatprep.subr.mxu1 %v16418_v30  ;;  %10306 = vmatpush1.msk.msra.mxu0 %vm17090_vm12, %v16385_v17  ;;  %vm17096_vm2 = vnez %v17095_v49 }
 0x47e   :  { %5730 = vmatpush1.msra.mxu1 %v17091_v31  ;;  %5507 = vmatprep.subr.mxu0 %v16418_v30  ;;  %v17098_v31 = vld [vmem:[#allocation19_spill] sm:$0xff] }
 0x47f   :  { %5736 = vmatprep.subr.mxu1 %v16418_v30  ;;  %10307 = vmatpush1.msk.msra.mxu0 %vm17093_vm7, %v16385_v17  ;;  %vm17099_vm1 = vnez %v17098_v31 }
 0x480   :  { %5742 = vmatpush1.msra.mxu1 %v17094_v51  ;;  %5511 = vmatprep.subr.mxu0 %v16418_v30  ;;  %v17101_v51 = vld [vmem:[#allocation23_spill] sm:$0xff] }
 0x481   :  { %5748 = vmatprep.subr.mxu1 %v16418_v30  ;;  %10308 = vmatpush1.msk.msra.mxu0 %vm17096_vm2, %v16385_v17  ;;  %vm17102_vm9 = vnez %v17101_v51 }
 0x482   :  { %5754 = vmatpush1.msra.mxu1 %v17097_v37  ;;  %5515 = vmatprep.subr.mxu0 %v16418_v30  ;;  %v17104_v37 = vld [vmem:[#allocation25_spill] sm:$0xff] }
 0x483   :  { %5760 = vmatprep.subr.mxu1 %v16418_v30  ;;  %10309 = vmatpush1.msk.msra.mxu0 %vm17099_vm1, %v16385_v17  ;;  %vm17105_vm6 = vnez %v17104_v37 }
 0x484   :  { %5766 = vmatpush1.msra.mxu1 %v17100_v42  ;;  %5519 = vmatprep.subr.mxu0 %v16418_v30  ;;  %v17107_v42 = vld [vmem:[#allocation29_spill] sm:$0xff] }
 0x485   :  { %5772 = vmatprep.subr.mxu1 %v16418_v30  ;;  %10310 = vmatpush1.msk.msra.mxu0 %vm17102_vm9, %v16385_v17  ;;  %vm17108_vm8 = vnez %v17107_v42 }
 0x486   :  { %5778 = vmatpush1.msra.mxu1 %v17103_v33  ;;  %5523 = vmatprep.subr.mxu0 %v16418_v30  ;;  %v17110_v33 = vld [vmem:[#allocation32_spill] sm:$0xff] }
 0x487   :  { %5784 = vmatprep.subr.mxu1 %v16418_v30  ;;  %10311 = vmatpush1.msk.msra.mxu0 %vm17105_vm6, %v16385_v17  ;;  %vm17111_vm10 = vnez %v17110_v33 }
 0x488   :  { %5790 = vmatpush1.msra.mxu1 %v17106_v52  ;;  %5527 = vmatprep.subr.mxu0 %v16418_v30  ;;  %v17112_v52 = vld [vmem:[#allocation36_spill] sm:$0xff] }
 0x489   :  { %5796 = vmatprep.subr.mxu1 %v16418_v30  ;;  %10312 = vmatpush1.msk.msra.mxu0 %vm17108_vm8, %v16385_v17  ;;  %vm17113_vm15 = vnez %v17112_v52 }
 0x48a   :  { %5802 = vmatpush1.msra.mxu1 %v17109_v56  ;;  %5531 = vmatprep.subr.mxu0 %v16418_v30  ;;  %v17114_v56 = vld [vmem:[#allocation211_spill] sm:$0xff] }
 0x48b   :  { %5808 = vmatprep.subr.mxu1 %v16418_v30  ;;  %10313 = vmatpush1.msk.msra.mxu0 %vm17111_vm10, %v16385_v17 }
 0x48c   :  { %5814 = vmatpush1.msra.mxu1 %v16418_v30  ;;  %5535 = vmatprep.subr.mxu0 %v16418_v30 }
 0x48d   :  { %5820 = vmatprep.subr.mxu1 %v16418_v30  ;;  %10314 = vmatpush1.msk.msra.mxu0 %vm17113_vm15, %v16385_v17 }
 0x48e   :  { %5826 = vmatpush1.msra.mxu1 %v16418_v30  ;;  %5539 = vmatprep.subr.mxu0 %v16418_v30 }
 0x48f   :  { %5832 = vmatprep.subr.mxu1 %v17114_v56  ;;  %10315 = vmatpush1.msk.msra.mxu0 %vm17116_vm14, %v16385_v17  ;;  %v17121_v56 = vld [vmem:[#allocation220_spill] sm:$0xff] }
 0x490   :  { %5838 = vmatpush2.msra.mxu1 %v16418_v30  ;;  %5543 = vmatprep.subr.mxu0 %v16418_v30 }
 0x491   :  { %5844 = vmatprep.subr.mxu1 %v17117_v9  ;;  %10316 = vmatpush1.msk.msra.mxu0 %vm17119_vm5, %v16385_v17  ;;  %v17122_v9 = vld [vmem:[#allocation188_spill] sm:$0xff] }
 0x492   :  { %5850 = vmatpush2.msra.mxu1 %v16418_v30  ;;  %5547 = vmatprep.subr.mxu0 %v16418_v30  ;;  %vm17123_vm0 = vnez %v17122_v9 }
 0x493   :  { %5856 = vmatprep.subr.mxu1 %v17120_v45  ;;  %5549 = vmatpush1.msra.mxu0 %v16418_v30  ;;  %v17125_v45 = vld [vmem:[#allocation191_spill] sm:$0xff] }
 0x494   :  { %5862 = vmatpush2.msra.mxu1 %v16418_v30  ;;  %5551 = vmatprep.subr.mxu0 %v16418_v30  ;;  %vm17126_vm11 = vnez %v17125_v45 }
 0x495   :  { %5868 = vmatprep.subr.mxu1 %v17121_v56  ;;  %5553 = vmatpush1.msra.mxu0 %v16418_v30  ;;  %v17128_v56 = vld [vmem:[#allocation75_spill] sm:$0xff] }
 0x496   :  { %5874 = vmatpush2.msra.mxu1 %v16418_v30  ;;  %10317 = vmatprep.subr.msk.mxu0 %vm17123_vm0, %v16385_v17  ;;  %vm17129_vm5 = vnez %v17128_v56 }
 0x497   :  { %5880 = vmatprep.subr.mxu1 %v17124_v35  ;;  %5557 = vmatpush2.msra.mxu0 %v16418_v30  ;;  %v17131_v35 = vld [vmem:[#allocation78_spill] sm:$0xff] }
 0x498   :  { %5886 = vmatpush2.msra.mxu1 %v16418_v30  ;;  %10318 = vmatprep.subr.msk.mxu0 %vm17126_vm11, %v16385_v17  ;;  %vm17132_vm0 = vnez %v17131_v35 }
 0x499   :  { %5892 = vmatprep.subr.mxu1 %v17127_v4  ;;  %5561 = vmatpush2.msra.mxu0 %v16418_v30  ;;  %v17134_v4 = vld [vmem:[#allocation83_spill] sm:$0xff] }
 0x49a   :  { %5898 = vmatpush2.msra.mxu1 %v16418_v30  ;;  %10319 = vmatprep.subr.msk.mxu0 %vm17129_vm5, %v16385_v17  ;;  %vm17135_vm11 = vnez %v17134_v4 }
 0x49b   :  { %5904 = vmatprep.subr.mxu1 %v17130_v11  ;;  %5565 = vmatpush2.msra.mxu0 %v16418_v30  ;;  %v17137_v11 = vld [vmem:[#allocation88_spill] sm:$0xff] }
 0x49c   :  { %5910 = vmatpush2.msra.mxu1 %v16418_v30  ;;  %10320 = vmatprep.subr.msk.mxu0 %vm17132_vm0, %v16385_v17  ;;  %vm17138_vm5 = vnez %v17137_v11 }
 0x49d   :  { %5916 = vmatprep.subr.mxu1 %v17133_v22  ;;  %5569 = vmatpush2.msra.mxu0 %v16418_v30  ;;  %v17140_v22 = vld [vmem:[#allocation95_spill] sm:$0xff] }
 0x49e   :  { %5922 = vmatpush2.msra.mxu1 %v16418_v30  ;;  %10321 = vmatprep.subr.msk.mxu0 %vm17135_vm11, %v16385_v17  ;;  %vm17141_vm0 = vnez %v17140_v22 }
 0x49f   :  { %5928 = vmatprep.subr.mxu1 %v17136_v18  ;;  %5573 = vmatpush2.msra.mxu0 %v16418_v30  ;;  %v17143_v18 = vld [vmem:[#allocation100_spill] sm:$0xff] }
 0x4a0   :  { %5934 = vmatpush2.msra.mxu1 %v16418_v30  ;;  %10322 = vmatprep.subr.msk.mxu0 %vm17138_vm5, %v16385_v17  ;;  %vm17144_vm11 = vnez %v17143_v18 }
 0x4a1   :  { %5940 = vmatprep.subr.mxu1 %v17139_v54  ;;  %5577 = vmatpush2.msra.mxu0 %v16418_v30  ;;  %v13865_v54 = vand.u32 4294901760, %v13340_v14 }
 0x4a2   :  { %5946 = vmatpush2.msra.mxu1 %v16418_v30  ;;  %10323 = vmatprep.subr.msk.mxu0 %vm17141_vm0, %v16385_v17  ;;  %vm17147_vm0 = vnez %v17146_v10 }
 0x4a3   :  { %5952 = vmatprep.subr.mxu1 %v17142_v15  ;;  %5581 = vmatpush2.msra.mxu0 %v16418_v30  ;;  %v17148_v15 = vld [vmem:[#allocation244_spill] sm:$0xff] }
 0x4a4   :  { %5958 = vmatpush2.msra.mxu1 %v16418_v30  ;;  %10324 = vmatprep.subr.msk.mxu0 %vm17144_vm11, %v16385_v17  ;;  %vm17150_vm11 = vnez %v17149_v44 }
 0x4a5   :  { %5964 = vmatprep.subr.mxu1 %v17145_v7  ;;  %5585 = vmatpush2.msra.mxu0 %v16418_v30  ;;  %v13881_v7 = vsub.f32 %v13340_v14, %v13865_v54 }
 0x4a6   :  { %5970 = vmatpush2.msra.mxu1 %v16418_v30  ;;  %10325 = vmatprep.subr.msk.mxu0 %vm17147_vm0, %v16385_v17 }
 0x4a7   :  { %5976 = vmatprep.subr.mxu1 %v17148_v15  ;;  %5589 = vmatpush2.msra.mxu0 %v16418_v30  ;;  %v17152_v15 = vld [vmem:[#allocation112_spill] sm:$0xff]  ;;  %v16235_v14 = vand.u32 4294901760, %v13881_v7 }
 0x4a8   :  { %5982 = vmatpush2.msra.mxu1 %v16418_v30  ;;  %10326 = vmatprep.subr.msk.mxu0 %vm17150_vm11, %v16385_v17  ;;  %vm17153_vm0 = vnez %v17152_v15  ;;  %vm17156_vm11 = vnez %v17155_v26 }
 0x4a9   :  { %5988 = vmatprep.subr.mxu1 %v17151_v28  ;;  %5593 = vmatpush2.msra.mxu0 %v16418_v30  ;;  %v17157_v28 = vld [vmem:[#allocation247_spill] sm:$0xff] }
 0x4aa   :  { %5994 = vmatpush2.msra.mxu1 %v16418_v30  ;;  %10327 = vmatprep.subr.msk.mxu0 %vm17153_vm0, %v16385_v17  ;;  %vm17159_vm0 = vnez %v17158_v36 }
 0x4ab   :  { %6000 = vmatprep.subr.mxu1 %v16418_v30  ;;  %5597 = vmatpush2.msra.mxu0 %v16418_v30 }
 0x4ac   :  { %6006 = vmatpush2.msra.mxu1 %v17154_v16  ;;  %10328 = vmatprep.subr.msk.mxu0 %vm17156_vm11, %v16385_v17  ;;  %v5627_v16 = vsub.f32 %v13881_v7, %v16235_v14  ;;  %v17163_v14 = vld [vmem:[#allocation132_spill] sm:$0xff] }
 0x4ad   :  { %6012 = vmatprep.subr.mxu1 %v16418_v30  ;;  %5601 = vmatpush2.msra.mxu0 %v16418_v30 }
 0x4ae   :  { %6018 = vmatpush2.msra.mxu1 %v17157_v28  ;;  %10329 = vmatprep.subr.msk.mxu0 %vm17159_vm0, %v16385_v17  ;;  %v17160_v28 = vand.u32 4294901760, %v13691_v24  ;;  %vm17162_vm0 = vnez %v17161_v29 }
 0x4af   :  { %6022 = vmatmul.mubr.f32.vlgmr.msra.gmra.mxu1 %v13865_v54  ;;  %6232 = vmatprep.subr.mxu1 %v16418_v30 }
 0x4b0   :  { %5605 = vmatpush2.msra.mxu0 %v16418_v30  ;;  %10333 = vmatpush1.msk.msra.mxu1 %vm17081_vm3, %v16385_v17  ;;  %vm17164_vm3 = vnez %v17163_v14 }
 0x4b1   :  { %6362 = vmatprep.mubr.f32.mxu1 %v17160_v28  ;;  %10330 = vmatprep.subr.msk.mxu0 %vm17162_vm0, %v16385_v17  ;;  %v5628_v28 = vand.u32 4294901760, %v5627_v16  ;;  %v17168_v16 = vld [vmem:[#allocation158_spill] sm:$0xff] }
 0x4b2   :  { %6236 = vmatprep.subr.mxu1 %v16418_v30  ;;  %5609 = vmatpush2.msra.mxu0 %v16418_v30 }
 0x4b3   :  { %10334 = vmatpush1.msk.msra.mxu1 %vm17084_vm4, %v16385_v17  ;;  %5611 = vmatprep.subr.mxu0 %v16418_v30  ;;  %vm17166_vm4 = vnez %v17165_v50 }
 0x4b4   :  { %6240 = vmatprep.subr.mxu1 %v16418_v30  ;;  %10331 = vmatpush2.msk.msra.mxu0 %vm17164_vm3, %v16385_v17 }
 0x4b5   :  { %10335 = vmatpush1.msk.msra.mxu1 %vm17087_vm13, %v16385_v17  ;;  %5615 = vmatprep.subr.mxu0 %v16418_v30 }
 0x4b6   :  { %6244 = vmatprep.subr.mxu1 %v16418_v30  ;;  %10332 = vmatpush2.msk.msra.mxu0 %vm17166_vm4, %v16385_v17 }
 0x4b7   :  { %10336 = vmatpush1.msk.msra.mxu1 %vm17090_vm12, %v16385_v17  ;;  %5629 = vmatmul.mubr.f32.vlgmr.msra.gmra.mxu0 %v5628_v28  ;;  %v17169_v28 = vld [vmem:[#allocation160_spill] sm:$0xff] }
 0x4b8   :  { %6030 = vmatprep.subr.mxu0 %v16418_v30  ;;  %6248 = vmatprep.subr.mxu1 %v16418_v30 }
 0x4b9   :  { %6033 = vmatpush1.msra.mxu0 %v17167_v53  ;;  %6222 = vmatprep.mubr.f32.mxu0 %v13691_v24  ;;  %v17170_v24 = vld [vmem:[#allocation163_spill] sm:$0xff] }
 0x4ba   :  { %10337 = vmatpush1.msk.msra.mxu1 %vm17093_vm7, %v16385_v17  ;;  %6036 = vmatprep.subr.mxu0 %v16418_v30 }
 0x4bb   :  { %6252 = vmatprep.subr.mxu1 %v16418_v30  ;;  %6039 = vmatpush1.msra.mxu0 %v17168_v16  ;;  %v17171_v16 = vld [vmem:[#allocation165_spill] sm:$0xff] }
 0x4bc   :  { %10338 = vmatpush1.msk.msra.mxu1 %vm17096_vm2, %v16385_v17  ;;  %6042 = vmatprep.subr.mxu0 %v16418_v30 }
 0x4bd   :  { %6256 = vmatprep.subr.mxu1 %v16418_v30  ;;  %6045 = vmatpush1.msra.mxu0 %v17169_v28  ;;  %v17172_v28 = vld [vmem:[#allocation168_spill] sm:$0xff] }
 0x4be   :  { %10339 = vmatpush1.msk.msra.mxu1 %vm17099_vm1, %v16385_v17  ;;  %6048 = vmatprep.subr.mxu0 %v16418_v30 }
 0x4bf   :  { %6260 = vmatprep.subr.mxu1 %v16418_v30  ;;  %6051 = vmatpush1.msra.mxu0 %v17170_v24  ;;  %v17173_v24 = vld [vmem:[#allocation170_spill] sm:$0xff] }
 0x4c0   :  { %10340 = vmatpush1.msk.msra.mxu1 %vm17102_vm9, %v16385_v17  ;;  %6054 = vmatprep.subr.mxu0 %v16418_v30 }
 0x4c1   :  { %6264 = vmatprep.subr.mxu1 %v16418_v30  ;;  %6057 = vmatpush1.msra.mxu0 %v17171_v16  ;;  %v17174_v16 = vld [vmem:[#allocation172_spill] sm:$0xff] }
 0x4c2   :  { %10341 = vmatpush1.msk.msra.mxu1 %vm17105_vm6, %v16385_v17  ;;  %6060 = vmatprep.subr.mxu0 %v16418_v30 }
 0x4c3   :  { %6268 = vmatprep.subr.mxu1 %v16418_v30  ;;  %6063 = vmatpush1.msra.mxu0 %v17172_v28  ;;  %v17175_v28 = vld [vmem:[#allocation177_spill] sm:$0xff] }
 0x4c4   :  { %10342 = vmatpush1.msk.msra.mxu1 %vm17108_vm8, %v16385_v17  ;;  %6066 = vmatprep.subr.mxu0 %v16418_v30 }
 0x4c5   :  { %6272 = vmatprep.subr.mxu1 %v16418_v30  ;;  %6069 = vmatpush1.msra.mxu0 %v17173_v24  ;;  %v17176_v24 = vld [vmem:[#allocation179_spill] sm:$0xff] }
 0x4c6   :  { %10343 = vmatpush1.msk.msra.mxu1 %vm17111_vm10, %v16385_v17  ;;  %6072 = vmatprep.subr.mxu0 %v16418_v30  ;;  %vm17177_vm10 = vnez %v17118_v63 }
 0x4c7   :  { %6276 = vmatprep.subr.mxu1 %v16418_v30  ;;  %6075 = vmatpush1.msra.mxu0 %v17174_v16  ;;  %v17178_v16 = vld [vmem:[#allocation181_spill] sm:$0xff] }
 0x4c8   :  { %10344 = vmatpush1.msk.msra.mxu1 %vm17113_vm15, %v16385_v17  ;;  %6078 = vmatprep.subr.mxu0 %v16418_v30  ;;  %vm17184_vm15 = vnez %v17128_v56 }
 0x4c9   :  { %6280 = vmatprep.subr.mxu1 %v16418_v30  ;;  %6081 = vmatpush1.msra.mxu0 %v17175_v28  ;;  %v17179_v28 = vld [vmem:[#allocation183_spill] sm:$0xff] }
 0x4ca   :  { %10345 = vmatpush1.msk.msra.mxu1 %vm17116_vm14, %v16385_v17  ;;  %6084 = vmatprep.subr.mxu0 %v16418_v30  ;;  %vm17182_vm14 = vnez %v17125_v45 }
 0x4cb   :  { %6284 = vmatprep.subr.mxu1 %v16418_v30  ;;  %6087 = vmatpush1.msra.mxu0 %v17176_v24  ;;  %v17181_v24 = vld [vmem:[#allocation186_spill] sm:$0xff] }
 0x4cc   :  { %10346 = vmatpush1.msk.msra.mxu1 %vm17177_vm10, %v16385_v17  ;;  %6090 = vmatprep.subr.mxu0 %v16418_v30  ;;  %vm17180_vm10 = vnez %v17122_v9 }
 0x4cd   :  { %6288 = vmatprep.subr.mxu1 %v16418_v30  ;;  %6093 = vmatpush1.msra.mxu0 %v17178_v16  ;;  %v17183_v16 = vld [vmem:[#allocation190_spill] sm:$0xff] }
 0x4ce   :  { %6290 = vmatpush1.msra.mxu1 %v16418_v30  ;;  %6096 = vmatprep.subr.mxu0 %v16418_v30 }
 0x4cf   :  { %6292 = vmatprep.subr.mxu1 %v16418_v30  ;;  %6099 = vmatpush1.msra.mxu0 %v17179_v28  ;;  %v17189_v28 = vld [vmem:[#allocation201_spill] sm:$0xff] }
 0x4d0   :  { %6294 = vmatpush1.msra.mxu1 %v16418_v30  ;;  %6102 = vmatprep.subr.mxu0 %v16418_v30 }
 0x4d1   :  { %10347 = vmatprep.subr.msk.mxu1 %vm17180_vm10, %v16385_v17  ;;  %6105 = vmatpush1.msra.mxu0 %v17181_v24  ;;  %vm17185_vm10 = vnez %v17131_v35  ;;  %v17188_v24 = vld [vmem:[#allocation198_spill] sm:$0xff] }
 0x4d2   :  { %6298 = vmatpush2.msra.mxu1 %v16418_v30  ;;  %6108 = vmatprep.subr.mxu0 %v16418_v30 }
 0x4d3   :  { %10348 = vmatprep.subr.msk.mxu1 %vm17182_vm14, %v16385_v17  ;;  %6111 = vmatpush1.msra.mxu0 %v17183_v16  ;;  %v17186_v16 = vld [vmem:[#allocation197_spill] sm:$0xff]  ;;  %vm17187_vm14 = vnez %v17134_v4 }
 0x4d4   :  { %6302 = vmatpush2.msra.mxu1 %v16418_v30  ;;  %6114 = vmatprep.subr.mxu0 %v16418_v30 }
 0x4d5   :  { %10349 = vmatprep.subr.msk.mxu1 %vm17184_vm15, %v16385_v17  ;;  %6117 = vmatpush1.msra.mxu0 %v16418_v30 }
 0x4d6   :  { %6306 = vmatpush2.msra.mxu1 %v16418_v30  ;;  %6120 = vmatprep.subr.mxu0 %v16418_v30 }
 0x4d7   :  { %10350 = vmatprep.subr.msk.mxu1 %vm17185_vm10, %v16385_v17  ;;  %6123 = vmatpush1.msra.mxu0 %v16418_v30  ;;  %vm17190_vm10 = vnez %v17140_v22 }
 0x4d8   :  { %6310 = vmatpush2.msra.mxu1 %v16418_v30  ;;  %6126 = vmatprep.subr.mxu0 %v17186_v16  ;;  %v17191_v16 = vld [vmem:[#allocation204_spill] sm:$0xff] }
 0x4d9   :  { %10351 = vmatprep.subr.msk.mxu1 %vm17187_vm14, %v16385_v17  ;;  %6129 = vmatpush2.msra.mxu0 %v16418_v30  ;;  %vm17192_vm14 = vnez %v17143_v18 }
 0x4da   :  { %6314 = vmatpush2.msra.mxu1 %v16418_v30  ;;  %6132 = vmatprep.subr.mxu0 %v17188_v24  ;;  %v17193_v24 = vld [vmem:[#allocation206_spill] sm:$0xff] }
 0x4db   :  { %10352 = vmatprep.subr.msk.mxu1 %vm17138_vm5, %v16385_v17  ;;  %6135 = vmatpush2.msra.mxu0 %v16418_v30  ;;  %vm17194_vm5 = vnez %v17146_v10 }
 0x4dc   :  { %6318 = vmatpush2.msra.mxu1 %v16418_v30  ;;  %6138 = vmatprep.subr.mxu0 %v17189_v28  ;;  %v17195_v28 = vld [vmem:[#allocation209_spill] sm:$0xff] }
 0x4dd   :  { %10353 = vmatprep.subr.msk.mxu1 %vm17190_vm10, %v16385_v17  ;;  %6141 = vmatpush2.msra.mxu0 %v16418_v30  ;;  %vm17196_vm10 = vnez %v17149_v44 }
 0x4de   :  { %6322 = vmatpush2.msra.mxu1 %v16418_v30  ;;  %6144 = vmatprep.subr.mxu0 %v17191_v16  ;;  %v17197_v16 = vld [vmem:[#allocation212_spill] sm:$0xff] }
 0x4df   :  { %10354 = vmatprep.subr.msk.mxu1 %vm17192_vm14, %v16385_v17  ;;  %6147 = vmatpush2.msra.mxu0 %v16418_v30  ;;  %vm17198_vm14 = vnez %v17152_v15 }
 0x4e0   :  { %6326 = vmatpush2.msra.mxu1 %v16418_v30  ;;  %6150 = vmatprep.subr.mxu0 %v17193_v24  ;;  %v17199_v24 = vld [vmem:[#allocation213_spill] sm:$0xff] }
 0x4e1   :  { %10355 = vmatprep.subr.msk.mxu1 %vm17194_vm5, %v16385_v17  ;;  %6153 = vmatpush2.msra.mxu0 %v16418_v30 }
 0x4e2   :  { %6330 = vmatpush2.msra.mxu1 %v16418_v30  ;;  %6156 = vmatprep.subr.mxu0 %v17195_v28  ;;  %v17200_v28 = vld [vmem:[#allocation218_spill] sm:$0xff] }
 0x4e3   :  { %10356 = vmatprep.subr.msk.mxu1 %vm17196_vm10, %v16385_v17  ;;  %6159 = vmatpush2.msra.mxu0 %v16418_v30  ;;  %vm17201_vm10 = vnez %v17158_v36 }
 0x4e4   :  { %6334 = vmatpush2.msra.mxu1 %v16418_v30  ;;  %6162 = vmatprep.subr.mxu0 %v17197_v16  ;;  %v17202_v16 = vld [vmem:[#allocation221_spill] sm:$0xff] }
 0x4e5   :  { %10357 = vmatprep.subr.msk.mxu1 %vm17198_vm14, %v16385_v17  ;;  %6165 = vmatpush2.msra.mxu0 %v16418_v30 }
 0x4e6   :  { %6338 = vmatpush2.msra.mxu1 %v16418_v30  ;;  %6168 = vmatprep.subr.mxu0 %v17199_v24  ;;  %v17203_v24 = vld [vmem:[#allocation224_spill] sm:$0xff] }
 0x4e7   :  { %10358 = vmatprep.subr.msk.mxu1 %vm17156_vm11, %v16385_v17  ;;  %6171 = vmatpush2.msra.mxu0 %v16418_v30 }
 0x4e8   :  { %6342 = vmatpush2.msra.mxu1 %v16418_v30  ;;  %6174 = vmatprep.subr.mxu0 %v17200_v28  ;;  %v17204_v28 = vld [vmem:[#allocation227_spill] sm:$0xff] }
 0x4e9   :  { %10359 = vmatprep.subr.msk.mxu1 %vm17201_vm10, %v16385_v17  ;;  %6177 = vmatpush2.msra.mxu0 %v16418_v30 }
 0x4ea   :  { %6346 = vmatpush2.msra.mxu1 %v16418_v30  ;;  %6180 = vmatprep.subr.mxu0 %v17202_v16  ;;  %v17205_v16 = vld [vmem:[#allocation230_spill] sm:$0xff] }
 0x4eb   :  { %10360 = vmatprep.subr.msk.mxu1 %vm17162_vm0, %v16385_v17  ;;  %6183 = vmatpush2.msra.mxu0 %v16418_v30 }
 0x4ec   :  { %6350 = vmatpush2.msra.mxu1 %v16418_v30  ;;  %6186 = vmatprep.subr.mxu0 %v17203_v24  ;;  %v17206_v24 = vand.u32 4294901760, %v13881_v7 }
 0x4ed   :  { %6352 = vmatprep.subr.mxu1 %v16418_v30  ;;  %6189 = vmatpush2.msra.mxu0 %v16418_v30 }
 0x4ee   :  { %10361 = vmatpush2.msk.msra.mxu1 %vm17164_vm3, %v16385_v17  ;;  %6192 = vmatprep.subr.mxu0 %v17204_v28  ;;  %vm17207_vm3 = vnez %v17080_v20  ;;  %v17208_v28 = vld [vmem:[#allocation233_spill] sm:$0xff] }
 0x4ef   :  { %6356 = vmatprep.subr.mxu1 %v16418_v30  ;;  %6195 = vmatpush2.msra.mxu0 %v16418_v30 }
 0x4f0   :  { %10362 = vmatpush2.msk.msra.mxu1 %vm17166_vm4, %v16385_v17  ;;  %6198 = vmatprep.subr.mxu0 %v17205_v16  ;;  %vm17209_vm4 = vnez %v17083_v62  ;;  %v4739_v16 = vpop.f32.mrf.mxu1 }
 0x4f1   :  { %6366 = vmatmul.mubr.f32.vlgmr.msra.gmra.mxu1 %v17206_v24  ;;  %6638 = vmatprep.subr.mxu1 %v16418_v30  ;;  %v17210_v24 = vld [vmem:[#allocation236_spill] sm:$0xff] }
 0x4f2   :  { %6201 = vmatpush2.msra.mxu0 %v16418_v30  ;;  %10363 = vmatpush1.msk.msra.mxu1 %vm17207_vm3, %v16385_v17  ;;  %vm17289_vm3 = vnez %v16942_v3 }
 0x4f3   :  { %6766 = vmatprep.mubr.f32.mxu1 %v13676_v27  ;;  %6204 = vmatprep.subr.mxu0 %v17208_v28  ;;  %v17211_v28 = vld [vmem:[#allocation239_spill] sm:$0xff] }
 0x4f4   :  { %6642 = vmatprep.subr.mxu1 %v16418_v30  ;;  %6207 = vmatpush2.msra.mxu0 %v16418_v30 }
 0x4f5   :  { %10364 = vmatpush1.msk.msra.mxu1 %vm17209_vm4, %v16385_v17  ;;  %6210 = vmatprep.subr.mxu0 %v16418_v30  ;;  %vm17287_vm4 = vnez %v16939_v59 }
 0x4f6   :  { %6646 = vmatprep.subr.mxu1 %v16418_v30  ;;  %6213 = vmatpush2.msra.mxu0 %v17210_v24  ;;  %v17212_v24 = vld [vmem:[#allocation159_spill] sm:$0xff] }
 0x4f7   :  { %10365 = vmatpush1.msk.msra.mxu1 %vm17087_vm13, %v16385_v17  ;;  %6216 = vmatprep.subr.mxu0 %v16418_v30  ;;  %vm17285_vm13 = vnez %v16936_v2 }
 0x4f8   :  { %6650 = vmatprep.subr.mxu1 %v16418_v30  ;;  %6219 = vmatpush2.msra.mxu0 %v17211_v28  ;;  %v17213_v28 = vld [vmem:[#allocation161_spill] sm:$0xff] }
 0x4f9   :  { %10366 = vmatpush1.msk.msra.mxu1 %vm17090_vm12, %v16385_v17  ;;  %6225 = vmatmul.mubr.f32.vlgmr.msra.gmra.mxu0 %v13881_v7  ;;  %v17214_v7 = vld [vmem:[#allocation164_spill] sm:$0xff]  ;;  %vm17283_vm12 = vnez %v16933_v6 }
 0x4fa   :  { %6375 = vmatprep.subr.mxu0 %v16418_v30  ;;  %6654 = vmatprep.subr.mxu1 %v16418_v30 }
 0x4fb   :  { %6379 = vmatpush1.msra.mxu0 %v17212_v24  ;;  %6629 = vmatprep.mubr.f32.mxu0 %v13676_v27  ;;  %v17215_v27 = vld [vmem:[#allocation166_spill] sm:$0xff]  ;;  %v17255_v24 = vld [vmem:[#allocation243_spill] sm:$0xff] }
 0x4fc   :  { %10367 = vmatpush1.msk.msra.mxu1 %vm17093_vm7, %v16385_v17  ;;  %6383 = vmatprep.subr.mxu0 %v16418_v30  ;;  %vm17281_vm7 = vnez %v16930_v39 }
 0x4fd   :  { %6658 = vmatprep.subr.mxu1 %v16418_v30  ;;  %6387 = vmatpush1.msra.mxu0 %v17213_v28  ;;  %v17216_v28 = vld [vmem:[#allocation169_spill] sm:$0xff] }
 0x4fe   :  { %10368 = vmatpush1.msk.msra.mxu1 %vm17096_vm2, %v16385_v17  ;;  %6391 = vmatprep.subr.mxu0 %v16418_v30  ;;  %vm17279_vm2 = vnez %v16927_v5 }
 0x4ff   :  { %6662 = vmatprep.subr.mxu1 %v16418_v30  ;;  %6395 = vmatpush1.msra.mxu0 %v17214_v7  ;;  %v17217_v7 = vld [vmem:[#allocation173_spill] sm:$0xff] }
 0x500   :  { %10369 = vmatpush1.msk.msra.mxu1 %vm17099_vm1, %v16385_v17  ;;  %6399 = vmatprep.subr.mxu0 %v16418_v30  ;;  %vm17277_vm1 = vnez %v16924_v60  ;;  %v17380_v60 = vld [vmem:[#allocation57_spill] sm:$0xff] }
 0x501   :  { %6666 = vmatprep.subr.mxu1 %v16418_v30  ;;  %6403 = vmatpush1.msra.mxu0 %v17215_v27  ;;  %v17218_v27 = vld [vmem:[#allocation175_spill] sm:$0xff] }
 0x502   :  { %10370 = vmatpush1.msk.msra.mxu1 %vm17102_vm9, %v16385_v17  ;;  %6407 = vmatprep.subr.mxu0 %v16418_v30  ;;  %vm17219_vm9 = vnez %v17110_v33 }
 0x503   :  { %6670 = vmatprep.subr.mxu1 %v16418_v30  ;;  %6411 = vmatpush1.msra.mxu0 %v17216_v28  ;;  %v17220_v28 = vld [vmem:[#allocation176_spill] sm:$0xff] }
 0x504   :  { %10371 = vmatpush1.msk.msra.mxu1 %vm17105_vm6, %v16385_v17  ;;  %6415 = vmatprep.subr.mxu0 %v16418_v30  ;;  %vm17221_vm6 = vnez %v17112_v52 }
 0x505   :  { %6674 = vmatprep.subr.mxu1 %v16418_v30  ;;  %6419 = vmatpush1.msra.mxu0 %v17217_v7  ;;  %v17222_v7 = vld [vmem:[#allocation182_spill] sm:$0xff] }
 0x506   :  { %10372 = vmatpush1.msk.msra.mxu1 %vm17108_vm8, %v16385_v17  ;;  %6423 = vmatprep.subr.mxu0 %v16418_v30  ;;  %vm17223_vm8 = vnez %v17115_v25 }
 0x507   :  { %6678 = vmatprep.subr.mxu1 %v16418_v30  ;;  %6427 = vmatpush1.msra.mxu0 %v17218_v27  ;;  %v17224_v27 = vld [vmem:[#allocation8_spill] sm:$0xff] }
 0x508   :  { %10373 = vmatpush1.msk.msra.mxu1 %vm17219_vm9, %v16385_v17  ;;  %6431 = vmatprep.subr.mxu0 %v16418_v30  ;;  %vm17225_vm9 = vnez %v17118_v63 }
 0x509   :  { %6682 = vmatprep.subr.mxu1 %v16418_v30  ;;  %6435 = vmatpush1.msra.mxu0 %v17220_v28  ;;  %v17226_v28 = vld [vmem:[#allocation184_spill] sm:$0xff] }
 0x50a   :  { %10374 = vmatpush1.msk.msra.mxu1 %vm17221_vm6, %v16385_v17  ;;  %6439 = vmatprep.subr.mxu0 %v16418_v30  ;;  %vm17275_vm6 = vnez %v16921_v0  ;;  %v17378_v0 = vld [vmem:[#allocation53_spill] sm:$0xff] }
 0x50b   :  { %6686 = vmatprep.subr.mxu1 %v16418_v30  ;;  %6443 = vmatpush1.msra.mxu0 %v17222_v7  ;;  %v17227_v7 = vld [vmem:[#allocation189_spill] sm:$0xff] }
 0x50c   :  { %10375 = vmatpush1.msk.msra.mxu1 %vm17223_vm8, %v16385_v17  ;;  %6447 = vmatprep.subr.mxu0 %v16418_v30  ;;  %vm17230_vm8 = vnez %v17125_v45 }
 0x50d   :  { %6690 = vmatprep.subr.mxu1 %v16418_v30  ;;  %6451 = vmatpush1.msra.mxu0 %v17224_v27  ;;  %v17229_v27 = vld [vmem:[#allocation193_spill] sm:$0xff] }
 0x50e   :  { %10376 = vmatpush1.msk.msra.mxu1 %vm17225_vm9, %v16385_v17  ;;  %6455 = vmatprep.subr.mxu0 %v16418_v30  ;;  %vm17228_vm9 = vnez %v17122_v9 }
 0x50f   :  { %6694 = vmatprep.subr.mxu1 %v16418_v30  ;;  %6459 = vmatpush1.msra.mxu0 %v17226_v28  ;;  %v17231_v28 = vld [vmem:[#allocation195_spill] sm:$0xff] }
 0x510   :  { %6696 = vmatpush1.msra.mxu1 %v16418_v30  ;;  %6463 = vmatprep.subr.mxu0 %v16418_v30 }
 0x511   :  { %6698 = vmatprep.subr.mxu1 %v16418_v30  ;;  %6467 = vmatpush1.msra.mxu0 %v17227_v7  ;;  %v17237_v7 = vld [vmem:[#allocation207_spill] sm:$0xff] }
 0x512   :  { %6700 = vmatpush1.msra.mxu1 %v16418_v30  ;;  %6471 = vmatprep.subr.mxu0 %v16418_v30 }
 0x513   :  { %10377 = vmatprep.subr.msk.mxu1 %vm17228_vm9, %v16385_v17  ;;  %6475 = vmatpush1.msra.mxu0 %v17229_v27  ;;  %vm17232_vm9 = vnez %v17131_v35  ;;  %v17235_v27 = vld [vmem:[#allocation203_spill] sm:$0xff]  ;;  %v10394_v35 = vld [vmem:[%s15546_s1 + $0x30] sm:$0xff] }
 0x514   :  { %6704 = vmatpush2.msra.mxu1 %v16418_v30  ;;  %6479 = vmatprep.subr.mxu0 %v16418_v30 }
 0x515   :  { %10378 = vmatprep.subr.msk.mxu1 %vm17230_vm8, %v16385_v17  ;;  %6483 = vmatpush1.msra.mxu0 %v17231_v28  ;;  %v17233_v28 = vld [vmem:[#allocation200_spill] sm:$0xff]  ;;  %vm17234_vm8 = vnez %v17134_v4 }
 0x516   :  { %6708 = vmatpush2.msra.mxu1 %v16418_v30  ;;  %6487 = vmatprep.subr.mxu0 %v16418_v30 }
 0x517   :  { %10379 = vmatprep.subr.msk.mxu1 %vm17184_vm15, %v16385_v17  ;;  %6491 = vmatpush1.msra.mxu0 %v16418_v30  ;;  %vm17236_vm15 = vnez %v17137_v11 }
 0x518   :  { %6712 = vmatpush2.msra.mxu1 %v16418_v30  ;;  %6495 = vmatprep.subr.mxu0 %v16418_v30 }
 0x519   :  { %10380 = vmatprep.subr.msk.mxu1 %vm17232_vm9, %v16385_v17  ;;  %6499 = vmatpush1.msra.mxu0 %v16418_v30  ;;  %vm17238_vm9 = vnez %v17140_v22 }
 0x51a   :  { %6716 = vmatpush2.msra.mxu1 %v16418_v30  ;;  %6503 = vmatprep.subr.mxu0 %v17233_v28  ;;  %v17239_v28 = vld [vmem:[#allocation208_spill] sm:$0xff] }
 0x51b   :  { %10381 = vmatprep.subr.msk.mxu1 %vm17234_vm8, %v16385_v17  ;;  %6507 = vmatpush2.msra.mxu0 %v16418_v30  ;;  %vm17240_vm8 = vnez %v17143_v18 }
 0x51c   :  { %6720 = vmatpush2.msra.mxu1 %v16418_v30  ;;  %6511 = vmatprep.subr.mxu0 %v17235_v27  ;;  %v17241_v27 = vld [vmem:[#allocation210_spill] sm:$0xff] }
 0x51d   :  { %10382 = vmatprep.subr.msk.mxu1 %vm17236_vm15, %v16385_v17  ;;  %6515 = vmatpush2.msra.mxu0 %v16418_v30  ;;  %vm17273_vm15 = vnez %v16918_v46  ;;  %v17376_v46 = vld [vmem:[#allocation49_spill] sm:$0xff] }
 0x51e   :  { %6724 = vmatpush2.msra.mxu1 %v16418_v30  ;;  %6519 = vmatprep.subr.mxu0 %v17237_v7  ;;  %v17242_v7 = vld [vmem:[#allocation215_spill] sm:$0xff] }
 0x51f   :  { %10383 = vmatprep.subr.msk.mxu1 %vm17238_vm9, %v16385_v17  ;;  %6523 = vmatpush2.msra.mxu0 %v16418_v30  ;;  %vm17243_vm9 = vnez %v17149_v44 }
 0x520   :  { %6728 = vmatpush2.msra.mxu1 %v16418_v30  ;;  %6527 = vmatprep.subr.mxu0 %v17239_v28  ;;  %v17244_v28 = vld [vmem:[#allocation217_spill] sm:$0xff] }
 0x521   :  { %10384 = vmatprep.subr.msk.mxu1 %vm17240_vm8, %v16385_v17  ;;  %6531 = vmatpush2.msra.mxu0 %v16418_v30  ;;  %vm17271_vm8 = vnez %v16915_v47  ;;  %v17375_v47 = vld [vmem:[#allocation45_spill] sm:$0xff] }
 0x522   :  { %6732 = vmatpush2.msra.mxu1 %v16418_v30  ;;  %6535 = vmatprep.subr.mxu0 %v17241_v27  ;;  %v17245_v27 = vld [vmem:[#allocation219_spill] sm:$0xff] }
 0x523   :  { %10385 = vmatprep.subr.msk.mxu1 %vm17194_vm5, %v16385_v17  ;;  %6539 = vmatpush2.msra.mxu0 %v16418_v30  ;;  %vm17269_vm5 = vnez %v16912_v12  ;;  %v17374_v12 = vld [vmem:[#allocation42_spill] sm:$0xff] }
 0x524   :  { %6736 = vmatpush2.msra.mxu1 %v16418_v30  ;;  %6543 = vmatprep.subr.mxu0 %v17242_v7  ;;  %v17246_v7 = vld [vmem:[#allocation223_spill] sm:$0xff] }
 0x525   :  { %10386 = vmatprep.subr.msk.mxu1 %vm17243_vm9, %v16385_v17  ;;  %6547 = vmatpush2.msra.mxu0 %v16418_v30  ;;  %vm17267_vm9 = vnez %v16909_v48  ;;  %v17373_v48 = vld [vmem:[#allocation38_spill] sm:$0xff] }
 0x526   :  { %6740 = vmatpush2.msra.mxu1 %v16418_v30  ;;  %6551 = vmatprep.subr.mxu0 %v17244_v28  ;;  %v17247_v28 = vld [vmem:[#allocation226_spill] sm:$0xff] }
 0x527   :  { %10387 = vmatprep.subr.msk.mxu1 %vm17198_vm14, %v16385_v17  ;;  %6555 = vmatpush2.msra.mxu0 %v16418_v30  ;;  %vm17264_vm14 = vnez %v16905_v34  ;;  %v17372_v34 = vld [vmem:[#allocation33_spill] sm:$0xff] }
 0x528   :  { %6744 = vmatpush2.msra.mxu1 %v16418_v30  ;;  %6559 = vmatprep.subr.mxu0 %v17245_v27  ;;  %v17248_v27 = vld [vmem:[#allocation229_spill] sm:$0xff] }
 0x529   :  { %10388 = vmatprep.subr.msk.mxu1 %vm17156_vm11, %v16385_v17  ;;  %6563 = vmatpush2.msra.mxu0 %v16418_v30  ;;  %vm17262_vm11 = vnez %v16902_v55  ;;  %v17371_v55 = vld [vmem:[#allocation26_spill] sm:$0xff] }
 0x52a   :  { %6748 = vmatpush2.msra.mxu1 %v16418_v30  ;;  %6567 = vmatprep.subr.mxu0 %v17246_v7  ;;  %v17250_v7 = vld [vmem:[#allocation232_spill] sm:$0xff] }
 0x52b   :  { %10389 = vmatprep.subr.msk.mxu1 %vm17201_vm10, %v16385_v17  ;;  %6571 = vmatpush2.msra.mxu0 %v16418_v30  ;;  %vm17249_vm10 = vnez %v17163_v14 }
 0x52c   :  { %6752 = vmatpush2.msra.mxu1 %v16418_v30  ;;  %6575 = vmatprep.subr.mxu0 %v17247_v28  ;;  %v17252_v28 = vld [vmem:[#allocation235_spill] sm:$0xff] }
 0x52d   :  { %10390 = vmatprep.subr.msk.mxu1 %vm17162_vm0, %v16385_v17  ;;  %6579 = vmatpush2.msra.mxu0 %v16418_v30  ;;  %vm17251_vm0 = vnez %v17165_v50  ;;  %v4741_v50 = vpop.f32.mrf.mxu1 }
 0x52e   :  { %6756 = vmatpush2.msra.mxu1 %v16418_v30  ;;  %6583 = vmatprep.subr.mxu0 %v17248_v27  ;;  %v17253_v27 = vld [vmem:[#allocation238_spill] sm:$0xff] }
 0x52f   :  { %6758 = vmatprep.subr.mxu1 %v16418_v30  ;;  %6587 = vmatpush2.msra.mxu0 %v16418_v30  ;;  %v5083_v14 = vpop.f32.mrf.mxu1 }
 0x530   :  { %10391 = vmatpush2.msk.msra.mxu1 %vm17249_vm10, %v16385_v17  ;;  %6591 = vmatprep.subr.mxu0 %v17250_v7  ;;  %v17254_v7 = vld [vmem:[#allocation241_spill] sm:$0xff] }
 0x531   :  { %6762 = vmatprep.subr.mxu1 %v16418_v30  ;;  %6595 = vmatpush2.msra.mxu0 %v16418_v30  ;;  %v5085_v26 = vpop.f32.mrf.mxu1 }
 0x532   :  { %10392 = vmatpush2.msk.msra.mxu1 %vm17251_vm0, %v16385_v17  ;;  %6599 = vmatprep.subr.mxu0 %v17252_v28  ;;  %v4346_v28 = vpop.f32.mrf.mxu0  ;;  %vm17256_vm0 = vcmask 64512  }
 0x533   :  { %6768 = vmatmul.mubr.f32.vlgmr.msra.gmra.mxu1 %v13865_v54  ;;  %6603 = vmatpush2.msra.mxu0 %v16418_v30  ;;  %v5485_v15 = vpop.f32.mrf.mxu1  ;;  %v4347_v18 = vadd.f32 %v4346_v28, %v13332_v8  ;;  %v6796_v33 = vsel %vm17256_vm0, %v10394_v35, 0  ;;  %vm17257_vm10 = vmmov %vm17256_vm0 }
 0x534   :  { %6607 = vmatprep.subr.mxu0 %v17253_v27  ;;  %6978 = vmatprep.mubr.f32.mxu1 %v16418_v30  ;;  %v4348_v53 = vpop.f32.mrf.mxu0 }
 0x535   :  { %6611 = vmatpush2.msra.mxu0 %v16418_v30  ;;  %v5487_v10 = vpop.f32.mrf.mxu1  ;;  %v4740_v4 = vadd.f32 %v4739_v16, %v4347_v18  ;;  %v14316_v16 = vand.u32 4294901760, %v6796_v33 }
 0x536   :  { %6615 = vmatprep.subr.mxu0 %v16418_v30  ;;  %v4942_v27 = vpop.f32.mrf.mxu0 }
 0x537   :  { %6619 = vmatpush2.msra.mxu0 %v17254_v7  ;;  %v4943_v45 = vadd.f32 %v4942_v27, %v4740_v4 }
 0x538   :  { %6623 = vmatprep.subr.mxu0 %v16418_v30  ;;  %v4944_v29 = vpop.f32.mrf.mxu0 }
 0x539   :  { %6627 = vmatpush2.msra.mxu0 %v17255_v24 }
 0x53a   :  { %6631 = vmatmul.mubr.f32.vlgmr.msra.gmra.mxu0 %v13865_v54  ;;  %v5348_v36 = vpop.f32.mrf.mxu0  ;;  %v4349_v54 = vadd.f32 %v4348_v53, %v13336_v32  ;;  %v10395_v53 = vld [vmem:[%s15546_s1 + $0x38] sm:$0xff]  ;;  %v5084_v32 = vadd.f32 %v5083_v14, %v4943_v45  ;;  %v14323_v45 = vsub.f32 %v6796_v33, %v14316_v16 }
 0x53b   :  { %6870 = vmatprep.mubr.f32.mxu0 %v16418_v30 }
 0x53c   :  { %v5350_v44 = vpop.f32.mrf.mxu0  ;;  %v4742_v9 = vadd.f32 %v4741_v50, %v4349_v54  ;;  %v5349_v51 = vadd.f32 %v5348_v36, %v5084_v32 }
 0x53e   :  { %v4945_v42 = vadd.f32 %v4944_v29, %v4742_v9  ;;  %v10396_v29 = vld [vmem:[%s15546_s1 + $0x40] sm:$0xff]  ;;  %v5486_v36 = vadd.f32 %v5485_v15, %v5349_v51 }
 0x540   :  { %v5086_v4 = vadd.f32 %v5085_v26, %v4945_v42 }
 0x56f   :  { %v6023_v24 = vpop.f32.mrf.mxu1 }
 0x571   :  { %v6025_v56 = vpop.f32.mrf.mxu1 }
 0x577   :  { %v5630_v7 = vpop.f32.mrf.mxu0 }
 0x578   :  { %v6024_v63 = vadd.f32 %v6023_v24, %v5630_v7  ;;  %v6799_v24 = vsel %vm17257_vm10, %v10395_v53, 0 }
 0x579   :  { %v5632_v22 = vpop.f32.mrf.mxu0  ;;  %v14325_v9 = vand.u32 4294901760, %v6799_v24 }
 0x57a   :  { %v6026_v8 = vadd.f32 %v6025_v56, %v5632_v22  ;;  %v5351_v22 = vadd.f32 %v5350_v44, %v5086_v4  ;;  %v6802_v56 = vsel %vm17256_vm0, %v10396_v29, 0  ;;  %v6781_v44 = vpop.permute.xlu0 %6780 }
 0x57b   :  { %v14332_v33 = vand.u32 4294901760, %v6802_v56 }
 0x57c   :  { %v5488_v42 = vadd.f32 %v5487_v10, %v5351_v22 }
 0x57d   :  { %v6894_v10 = vsub.f32 %v6802_v56, %v14332_v33 }
 0x5b1   :  { %v6367_v25 = vpop.f32.mrf.mxu1 }
 0x5b3   :  { %v6369_v37 = vpop.f32.mrf.mxu1 }
 0x5b9   :  { %v6226_v11 = vpop.f32.mrf.mxu0 }
 0x5ba   :  { %v6227_v28 = vadd.f32 %v6226_v11, %v6024_v63 }
 0x5bb   :  { %v6228_v52 = vpop.f32.mrf.mxu0 }
 0x5bc   :  { %v6229_v18 = vadd.f32 %v6228_v52, %v6026_v8  ;;  %v6368_v50 = vadd.f32 %v6367_v25, %v6227_v28  ;;  %v6873_v8 = vand.u32 4294901760, %v14323_v45 }
 0x5be   :  { %v6370_v35 = vadd.f32 %v6369_v37, %v6229_v18  ;;  %v14330_v37 = vsub.f32 %v6799_v24, %v14325_v9  ;;  %v6874_v51 = vsub.f32 %v14323_v45, %v6873_v8 }
 0x5c0   :  { %v6884_v18 = vand.u32 4294901760, %v14330_v37  ;;  %v6875_v24 = vand.u32 4294901760, %v6874_v51  ;;  %v17278_v51 = vld [vmem:[#allocation70_spill] sm:$0xff] }
 0x5f3   :  { %v6769_v7 = vpop.f32.mrf.mxu1 }
 0x5f5   :  { %v6771_v52 = vpop.f32.mrf.mxu1 }
 0x5fa   :  { %v6632_v27 = vpop.f32.mrf.mxu0 }
 0x5fb   :  { %v6633_v11 = vadd.f32 %v6632_v27, %v6368_v50 }
 0x5fc   :  { %v6634_v63 = vpop.f32.mrf.mxu0 }
 0x5fd   :  { %v6770_v26 = vadd.f32 %v6769_v7, %v6633_v11  ;;  %v6635_v25 = vadd.f32 %v6634_v63, %v6370_v35  ;;  %v6885_v11 = vsub.f32 %v14330_v37, %v6884_v18  ;;  %v6895_v35 = vand.u32 4294901760, %v6894_v10 }
 0x5ff   :  { %v6774_v14 = vadd.f32 %v6770_v26, %v5486_v36  ;;  %v6772_v54 = vadd.f32 %v6771_v52, %v6635_v25  ;;  %v6886_v25 = vand.u32 4294901760, %v6885_v11  ;;  %v6896_v56 = vsub.f32 %v6894_v10, %v6895_v35  ;;  %v17298_v11 = vld [vmem:[#allocation123_spill] sm:$0xff] }
 0x601   :  { %v6783_v28 = vadd.f32 %v6781_v44, %v6774_v14  ;;  %v6775_v53 = vadd.f32 %v6772_v54, %v5488_v42  ;;  %v6897_v54 = vand.u32 4294901760, %v6896_v56  ;;  %v17308_v56 = vld [vmem:[#allocation121_spill] sm:$0xff] }
 0x603   :  { %v6787_v32 = vmul.f32 0.01, %v6783_v28  ;;  %v6784_v15 = vadd.f32 %v6781_v44, %v6775_v53  ;;  %vm6785_vm10 = vcmp.gt.f32.partialorder %v6783_v28, 0.0  ;;  %v17272_v53 = vld [vmem:[#allocation65_spill] sm:$0xff] }
 0x605   :  { %v6788_v4 = vmul.f32 0.01, %v6784_v15  ;;  %vm6786_vm0 = vcmp.gt.f32.partialorder %v6784_v15, 0.0  ;;  %v6789_v50 = vsel %vm6785_vm10, %v6783_v28, %v6787_v32  ;;  %vm17258_vm10 = vnez %v17028_v58  ;;  %v17268_v28 = vld [vmem:[#allocation59_spill] sm:$0xff] }
 0x606   :  { %v6836_v7 = vand.u32 4294901760, %v6789_v50  ;;  %v17274_v32 = vld [vmem:[#allocation67_spill] sm:$0xff] }
 0x607   :  { %v6790_v27 = vsel %vm6786_vm0, %v6784_v15, %v6788_v4  ;;  %vm17260_vm0 = vnez %v16899_v41  ;;  %v17276_v15 = vld [vmem:[#allocation69_spill] sm:$0xff]  ;;  %v17370_v41 = vld [vmem:[#allocation14_spill] sm:$0xff] }
 0x608   :  { %v6834_v29 = vand.u32 4294901760, %v6790_v27  ;;  %v6941_v22 = vsub.f32 %v6789_v50, %v6836_v7  ;;  %v17284_v4 = vld [vmem:[#allocation89_spill] sm:$0xff]  ;;  %v17286_v50 = vld [vmem:[#allocation94_spill] sm:$0xff] }
 0x60a   :  { %6835 = vmatprep.subr.mxu0 %v6834_v29  ;;  %v6935_v63 = vsub.f32 %v6790_v27, %v6834_v29  ;;  %v6942_v36 = vand.u32 4294901760, %v6941_v22  ;;  %v17290_v27 = vld [vmem:[#allocation101_spill] sm:$0xff] }
 0x60b   :  { %6837 = vmatpush1.msra.mxu0 %v6836_v7 }
 0x60c   :  { %6876 = vmatmul.mubr.f32.vlgmr.msra.gmra.mxu0 %v6875_v24  ;;  %7032 = vmatprep.subr.mxu0 %v6935_v63  ;;  %v6936_v26 = vand.u32 4294901760, %v6935_v63  ;;  %v6943_v52 = vsub.f32 %v6941_v22, %v6942_v36  ;;  %v17292_v24 = vld [vmem:[#allocation106_spill] sm:$0xff] }
 0x60d   :  { %7035 = vmatpush1.msra.mxu0 %v6941_v22  ;;  %6881 = vmatprep.mubr.f32.mxu0 %v16418_v30  ;;  %v17296_v22 = vld [vmem:[#allocation116_spill] sm:$0xff] }
 0x60e   :  { %7220 = vmatprep.subr.mxu0 %v6936_v26  ;;  %v6937_v42 = vsub.f32 %v6935_v63, %v6936_v26  ;;  %v6944_v44 = vand.u32 4294901760, %v6943_v52  ;;  %v17302_v63 = vld [vmem:[#allocation133_spill] sm:$0xff]  ;;  %v17305_v26 = vld [vmem:[#allocation120_spill] sm:$0xff]  ;;  %v17310_v52 = vld [vmem:[#allocation146_spill] sm:$0xff] }
 0x610   :  { %6887 = vmatmul.mubr.f32.gmra.mxu0 %v6886_v25  ;;  %v6938_v14 = vand.u32 4294901760, %v6937_v42  ;;  %v17307_v25 = vld [vmem:[#allocation142_spill] sm:$0xff] }
 0x611   :  { %6892 = vmatprep.mubr.f32.mxu0 %v16418_v30  ;;  %v17311_v42 = vld [vmem:[#allocation126_spill] sm:$0xff] }
 0x612   :  { %6939 = vmatprep.subr.mxu1 %v6938_v14  ;;  %v17313_v14 = vld [vmem:[#allocation149_spill] sm:$0xff] }
 0x613   :  { %6945 = vmatpush1.msra.mxu1 %v6944_v44  ;;  %v17316_v44 = vld [vmem:[#allocation152_spill] sm:$0xff] }
 0x614   :  { %6898 = vmatmul.mubr.f32.gmra.mxu0 %v6897_v54  ;;  %6980 = vmatmul.mubr.f32.vlgmr.msra.gmra.mxu1 %v14316_v16  ;;  %v17314_v54 = vld [vmem:[#allocation131_spill] sm:$0xff] }
 0x615   :  { %7124 = vmatprep.subr.mxu1 %v6834_v29  ;;  %6985 = vmatprep.mubr.f32.mxu1 %v16418_v30 }
 0x616   :  { %7126 = vmatpush1.msra.mxu1 %v6836_v7  ;;  %7068 = vmatprep.mubr.f32.mxu0 %v16418_v30 }
 0x617   :  { %7310 = vmatprep.subr.mxu1 %v6834_v29  ;;  %v17294_v29 = vld [vmem:[#allocation111_spill] sm:$0xff] }
 0x618   :  { %6987 = vmatmul.mubr.f32.gmra.mxu1 %v14325_v9  ;;  %7071 = vmatmul.mubr.f32.vlgmr.msra.gmra.mxu0 %v14323_v45  ;;  %v17259_v45 = vld [vmem:[#allocation22_spill] sm:$0xff] }
 0x619   :  { %7224 = vmatpush1.msra.mxu0 %v6942_v36  ;;  %6992 = vmatprep.mubr.f32.mxu1 %v16418_v30  ;;  %v17304_v36 = vld [vmem:[#allocation138_spill] sm:$0xff] }
 0x61a   :  { %7076 = vmatprep.mubr.f32.mxu0 %v16418_v30  ;;  %10397 = vmatprep.subr.msk.mxu0 %vm17258_vm10, %v16385_v17 }
 0x61c   :  { %6994 = vmatmul.mubr.f32.gmra.mxu1 %v14332_v33  ;;  %7079 = vmatmul.mubr.f32.gmra.mxu0 %v14330_v37  ;;  %v17265_v37 = vld [vmem:[#allocation52_spill] sm:$0xff] }
 0x61d   :  { %7084 = vmatprep.mubr.f32.mxu0 %v16418_v30  ;;  %7159 = vmatprep.mubr.f32.mxu1 %v16418_v30 }
 0x620   :  { %7087 = vmatmul.mubr.f32.gmra.mxu0 %v6894_v10  ;;  %7163 = vmatmul.mubr.f32.vlgmr.msra.gmra.mxu1 %v6873_v8  ;;  %v17261_v8 = vld [vmem:[#allocation41_spill] sm:$0xff]  ;;  %v17282_v10 = vld [vmem:[#allocation72_spill] sm:$0xff] }
 0x621   :  { %7312 = vmatpush1.msra.mxu1 %v6836_v7  ;;  %7168 = vmatprep.mubr.f32.mxu1 %v16418_v30  ;;  %v17288_v7 = vld [vmem:[#allocation99_spill] sm:$0xff] }
 0x622   :  { %7257 = vmatprep.mubr.f32.mxu0 %v16418_v30  ;;  %7517 = vmatprep.subr.mxu1 %v17259_v45  ;;  %v17317_v45 = vld [vmem:[#allocation136_spill] sm:$0xff] }
 0x624   :  { %7172 = vmatmul.mubr.f32.gmra.mxu1 %v6884_v18  ;;  %7259 = vmatmul.mubr.f32.vlgmr.msra.gmra.mxu0 %v14316_v16  ;;  %v17280_v18 = vld [vmem:[#allocation71_spill] sm:$0xff] }
 0x625   :  { %7177 = vmatprep.mubr.f32.mxu1 %v16418_v30  ;;  %7264 = vmatprep.mubr.f32.mxu0 %v16418_v30 }
 0x626   :  { %7370 = vmatpush1.msra.mxu0 %v16418_v30 }
 0x627   :  { %10398 = vmatprep.subr.msk.mxu0 %vm17260_vm0, %v16385_v17 }
 0x628   :  { %7181 = vmatmul.mubr.f32.gmra.mxu1 %v6895_v35  ;;  %7266 = vmatmul.mubr.f32.gmra.mxu0 %v14325_v9  ;;  %v17300_v35 = vld [vmem:[#allocation128_spill] sm:$0xff] }
 0x629   :  { %7271 = vmatprep.mubr.f32.mxu0 %v16418_v30  ;;  %7345 = vmatprep.mubr.f32.mxu1 %v16418_v30 }
 0x62a   :  { %7374 = vmatpush1.msra.mxu0 %v16418_v30 }
 0x62b   :  { %7376 = vmatprep.subr.mxu0 %v16418_v30 }
 0x62c   :  { %7273 = vmatmul.mubr.f32.gmra.mxu0 %v14332_v33  ;;  %7347 = vmatmul.mubr.f32.vlgmr.msra.gmra.mxu1 %v14316_v16  ;;  %v17263_v16 = vld [vmem:[#allocation48_spill] sm:$0xff] }
 0x62d   :  { %7352 = vmatprep.mubr.f32.mxu1 %v16418_v30  ;;  %7523 = vmatpush1.msra.mxu1 %v16418_v30 }
 0x62e   :  { %7529 = vmatprep.subr.mxu1 %v17261_v8  ;;  %10399 = vmatpush1.msk.msra.mxu0 %vm17262_vm11, %v16385_v17  ;;  %v17319_v8 = vld [vmem:[#allocation154_spill] sm:$0xff] }
 0x62f   :  { %7535 = vmatpush1.msra.mxu1 %v16418_v30  ;;  %7380 = vmatprep.subr.mxu0 %v16418_v30 }
 0x630   :  { %7354 = vmatmul.mubr.f32.gmra.mxu1 %v14325_v9  ;;  %7541 = vmatprep.subr.mxu1 %v16418_v30  ;;  %v17266_v9 = vld [vmem:[#allocation56_spill] sm:$0xff] }
 0x631   :  { %7359 = vmatprep.mubr.f32.mxu1 %v16418_v30  ;;  %7547 = vmatpush1.msra.mxu1 %v17263_v16  ;;  %v17320_v16 = vld [vmem:[#allocation141_spill] sm:$0xff] }
 0x632   :  { %7553 = vmatprep.subr.mxu1 %v16418_v30  ;;  %10400 = vmatpush1.msk.msra.mxu0 %vm17264_vm14, %v16385_v17 }
 0x633   :  { %7559 = vmatpush1.msra.mxu1 %v17265_v37  ;;  %7384 = vmatprep.subr.mxu0 %v16418_v30  ;;  %v17322_v37 = vld [vmem:[#allocation155_spill] sm:$0xff] }
 0x634   :  { %7361 = vmatmul.mubr.f32.gmra.mxu1 %v14332_v33  ;;  %7565 = vmatprep.subr.mxu1 %v16418_v30  ;;  %v17270_v33 = vld [vmem:[#allocation62_spill] sm:$0xff] }
 0x635   :  { %7571 = vmatpush1.msra.mxu1 %v17266_v9  ;;  %10401 = vmatpush1.msk.msra.mxu0 %vm17267_vm9, %v16385_v17  ;;  %v17323_v9 = vld [vmem:[#allocation145_spill] sm:$0xff] }
 0x636   :  { %7577 = vmatprep.subr.mxu1 %v16418_v30  ;;  %7388 = vmatprep.subr.mxu0 %v16418_v30 }
 0x637   :  { %7583 = vmatpush1.msra.mxu1 %v17268_v28  ;;  %10402 = vmatpush1.msk.msra.mxu0 %vm17269_vm5, %v16385_v17  ;;  %v17325_v28 = vld [vmem:[#allocation11_spill] sm:$0xff] }
 0x638   :  { %7589 = vmatprep.subr.mxu1 %v16418_v30  ;;  %7392 = vmatprep.subr.mxu0 %v16418_v30 }
 0x639   :  { %7595 = vmatpush1.msra.mxu1 %v17270_v33  ;;  %10403 = vmatpush1.msk.msra.mxu0 %vm17271_vm8, %v16385_v17 }
 0x63a   :  { %7601 = vmatprep.subr.mxu1 %v16418_v30  ;;  %7396 = vmatprep.subr.mxu0 %v16418_v30 }
 0x63b   :  { %7607 = vmatpush1.msra.mxu1 %v17272_v53  ;;  %10404 = vmatpush1.msk.msra.mxu0 %vm17273_vm15, %v16385_v17 }
 0x63c   :  { %7613 = vmatprep.subr.mxu1 %v16418_v30  ;;  %7400 = vmatprep.subr.mxu0 %v16418_v30 }
 0x63d   :  { %7619 = vmatpush1.msra.mxu1 %v17274_v32  ;;  %10405 = vmatpush1.msk.msra.mxu0 %vm17275_vm6, %v16385_v17 }
 0x63e   :  { %7625 = vmatprep.subr.mxu1 %v16418_v30  ;;  %7404 = vmatprep.subr.mxu0 %v16418_v30 }
 0x63f   :  { %7631 = vmatpush1.msra.mxu1 %v17276_v15  ;;  %10406 = vmatpush1.msk.msra.mxu0 %vm17277_vm1, %v16385_v17 }
 0x640   :  { %7637 = vmatprep.subr.mxu1 %v16418_v30  ;;  %7408 = vmatprep.subr.mxu0 %v16418_v30 }
 0x641   :  { %7643 = vmatpush1.msra.mxu1 %v17278_v51  ;;  %10407 = vmatpush1.msk.msra.mxu0 %vm17279_vm2, %v16385_v17 }
 0x642   :  { %7649 = vmatprep.subr.mxu1 %v16418_v30  ;;  %7412 = vmatprep.subr.mxu0 %v16418_v30 }
 0x643   :  { %7655 = vmatpush1.msra.mxu1 %v17280_v18  ;;  %10408 = vmatpush1.msk.msra.mxu0 %vm17281_vm7, %v16385_v17 }
 0x644   :  { %7661 = vmatprep.subr.mxu1 %v16418_v30  ;;  %7416 = vmatprep.subr.mxu0 %v16418_v30 }
 0x645   :  { %7667 = vmatpush1.msra.mxu1 %v17282_v10  ;;  %10409 = vmatpush1.msk.msra.mxu0 %vm17283_vm12, %v16385_v17 }
 0x646   :  { %7673 = vmatprep.subr.mxu1 %v16418_v30  ;;  %7420 = vmatprep.subr.mxu0 %v16418_v30 }
 0x647   :  { %7679 = vmatpush1.msra.mxu1 %v17284_v4  ;;  %10410 = vmatpush1.msk.msra.mxu0 %vm17285_vm13, %v16385_v17  ;;  %vm17291_vm13 = vnez %v16945_v19 }
 0x648   :  { %7685 = vmatprep.subr.mxu1 %v16418_v30  ;;  %7424 = vmatprep.subr.mxu0 %v16418_v30 }
 0x649   :  { %7691 = vmatpush1.msra.mxu1 %v17286_v50  ;;  %10411 = vmatpush1.msk.msra.mxu0 %vm17287_vm4, %v16385_v17  ;;  %vm17293_vm4 = vnez %v16948_v13 }
 0x64a   :  { %7697 = vmatprep.subr.mxu1 %v16418_v30  ;;  %7428 = vmatprep.subr.mxu0 %v16418_v30 }
 0x64b   :  { %7703 = vmatpush1.msra.mxu1 %v17288_v7  ;;  %10412 = vmatpush1.msk.msra.mxu0 %vm17289_vm3, %v16385_v17  ;;  %vm17295_vm3 = vnez %v16951_v1 }
 0x64c   :  { %7733 = vmatprep.subr.mxu1 %v17290_v27  ;;  %10413 = vmatprep.subr.msk.mxu0 %vm17291_vm13, %v16385_v17  ;;  %vm17297_vm13 = vnez %v16954_v23 }
 0x64d   :  { %7739 = vmatpush2.msra.mxu1 %v16418_v30  ;;  %7442 = vmatpush2.msra.mxu0 %v16418_v30 }
 0x64e   :  { %7745 = vmatprep.subr.mxu1 %v17292_v24  ;;  %10414 = vmatprep.subr.msk.mxu0 %vm17293_vm4, %v16385_v17  ;;  %vm17299_vm4 = vnez %v16957_v61 }
 0x64f   :  { %7751 = vmatpush2.msra.mxu1 %v16418_v30  ;;  %7446 = vmatpush2.msra.mxu0 %v16418_v30 }
 0x650   :  { %7757 = vmatprep.subr.mxu1 %v17294_v29  ;;  %10415 = vmatprep.subr.msk.mxu0 %vm17295_vm3, %v16385_v17  ;;  %vm17301_vm3 = vnez %v16960_v38 }
 0x651   :  { %7763 = vmatpush2.msra.mxu1 %v16418_v30  ;;  %7450 = vmatpush2.msra.mxu0 %v16418_v30 }
 0x652   :  { %7769 = vmatprep.subr.mxu1 %v17296_v22  ;;  %10416 = vmatprep.subr.msk.mxu0 %vm17297_vm13, %v16385_v17  ;;  %vm17303_vm13 = vnez %v16963_v40 }
 0x653   :  { %7775 = vmatpush2.msra.mxu1 %v16418_v30  ;;  %7454 = vmatpush2.msra.mxu0 %v16418_v30 }
 0x654   :  { %7781 = vmatprep.subr.mxu1 %v17298_v11  ;;  %10417 = vmatprep.subr.msk.mxu0 %vm17299_vm4, %v16385_v17  ;;  %vm17306_vm4 = vnez %v17305_v26 }
 0x655   :  { %7787 = vmatpush2.msra.mxu1 %v16418_v30  ;;  %7458 = vmatpush2.msra.mxu0 %v16418_v30 }
 0x656   :  { %7793 = vmatprep.subr.mxu1 %v17300_v35  ;;  %10418 = vmatprep.subr.msk.mxu0 %vm17301_vm3, %v16385_v17  ;;  %vm17309_vm3 = vnez %v17308_v56 }
 0x657   :  { %7799 = vmatpush2.msra.mxu1 %v16418_v30  ;;  %7462 = vmatpush2.msra.mxu0 %v16418_v30 }
 0x658   :  { %7805 = vmatprep.subr.mxu1 %v17302_v63  ;;  %10419 = vmatprep.subr.msk.mxu0 %vm17303_vm13, %v16385_v17  ;;  %vm17312_vm13 = vnez %v17311_v42 }
 0x659   :  { %7811 = vmatpush2.msra.mxu1 %v16418_v30  ;;  %7466 = vmatpush2.msra.mxu0 %v16418_v30 }
 0x65a   :  { %7817 = vmatprep.subr.mxu1 %v17304_v36  ;;  %10420 = vmatprep.subr.msk.mxu0 %vm17306_vm4, %v16385_v17  ;;  %vm17315_vm4 = vnez %v17314_v54 }
 0x65b   :  { %7823 = vmatpush2.msra.mxu1 %v16418_v30  ;;  %7470 = vmatpush2.msra.mxu0 %v16418_v30 }
 0x65c   :  { %7829 = vmatprep.subr.mxu1 %v17307_v25  ;;  %10421 = vmatprep.subr.msk.mxu0 %vm17309_vm3, %v16385_v17  ;;  %vm17318_vm3 = vnez %v17317_v45  ;;  %v17410_v45 = vld [vmem:[#allocation143_spill] sm:$0xff] }
 0x65d   :  { %7835 = vmatpush2.msra.mxu1 %v16418_v30  ;;  %7474 = vmatpush2.msra.mxu0 %v16418_v30 }
 0x65e   :  { %7841 = vmatprep.subr.mxu1 %v17310_v52  ;;  %10422 = vmatprep.subr.msk.mxu0 %vm17312_vm13, %v16385_v17  ;;  %vm17321_vm13 = vnez %v17320_v16 }
 0x65f   :  { %7847 = vmatpush2.msra.mxu1 %v16418_v30  ;;  %7478 = vmatpush2.msra.mxu0 %v16418_v30 }
 0x660   :  { %7853 = vmatprep.subr.mxu1 %v17313_v14  ;;  %10423 = vmatprep.subr.msk.mxu0 %vm17315_vm4, %v16385_v17  ;;  %vm17324_vm4 = vnez %v17323_v9  ;;  %v17412_v9 = vld [vmem:[#allocation147_spill] sm:$0xff] }
 0x661   :  { %7859 = vmatpush2.msra.mxu1 %v16418_v30  ;;  %7482 = vmatpush2.msra.mxu0 %v16418_v30 }
 0x662   :  { %7865 = vmatprep.subr.mxu1 %v17316_v44  ;;  %10424 = vmatprep.subr.msk.mxu0 %vm17318_vm3, %v16385_v17 }
 0x663   :  { %7871 = vmatpush2.msra.mxu1 %v16418_v30  ;;  %7486 = vmatpush2.msra.mxu0 %v16418_v30 }
 0x664   :  { %7877 = vmatprep.subr.mxu1 %v17319_v8  ;;  %10425 = vmatprep.subr.msk.mxu0 %vm17321_vm13, %v16385_v17 }
 0x665   :  { %7883 = vmatpush2.msra.mxu1 %v16418_v30  ;;  %7490 = vmatpush2.msra.mxu0 %v16418_v30 }
 0x666   :  { %7889 = vmatprep.subr.mxu1 %v17322_v37  ;;  %10426 = vmatprep.subr.msk.mxu0 %vm17324_vm4, %v16385_v17 }
 0x667   :  { %7895 = vmatpush2.msra.mxu1 %v16418_v30  ;;  %7494 = vmatpush2.msra.mxu0 %v16418_v30 }
 0x668   :  { %10427 = vmatprep.subr.msk.mxu1 %vm17258_vm10, %v16385_v17  ;;  %7907 = vmatprep.subr.mxu0 %v17325_v28 }
 0x6cc   :  { %v6877_v33 = vpop.f32.mrf.mxu0 }
 0x6ce   :  { %v6879_v53 = vpop.f32.mrf.mxu0 }
 0x6d0   :  { %v6888_v32 = vpop.f32.mrf.mxu0 }
 0x6d2   :  { %v6890_v15 = vpop.f32.mrf.mxu0 }
 0x6d4   :  { %v6899_v51 = vpop.f32.mrf.mxu0  ;;  %v6981_v18 = vpop.f32.mrf.mxu1 }
 0x6d6   :  { %v6901_v10 = vpop.f32.mrf.mxu0  ;;  %v6983_v4 = vpop.f32.mrf.mxu1 }
 0x6d8   :  { %v6988_v50 = vpop.f32.mrf.mxu1  ;;  %v7072_v7 = vpop.f32.mrf.mxu0 }
 0x6d9   :  { %v6989_v27 = vadd.f32 %v6988_v50, %v6888_v32  ;;  %v6982_v32 = vadd.f32 %v6981_v18, %v6877_v33 }
 0x6da   :  { %v6990_v24 = vpop.f32.mrf.mxu1  ;;  %v7074_v29 = vpop.f32.mrf.mxu0 }
 0x6db   :  { %v6991_v22 = vadd.f32 %v6990_v24, %v6890_v15  ;;  %v6984_v24 = vadd.f32 %v6983_v4, %v6879_v53  ;;  %v7073_v20 = vadd.f32 %v7072_v7, %v6982_v32 }
 0x6dc   :  { %v6995_v11 = vpop.f32.mrf.mxu1  ;;  %v7080_v35 = vpop.f32.mrf.mxu0 }
 0x6dd   :  { %v6996_v63 = vadd.f32 %v6995_v11, %v6899_v51  ;;  %v7081_v36 = vadd.f32 %v7080_v35, %v6989_v27  ;;  %v7075_v35 = vadd.f32 %v7074_v29, %v6984_v24 }
 0x6de   :  { %v6997_v25 = vpop.f32.mrf.mxu1  ;;  %v7082_v52 = vpop.f32.mrf.mxu0 }
 0x6df   :  { %v6998_v14 = vadd.f32 %v6997_v25, %v6901_v10  ;;  %v7083_v44 = vadd.f32 %v7082_v52, %v6991_v22 }
 0x6e0   :  { %v7088_v8 = vpop.f32.mrf.mxu0  ;;  %v7164_v37 = vpop.f32.mrf.mxu1 }
 0x6e1   :  { %v7089_v28 = vadd.f32 %v7088_v8, %v6996_v63  ;;  %v7165_v10 = vadd.f32 %v7164_v37, %v7073_v20 }
 0x6e2   :  { %v7090_v31 = vpop.f32.mrf.mxu0  ;;  %v7166_v49 = vpop.f32.mrf.mxu1 }
 0x6e3   :  { %v7091_v21 = vadd.f32 %v7090_v31, %v6998_v14  ;;  %v7167_v8 = vadd.f32 %v7166_v49, %v7075_v35  ;;  %v17327_v35 = vld [vmem:[#allocation27_spill] sm:$0xff] }
 0x6e4   :  { %v7173_v43 = vpop.f32.mrf.mxu1  ;;  %v7260_v57 = vpop.f32.mrf.mxu0 }
 0x6e5   :  { %v7174_v50 = vadd.f32 %v7173_v43, %v7081_v36  ;;  %v7261_v58 = vadd.f32 %v7260_v57, %v7165_v10  ;;  %v17328_v10 = vld [vmem:[#allocation30_spill] sm:$0xff] }
 0x6e6   :  { %v7175_v62 = vpop.f32.mrf.mxu1  ;;  %v7262_v15 = vpop.f32.mrf.mxu0 }
 0x6e7   :  { %v7176_v51 = vadd.f32 %v7175_v62, %v7083_v44  ;;  %v7263_v18 = vadd.f32 %v7262_v15, %v7167_v8  ;;  %v17333_v8 = vld [vmem:[#allocation50_spill] sm:$0xff] }
 0x6e8   :  { %v7182_v27 = vpop.f32.mrf.mxu1  ;;  %v7267_v11 = vpop.f32.mrf.mxu0 }
 0x6e9   :  { %v7183_v22 = vadd.f32 %v7182_v27, %v7089_v28  ;;  %v7268_v25 = vadd.f32 %v7267_v11, %v7174_v50  ;;  %v17326_v11 = vld [vmem:[#allocation20_spill] sm:$0xff] }
 0x6ea   :  { %v7184_v52 = vpop.f32.mrf.mxu1  ;;  %v7269_v63 = vpop.f32.mrf.mxu0 }
 0x6eb   :  { %v14549_v31 = vadd.f32 %v7184_v52, %v7091_v21  ;;  %v7270_v14 = vadd.f32 %v7269_v63, %v7176_v51  ;;  %v17331_v52 = vld [vmem:[#allocation43_spill] sm:$0xff]  ;;  %v17332_v63 = vld [vmem:[#allocation46_spill] sm:$0xff] }
 0x6ec   :  { %v7274_v33 = vpop.f32.mrf.mxu0  ;;  %v7348_v43 = vpop.f32.mrf.mxu1 }
 0x6ed   :  { %v7275_v36 = vadd.f32 %v7274_v33, %v7183_v22  ;;  %v7349_v53 = vadd.f32 %v7348_v43, %v7261_v58  ;;  %v17329_v22 = vld [vmem:[#allocation34_spill] sm:$0xff]  ;;  %v17338_v43 = vld [vmem:[#allocation61_spill] sm:$0xff] }
 0x6ee   :  { %v7350_v4 = vpop.f32.mrf.mxu1  ;;  %v17336_v33 = vld [vmem:[#allocation58_spill] sm:$0xff] }
 0x6ef   :  { %v14551_v62 = vand.u32 4294901760, %v7349_v53  ;;  %v7351_v7 = vadd.f32 %v7350_v4, %v7263_v18  ;;  %v17341_v18 = vld [vmem:[#allocation64_spill] sm:$0xff]  ;;  %v17347_v4 = vld [vmem:[#allocation85_spill] sm:$0xff] }
 0x6f0   :  { %v7355_v29 = vpop.f32.mrf.mxu1 }
 0x6f1   :  { %v14554_v20 = vsub.f32 %v7349_v53, %v14551_v62  ;;  %v14556_v44 = vand.u32 4294901760, %v7351_v7  ;;  %v14558_v49 = vadd.f32 %v7355_v29, %v7268_v25  ;;  %v17330_v25 = vld [vmem:[#allocation37_spill] sm:$0xff]  ;;  %v17345_v53 = vld [vmem:[#allocation80_spill] sm:$0xff] }
 0x6f2   :  { %v7357_v21 = vpop.f32.mrf.mxu1  ;;  %v17350_v29 = vld [vmem:[#allocation92_spill] sm:$0xff] }
 0x6f3   :  { %v7503_v57 = vand.u32 4294901760, %v14554_v20  ;;  %v7496_v37 = vsub.f32 %v7351_v7, %v14556_v44  ;;  %v14562_v28 = vadd.f32 %v7357_v21, %v7270_v14  ;;  %7897 = vmatprep.mubr.f32.mxu1 %v14556_v44  ;;  %v17334_v14 = vld [vmem:[#allocation54_spill] sm:$0xff]  ;;  %v17352_v21 = vld [vmem:[#allocation97_spill] sm:$0xff] }
 0x6f4   :  { %v7362_v58 = vpop.f32.mrf.mxu1  ;;  %7899 = vmatmul.mubr.f32.vlgmr.msra.gmra.mxu1 %v14551_v62  ;;  %v17348_v7 = vld [vmem:[#allocation86_spill] sm:$0xff] }
 0x6f5   :  { %v14566_v32 = vadd.f32 %v7362_v58, %v7275_v36  ;;  %8111 = vmatpush1.msra.mxu1 %v16418_v30  ;;  %v7497_v50 = vand.u32 4294901760, %v7496_v37  ;;  %v7504_v15 = vsub.f32 %v14554_v20, %v7503_v57  ;;  %v17343_v36 = vld [vmem:[#allocation76_spill] sm:$0xff] }
 0x6f6   :  { %10428 = vmatprep.subr.msk.mxu1 %vm17260_vm0, %v16385_v17  ;;  %v17356_v58 = vld [vmem:[#allocation108_spill] sm:$0xff] }
 0x6f7   :  { %8115 = vmatpush1.msra.mxu1 %v16418_v30  ;;  %8239 = vmatprep.mubr.f32.mxu1 %v7497_v50  ;;  %v7498_v24 = vsub.f32 %v7496_v37, %v7497_v50  ;;  %v7505_v27 = vand.u32 4294901760, %v7504_v15  ;;  %v17358_v50 = vld [vmem:[#allocation114_spill] sm:$0xff]  ;;  %v17360_v15 = vld [vmem:[#allocation119_spill] sm:$0xff] }
 0x6f8   :  { %8117 = vmatprep.subr.mxu1 %v16418_v30 }
 0x6f9   :  { %10429 = vmatpush1.msk.msra.mxu1 %vm17262_vm11, %v16385_v17  ;;  %v7499_v51 = vand.u32 4294901760, %v7498_v24  ;;  %v17362_v24 = vld [vmem:[#allocation125_spill] sm:$0xff] }
 0x6fa   :  { %8121 = vmatprep.subr.mxu1 %v16418_v30 }
 0x6fb   :  { %10430 = vmatpush1.msk.msra.mxu1 %vm17264_vm14, %v16385_v17  ;;  %7500 = vmatprep.mubr.f32.mxu0 %v7499_v51  ;;  %v17363_v51 = vld [vmem:[#allocation130_spill] sm:$0xff] }
 0x6fc   :  { %8125 = vmatprep.subr.mxu1 %v16418_v30  ;;  %7506 = vmatmul.mubr.f32.vlgmr.msra.gmra.mxu0 %v7505_v27  ;;  %v17364_v27 = vld [vmem:[#allocation135_spill] sm:$0xff] }
 0x6fd   :  { %7910 = vmatpush1.msra.mxu0 %v16418_v30  ;;  %10431 = vmatpush1.msk.msra.mxu1 %vm17267_vm9, %v16385_v17 }
 0x6fe   :  { %7913 = vmatprep.subr.mxu0 %v17326_v11  ;;  %8099 = vmatprep.mubr.f32.mxu0 %v7496_v37  ;;  %v17354_v37 = vld [vmem:[#allocation103_spill] sm:$0xff]  ;;  %v17365_v11 = vld [vmem:[#allocation140_spill] sm:$0xff] }
 0x6ff   :  { %8129 = vmatprep.subr.mxu1 %v16418_v30  ;;  %7916 = vmatpush1.msra.mxu0 %v16418_v30 }
 0x700   :  { %10432 = vmatpush1.msk.msra.mxu1 %vm17269_vm5, %v16385_v17  ;;  %7919 = vmatprep.subr.mxu0 %v16418_v30 }
 0x701   :  { %8133 = vmatprep.subr.mxu1 %v16418_v30  ;;  %7922 = vmatpush1.msra.mxu0 %v17327_v35  ;;  %v17436_v35 = vld [vmem:[#allocation19_spill] sm:$0xff] }
 0x702   :  { %10433 = vmatpush1.msk.msra.mxu1 %vm17271_vm8, %v16385_v17  ;;  %7925 = vmatprep.subr.mxu0 %v16418_v30 }
 0x703   :  { %8137 = vmatprep.subr.mxu1 %v16418_v30  ;;  %7928 = vmatpush1.msra.mxu0 %v17328_v10  ;;  %v17367_v10 = vld [vmem:[#allocation144_spill] sm:$0xff] }
 0x704   :  { %10434 = vmatpush1.msk.msra.mxu1 %vm17273_vm15, %v16385_v17  ;;  %7931 = vmatprep.subr.mxu0 %v16418_v30 }
 0x705   :  { %8141 = vmatprep.subr.mxu1 %v16418_v30  ;;  %7934 = vmatpush1.msra.mxu0 %v17329_v22  ;;  %v17369_v22 = vld [vmem:[#allocation151_spill] sm:$0xff] }
 0x706   :  { %10435 = vmatpush1.msk.msra.mxu1 %vm17275_vm6, %v16385_v17  ;;  %7937 = vmatprep.subr.mxu0 %v16418_v30 }
 0x707   :  { %8145 = vmatprep.subr.mxu1 %v16418_v30  ;;  %7940 = vmatpush1.msra.mxu0 %v17330_v25  ;;  %v17404_v25 = vld [vmem:[#allocation113_spill] sm:$0xff] }
 0x708   :  { %10436 = vmatpush1.msk.msra.mxu1 %vm17277_vm1, %v16385_v17  ;;  %7943 = vmatprep.subr.mxu0 %v16418_v30 }
 0x709   :  { %8149 = vmatprep.subr.mxu1 %v16418_v30  ;;  %7946 = vmatpush1.msra.mxu0 %v17331_v52 }
 0x70a   :  { %10437 = vmatpush1.msk.msra.mxu1 %vm17279_vm2, %v16385_v17  ;;  %7949 = vmatprep.subr.mxu0 %v16418_v30  ;;  %vm17335_vm2 = vnez %v16936_v2 }
 0x70b   :  { %8153 = vmatprep.subr.mxu1 %v16418_v30  ;;  %7952 = vmatpush1.msra.mxu0 %v17332_v63 }
 0x70c   :  { %10438 = vmatpush1.msk.msra.mxu1 %vm17281_vm7, %v16385_v17  ;;  %7955 = vmatprep.subr.mxu0 %v16418_v30  ;;  %vm17337_vm7 = vnez %v16939_v59 }
 0x70d   :  { %8157 = vmatprep.subr.mxu1 %v16418_v30  ;;  %7958 = vmatpush1.msra.mxu0 %v17333_v8  ;;  %v17411_v8 = vld [vmem:[#allocation167_spill] sm:$0xff] }
 0x70e   :  { %10439 = vmatpush1.msk.msra.mxu1 %vm17283_vm12, %v16385_v17  ;;  %7961 = vmatprep.subr.mxu0 %v16418_v30  ;;  %vm17339_vm12 = vnez %v16942_v3 }
 0x70f   :  { %8161 = vmatprep.subr.mxu1 %v16418_v30  ;;  %7964 = vmatpush1.msra.mxu0 %v17334_v14  ;;  %v17413_v14 = vld [vmem:[#allocation171_spill] sm:$0xff] }
 0x710   :  { %10440 = vmatpush1.msk.msra.mxu1 %vm17335_vm2, %v16385_v17  ;;  %7967 = vmatprep.subr.mxu0 %v16418_v30  ;;  %vm17340_vm2 = vnez %v16945_v19 }
 0x711   :  { %8165 = vmatprep.subr.mxu1 %v16418_v30  ;;  %7970 = vmatpush1.msra.mxu0 %v17336_v33  ;;  %v17414_v33 = vld [vmem:[#allocation150_spill] sm:$0xff] }
 0x712   :  { %10441 = vmatpush1.msk.msra.mxu1 %vm17337_vm7, %v16385_v17  ;;  %7973 = vmatprep.subr.mxu0 %v16418_v30  ;;  %vm17342_vm7 = vnez %v16948_v13 }
 0x713   :  { %8169 = vmatprep.subr.mxu1 %v16418_v30  ;;  %7976 = vmatpush1.msra.mxu0 %v17338_v43 }
 0x714   :  { %10442 = vmatpush1.msk.msra.mxu1 %vm17339_vm12, %v16385_v17  ;;  %7979 = vmatprep.subr.mxu0 %v16418_v30  ;;  %vm17344_vm12 = vnez %v16951_v1 }
 0x715   :  { %10443 = vmatprep.subr.msk.mxu1 %vm17340_vm2, %v16385_v17  ;;  %7982 = vmatpush1.msra.mxu0 %v17341_v18  ;;  %vm17346_vm2 = vnez %v16954_v23  ;;  %v17415_v18 = vld [vmem:[#allocation174_spill] sm:$0xff] }
 0x716   :  { %8183 = vmatpush2.msra.mxu1 %v16418_v30  ;;  %7985 = vmatprep.subr.mxu0 %v16418_v30 }
 0x717   :  { %10444 = vmatprep.subr.msk.mxu1 %vm17342_vm7, %v16385_v17  ;;  %7988 = vmatpush1.msra.mxu0 %v17343_v36  ;;  %vm17349_vm7 = vnez %v16957_v61  ;;  %v17416_v36 = vld [vmem:[#allocation153_spill] sm:$0xff] }
 0x718   :  { %8187 = vmatpush2.msra.mxu1 %v16418_v30  ;;  %7991 = vmatprep.subr.mxu0 %v16418_v30 }
 0x719   :  { %10445 = vmatprep.subr.msk.mxu1 %vm17344_vm12, %v16385_v17  ;;  %7994 = vmatpush1.msra.mxu0 %v17345_v53  ;;  %vm17351_vm12 = vnez %v16960_v38  ;;  %v17417_v53 = vld [vmem:[#allocation178_spill] sm:$0xff] }
 0x71a   :  { %8191 = vmatpush2.msra.mxu1 %v16418_v30  ;;  %7997 = vmatprep.subr.mxu0 %v16418_v30 }
 0x71b   :  { %10446 = vmatprep.subr.msk.mxu1 %vm17346_vm2, %v16385_v17  ;;  %8000 = vmatpush1.msra.mxu0 %v17347_v4  ;;  %vm17353_vm2 = vnez %v16963_v40 }
 0x71c   :  { %8195 = vmatpush2.msra.mxu1 %v16418_v30  ;;  %8015 = vmatprep.subr.mxu0 %v17348_v7  ;;  %v17418_v7 = vld [vmem:[#allocation7_spill] sm:$0xff] }
 0x71d   :  { %10447 = vmatprep.subr.msk.mxu1 %vm17349_vm7, %v16385_v17  ;;  %8018 = vmatpush2.msra.mxu0 %v16418_v30  ;;  %vm17355_vm7 = vnez %v17305_v26 }
 0x71e   :  { %8199 = vmatpush2.msra.mxu1 %v16418_v30  ;;  %8021 = vmatprep.subr.mxu0 %v17350_v29  ;;  %v17420_v29 = vld [vmem:[#allocation180_spill] sm:$0xff] }
 0x71f   :  { %10448 = vmatprep.subr.msk.mxu1 %vm17351_vm12, %v16385_v17  ;;  %8024 = vmatpush2.msra.mxu0 %v16418_v30  ;;  %vm17357_vm12 = vnez %v17308_v56  ;;  %v17407_v56 = vld [vmem:[#allocation129_spill] sm:$0xff] }
 0x720   :  { %8203 = vmatpush2.msra.mxu1 %v16418_v30  ;;  %8027 = vmatprep.subr.mxu0 %v17352_v21  ;;  %v17421_v21 = vld [vmem:[#allocation6_spill] sm:$0xff] }
 0x721   :  { %10449 = vmatprep.subr.msk.mxu1 %vm17353_vm2, %v16385_v17  ;;  %8030 = vmatpush2.msra.mxu0 %v16418_v30  ;;  %vm17359_vm2 = vnez %v17311_v42  ;;  %v17408_v42 = vld [vmem:[#allocation134_spill] sm:$0xff] }
 0x722   :  { %8207 = vmatpush2.msra.mxu1 %v16418_v30  ;;  %8033 = vmatprep.subr.mxu0 %v17354_v37  ;;  %v17424_v37 = vld [vmem:[#allocation10_spill] sm:$0xff] }
 0x723   :  { %10450 = vmatprep.subr.msk.mxu1 %vm17355_vm7, %v16385_v17  ;;  %8036 = vmatpush2.msra.mxu0 %v16418_v30  ;;  %vm17361_vm7 = vnez %v17314_v54  ;;  %v17409_v54 = vld [vmem:[#allocation139_spill] sm:$0xff] }
 0x724   :  { %8211 = vmatpush2.msra.mxu1 %v16418_v30  ;;  %8039 = vmatprep.subr.mxu0 %v17356_v58  ;;  %v17426_v58 = vld [vmem:[#allocation185_spill] sm:$0xff] }
 0x725   :  { %10451 = vmatprep.subr.msk.mxu1 %vm17357_vm12, %v16385_v17  ;;  %8042 = vmatpush2.msra.mxu0 %v16418_v30 }
 0x726   :  { %8215 = vmatpush2.msra.mxu1 %v16418_v30  ;;  %8045 = vmatprep.subr.mxu0 %v17358_v50  ;;  %v17427_v50 = vld [vmem:[#allocation13_spill] sm:$0xff] }
 0x727   :  { %10452 = vmatprep.subr.msk.mxu1 %vm17359_vm2, %v16385_v17  ;;  %8048 = vmatpush2.msra.mxu0 %v16418_v30 }
 0x728   :  { %8219 = vmatpush2.msra.mxu1 %v16418_v30  ;;  %8051 = vmatprep.subr.mxu0 %v17360_v15  ;;  %v17429_v15 = vld [vmem:[#allocation187_spill] sm:$0xff] }
 0x729   :  { %10453 = vmatprep.subr.msk.mxu1 %vm17361_vm7, %v16385_v17  ;;  %8054 = vmatpush2.msra.mxu0 %v16418_v30 }
 0x72a   :  { %8223 = vmatpush2.msra.mxu1 %v16418_v30  ;;  %8057 = vmatprep.subr.mxu0 %v17362_v24  ;;  %v17430_v24 = vld [vmem:[#allocation16_spill] sm:$0xff] }
 0x72b   :  { %10454 = vmatprep.subr.msk.mxu1 %vm17318_vm3, %v16385_v17  ;;  %8060 = vmatpush2.msra.mxu0 %v16418_v30 }
 0x72c   :  { %8227 = vmatpush2.msra.mxu1 %v16418_v30  ;;  %8063 = vmatprep.subr.mxu0 %v17363_v51  ;;  %v17432_v51 = vld [vmem:[#allocation192_spill] sm:$0xff] }
 0x72d   :  { %10455 = vmatprep.subr.msk.mxu1 %vm17321_vm13, %v16385_v17  ;;  %8066 = vmatpush2.msra.mxu0 %v16418_v30 }
 0x72e   :  { %8231 = vmatpush2.msra.mxu1 %v16418_v30  ;;  %8069 = vmatprep.subr.mxu0 %v17364_v27  ;;  %v17433_v27 = vld [vmem:[#allocation17_spill] sm:$0xff] }
 0x72f   :  { %10456 = vmatprep.subr.msk.mxu1 %vm17324_vm4, %v16385_v17  ;;  %8072 = vmatpush2.msra.mxu0 %v16418_v30 }
 0x730   :  { %8235 = vmatpush2.msra.mxu1 %v16418_v30  ;;  %8075 = vmatprep.subr.mxu0 %v17365_v11  ;;  %v17435_v11 = vld [vmem:[#allocation194_spill] sm:$0xff] }
 0x731   :  { %8243 = vmatmul.mubr.f32.vlgmr.msra.gmra.mxu1 %v7503_v57  ;;  %10457 = vmatprep.subr.msk.mxu1 %vm17258_vm10, %v16385_v17  ;;  %v17368_v57 = vld [vmem:[#allocation148_spill] sm:$0xff]  ;;  %vm17392_vm10 = vnez %v16951_v1 }
 0x732   :  { %8078 = vmatpush2.msra.mxu0 %v16418_v30  ;;  %8517 = vmatpush1.msra.mxu1 %v16418_v30  ;;  %v17398_v1 = vld [vmem:[#allocation96_spill] sm:$0xff] }
 0x733   :  { %8643 = vmatprep.mubr.f32.mxu1 %v14556_v44  ;;  %8081 = vmatprep.subr.mxu0 %v17367_v10  ;;  %v17438_v10 = vld [vmem:[#allocation196_spill] sm:$0xff] }
 0x734   :  { %10458 = vmatprep.subr.msk.mxu1 %vm17260_vm0, %v16385_v17  ;;  %8084 = vmatpush2.msra.mxu0 %v16418_v30  ;;  %vm17394_vm0 = vnez %v16954_v23  ;;  %v7276_v23 = vpop.f32.mrf.mxu0 }
 0x735   :  { %8521 = vmatpush1.msra.mxu1 %v16418_v30  ;;  %8087 = vmatprep.subr.mxu0 %v17368_v57  ;;  %v17439_v57 = vld [vmem:[#allocation23_spill] sm:$0xff] }
 0x736   :  { %8523 = vmatprep.subr.mxu1 %v16418_v30  ;;  %8090 = vmatpush2.msra.mxu0 %v16418_v30 }
 0x737   :  { %10459 = vmatpush1.msk.msra.mxu1 %vm17262_vm11, %v16385_v17  ;;  %8093 = vmatprep.subr.mxu0 %v17369_v22  ;;  %vm17390_vm11 = vnez %v16948_v13  ;;  %v17395_v13 = vld [vmem:[#allocation90_spill] sm:$0xff]  ;;  %v17441_v22 = vld [vmem:[#allocation199_spill] sm:$0xff] }
 0x738   :  { %8527 = vmatprep.subr.mxu1 %v16418_v30  ;;  %8096 = vmatpush2.msra.mxu0 %v16418_v30 }
 0x739   :  { %10460 = vmatpush1.msk.msra.mxu1 %vm17264_vm14, %v16385_v17  ;;  %8102 = vmatmul.mubr.f32.vlgmr.msra.gmra.mxu0 %v14554_v20  ;;  %vm17387_vm14 = vnez %v16942_v3  ;;  %v17396_v3 = vld [vmem:[#allocation91_spill] sm:$0xff]  ;;  %v17400_v20 = vld [vmem:[#allocation102_spill] sm:$0xff] }
 0x73a   :  { %8252 = vmatprep.subr.mxu0 %v17370_v41  ;;  %8531 = vmatprep.subr.mxu1 %v16418_v30  ;;  %v17442_v41 = vld [vmem:[#allocation25_spill] sm:$0xff] }
 0x73b   :  { %8256 = vmatpush1.msra.mxu0 %v16418_v30  ;;  %8506 = vmatprep.mubr.f32.mxu0 %v14556_v44  ;;  %v17402_v44 = vld [vmem:[#allocation107_spill] sm:$0xff] }
 0x73c   :  { %10461 = vmatpush1.msk.msra.mxu1 %vm17267_vm9, %v16385_v17  ;;  %8260 = vmatprep.subr.mxu0 %v17371_v55  ;;  %vm17385_vm9 = vnez %v16939_v59  ;;  %v17391_v59 = vld [vmem:[#allocation79_spill] sm:$0xff]  ;;  %v17444_v55 = vld [vmem:[#allocation202_spill] sm:$0xff] }
 0x73d   :  { %8535 = vmatprep.subr.mxu1 %v16418_v30  ;;  %8264 = vmatpush1.msra.mxu0 %v16418_v30 }
 0x73e   :  { %10462 = vmatpush1.msk.msra.mxu1 %vm17269_vm5, %v16385_v17  ;;  %8268 = vmatprep.subr.mxu0 %v16418_v30  ;;  %vm17377_vm5 = vnez %v16927_v5  ;;  %v17382_v5 = vld [vmem:[#allocation60_spill] sm:$0xff] }
 0x73f   :  { %8539 = vmatprep.subr.mxu1 %v16418_v30  ;;  %8272 = vmatpush1.msra.mxu0 %v17372_v34  ;;  %v17445_v34 = vld [vmem:[#allocation29_spill] sm:$0xff] }
 0x740   :  { %10463 = vmatpush1.msk.msra.mxu1 %vm17271_vm8, %v16385_v17  ;;  %8276 = vmatprep.subr.mxu0 %v16418_v30  ;;  %vm17383_vm8 = vnez %v16936_v2  ;;  %v17389_v2 = vld [vmem:[#allocation68_spill] sm:$0xff] }
 0x741   :  { %8543 = vmatprep.subr.mxu1 %v16418_v30  ;;  %8280 = vmatpush1.msra.mxu0 %v17373_v48  ;;  %v17447_v48 = vld [vmem:[#allocation205_spill] sm:$0xff] }
 0x742   :  { %10464 = vmatpush1.msk.msra.mxu1 %vm17273_vm15, %v16385_v17  ;;  %8284 = vmatprep.subr.mxu0 %v16418_v30  ;;  %vm17388_vm15 = vnez %v16945_v19  ;;  %v17393_v19 = vld [vmem:[#allocation84_spill] sm:$0xff] }
 0x743   :  { %8547 = vmatprep.subr.mxu1 %v16418_v30  ;;  %8288 = vmatpush1.msra.mxu0 %v17374_v12  ;;  %v17448_v12 = vld [vmem:[#allocation32_spill] sm:$0xff] }
 0x744   :  { %10465 = vmatpush1.msk.msra.mxu1 %vm17275_vm6, %v16385_v17  ;;  %8292 = vmatprep.subr.mxu0 %v16418_v30  ;;  %vm17379_vm6 = vnez %v16930_v39  ;;  %v17384_v39 = vld [vmem:[#allocation63_spill] sm:$0xff] }
 0x745   :  { %8551 = vmatprep.subr.mxu1 %v16418_v30  ;;  %8296 = vmatpush1.msra.mxu0 %v17375_v47  ;;  %v17450_v47 = vld [vmem:[#allocation36_spill] sm:$0xff] }
 0x746   :  { %10466 = vmatpush1.msk.msra.mxu1 %vm17277_vm1, %v16385_v17  ;;  %8300 = vmatprep.subr.mxu0 %v16418_v30  ;;  %vm17381_vm1 = vnez %v16933_v6  ;;  %v17386_v6 = vld [vmem:[#allocation66_spill] sm:$0xff] }
 0x747   :  { %8555 = vmatprep.subr.mxu1 %v16418_v30  ;;  %8304 = vmatpush1.msra.mxu0 %v17376_v46  ;;  %v17452_v46 = vld [vmem:[#allocation211_spill] sm:$0xff] }
 0x748   :  { %10467 = vmatpush1.msk.msra.mxu1 %vm17377_vm5, %v16385_v17  ;;  %8308 = vmatprep.subr.mxu0 %v16418_v30  ;;  %vm17397_vm5 = vnez %v16957_v61  ;;  %v7364_v61 = vpop.f32.mrf.mxu1 }
 0x749   :  { %8559 = vmatprep.subr.mxu1 %v16418_v30  ;;  %8312 = vmatpush1.msra.mxu0 %v17378_v0  ;;  %v17453_v0 = vld [vmem:[#allocation40_spill] sm:$0xff] }
 0x74a   :  { %10468 = vmatpush1.msk.msra.mxu1 %vm17379_vm6, %v16385_v17  ;;  %8316 = vmatprep.subr.mxu0 %v16418_v30  ;;  %vm17399_vm6 = vnez %v16960_v38  ;;  %v7277_v38 = vadd.f32 %v7276_v23, %v14549_v31  ;;  %v17405_v31 = vld [vmem:[#allocation118_spill] sm:$0xff] }
 0x74b   :  { %8563 = vmatprep.subr.mxu1 %v16418_v30  ;;  %8320 = vmatpush1.msra.mxu0 %v17380_v60  ;;  %v17455_v60 = vld [vmem:[#allocation214_spill] sm:$0xff] }
 0x74c   :  { %10469 = vmatpush1.msk.msra.mxu1 %vm17381_vm1, %v16385_v17  ;;  %8324 = vmatprep.subr.mxu0 %v16418_v30  ;;  %vm17401_vm1 = vnez %v16963_v40  ;;  %v7365_v40 = vadd.f32 %v7364_v61, %v7277_v38  ;;  %v17469_v23 = vld [vmem:[#allocation78_spill] sm:$0xff]  ;;  %v17472_v61 = vld [vmem:[#allocation83_spill] sm:$0xff]  ;;  %v17475_v38 = vld [vmem:[#allocation88_spill] sm:$0xff] }
 0x74d   :  { %8567 = vmatprep.subr.mxu1 %v16418_v30  ;;  %8328 = vmatpush1.msra.mxu0 %v17382_v5  ;;  %v17456_v5 = vld [vmem:[#allocation73_spill] sm:$0xff] }
 0x74e   :  { %10470 = vmatpush1.msk.msra.mxu1 %vm17383_vm8, %v16385_v17  ;;  %8332 = vmatprep.subr.mxu0 %v16418_v30  ;;  %vm17403_vm8 = vnez %v17305_v26  ;;  %v17406_v26 = vld [vmem:[#allocation124_spill] sm:$0xff]  ;;  %v14902_v52 = vand.u32 4294901760, %v7365_v40 }
 0x74f   :  { %8571 = vmatprep.subr.mxu1 %v16418_v30  ;;  %8336 = vmatpush1.msra.mxu0 %v17384_v39  ;;  %v17458_v39 = vld [vmem:[#allocation216_spill] sm:$0xff] }
 0x750   :  { %10471 = vmatpush1.msk.msra.mxu1 %vm17385_vm9, %v16385_v17  ;;  %8340 = vmatprep.subr.mxu0 %v16418_v30  ;;  %v14917_v63 = vsub.f32 %v7365_v40, %v14902_v52  ;;  %vm17437_vm9 = vnez %v17436_v35  ;;  %v17478_v40 = vld [vmem:[#allocation95_spill] sm:$0xff] }
 0x751   :  { %8575 = vmatprep.subr.mxu1 %v16418_v30  ;;  %8344 = vmatpush1.msra.mxu0 %v17386_v6  ;;  %v17459_v6 = vld [vmem:[#allocation220_spill] sm:$0xff]  ;;  %v17554_v35 = vld [vmem:[#allocation175_spill] sm:$0xff] }
 0x752   :  { %10472 = vmatpush1.msk.msra.mxu1 %vm17387_vm14, %v16385_v17  ;;  %8348 = vmatprep.subr.mxu0 %v16418_v30  ;;  %v8781_v16 = vand.u32 4294901760, %v14917_v63  ;;  %vm17440_vm14 = vnez %v17439_v57  ;;  %v17556_v57 = vld [vmem:[#allocation176_spill] sm:$0xff] }
 0x753   :  { %10473 = vmatprep.subr.msk.mxu1 %vm17388_vm15, %v16385_v17  ;;  %8352 = vmatpush1.msra.mxu0 %v17389_v2  ;;  %vm17443_vm15 = vnez %v17442_v41  ;;  %v17460_v2 = vld [vmem:[#allocation188_spill] sm:$0xff]  ;;  %v17558_v41 = vld [vmem:[#allocation182_spill] sm:$0xff] }
 0x754   :  { %8589 = vmatpush2.msra.mxu1 %v16418_v30  ;;  %8356 = vmatprep.subr.mxu0 %v16418_v30  ;;  %v8782_v43 = vsub.f32 %v14917_v63, %v8781_v16 }
 0x755   :  { %10474 = vmatprep.subr.msk.mxu1 %vm17390_vm11, %v16385_v17  ;;  %8360 = vmatpush1.msra.mxu0 %v17391_v59  ;;  %vm17446_vm11 = vnez %v17445_v34  ;;  %v17462_v59 = vld [vmem:[#allocation222_spill] sm:$0xff]  ;;  %v17560_v34 = vld [vmem:[#allocation8_spill] sm:$0xff] }
 0x756   :  { %8593 = vmatpush2.msra.mxu1 %v16418_v30  ;;  %8364 = vmatprep.subr.mxu0 %v16418_v30  ;;  %v8783_v4 = vand.u32 4294901760, %v8782_v43  ;;  %v17492_v43 = vld [vmem:[#allocation246_spill] sm:$0xff] }
 0x757   :  { %10475 = vmatprep.subr.msk.mxu1 %vm17392_vm10, %v16385_v17  ;;  %8368 = vmatpush1.msra.mxu0 %v17393_v19  ;;  %vm17449_vm10 = vnez %v17448_v12  ;;  %v17463_v19 = vld [vmem:[#allocation191_spill] sm:$0xff] }
 0x758   :  { %8597 = vmatpush2.msra.mxu1 %v16418_v30  ;;  %8372 = vmatprep.subr.mxu0 %v16418_v30 }
 0x759   :  { %10476 = vmatprep.subr.msk.mxu1 %vm17394_vm0, %v16385_v17  ;;  %8376 = vmatpush1.msra.mxu0 %v17395_v13  ;;  %vm17451_vm0 = vnez %v17450_v47  ;;  %v17465_v13 = vld [vmem:[#allocation225_spill] sm:$0xff] }
 0x75a   :  { %8601 = vmatpush2.msra.mxu1 %v16418_v30  ;;  %8396 = vmatprep.subr.mxu0 %v17396_v3  ;;  %v17466_v3 = vld [vmem:[#allocation75_spill] sm:$0xff] }
 0x75b   :  { %10477 = vmatprep.subr.msk.mxu1 %vm17397_vm5, %v16385_v17  ;;  %8400 = vmatpush2.msra.mxu0 %v16418_v30  ;;  %vm17454_vm5 = vnez %v17453_v0 }
 0x75c   :  { %8605 = vmatpush2.msra.mxu1 %v16418_v30  ;;  %8404 = vmatprep.subr.mxu0 %v17398_v1  ;;  %v17468_v1 = vld [vmem:[#allocation228_spill] sm:$0xff] }
 0x75d   :  { %10478 = vmatprep.subr.msk.mxu1 %vm17399_vm6, %v16385_v17  ;;  %8408 = vmatpush2.msra.mxu0 %v16418_v30  ;;  %vm17457_vm6 = vnez %v17456_v5 }
 0x75e   :  { %8609 = vmatpush2.msra.mxu1 %v16418_v30  ;;  %8412 = vmatprep.subr.mxu0 %v17400_v20  ;;  %v17471_v20 = vld [vmem:[#allocation231_spill] sm:$0xff] }
 0x75f   :  { %10479 = vmatprep.subr.msk.mxu1 %vm17401_vm1, %v16385_v17  ;;  %8416 = vmatpush2.msra.mxu0 %v16418_v30  ;;  %vm17461_vm1 = vnez %v17460_v2 }
 0x760   :  { %8613 = vmatpush2.msra.mxu1 %v16418_v30  ;;  %8420 = vmatprep.subr.mxu0 %v17402_v44  ;;  %v17474_v44 = vld [vmem:[#allocation234_spill] sm:$0xff] }
 0x761   :  { %10480 = vmatprep.subr.msk.mxu1 %vm17403_vm8, %v16385_v17  ;;  %8424 = vmatpush2.msra.mxu0 %v16418_v30  ;;  %vm17464_vm8 = vnez %v17463_v19 }
 0x762   :  { %8617 = vmatpush2.msra.mxu1 %v16418_v30  ;;  %8428 = vmatprep.subr.mxu0 %v17404_v25  ;;  %v17477_v25 = vld [vmem:[#allocation237_spill] sm:$0xff] }
 0x763   :  { %10481 = vmatprep.subr.msk.mxu1 %vm17357_vm12, %v16385_v17  ;;  %8432 = vmatpush2.msra.mxu0 %v16418_v30  ;;  %vm17431_vm12 = vnez %v17430_v24  ;;  %v17552_v24 = vld [vmem:[#allocation169_spill] sm:$0xff] }
 0x764   :  { %8621 = vmatpush2.msra.mxu1 %v16418_v30  ;;  %8436 = vmatprep.subr.mxu0 %v17405_v31  ;;  %v17480_v31 = vld [vmem:[#allocation240_spill] sm:$0xff] }
 0x765   :  { %10482 = vmatprep.subr.msk.mxu1 %vm17359_vm2, %v16385_v17  ;;  %8440 = vmatpush2.msra.mxu0 %v16418_v30  ;;  %vm17419_vm2 = vnez %v17418_v7 }
 0x766   :  { %8625 = vmatpush2.msra.mxu1 %v16418_v30  ;;  %8444 = vmatprep.subr.mxu0 %v17406_v26  ;;  %v17481_v26 = vld [vmem:[#allocation100_spill] sm:$0xff] }
 0x767   :  { %10483 = vmatprep.subr.msk.mxu1 %vm17361_vm7, %v16385_v17  ;;  %8448 = vmatpush2.msra.mxu0 %v16418_v30  ;;  %vm17428_vm7 = vnez %v17427_v50  ;;  %v17550_v50 = vld [vmem:[#allocation164_spill] sm:$0xff] }
 0x768   :  { %8629 = vmatpush2.msra.mxu1 %v16418_v30  ;;  %8452 = vmatprep.subr.mxu0 %v17407_v56  ;;  %v15091_v56 = vand.u32 4294901760, %v14566_v32 }
 0x769   :  { %10484 = vmatprep.subr.msk.mxu1 %vm17318_vm3, %v16385_v17  ;;  %8456 = vmatpush2.msra.mxu0 %v16418_v30  ;;  %vm17422_vm3 = vnez %v17421_v21 }
 0x76a   :  { %8633 = vmatpush2.msra.mxu1 %v16418_v30  ;;  %8460 = vmatprep.subr.mxu0 %v17408_v42  ;;  %v17483_v42 = vld [vmem:[#allocation242_spill] sm:$0xff] }
 0x76b   :  { %10485 = vmatprep.subr.msk.mxu1 %vm17321_vm13, %v16385_v17  ;;  %8464 = vmatpush2.msra.mxu0 %v16418_v30  ;;  %vm17434_vm13 = vnez %v17433_v27  ;;  %v17553_v27 = vld [vmem:[#allocation173_spill] sm:$0xff] }
 0x76c   :  { %8637 = vmatpush2.msra.mxu1 %v16418_v30  ;;  %8468 = vmatprep.subr.mxu0 %v17409_v54  ;;  %v17484_v54 = vld [vmem:[#allocation105_spill] sm:$0xff] }
 0x76d   :  { %10486 = vmatprep.subr.msk.mxu1 %vm17324_vm4, %v16385_v17  ;;  %8472 = vmatpush2.msra.mxu0 %v16418_v30  ;;  %vm17425_vm4 = vnez %v17424_v37  ;;  %v17549_v37 = vld [vmem:[#allocation161_spill] sm:$0xff] }
 0x76e   :  { %8641 = vmatpush2.msra.mxu1 %v16418_v30  ;;  %8476 = vmatprep.subr.mxu0 %v17410_v45  ;;  %v17486_v45 = vld [vmem:[#allocation244_spill] sm:$0xff] }
 0x76f   :  { %8645 = vmatmul.mubr.f32.vlgmr.msra.gmra.mxu1 %v14551_v62  ;;  %8801 = vmatprep.subr.mxu1 %v16418_v30 }
 0x770   :  { %8480 = vmatpush2.msra.mxu0 %v16418_v30  ;;  %8807 = vmatpush1.msra.mxu1 %v17411_v8  ;;  %v17487_v8 = vld [vmem:[#allocation110_spill] sm:$0xff] }
 0x771   :  { %9181 = vmatprep.mubr.f32.mxu1 %v14902_v52  ;;  %8484 = vmatprep.subr.mxu0 %v17412_v9  ;;  %v15107_v9 = vsub.f32 %v14566_v32, %v15091_v56 }
 0x772   :  { %8813 = vmatprep.subr.mxu1 %v16418_v30  ;;  %8488 = vmatpush2.msra.mxu0 %v16418_v30 }
 0x773   :  { %8819 = vmatpush1.msra.mxu1 %v17413_v14  ;;  %8492 = vmatprep.subr.mxu0 %v17414_v33  ;;  %v17489_v14 = vld [vmem:[#allocation245_spill] sm:$0xff]  ;;  %v17490_v33 = vld [vmem:[#allocation112_spill] sm:$0xff]  ;;  %v8787_v32 = vand.u32 4294901760, %v15107_v9 }
 0x774   :  { %8825 = vmatprep.subr.mxu1 %v16418_v30  ;;  %8496 = vmatpush2.msra.mxu0 %v16418_v30 }
 0x775   :  { %8831 = vmatpush1.msra.mxu1 %v17415_v18  ;;  %8500 = vmatprep.subr.mxu0 %v17416_v36  ;;  %v17493_v18 = vld [vmem:[#allocation117_spill] sm:$0xff]  ;;  %v17495_v36 = vld [vmem:[#allocation247_spill] sm:$0xff] }
 0x776   :  { %8837 = vmatprep.subr.mxu1 %v16418_v30  ;;  %8504 = vmatpush2.msra.mxu0 %v16418_v30 }
 0x777   :  { %8843 = vmatpush1.msra.mxu1 %v17417_v53  ;;  %8508 = vmatmul.mubr.f32.vlgmr.msra.gmra.mxu0 %v14551_v62  ;;  %v17423_v62 = vld [vmem:[#allocation5_spill] sm:$0xff]  ;;  %v17496_v53 = vld [vmem:[#allocation122_spill] sm:$0xff] }
 0x778   :  { %8652 = vmatprep.subr.mxu0 %v16418_v30  ;;  %8849 = vmatprep.subr.mxu1 %v16418_v30 }
 0x779   :  { %10487 = vmatpush1.msk.msra.mxu0 %vm17419_vm2, %v16385_v17  ;;  %8784 = vmatprep.mubr.f32.mxu0 %v8783_v4  ;;  %v8788_v4 = vsub.f32 %v15107_v9, %v8787_v32 }
 0x77a   :  { %8855 = vmatpush1.msra.mxu1 %v17420_v29  ;;  %8656 = vmatprep.subr.mxu0 %v16418_v30  ;;  %v17498_v29 = vld [vmem:[#allocation127_spill] sm:$0xff] }
 0x77b   :  { %8861 = vmatprep.subr.mxu1 %v16418_v30  ;;  %10488 = vmatpush1.msk.msra.mxu0 %vm17422_vm3, %v16385_v17 }
 0x77c   :  { %8867 = vmatpush1.msra.mxu1 %v17423_v62  ;;  %8660 = vmatprep.subr.mxu0 %v16418_v30  ;;  %v17500_v62 = vld [vmem:[#allocation132_spill] sm:$0xff] }
 0x77d   :  { %8873 = vmatprep.subr.mxu1 %v16418_v30  ;;  %10489 = vmatpush1.msk.msra.mxu0 %vm17425_vm4, %v16385_v17 }
 0x77e   :  { %8879 = vmatpush1.msra.mxu1 %v17426_v58  ;;  %8664 = vmatprep.subr.mxu0 %v16418_v30  ;;  %v17502_v58 = vld [vmem:[#allocation137_spill] sm:$0xff] }
 0x77f   :  { %8885 = vmatprep.subr.mxu1 %v16418_v30  ;;  %10490 = vmatpush1.msk.msra.mxu0 %vm17428_vm7, %v16385_v17 }
 0x780   :  { %8891 = vmatpush1.msra.mxu1 %v17429_v15  ;;  %8668 = vmatprep.subr.mxu0 %v16418_v30  ;;  %v17504_v15 = vld [vmem:[#allocation12_spill] sm:$0xff] }
 0x781   :  { %8897 = vmatprep.subr.mxu1 %v16418_v30  ;;  %10491 = vmatpush1.msk.msra.mxu0 %vm17431_vm12, %v16385_v17 }
 0x782   :  { %8903 = vmatpush1.msra.mxu1 %v17432_v51  ;;  %8672 = vmatprep.subr.mxu0 %v16418_v30  ;;  %v17505_v51 = vld [vmem:[#allocation158_spill] sm:$0xff] }
 0x783   :  { %8909 = vmatprep.subr.mxu1 %v16418_v30  ;;  %10492 = vmatpush1.msk.msra.mxu0 %vm17434_vm13, %v16385_v17 }
 0x784   :  { %8915 = vmatpush1.msra.mxu1 %v17435_v11  ;;  %8676 = vmatprep.subr.mxu0 %v16418_v30  ;;  %v17506_v11 = vld [vmem:[#allocation160_spill] sm:$0xff] }
 0x785   :  { %8921 = vmatprep.subr.mxu1 %v16418_v30  ;;  %10493 = vmatpush1.msk.msra.mxu0 %vm17437_vm9, %v16385_v17 }
 0x786   :  { %8927 = vmatpush1.msra.mxu1 %v17438_v10  ;;  %8680 = vmatprep.subr.mxu0 %v16418_v30  ;;  %v17508_v10 = vld [vmem:[#allocation165_spill] sm:$0xff] }
 0x787   :  { %8933 = vmatprep.subr.mxu1 %v16418_v30  ;;  %10494 = vmatpush1.msk.msra.mxu0 %vm17440_vm14, %v16385_v17 }
 0x788   :  { %8939 = vmatpush1.msra.mxu1 %v17441_v22  ;;  %8684 = vmatprep.subr.mxu0 %v16418_v30  ;;  %v17509_v22 = vld [vmem:[#allocation168_spill] sm:$0xff] }
 0x789   :  { %8945 = vmatprep.subr.mxu1 %v16418_v30  ;;  %10495 = vmatpush1.msk.msra.mxu0 %vm17443_vm15, %v16385_v17 }
 0x78a   :  { %8951 = vmatpush1.msra.mxu1 %v17444_v55  ;;  %8688 = vmatprep.subr.mxu0 %v16418_v30  ;;  %v17510_v55 = vld [vmem:[#allocation170_spill] sm:$0xff] }
 0x78b   :  { %8957 = vmatprep.subr.mxu1 %v16418_v30  ;;  %10496 = vmatpush1.msk.msra.mxu0 %vm17446_vm11, %v16385_v17 }
 0x78c   :  { %8963 = vmatpush1.msra.mxu1 %v17447_v48  ;;  %8692 = vmatprep.subr.mxu0 %v16418_v30  ;;  %v17511_v48 = vld [vmem:[#allocation172_spill] sm:$0xff] }
 0x78d   :  { %8969 = vmatprep.subr.mxu1 %v16418_v30  ;;  %10497 = vmatpush1.msk.msra.mxu0 %vm17449_vm10, %v16385_v17 }
 0x78e   :  { %8975 = vmatpush1.msra.mxu1 %v16418_v30  ;;  %8696 = vmatprep.subr.mxu0 %v16418_v30 }
 0x78f   :  { %8981 = vmatprep.subr.mxu1 %v16418_v30  ;;  %10498 = vmatpush1.msk.msra.mxu0 %vm17451_vm0, %v16385_v17 }
 0x790   :  { %8987 = vmatpush1.msra.mxu1 %v16418_v30  ;;  %8700 = vmatprep.subr.mxu0 %v16418_v30 }
 0x791   :  { %8993 = vmatprep.subr.mxu1 %v17452_v46  ;;  %10499 = vmatpush1.msk.msra.mxu0 %vm17454_vm5, %v16385_v17  ;;  %v17512_v46 = vld [vmem:[#allocation177_spill] sm:$0xff] }
 0x792   :  { %8999 = vmatpush2.msra.mxu1 %v16418_v30  ;;  %8704 = vmatprep.subr.mxu0 %v16418_v30 }
 0x793   :  { %9005 = vmatprep.subr.mxu1 %v17455_v60  ;;  %10500 = vmatpush1.msk.msra.mxu0 %vm17457_vm6, %v16385_v17  ;;  %vm17467_vm6 = vnez %v17466_v3  ;;  %v17513_v60 = vld [vmem:[#allocation179_spill] sm:$0xff] }
 0x794   :  { %9011 = vmatpush2.msra.mxu1 %v16418_v30  ;;  %8708 = vmatprep.subr.mxu0 %v16418_v30 }
 0x795   :  { %9017 = vmatprep.subr.mxu1 %v17458_v39  ;;  %8710 = vmatpush1.msra.mxu0 %v16418_v30  ;;  %v17515_v39 = vld [vmem:[#allocation181_spill] sm:$0xff] }
 0x796   :  { %9023 = vmatpush2.msra.mxu1 %v16418_v30  ;;  %8712 = vmatprep.subr.mxu0 %v16418_v30 }
 0x797   :  { %9029 = vmatprep.subr.mxu1 %v17459_v6  ;;  %8714 = vmatpush1.msra.mxu0 %v16418_v30  ;;  %v17516_v6 = vld [vmem:[#allocation183_spill] sm:$0xff] }
 0x798   :  { %9035 = vmatpush2.msra.mxu1 %v16418_v30  ;;  %10501 = vmatprep.subr.msk.mxu0 %vm17461_vm1, %v16385_v17  ;;  %vm17470_vm1 = vnez %v17469_v23 }
 0x799   :  { %9041 = vmatprep.subr.mxu1 %v17462_v59  ;;  %8718 = vmatpush2.msra.mxu0 %v16418_v30  ;;  %v17518_v59 = vld [vmem:[#allocation186_spill] sm:$0xff] }
 0x79a   :  { %9047 = vmatpush2.msra.mxu1 %v16418_v30  ;;  %10502 = vmatprep.subr.msk.mxu0 %vm17464_vm8, %v16385_v17  ;;  %vm17473_vm8 = vnez %v17472_v61 }
 0x79b   :  { %9053 = vmatprep.subr.mxu1 %v17465_v13  ;;  %8722 = vmatpush2.msra.mxu0 %v16418_v30  ;;  %v17520_v13 = vld [vmem:[#allocation190_spill] sm:$0xff] }
 0x79c   :  { %9059 = vmatpush2.msra.mxu1 %v16418_v30  ;;  %10503 = vmatprep.subr.msk.mxu0 %vm17467_vm6, %v16385_v17  ;;  %vm17476_vm6 = vnez %v17475_v38 }
 0x79d   :  { %9065 = vmatprep.subr.mxu1 %v17468_v1  ;;  %8726 = vmatpush2.msra.mxu0 %v16418_v30  ;;  %v17523_v1 = vld [vmem:[#allocation197_spill] sm:$0xff] }
 0x79e   :  { %9071 = vmatpush2.msra.mxu1 %v16418_v30  ;;  %10504 = vmatprep.subr.msk.mxu0 %vm17470_vm1, %v16385_v17  ;;  %vm17479_vm1 = vnez %v17478_v40 }
 0x79f   :  { %9077 = vmatprep.subr.mxu1 %v17471_v20  ;;  %8730 = vmatpush2.msra.mxu0 %v16418_v30  ;;  %v17525_v20 = vld [vmem:[#allocation198_spill] sm:$0xff] }
 0x7a0   :  { %9083 = vmatpush2.msra.mxu1 %v16418_v30  ;;  %10505 = vmatprep.subr.msk.mxu0 %vm17473_vm8, %v16385_v17  ;;  %vm17482_vm8 = vnez %v17481_v26 }
 0x7a1   :  { %9089 = vmatprep.subr.mxu1 %v17474_v44  ;;  %8734 = vmatpush2.msra.mxu0 %v16418_v30  ;;  %v17526_v44 = vld [vmem:[#allocation201_spill] sm:$0xff] }
 0x7a2   :  { %9095 = vmatpush2.msra.mxu1 %v16418_v30  ;;  %10506 = vmatprep.subr.msk.mxu0 %vm17476_vm6, %v16385_v17 }
 0x7a3   :  { %9101 = vmatprep.subr.mxu1 %v17477_v25  ;;  %8738 = vmatpush2.msra.mxu0 %v16418_v30  ;;  %v17528_v25 = vld [vmem:[#allocation204_spill] sm:$0xff] }
 0x7a4   :  { %9107 = vmatpush2.msra.mxu1 %v16418_v30  ;;  %10507 = vmatprep.subr.msk.mxu0 %vm17479_vm1, %v16385_v17  ;;  %vm17485_vm1 = vnez %v17484_v54 }
 0x7a5   :  { %9113 = vmatprep.subr.mxu1 %v17480_v31  ;;  %8742 = vmatpush2.msra.mxu0 %v16418_v30  ;;  %v17530_v31 = vld [vmem:[#allocation206_spill] sm:$0xff] }
 0x7a6   :  { %9119 = vmatpush2.msra.mxu1 %v16418_v30  ;;  %10508 = vmatprep.subr.msk.mxu0 %vm17482_vm8, %v16385_v17  ;;  %vm17488_vm8 = vnez %v17487_v8 }
 0x7a7   :  { %9125 = vmatprep.subr.mxu1 %v17483_v42  ;;  %8746 = vmatpush2.msra.mxu0 %v16418_v30  ;;  %v17532_v42 = vld [vmem:[#allocation209_spill] sm:$0xff] }
 0x7a8   :  { %9131 = vmatpush2.msra.mxu1 %v16418_v30  ;;  %10509 = vmatprep.subr.msk.mxu0 %vm17485_vm1, %v16385_v17  ;;  %vm17491_vm1 = vnez %v17490_v33 }
 0x7a9   :  { %9137 = vmatprep.subr.mxu1 %v17486_v45  ;;  %8750 = vmatpush2.msra.mxu0 %v16418_v30  ;;  %v17534_v45 = vld [vmem:[#allocation212_spill] sm:$0xff] }
 0x7aa   :  { %9143 = vmatpush2.msra.mxu1 %v16418_v30  ;;  %10510 = vmatprep.subr.msk.mxu0 %vm17488_vm8, %v16385_v17  ;;  %vm17494_vm8 = vnez %v17493_v18  ;;  %v10577_v18 = vld [vmem:[%s15547_s2 + $0x10] sm:$0xff]  ;;  %s10611_s2 = smov [#allocation2]  }
 0x7ab   :  { %9149 = vmatprep.subr.mxu1 %v17489_v14  ;;  %8754 = vmatpush2.msra.mxu0 %v16418_v30  ;;  %v17536_v14 = vld [vmem:[#allocation213_spill] sm:$0xff]  ;;  %s9962_s12 = sshll.u32 %s10611_s2, 4  ;;  %s9963_s12 = int_to_ptr.vmem [resolvable:$true] %s9962_s12 }
 0x7ac   :  { %9155 = vmatpush2.msra.mxu1 %v16418_v30  ;;  %10511 = vmatprep.subr.msk.mxu0 %vm17491_vm1, %v16385_v17  ;;  %vm17497_vm1 = vnez %v17496_v53  ;;  %s10586_s17 = scalar_lea.vmem %s9963_s12, 256  ;;  %p10591_p1 = scmp.lt.s32.totalorder %s9963_s12, %s9963_s12 }
 0x7ad   :  { %9161 = vmatprep.subr.mxu1 %v16418_v30  ;;  %8758 = vmatpush2.msra.mxu0 %v16418_v30  ;;  %p10587_p0 = scmp.ne.s32.totalorder %s9963_s12, %s10586_s17  ;;  %p10592_p2 = scmp.lt.s32.totalorder %s10586_s17, %s10586_s17 }
 0x7ae   :  { %9167 = vmatpush2.msra.mxu1 %v17492_v43  ;;  %10512 = vmatprep.subr.msk.mxu0 %vm17494_vm8, %v16385_v17  ;;  %v17537_v43 = vld [vmem:[#allocation218_spill] sm:$0xff] }
 0x7af   :  { %9173 = vmatprep.subr.mxu1 %v16418_v30  ;;  %8762 = vmatpush2.msra.mxu0 %v16418_v30  ;;  %p10593_p3 = por %p10592_p2, %p10591_p1 }
 0x7b0   :  { %9179 = vmatpush2.msra.mxu1 %v17495_v36  ;;  %10513 = vmatprep.subr.msk.mxu0 %vm17497_vm1, %v16385_v17  ;;  %vm17499_vm1 = vnez %v17498_v29  ;;  %v17539_v36 = vld [vmem:[#allocation221_spill] sm:$0xff]  ;;  %v17589_v29 = vld [vmem:[#allocation238_spill] sm:$0xff] }
 0x7b1   :  { %9183 = vmatmul.mubr.f32.vlgmr.msra.gmra.mxu1 %v15091_v56  ;;  %9393 = vmatprep.subr.mxu1 %v16418_v30  ;;  %p10594_p4 = pnand %p10593_p3, %p10587_p0 }
 0x7b2   :  { %8766 = vmatpush2.msra.mxu0 %v16418_v30  ;;  %10517 = vmatpush1.msk.msra.mxu1 %vm17419_vm2, %v16385_v17  ;;  %vm17501_vm2 = vnez %v17500_v62 }
 0x7b3   :  { %9523 = vmatprep.mubr.f32.mxu1 %v8781_v16  ;;  %10514 = vmatprep.subr.msk.mxu0 %vm17499_vm1, %v16385_v17  ;;  %v8789_v16 = vand.u32 4294901760, %v8788_v4  ;;  %v17540_v4 = vld [vmem:[#allocation224_spill] sm:$0xff] }
 0x7b4   :  { %9397 = vmatprep.subr.mxu1 %v16418_v30  ;;  %8770 = vmatpush2.msra.mxu0 %v16418_v30 }
 0x7b5   :  { %10518 = vmatpush1.msk.msra.mxu1 %vm17422_vm3, %v16385_v17  ;;  %8772 = vmatprep.subr.mxu0 %v16418_v30  ;;  %vm17503_vm3 = vnez %v17502_v58 }
 0x7b6   :  { %9401 = vmatprep.subr.mxu1 %v16418_v30  ;;  %10515 = vmatpush2.msk.msra.mxu0 %vm17501_vm2, %v16385_v17 }
 0x7b7   :  { %10519 = vmatpush1.msk.msra.mxu1 %vm17425_vm4, %v16385_v17  ;;  %8776 = vmatprep.subr.mxu0 %v16418_v30 }
 0x7b8   :  { %9405 = vmatprep.subr.mxu1 %v16418_v30  ;;  %10516 = vmatpush2.msk.msra.mxu0 %vm17503_vm3, %v16385_v17 }
 0x7b9   :  { %10520 = vmatpush1.msk.msra.mxu1 %vm17428_vm7, %v16385_v17  ;;  %8790 = vmatmul.mubr.f32.vlgmr.msra.gmra.mxu0 %v8789_v16  ;;  %v17541_v16 = vld [vmem:[#allocation227_spill] sm:$0xff] }
 0x7ba   :  { %9191 = vmatprep.subr.mxu0 %v16418_v30  ;;  %9409 = vmatprep.subr.mxu1 %v16418_v30 }
 0x7bb   :  { %9194 = vmatpush1.msra.mxu0 %v17504_v15  ;;  %9383 = vmatprep.mubr.f32.mxu0 %v14917_v63  ;;  %v17507_v63 = vld [vmem:[#allocation163_spill] sm:$0xff]  ;;  %v17542_v15 = vld [vmem:[#allocation230_spill] sm:$0xff] }
 0x7bc   :  { %10521 = vmatpush1.msk.msra.mxu1 %vm17431_vm12, %v16385_v17  ;;  %9197 = vmatprep.subr.mxu0 %v16418_v30 }
 0x7bd   :  { %9413 = vmatprep.subr.mxu1 %v16418_v30  ;;  %9200 = vmatpush1.msra.mxu0 %v17505_v51  ;;  %v17544_v51 = vld [vmem:[#allocation233_spill] sm:$0xff] }
 0x7be   :  { %10522 = vmatpush1.msk.msra.mxu1 %vm17434_vm13, %v16385_v17  ;;  %9203 = vmatprep.subr.mxu0 %v16418_v30 }
 0x7bf   :  { %9417 = vmatprep.subr.mxu1 %v16418_v30  ;;  %9206 = vmatpush1.msra.mxu0 %v17506_v11  ;;  %v17591_v11 = vld [vmem:[#allocation243_spill] sm:$0xff] }
 0x7c0   :  { %10523 = vmatpush1.msk.msra.mxu1 %vm17437_vm9, %v16385_v17  ;;  %9209 = vmatprep.subr.mxu0 %v16418_v30 }
 0x7c1   :  { %9421 = vmatprep.subr.mxu1 %v16418_v30  ;;  %9212 = vmatpush1.msra.mxu0 %v17507_v63 }
 0x7c2   :  { %10524 = vmatpush1.msk.msra.mxu1 %vm17440_vm14, %v16385_v17  ;;  %9215 = vmatprep.subr.mxu0 %v16418_v30 }
 0x7c3   :  { %9425 = vmatprep.subr.mxu1 %v16418_v30  ;;  %9218 = vmatpush1.msra.mxu0 %v17508_v10 }
 0x7c4   :  { %10525 = vmatpush1.msk.msra.mxu1 %vm17443_vm15, %v16385_v17  ;;  %9221 = vmatprep.subr.mxu0 %v16418_v30 }
 0x7c5   :  { %9429 = vmatprep.subr.mxu1 %v16418_v30  ;;  %9224 = vmatpush1.msra.mxu0 %v17509_v22 }
 0x7c6   :  { %10526 = vmatpush1.msk.msra.mxu1 %vm17446_vm11, %v16385_v17  ;;  %9227 = vmatprep.subr.mxu0 %v16418_v30 }
 0x7c7   :  { %9433 = vmatprep.subr.mxu1 %v16418_v30  ;;  %9230 = vmatpush1.msra.mxu0 %v17510_v55 }
 0x7c8   :  { %10527 = vmatpush1.msk.msra.mxu1 %vm17449_vm10, %v16385_v17  ;;  %9233 = vmatprep.subr.mxu0 %v16418_v30  ;;  %vm17514_vm10 = vnez %v17456_v5 }
 0x7c9   :  { %9437 = vmatprep.subr.mxu1 %v16418_v30  ;;  %9236 = vmatpush1.msra.mxu0 %v17511_v48 }
 0x7ca   :  { %10528 = vmatpush1.msk.msra.mxu1 %vm17451_vm0, %v16385_v17  ;;  %9239 = vmatprep.subr.mxu0 %v16418_v30  ;;  %vm17521_vm0 = vnez %v17466_v3  ;;  %v17573_v3 = vld [vmem:[#allocation207_spill] sm:$0xff] }
 0x7cb   :  { %9441 = vmatprep.subr.mxu1 %v16418_v30  ;;  %9242 = vmatpush1.msra.mxu0 %v17512_v46 }
 0x7cc   :  { %10529 = vmatpush1.msk.msra.mxu1 %vm17454_vm5, %v16385_v17  ;;  %9245 = vmatprep.subr.mxu0 %v16418_v30  ;;  %vm17519_vm5 = vnez %v17463_v19 }
 0x7cd   :  { %9445 = vmatprep.subr.mxu1 %v16418_v30  ;;  %9248 = vmatpush1.msra.mxu0 %v17513_v60 }
 0x7ce   :  { %10530 = vmatpush1.msk.msra.mxu1 %vm17514_vm10, %v16385_v17  ;;  %9251 = vmatprep.subr.mxu0 %v16418_v30  ;;  %vm17517_vm10 = vnez %v17460_v2 }
 0x7cf   :  { %9449 = vmatprep.subr.mxu1 %v16418_v30  ;;  %9254 = vmatpush1.msra.mxu0 %v17515_v39 }
 0x7d0   :  { %9451 = vmatpush1.msra.mxu1 %v16418_v30  ;;  %9257 = vmatprep.subr.mxu0 %v16418_v30 }
 0x7d1   :  { %9453 = vmatprep.subr.mxu1 %v16418_v30  ;;  %9260 = vmatpush1.msra.mxu0 %v17516_v6 }
 0x7d2   :  { %9455 = vmatpush1.msra.mxu1 %v16418_v30  ;;  %9263 = vmatprep.subr.mxu0 %v16418_v30 }
 0x7d3   :  { %10531 = vmatprep.subr.msk.mxu1 %vm17517_vm10, %v16385_v17  ;;  %9266 = vmatpush1.msra.mxu0 %v17518_v59  ;;  %vm17522_vm10 = vnez %v17469_v23 }
 0x7d4   :  { %9459 = vmatpush2.msra.mxu1 %v16418_v30  ;;  %9269 = vmatprep.subr.mxu0 %v16418_v30 }
 0x7d5   :  { %10532 = vmatprep.subr.msk.mxu1 %vm17519_vm5, %v16385_v17  ;;  %9272 = vmatpush1.msra.mxu0 %v17520_v13  ;;  %vm17524_vm5 = vnez %v17472_v61 }
 0x7d6   :  { %9463 = vmatpush2.msra.mxu1 %v16418_v30  ;;  %9275 = vmatprep.subr.mxu0 %v16418_v30 }
 0x7d7   :  { %10533 = vmatprep.subr.msk.mxu1 %vm17521_vm0, %v16385_v17  ;;  %9278 = vmatpush1.msra.mxu0 %v16418_v30 }
 0x7d8   :  { %9467 = vmatpush2.msra.mxu1 %v16418_v30  ;;  %9281 = vmatprep.subr.mxu0 %v16418_v30 }
 0x7d9   :  { %10534 = vmatprep.subr.msk.mxu1 %vm17522_vm10, %v16385_v17  ;;  %9284 = vmatpush1.msra.mxu0 %v16418_v30  ;;  %vm17527_vm10 = vnez %v17478_v40 }
 0x7da   :  { %9471 = vmatpush2.msra.mxu1 %v16418_v30  ;;  %9287 = vmatprep.subr.mxu0 %v17523_v1 }
 0x7db   :  { %10535 = vmatprep.subr.msk.mxu1 %vm17524_vm5, %v16385_v17  ;;  %9290 = vmatpush2.msra.mxu0 %v16418_v30  ;;  %vm17529_vm5 = vnez %v17481_v26 }
 0x7dc   :  { %9475 = vmatpush2.msra.mxu1 %v16418_v30  ;;  %9293 = vmatprep.subr.mxu0 %v17525_v20 }
 0x7dd   :  { %10536 = vmatprep.subr.msk.mxu1 %vm17476_vm6, %v16385_v17  ;;  %9296 = vmatpush2.msra.mxu0 %v16418_v30  ;;  %vm17531_vm6 = vnez %v17484_v54  ;;  %v17582_v54 = vld [vmem:[#allocation223_spill] sm:$0xff] }
 0x7de   :  { %9479 = vmatpush2.msra.mxu1 %v16418_v30  ;;  %9299 = vmatprep.subr.mxu0 %v17526_v44 }
 0x7df   :  { %10537 = vmatprep.subr.msk.mxu1 %vm17527_vm10, %v16385_v17  ;;  %9302 = vmatpush2.msra.mxu0 %v16418_v30  ;;  %vm17533_vm10 = vnez %v17487_v8 }
 0x7e0   :  { %9483 = vmatpush2.msra.mxu1 %v16418_v30  ;;  %9305 = vmatprep.subr.mxu0 %v17528_v25 }
 0x7e1   :  { %10538 = vmatprep.subr.msk.mxu1 %vm17529_vm5, %v16385_v17  ;;  %9308 = vmatpush2.msra.mxu0 %v16418_v30  ;;  %vm17535_vm5 = vnez %v17490_v33  ;;  %v17586_v33 = vld [vmem:[#allocation232_spill] sm:$0xff] }
 0x7e2   :  { %9487 = vmatpush2.msra.mxu1 %v16418_v30  ;;  %9311 = vmatprep.subr.mxu0 %v17530_v31 }
 0x7e3   :  { %10539 = vmatprep.subr.msk.mxu1 %vm17531_vm6, %v16385_v17  ;;  %9314 = vmatpush2.msra.mxu0 %v16418_v30 }
 0x7e4   :  { %9491 = vmatpush2.msra.mxu1 %v16418_v30  ;;  %9317 = vmatprep.subr.mxu0 %v17532_v42 }
 0x7e5   :  { %10540 = vmatprep.subr.msk.mxu1 %vm17533_vm10, %v16385_v17  ;;  %9320 = vmatpush2.msra.mxu0 %v16418_v30  ;;  %vm17538_vm10 = vnez %v17496_v53  ;;  %v17588_v53 = vld [vmem:[#allocation235_spill] sm:$0xff] }
 0x7e6   :  { %9495 = vmatpush2.msra.mxu1 %v16418_v30  ;;  %9323 = vmatprep.subr.mxu0 %v17534_v45 }
 0x7e7   :  { %10541 = vmatprep.subr.msk.mxu1 %vm17535_vm5, %v16385_v17  ;;  %9326 = vmatpush2.msra.mxu0 %v16418_v30 }
 0x7e8   :  { %9499 = vmatpush2.msra.mxu1 %v16418_v30  ;;  %9329 = vmatprep.subr.mxu0 %v17536_v14 }
 0x7e9   :  { %10542 = vmatprep.subr.msk.mxu1 %vm17494_vm8, %v16385_v17  ;;  %9332 = vmatpush2.msra.mxu0 %v16418_v30 }
 0x7ea   :  { %9503 = vmatpush2.msra.mxu1 %v16418_v30  ;;  %9335 = vmatprep.subr.mxu0 %v17537_v43 }
 0x7eb   :  { %10543 = vmatprep.subr.msk.mxu1 %vm17538_vm10, %v16385_v17  ;;  %9338 = vmatpush2.msra.mxu0 %v16418_v30 }
 0x7ec   :  { %9507 = vmatpush2.msra.mxu1 %v16418_v30  ;;  %9341 = vmatprep.subr.mxu0 %v17539_v36 }
 0x7ed   :  { %10544 = vmatprep.subr.msk.mxu1 %vm17499_vm1, %v16385_v17  ;;  %9344 = vmatpush2.msra.mxu0 %v16418_v30 }
 0x7ee   :  { %9511 = vmatpush2.msra.mxu1 %v16418_v30  ;;  %9347 = vmatprep.subr.mxu0 %v17540_v4 }
 0x7ef   :  { %9513 = vmatprep.subr.mxu1 %v16418_v30  ;;  %9350 = vmatpush2.msra.mxu0 %v16418_v30 }
 0x7f0   :  { %10545 = vmatpush2.msk.msra.mxu1 %vm17501_vm2, %v16385_v17  ;;  %9353 = vmatprep.subr.mxu0 %v17541_v16  ;;  %vm17543_vm2 = vnez %v17418_v7  ;;  %v17547_v7 = vld [vmem:[#allocation239_spill] sm:$0xff] }
 0x7f1   :  { %9517 = vmatprep.subr.mxu1 %v16418_v30  ;;  %9356 = vmatpush2.msra.mxu0 %v16418_v30 }
 0x7f2   :  { %10546 = vmatpush2.msk.msra.mxu1 %vm17503_vm3, %v16385_v17  ;;  %9359 = vmatprep.subr.mxu0 %v17542_v15  ;;  %vm17545_vm3 = vnez %v17421_v21  ;;  %v17548_v21 = vld [vmem:[#allocation159_spill] sm:$0xff] }
 0x7f3   :  { %9527 = vmatmul.mubr.f32.vlgmr.msra.gmra.mxu1 %v8787_v32  ;;  %9799 = vmatprep.subr.mxu1 %v16418_v30  ;;  %v17546_v32 = vld [vmem:[#allocation236_spill] sm:$0xff] }
 0x7f4   :  { %9362 = vmatpush2.msra.mxu0 %v16418_v30  ;;  %10547 = vmatpush1.msk.msra.mxu1 %vm17543_vm2, %v16385_v17  ;;  %vm17555_vm2 = vnez %v17448_v12  ;;  %v17562_v12 = vld [vmem:[#allocation184_spill] sm:$0xff] }
 0x7f5   :  { %9927 = vmatprep.mubr.f32.mxu1 %v14902_v52  ;;  %9365 = vmatprep.subr.mxu0 %v17544_v51 }
 0x7f6   :  { %9803 = vmatprep.subr.mxu1 %v16418_v30  ;;  %9368 = vmatpush2.msra.mxu0 %v16418_v30 }
 0x7f7   :  { %10548 = vmatpush1.msk.msra.mxu1 %vm17545_vm3, %v16385_v17  ;;  %9371 = vmatprep.subr.mxu0 %v16418_v30  ;;  %vm17557_vm3 = vnez %v17450_v47  ;;  %v17563_v47 = vld [vmem:[#allocation189_spill] sm:$0xff] }
 0x7f8   :  { %9807 = vmatprep.subr.mxu1 %v16418_v30  ;;  %9374 = vmatpush2.msra.mxu0 %v17546_v32 }
 0x7f9   :  { %10549 = vmatpush1.msk.msra.mxu1 %vm17425_vm4, %v16385_v17  ;;  %9377 = vmatprep.subr.mxu0 %v16418_v30  ;;  %vm17559_vm4 = vnez %v17453_v0  ;;  %v17565_v0 = vld [vmem:[#allocation193_spill] sm:$0xff] }
 0x7fa   :  { %9811 = vmatprep.subr.mxu1 %v16418_v30  ;;  %9380 = vmatpush2.msra.mxu0 %v17547_v7 }
 0x7fb   :  { %10550 = vmatpush1.msk.msra.mxu1 %vm17428_vm7, %v16385_v17  ;;  %9386 = vmatmul.mubr.f32.vlgmr.msra.gmra.mxu0 %v15107_v9  ;;  %vm17561_vm7 = vnez %v17456_v5  ;;  %v17567_v5 = vld [vmem:[#allocation195_spill] sm:$0xff]  ;;  %v17584_v9 = vld [vmem:[#allocation229_spill] sm:$0xff] }
 0x7fc   :  { %9536 = vmatprep.subr.mxu0 %v16418_v30  ;;  %9815 = vmatprep.subr.mxu1 %v16418_v30 }
 0x7fd   :  { %9540 = vmatpush1.msra.mxu0 %v17548_v21  ;;  %9790 = vmatprep.mubr.f32.mxu0 %v14902_v52  ;;  %v17551_v52 = vld [vmem:[#allocation166_spill] sm:$0xff] }
 0x7fe   :  { %10551 = vmatpush1.msk.msra.mxu1 %vm17431_vm12, %v16385_v17  ;;  %9544 = vmatprep.subr.mxu0 %v16418_v30  ;;  %vm17564_vm12 = vnez %v17460_v2  ;;  %v17569_v2 = vld [vmem:[#allocation200_spill] sm:$0xff] }
 0x7ff   :  { %9819 = vmatprep.subr.mxu1 %v16418_v30  ;;  %9548 = vmatpush1.msra.mxu0 %v17549_v37 }
 0x800   :  { %10552 = vmatpush1.msk.msra.mxu1 %vm17434_vm13, %v16385_v17  ;;  %9552 = vmatprep.subr.mxu0 %v16418_v30  ;;  %vm17566_vm13 = vnez %v17463_v19  ;;  %v17571_v19 = vld [vmem:[#allocation203_spill] sm:$0xff] }
 0x801   :  { %9823 = vmatprep.subr.mxu1 %v16418_v30  ;;  %9556 = vmatpush1.msra.mxu0 %v17550_v50 }
 0x802   :  { %10553 = vmatpush1.msk.msra.mxu1 %vm17437_vm9, %v16385_v17  ;;  %9560 = vmatprep.subr.mxu0 %v16418_v30  ;;  %vm17568_vm9 = vnez %v17469_v23  ;;  %v17575_v23 = vld [vmem:[#allocation208_spill] sm:$0xff] }
 0x803   :  { %9827 = vmatprep.subr.mxu1 %v16418_v30  ;;  %9564 = vmatpush1.msra.mxu0 %v17551_v52 }
 0x804   :  { %10554 = vmatpush1.msk.msra.mxu1 %vm17440_vm14, %v16385_v17  ;;  %9568 = vmatprep.subr.mxu0 %v16418_v30  ;;  %vm17570_vm14 = vnez %v17472_v61  ;;  %v17577_v61 = vld [vmem:[#allocation210_spill] sm:$0xff] }
 0x805   :  { %9831 = vmatprep.subr.mxu1 %v16418_v30  ;;  %9572 = vmatpush1.msra.mxu0 %v17552_v24 }
 0x806   :  { %10555 = vmatpush1.msk.msra.mxu1 %vm17443_vm15, %v16385_v17  ;;  %9576 = vmatprep.subr.mxu0 %v16418_v30  ;;  %vm17572_vm15 = vnez %v17475_v38  ;;  %v17578_v38 = vld [vmem:[#allocation215_spill] sm:$0xff] }
 0x807   :  { %9835 = vmatprep.subr.mxu1 %v16418_v30  ;;  %9580 = vmatpush1.msra.mxu0 %v17553_v27 }
 0x808   :  { %10556 = vmatpush1.msk.msra.mxu1 %vm17446_vm11, %v16385_v17  ;;  %9584 = vmatprep.subr.mxu0 %v16418_v30  ;;  %vm17574_vm11 = vnez %v17478_v40  ;;  %v17580_v40 = vld [vmem:[#allocation217_spill] sm:$0xff] }
 0x809   :  { %9839 = vmatprep.subr.mxu1 %v16418_v30  ;;  %9588 = vmatpush1.msra.mxu0 %v17554_v35 }
 0x80a   :  { %10557 = vmatpush1.msk.msra.mxu1 %vm17555_vm2, %v16385_v17  ;;  %9592 = vmatprep.subr.mxu0 %v16418_v30  ;;  %vm17579_vm2 = vnez %v17487_v8  ;;  %v17583_v8 = vld [vmem:[#allocation226_spill] sm:$0xff] }
 0x80b   :  { %9843 = vmatprep.subr.mxu1 %v16418_v30  ;;  %9596 = vmatpush1.msra.mxu0 %v17556_v57 }
 0x80c   :  { %10558 = vmatpush1.msk.msra.mxu1 %vm17557_vm3, %v16385_v17  ;;  %9600 = vmatprep.subr.mxu0 %v16418_v30 }
 0x80d   :  { %9847 = vmatprep.subr.mxu1 %v16418_v30  ;;  %9604 = vmatpush1.msra.mxu0 %v17558_v41 }
 0x80e   :  { %10559 = vmatpush1.msk.msra.mxu1 %vm17559_vm4, %v16385_v17  ;;  %9608 = vmatprep.subr.mxu0 %v16418_v30 }
 0x80f   :  { %9851 = vmatprep.subr.mxu1 %v16418_v30  ;;  %9612 = vmatpush1.msra.mxu0 %v17560_v34 }
 0x810   :  { %10560 = vmatpush1.msk.msra.mxu1 %vm17561_vm7, %v16385_v17  ;;  %9616 = vmatprep.subr.mxu0 %v16418_v30 }
 0x811   :  { %9855 = vmatprep.subr.mxu1 %v16418_v30  ;;  %9620 = vmatpush1.msra.mxu0 %v17562_v12 }
 0x812   :  { %9857 = vmatpush1.msra.mxu1 %v16418_v30  ;;  %9624 = vmatprep.subr.mxu0 %v16418_v30 }
 0x813   :  { %9859 = vmatprep.subr.mxu1 %v16418_v30  ;;  %9628 = vmatpush1.msra.mxu0 %v17563_v47 }
 0x814   :  { %9861 = vmatpush1.msra.mxu1 %v16418_v30  ;;  %9632 = vmatprep.subr.mxu0 %v16418_v30 }
 0x815   :  { %10561 = vmatprep.subr.msk.mxu1 %vm17564_vm12, %v16385_v17  ;;  %9636 = vmatpush1.msra.mxu0 %v17565_v0 }
 0x816   :  { %9865 = vmatpush2.msra.mxu1 %v16418_v30  ;;  %9640 = vmatprep.subr.mxu0 %v16418_v30 }
 0x817   :  { %10562 = vmatprep.subr.msk.mxu1 %vm17566_vm13, %v16385_v17  ;;  %9644 = vmatpush1.msra.mxu0 %v17567_v5 }
 0x818   :  { %9869 = vmatpush2.msra.mxu1 %v16418_v30  ;;  %9648 = vmatprep.subr.mxu0 %v16418_v30 }
 0x819   :  { %10563 = vmatprep.subr.msk.mxu1 %vm17521_vm0, %v16385_v17  ;;  %9652 = vmatpush1.msra.mxu0 %v16418_v30  ;;  %vm17576_vm0 = vnez %v17481_v26  ;;  %v17581_v26 = vld [vmem:[#allocation219_spill] sm:$0xff] }
 0x81a   :  { %9873 = vmatpush2.msra.mxu1 %v16418_v30  ;;  %9656 = vmatprep.subr.mxu0 %v16418_v30 }
 0x81b   :  { %10564 = vmatprep.subr.msk.mxu1 %vm17568_vm9, %v16385_v17  ;;  %9660 = vmatpush1.msra.mxu0 %v16418_v30 }
 0x81c   :  { %9877 = vmatpush2.msra.mxu1 %v16418_v30  ;;  %9664 = vmatprep.subr.mxu0 %v17569_v2 }
 0x81d   :  { %10565 = vmatprep.subr.msk.mxu1 %vm17570_vm14, %v16385_v17  ;;  %9668 = vmatpush2.msra.mxu0 %v16418_v30 }
 0x81e   :  { %9881 = vmatpush2.msra.mxu1 %v16418_v30  ;;  %9672 = vmatprep.subr.mxu0 %v17571_v19 }
 0x81f   :  { %10566 = vmatprep.subr.msk.mxu1 %vm17572_vm15, %v16385_v17  ;;  %9676 = vmatpush2.msra.mxu0 %v16418_v30 }
 0x820   :  { %9885 = vmatpush2.msra.mxu1 %v16418_v30  ;;  %9680 = vmatprep.subr.mxu0 %v17573_v3 }
 0x821   :  { %10567 = vmatprep.subr.msk.mxu1 %vm17574_vm11, %v16385_v17  ;;  %9684 = vmatpush2.msra.mxu0 %v16418_v30 }
 0x822   :  { %9889 = vmatpush2.msra.mxu1 %v16418_v30  ;;  %9688 = vmatprep.subr.mxu0 %v17575_v23 }
 0x823   :  { %10568 = vmatprep.subr.msk.mxu1 %vm17576_vm0, %v16385_v17  ;;  %9692 = vmatpush2.msra.mxu0 %v16418_v30 }
 0x824   :  { %9893 = vmatpush2.msra.mxu1 %v16418_v30  ;;  %9696 = vmatprep.subr.mxu0 %v17577_v61 }
 0x825   :  { %10569 = vmatprep.subr.msk.mxu1 %vm17531_vm6, %v16385_v17  ;;  %9700 = vmatpush2.msra.mxu0 %v16418_v30 }
 0x826   :  { %9897 = vmatpush2.msra.mxu1 %v16418_v30  ;;  %9704 = vmatprep.subr.mxu0 %v17578_v38 }
 0x827   :  { %10570 = vmatprep.subr.msk.mxu1 %vm17579_vm2, %v16385_v17  ;;  %9708 = vmatpush2.msra.mxu0 %v16418_v30 }
 0x828   :  { %9901 = vmatpush2.msra.mxu1 %v16418_v30  ;;  %9712 = vmatprep.subr.mxu0 %v17580_v40 }
 0x829   :  { %10571 = vmatprep.subr.msk.mxu1 %vm17535_vm5, %v16385_v17  ;;  %9716 = vmatpush2.msra.mxu0 %v16418_v30  ;;  %vm17587_vm5 = vnez %v17502_v58  ;;  %v7900_v58 = vpop.f32.mrf.mxu1 }
 0x82a   :  { %9905 = vmatpush2.msra.mxu1 %v16418_v30  ;;  %9720 = vmatprep.subr.mxu0 %v17581_v26  ;;  %v10584_v26 = vld [vmem:[%s15545_s0] sm:$0xff] }
 0x82b   :  { %10572 = vmatprep.subr.msk.mxu1 %vm17494_vm8, %v16385_v17  ;;  %9724 = vmatpush2.msra.mxu0 %v16418_v30  ;;  %v7902_v22 = vpop.f32.mrf.mxu1 }
 0x82c   :  { %9909 = vmatpush2.msra.mxu1 %v16418_v30  ;;  %9728 = vmatprep.subr.mxu0 %v17582_v54 }
 0x82d   :  { %10573 = vmatprep.subr.msk.mxu1 %vm17538_vm10, %v16385_v17  ;;  %9732 = vmatpush2.msra.mxu0 %v16418_v30  ;;  %vm17585_vm10 = vnez %v17500_v62  ;;  %v17590_v62 = vld [vmem:[#allocation241_spill] sm:$0xff]  ;;  %v8244_v55 = vpop.f32.mrf.mxu1 }
 0x82e   :  { %9913 = vmatpush2.msra.mxu1 %v16418_v30  ;;  %9736 = vmatprep.subr.mxu0 %v17583_v8 }
 0x82f   :  { %10574 = vmatprep.subr.msk.mxu1 %vm17499_vm1, %v16385_v17  ;;  %9740 = vmatpush2.msra.mxu0 %v16418_v30  ;;  %v8246_v60 = vpop.f32.mrf.mxu1 }
 0x830   :  { %9917 = vmatpush2.msra.mxu1 %v16418_v30  ;;  %9744 = vmatprep.subr.mxu0 %v17584_v9  ;;  %v10585_v9 = vld [vmem:[%s15545_s0 + $0x8] sm:$0xff] }
 0x831   :  { %9919 = vmatprep.subr.mxu1 %v16418_v30  ;;  %9748 = vmatpush2.msra.mxu0 %v16418_v30  ;;  %v8646_v39 = vpop.f32.mrf.mxu1 }
 0x832   :  { %10575 = vmatpush2.msk.msra.mxu1 %vm17585_vm10, %v16385_v17  ;;  %9752 = vmatprep.subr.mxu0 %v17586_v33 }
 0x833   :  { %9923 = vmatprep.subr.mxu1 %v16418_v30  ;;  %9756 = vmatpush2.msra.mxu0 %v16418_v30  ;;  %v8648_v13 = vpop.f32.mrf.mxu1 }
 0x834   :  { %10576 = vmatpush2.msk.msra.mxu1 %vm17587_vm5, %v16385_v17  ;;  %9760 = vmatprep.subr.mxu0 %v17588_v53  ;;  %v7507_v17 = vpop.f32.mrf.mxu0 }
 0x835   :  { %9929 = vmatmul.mubr.f32.vlgmr.msra.gmra.mxu1 %v15091_v56  ;;  %9764 = vmatpush2.msra.mxu0 %v16418_v30  ;;  %v7508_v1 = vadd.f32 %v7507_v17, %v14558_v49 }
 0x836   :  { %9768 = vmatprep.subr.mxu0 %v17589_v29  ;;  %9941 = vperm.xlu1 %10583, %v10577_v18   ;;  %v7509_v63 = vpop.f32.mrf.mxu0 }
 0x837   :  { %9772 = vmatpush2.msra.mxu0 %v16418_v30  ;;  %v7510_v44 = vadd.f32 %v7509_v63, %v14562_v28  ;;  %v7901_v25 = vadd.f32 %v7900_v58, %v7508_v1 }
 0x838   :  { %9776 = vmatprep.subr.mxu0 %v16418_v30  ;;  %v8103_v10 = vpop.f32.mrf.mxu0 }
 0x839   :  { %9780 = vmatpush2.msra.mxu0 %v17590_v62  ;;  %v8104_v42 = vadd.f32 %v8103_v10, %v7901_v25  ;;  %v7903_v45 = vadd.f32 %v7902_v22, %v7510_v44 }
 0x83a   :  { %9784 = vmatprep.subr.mxu0 %v16418_v30  ;;  %v8105_v48 = vpop.f32.mrf.mxu0 }
 0x83b   :  { %9788 = vmatpush2.msra.mxu0 %v17591_v11  ;;  %v8106_v4 = vadd.f32 %v8105_v48, %v7903_v45  ;;  %v8245_v51 = vadd.f32 %v8244_v55, %v8104_v42 }
 0x83c   :  { %9792 = vmatmul.mubr.f32.vlgmr.msra.gmra.mxu0 %v15091_v56  ;;  %v8509_v46 = vpop.f32.mrf.mxu0 }
 0x83d   :  { %v8510_v21 = vadd.f32 %v8509_v46, %v8245_v51  ;;  %v8247_v49 = vadd.f32 %v8246_v60, %v8106_v4 }
 0x83e   :  { %v8511_v6 = vpop.f32.mrf.mxu0 }
 0x83f   :  { %v8512_v28 = vadd.f32 %v8511_v6, %v8247_v49  ;;  %v8647_v57 = vadd.f32 %v8646_v39, %v8510_v21 }
 0x841   :  { %v8649_v0 = vadd.f32 %v8648_v13, %v8512_v28 }
 0x871   :  { %v9184_v30 = vpop.f32.mrf.mxu1 }
 0x873   :  { %v9186_v31 = vpop.f32.mrf.mxu1 }
 0x879   :  { %v8791_v59 = vpop.f32.mrf.mxu0 }
 0x87a   :  { %v9185_v14 = vadd.f32 %v9184_v30, %v8791_v59 }
 0x87b   :  { %v8793_v20 = vpop.f32.mrf.mxu0 }
 0x87c   :  { %v9187_v16 = vadd.f32 %v9186_v31, %v8793_v20 }
 0x8b1   :  { %v9942_v47 = vpop.permute.xlu1 %9941 }
 0x8b3   :  { %v9528_v43 = vpop.f32.mrf.mxu1 }
 0x8b5   :  { %v9530_v7 = vpop.f32.mrf.mxu1 }
 0x8bb   :  { %v9387_v56 = vpop.f32.mrf.mxu0 }
 0x8bc   :  { %v9388_v15 = vadd.f32 %v9387_v56, %v9185_v14 }
 0x8bd   :  { %v9389_v36 = vpop.f32.mrf.mxu0 }
 0x8be   :  { %v9390_v32 = vadd.f32 %v9389_v36, %v9187_v16  ;;  %v9529_v37 = vadd.f32 %v9528_v43, %v9388_v15 }
 0x8c0   :  { %v9531_v27 = vadd.f32 %v9530_v7, %v9390_v32 }
 0x8f5   :  { %v9930_v50 = vpop.f32.mrf.mxu1 }
 0x8f7   :  { %v9932_v12 = vpop.f32.mrf.mxu1 }
 0x8fc   :  { %v9793_v52 = vpop.f32.mrf.mxu0 }
 0x8fd   :  { %v9794_v24 = vadd.f32 %v9793_v52, %v9529_v37 }
 0x8fe   :  { %v9795_v35 = vpop.f32.mrf.mxu0 }
 0x8ff   :  { %v9931_v41 = vadd.f32 %v9930_v50, %v9794_v24  ;;  %v9796_v34 = vadd.f32 %v9795_v35, %v9531_v27 }
 0x901   :  { %v9933_v5 = vadd.f32 %v9932_v12, %v9796_v34  ;;  %v9935_v2 = vadd.f32 %v9931_v41, %v8647_v57 }
 0x903   :  { %v9936_v19 = vadd.f32 %v9933_v5, %v8649_v0  ;;  %v9944_v3 = vadd.f32 %v9942_v47, %v9935_v2 }
 0x905   :  { %v9945_v23 = vadd.f32 %v9942_v47, %v9936_v19  ;;  %vm9946_vm6 = vcmp.gt.f32.partialorder %v9944_v3, 0.0  ;;  %v9948_v61 = vmul.f32 0.01, %v9944_v3 }
 0x907   :  { %vm9947_vm1 = vcmp.gt.f32.partialorder %v9945_v23, 0.0  ;;  %v9949_v38 = vmul.f32 0.01, %v9945_v23  ;;  %v9950_v40 = vsel %vm9946_vm6, %v9944_v3, %v9948_v61 }
 0x908   :  { %v9952_v54 = vadd.f32 %v10584_v26, %v9950_v40 }
 0x909   :  { %v9951_v8 = vsel %vm9947_vm1, %v9945_v23, %v9949_v38 }
 0x90a   :  { %v9953_v33 = vadd.f32 %v10585_v9, %v9951_v8  ;;  %9954 = vst [vmem:[#allocation2] sm:$0xff] %v9952_v54 }
 0x90c   :  { %9955 = vst [vmem:[#allocation2 + $0x8] sm:$0xff] %v9953_v33 }
 0x90d   :  { %10597 = shalt.err (!%p10594_p4)
}
 0x90e   :  { %9965 = dma.vmem_to_hbm [thread:$0]  %s9963_s12, 256, %s15548_s3, [#allocation3]  }
 0x90f   :  { %10606 = dma.done.wait [#allocation3], 256  }
 0x910   :  { %10607 = vsyncadd [#allocation3], 4294967040 }
 0x911   :  { %9969 = vsyncpa [#allocation3], 1 }

</bundles_post_ra>
